<compile_context>
chip_gen: v7x
topology: tpu7x:2x2x1
jax: 0.10.0
libtpu: 0.0.40
codegen_flags: <defaults>
</compile_context>

<pallas_src>
import functools

import jax
import jax.numpy as jnp
from jax import lax
from jax.experimental import pallas as pl
from jax.experimental.pallas import tpu as pltpu


VMEM_SPEC = pl.BlockSpec(memory_space=pltpu.MemorySpace.VMEM)
SMEM_SPEC = pl.BlockSpec(memory_space=pltpu.MemorySpace.SMEM)


def _fused_multiview_kernel(w_ref, tx_ref, ph_ref, out_ref, *,
                            n, d, gamma, wlambda, iters,
                            eps, outer_iters, sinkhorn_iters):
    f32 = jnp.float32
    inv_n = 1.0 / float(n)

    # ---- shared constants, built once -------------------------------------
    row = lax.broadcasted_iota(jnp.int32, (n, n), 0)
    col = lax.broadcasted_iota(jnp.int32, (n, n), 1)
    is_diag = row == col
    E = jnp.where(is_diag, 1.0, 0.0).astype(f32)        # identity: GW target + mse target
    p_col = jnp.full((n, 1), inv_n, f32)                 # uniform marginal (column form)
    p_row = jnp.full((1, n), inv_n, f32)                 # uniform marginal (row form)

    # ---- 1) both RBF kernel matrices, back-to-back on the MXU --------------
    g_over_d = float(gamma) / float(d)

    def rbf(x_ref):
        x = x_ref[...].astype(f32)                                        # (n, d)
        gram = lax.dot_general(x, x, (((1,), (1,)), ((), ())),            # x @ x.T
                               preferred_element_type=f32)                # (n, n)
        diag = jnp.where(is_diag, gram, 0.0)
        sq_col = jnp.sum(diag, axis=1, keepdims=True)                     # ||x_i||^2  (n,1)
        sq_row = jnp.sum(diag, axis=0, keepdims=True)                     # ||x_j||^2  (1,n)
        d2 = jnp.maximum(sq_col + sq_row - 2.0 * gram, 0.0)
        return jnp.exp(-g_over_d * d2)

    C1 = rbf(tx_ref)
    C2 = rbf(ph_ref)

    # square-loss decomposition terms depending only on the source spaces
    a1 = jnp.sum((C1 * C1) * p_row, axis=1, keepdims=True)                # (C1^2) @ p  (n,1)
    a2 = jnp.sum((C2 * C2) * p_row, axis=1, keepdims=True)                # (C2^2) @ p  (n,1)

    inv_eps = 1.0 / float(eps)

    # ---- 2) Gromov-Wasserstein for BOTH views, interleaved ------------------
    # TODO(synk): exact ot.gromov.gromov_wasserstein runs a network-simplex EMD
    #             LP inside Frank-Wolfe (no Pallas equivalent); we use the
    #             entropic / Sinkhorn projected-gradient GW approximation with
    #             the same square-loss tensor-product gradient.
    def gw_pair(C_t):
        # C_t (shared target) is symmetric (eye, or T^T K T of a symmetric K),
        # so column sums give (C_t^2) @ q as a row and C_t.T == C_t.
        b_row = jnp.sum((C_t * C_t) * p_col, axis=0, keepdims=True)       # (1, n)
        constC1 = a1 + b_row
        constC2 = a2 + b_row
        T0 = p_col * p_row                                                # product coupling

        def outer_body(_, Ts):
            T1, T2 = Ts
            tmp1 = jnp.dot(jnp.dot(C1, T1, preferred_element_type=f32), C_t,
                           preferred_element_type=f32)
            tmp2 = jnp.dot(jnp.dot(C2, T2, preferred_element_type=f32), C_t,
                           preferred_element_type=f32)
            g1 = 2.0 * (constC1 - 2.0 * tmp1)
            g2 = 2.0 * (constC2 - 2.0 * tmp2)
            # constant shift (cancels in Sinkhorn) + exponent clamp keep exp()
            # away from exact f32 underflow -> no inf/NaN in the scalings.
            z1 = jnp.minimum((g1 - jnp.min(g1)) * inv_eps, 60.0)
            z2 = jnp.minimum((g2 - jnp.min(g2)) * inv_eps, 60.0)
            K1 = jnp.exp(-z1)
            K2 = jnp.exp(-z2)

            def sinkhorn_step(uv):
                u1, v1, u2, v2 = uv
                # u = p / (K @ v): VPU broadcast-mul + XLU row reduce + EUP recip
                du1 = jnp.maximum(jnp.sum(K1 * v1, axis=1, keepdims=True), 1e-30)
                du2 = jnp.maximum(jnp.sum(K2 * v2, axis=1, keepdims=True), 1e-30)
                u1 = p_col * pl.reciprocal(du1, approx=True)
                u2 = p_col * pl.reciprocal(du2, approx=True)
                # v = q / (K.T @ u): column reduce (no explicit K.T needed)
                dv1 = jnp.maximum(jnp.sum(K1 * u1, axis=0, keepdims=True), 1e-30)
                dv2 = jnp.maximum(jnp.sum(K2 * u2, axis=0, keepdims=True), 1e-30)
                v1 = p_row * pl.reciprocal(dv1, approx=True)
                v2 = p_row * pl.reciprocal(dv2, approx=True)
                return (u1, v1, u2, v2)

            uv = (jnp.ones((n, 1), f32), jnp.ones((1, n), f32),
                  jnp.ones((n, 1), f32), jnp.ones((1, n), f32))
            # fully unrolled: both views' chains interleave on VPU/XLU/EUP
            for _ in range(sinkhorn_iters):
                uv = sinkhorn_step(uv)
            u1, v1, u2, v2 = uv
            return (u1 * K1 * v1, u2 * K2 * v2)

        return lax.fori_loop(0, outer_iters, outer_body, (T0, T0))

    # ---- 3) C update: C = (w0 T1^T C1 T1 + w1 T2^T C2 T2) / (p p^T) --------
    w0 = w_ref[0]
    w1 = w_ref[1]

    def tct(Cm, T):
        M = jnp.dot(Cm, T, preferred_element_type=f32)                    # C @ T
        return lax.dot_general(T, M, (((0,), (0,)), ((), ())),            # T.T @ (C @ T)
                               preferred_element_type=f32)

    C = E
    for _ in range(iters):                              # static (default 1)
        T1, T2 = gw_pair(C)
        B = w0 * tct(C1, T1) + w1 * tct(C2, T2)
        C = B / (p_col * p_row)

    # ---- 4) loss = mse(C, I) + Wlambda * <w, log(w + 1e-10)> ---------------
    diff = C - E
    mse = jnp.sum(diff * diff) * (1.0 / float(n * n))

    # weight entropy on the vector units (avoid scalar transcendentals)
    lane = lax.broadcasted_iota(jnp.int32, (1, 128), 1)
    wv = jnp.where(lane == 0, w0, jnp.where(lane == 1, w1, 0.0)).astype(f32)
    ent = jnp.sum(jnp.where(lane < 2, wv * jnp.log(wv + 1e-10), 0.0))

    out_ref[0, 0] = mse + float(wlambda) * ent


def multiview_loss_fused(weights_views, tx_rep, ph_rep, *, gamma, wlambda,
                         iters=1, eps=0.05, outer_iters=10, sinkhorn_iters=50):
    n, d = tx_rep.shape
    kernel = functools.partial(
        _fused_multiview_kernel, n=int(n), d=int(d), gamma=float(gamma),
        wlambda=float(wlambda), iters=int(iters), eps=float(eps),
        outer_iters=int(outer_iters), sinkhorn_iters=int(sinkhorn_iters))
    out = pl.pallas_call(
        kernel,
        out_shape=jax.ShapeDtypeStruct((1, 1), jnp.float32),
        in_specs=[SMEM_SPEC, VMEM_SPEC, VMEM_SPEC],
        out_specs=SMEM_SPEC,
    )(weights_views.astype(jnp.float32),
      tx_rep.astype(jnp.float32),
      ph_rep.astype(jnp.float32))
    return out[0, 0]


# ----------------------------------------------------------------------------
# Module wrapper mirroring MultiViewLoss.forward (parameter glue stays in JAX)
# ----------------------------------------------------------------------------
class MultiViewLoss:
    def __init__(self, Wlambda=0.0, iters=1, gamma=1000.0):
        self.Wlambda = float(Wlambda)
        self.iters = int(iters)
        self.gamma = float(gamma)
        # nn.Parameter(torch.ones(2)) — deterministic init
        self.weights = jnp.ones((2,), jnp.float32)

    def __call__(self, tx_rep, ph_rep):
        weights_views = jax.nn.softmax(self.weights, axis=-1)    # parameter glue
        return multiview_loss_fused(weights_views, tx_rep, ph_rep,
                                    gamma=self.gamma, wlambda=self.Wlambda,
                                    iters=self.iters)


if __name__ == "__main__":
    key = jax.random.PRNGKey(0)
    k1, k2 = jax.random.split(key)
    batch, feat = 8, 128
    # scale 0.2 so the RBF kernels are non-degenerate at moderate gamma
    tx_rep = 0.2 * jax.random.normal(k1, (batch, feat), dtype=jnp.float32)
    ph_rep = 0.2 * jax.random.normal(k2, (batch, feat), dtype=jnp.float32)

    module = MultiViewLoss(Wlambda=0.1, iters=1, gamma=20.0)
    loss = module(tx_rep, ph_rep)
    loss = jax.block_until_ready(loss)
    assert jnp.isfinite(loss)
    print("KERNEL_OK")
</pallas_src>

<mosaic_0001>
module attributes {stable_mosaic.version = 11 : i64} {
  func.func @_fused_multiview_kernel(%arg0: memref<2xf32, #tpu.memory_space<smem>>, %arg1: memref<8x128xf32, #tpu.memory_space<vmem>>, %arg2: memref<8x128xf32, #tpu.memory_space<vmem>>, %arg3: memref<1x1xf32, #tpu.memory_space<smem>>) attributes {dimension_semantics = [], scalar_prefetch = 0 : i64, scratch_operands = 0 : i64, tpu.core_type = #tpu.core_type<tc>} {
    %0 = tpu.iota {dimensions = array<i32: 0>} : vector<8x8xi32>
    %1 = tpu.iota {dimensions = array<i32: 1>} : vector<8x8xi32>
    %2 = arith.cmpi eq, %0, %1 : vector<8x8xi32>
    %cst = arith.constant 1.000000e+00 : f32
    %cst_0 = arith.constant 0.000000e+00 : f32
    %3 = vector.broadcast %cst : f32 to vector<8x8xf32>
    %4 = vector.broadcast %cst_0 : f32 to vector<8x8xf32>
    %5 = arith.select %2, %3, %4 : vector<8x8xi1>, vector<8x8xf32>
    %cst_1 = arith.constant 1.250000e-01 : f32
    %6 = vector.broadcast %cst_1 : f32 to vector<8x1xf32>
    %cst_2 = arith.constant 1.250000e-01 : f32
    %7 = vector.broadcast %cst_2 : f32 to vector<1x8xf32>
    %c0 = arith.constant 0 : index
    %c0_3 = arith.constant 0 : index
    %8 = vector.load %arg1[%c0, %c0_3] : memref<8x128xf32, #tpu.memory_space<vmem>>, vector<8x128xf32>
    %cst_4 = arith.constant dense<0.000000e+00> : vector<8x8xf32>
    %9 = tpu.matmul %8, %8, %cst_4 {dimension_numbers = #tpu.dot_dimension_numbers<[1], [1], [0], [0], [0, 0, 1, 0], [], []>} : vector<8x128xf32>, vector<8x128xf32>, vector<8x8xf32> -> vector<8x8xf32>
    %cst_5 = arith.constant 0.000000e+00 : f32
    %10 = vector.broadcast %cst_5 : f32 to vector<8x8xf32>
    %11 = arith.select %2, %9, %10 : vector<8x8xi1>, vector<8x8xf32>
    %cst_6 = arith.constant dense<0.000000e+00> : vector<8xf32>
    %12 = vector.multi_reduction <add>, %11, %cst_6 [1] : vector<8x8xf32> to vector<8xf32>
    %13 = vector.shape_cast %12 : vector<8xf32> to vector<8x1xf32>
    %cst_7 = arith.constant dense<0.000000e+00> : vector<8xf32>
    %14 = vector.multi_reduction <add>, %11, %cst_7 [0] : vector<8x8xf32> to vector<8xf32>
    %15 = vector.shape_cast %14 : vector<8xf32> to vector<1x8xf32>
    %16 = vector.broadcast %13 : vector<8x1xf32> to vector<8x8xf32>
    %17 = vector.broadcast %15 : vector<1x8xf32> to vector<8x8xf32>
    %18 = arith.addf %16, %17 : vector<8x8xf32>
    %cst_8 = arith.constant 2.000000e+00 : f32
    %19 = vector.broadcast %cst_8 : f32 to vector<8x8xf32>
    %20 = arith.mulf %19, %9 : vector<8x8xf32>
    %21 = arith.subf %18, %20 : vector<8x8xf32>
    %cst_9 = arith.constant 0.000000e+00 : f32
    %22 = vector.broadcast %cst_9 : f32 to vector<8x8xf32>
    %23 = arith.maximumf %21, %22 : vector<8x8xf32>
    %cst_10 = arith.constant -1.562500e-01 : f32
    %24 = vector.broadcast %cst_10 : f32 to vector<8x8xf32>
    %25 = arith.mulf %24, %23 : vector<8x8xf32>
    %26 = math.exp %25 : vector<8x8xf32>
    %c0_11 = arith.constant 0 : index
    %c0_12 = arith.constant 0 : index
    %27 = vector.load %arg2[%c0_11, %c0_12] : memref<8x128xf32, #tpu.memory_space<vmem>>, vector<8x128xf32>
    %cst_13 = arith.constant dense<0.000000e+00> : vector<8x8xf32>
    %28 = tpu.matmul %27, %27, %cst_13 {dimension_numbers = #tpu.dot_dimension_numbers<[1], [1], [0], [0], [0, 0, 1, 0], [], []>} : vector<8x128xf32>, vector<8x128xf32>, vector<8x8xf32> -> vector<8x8xf32>
    %cst_14 = arith.constant 0.000000e+00 : f32
    %29 = vector.broadcast %cst_14 : f32 to vector<8x8xf32>
    %30 = arith.select %2, %28, %29 : vector<8x8xi1>, vector<8x8xf32>
    %cst_15 = arith.constant dense<0.000000e+00> : vector<8xf32>
    %31 = vector.multi_reduction <add>, %30, %cst_15 [1] : vector<8x8xf32> to vector<8xf32>
    %32 = vector.shape_cast %31 : vector<8xf32> to vector<8x1xf32>
    %cst_16 = arith.constant dense<0.000000e+00> : vector<8xf32>
    %33 = vector.multi_reduction <add>, %30, %cst_16 [0] : vector<8x8xf32> to vector<8xf32>
    %34 = vector.shape_cast %33 : vector<8xf32> to vector<1x8xf32>
    %35 = vector.broadcast %32 : vector<8x1xf32> to vector<8x8xf32>
    %36 = vector.broadcast %34 : vector<1x8xf32> to vector<8x8xf32>
    %37 = arith.addf %35, %36 : vector<8x8xf32>
    %cst_17 = arith.constant 2.000000e+00 : f32
    %38 = vector.broadcast %cst_17 : f32 to vector<8x8xf32>
    %39 = arith.mulf %38, %28 : vector<8x8xf32>
    %40 = arith.subf %37, %39 : vector<8x8xf32>
    %cst_18 = arith.constant 0.000000e+00 : f32
    %41 = vector.broadcast %cst_18 : f32 to vector<8x8xf32>
    %42 = arith.maximumf %40, %41 : vector<8x8xf32>
    %cst_19 = arith.constant -1.562500e-01 : f32
    %43 = vector.broadcast %cst_19 : f32 to vector<8x8xf32>
    %44 = arith.mulf %43, %42 : vector<8x8xf32>
    %45 = math.exp %44 : vector<8x8xf32>
    %46 = arith.mulf %26, %26 : vector<8x8xf32>
    %47 = vector.broadcast %7 : vector<1x8xf32> to vector<8x8xf32>
    %48 = arith.mulf %46, %47 : vector<8x8xf32>
    %cst_20 = arith.constant dense<0.000000e+00> : vector<8xf32>
    %49 = vector.multi_reduction <add>, %48, %cst_20 [1] : vector<8x8xf32> to vector<8xf32>
    %50 = vector.shape_cast %49 : vector<8xf32> to vector<8x1xf32>
    %51 = arith.mulf %45, %45 : vector<8x8xf32>
    %52 = vector.broadcast %7 : vector<1x8xf32> to vector<8x8xf32>
    %53 = arith.mulf %51, %52 : vector<8x8xf32>
    %cst_21 = arith.constant dense<0.000000e+00> : vector<8xf32>
    %54 = vector.multi_reduction <add>, %53, %cst_21 [1] : vector<8x8xf32> to vector<8xf32>
    %55 = vector.shape_cast %54 : vector<8xf32> to vector<8x1xf32>
    %c0_22 = arith.constant 0 : index
    %56 = memref.load %arg0[%c0_22] : memref<2xf32, #tpu.memory_space<smem>>
    %c1 = arith.constant 1 : index
    %57 = memref.load %arg0[%c1] : memref<2xf32, #tpu.memory_space<smem>>
    %58 = arith.mulf %5, %5 : vector<8x8xf32>
    %59 = vector.broadcast %6 : vector<8x1xf32> to vector<8x8xf32>
    %60 = arith.mulf %58, %59 : vector<8x8xf32>
    %cst_23 = arith.constant dense<0.000000e+00> : vector<8xf32>
    %61 = vector.multi_reduction <add>, %60, %cst_23 [0] : vector<8x8xf32> to vector<8xf32>
    %62 = vector.shape_cast %61 : vector<8xf32> to vector<1x8xf32>
    %63 = vector.broadcast %50 : vector<8x1xf32> to vector<8x8xf32>
    %64 = vector.broadcast %62 : vector<1x8xf32> to vector<8x8xf32>
    %65 = arith.addf %63, %64 : vector<8x8xf32>
    %66 = vector.broadcast %55 : vector<8x1xf32> to vector<8x8xf32>
    %67 = vector.broadcast %62 : vector<1x8xf32> to vector<8x8xf32>
    %68 = arith.addf %66, %67 : vector<8x8xf32>
    %69 = vector.broadcast %6 : vector<8x1xf32> to vector<8x8xf32>
    %70 = vector.broadcast %7 : vector<1x8xf32> to vector<8x8xf32>
    %71 = arith.mulf %69, %70 : vector<8x8xf32>
    %c0_i32 = arith.constant 0 : i32
    %c10_i32 = arith.constant 10 : i32
    %72 = arith.addi %c0_i32, %c10_i32 : i32
    %c1_i32 = arith.constant 1 : i32
    %73:2 = scf.for %arg4 = %c0_i32 to %72 step %c1_i32 iter_args(%arg5 = %71, %arg6 = %71) -> (vector<8x8xf32>, vector<8x8xf32>)  : i32 {
      %cst_39 = arith.constant dense<0.000000e+00> : vector<8x8xf32>
      %119 = tpu.matmul %26, %arg5, %cst_39 {dimension_numbers = #tpu.dot_dimension_numbers<[1], [0], [0], [1], [0, 0, 1, 1], [], []>} : vector<8x8xf32>, vector<8x8xf32>, vector<8x8xf32> -> vector<8x8xf32>
      %cst_40 = arith.constant dense<0.000000e+00> : vector<8x8xf32>
      %120 = tpu.matmul %119, %5, %cst_40 {dimension_numbers = #tpu.dot_dimension_numbers<[1], [0], [0], [1], [0, 0, 1, 1], [], []>} : vector<8x8xf32>, vector<8x8xf32>, vector<8x8xf32> -> vector<8x8xf32>
      %cst_41 = arith.constant dense<0.000000e+00> : vector<8x8xf32>
      %121 = tpu.matmul %45, %arg6, %cst_41 {dimension_numbers = #tpu.dot_dimension_numbers<[1], [0], [0], [1], [0, 0, 1, 1], [], []>} : vector<8x8xf32>, vector<8x8xf32>, vector<8x8xf32> -> vector<8x8xf32>
      %cst_42 = arith.constant dense<0.000000e+00> : vector<8x8xf32>
      %122 = tpu.matmul %121, %5, %cst_42 {dimension_numbers = #tpu.dot_dimension_numbers<[1], [0], [0], [1], [0, 0, 1, 1], [], []>} : vector<8x8xf32>, vector<8x8xf32>, vector<8x8xf32> -> vector<8x8xf32>
      %cst_43 = arith.constant 2.000000e+00 : f32
      %123 = vector.broadcast %cst_43 : f32 to vector<8x8xf32>
      %124 = arith.mulf %123, %120 : vector<8x8xf32>
      %125 = arith.subf %65, %124 : vector<8x8xf32>
      %cst_44 = arith.constant 2.000000e+00 : f32
      %126 = vector.broadcast %cst_44 : f32 to vector<8x8xf32>
      %127 = arith.mulf %126, %125 : vector<8x8xf32>
      %cst_45 = arith.constant 2.000000e+00 : f32
      %128 = vector.broadcast %cst_45 : f32 to vector<8x8xf32>
      %129 = arith.mulf %128, %122 : vector<8x8xf32>
      %130 = arith.subf %68, %129 : vector<8x8xf32>
      %cst_46 = arith.constant 2.000000e+00 : f32
      %131 = vector.broadcast %cst_46 : f32 to vector<8x8xf32>
      %132 = arith.mulf %131, %130 : vector<8x8xf32>
      %133 = vector.shape_cast %127 : vector<8x8xf32> to vector<1x8x8xf32>
      %cst_47 = arith.constant dense<0x7F800000> : vector<1xf32>
      %134 = vector.multi_reduction <minimumf>, %133, %cst_47 [1, 2] : vector<1x8x8xf32> to vector<1xf32>
      %135 = vector.shape_cast %134 : vector<1xf32> to vector<1x1x1xf32>
      %136 = vector.extract %135[0, 0, 0] : f32 from vector<1x1x1xf32>
      %137 = vector.broadcast %136 : f32 to vector<8x8xf32>
      %138 = arith.subf %127, %137 : vector<8x8xf32>
      %cst_48 = arith.constant 2.000000e+01 : f32
      %139 = vector.broadcast %cst_48 : f32 to vector<8x8xf32>
      %140 = arith.mulf %138, %139 : vector<8x8xf32>
      %cst_49 = arith.constant 6.000000e+01 : f32
      %141 = vector.broadcast %cst_49 : f32 to vector<8x8xf32>
      %142 = arith.minimumf %140, %141 : vector<8x8xf32>
      %143 = vector.shape_cast %132 : vector<8x8xf32> to vector<1x8x8xf32>
      %cst_50 = arith.constant dense<0x7F800000> : vector<1xf32>
      %144 = vector.multi_reduction <minimumf>, %143, %cst_50 [1, 2] : vector<1x8x8xf32> to vector<1xf32>
      %145 = vector.shape_cast %144 : vector<1xf32> to vector<1x1x1xf32>
      %146 = vector.extract %145[0, 0, 0] : f32 from vector<1x1x1xf32>
      %147 = vector.broadcast %146 : f32 to vector<8x8xf32>
      %148 = arith.subf %132, %147 : vector<8x8xf32>
      %cst_51 = arith.constant 2.000000e+01 : f32
      %149 = vector.broadcast %cst_51 : f32 to vector<8x8xf32>
      %150 = arith.mulf %148, %149 : vector<8x8xf32>
      %cst_52 = arith.constant 6.000000e+01 : f32
      %151 = vector.broadcast %cst_52 : f32 to vector<8x8xf32>
      %152 = arith.minimumf %150, %151 : vector<8x8xf32>
      %cst_53 = arith.constant 0.000000e+00 : f32
      %153 = vector.broadcast %cst_53 : f32 to vector<8x8xf32>
      %154 = arith.subf %153, %142 : vector<8x8xf32>
      %155 = math.exp %154 : vector<8x8xf32>
      %cst_54 = arith.constant 0.000000e+00 : f32
      %156 = vector.broadcast %cst_54 : f32 to vector<8x8xf32>
      %157 = arith.subf %156, %152 : vector<8x8xf32>
      %158 = math.exp %157 : vector<8x8xf32>
      %cst_55 = arith.constant 1.000000e+00 : f32
      %159 = vector.broadcast %cst_55 : f32 to vector<1x8xf32>
      %cst_56 = arith.constant 1.000000e+00 : f32
      %160 = vector.broadcast %cst_56 : f32 to vector<1x8xf32>
      %161 = vector.broadcast %159 : vector<1x8xf32> to vector<8x8xf32>
      %162 = arith.mulf %155, %161 : vector<8x8xf32>
      %cst_57 = arith.constant dense<0.000000e+00> : vector<8xf32>
      %163 = vector.multi_reduction <add>, %162, %cst_57 [1] : vector<8x8xf32> to vector<8xf32>
      %164 = vector.shape_cast %163 : vector<8xf32> to vector<8x1xf32>
      %cst_58 = arith.constant 1.000000e-30 : f32
      %165 = vector.broadcast %cst_58 : f32 to vector<8x1xf32>
      %166 = arith.maximumf %164, %165 : vector<8x1xf32>
      %167 = vector.broadcast %160 : vector<1x8xf32> to vector<8x8xf32>
      %168 = arith.mulf %158, %167 : vector<8x8xf32>
      %cst_59 = arith.constant dense<0.000000e+00> : vector<8xf32>
      %169 = vector.multi_reduction <add>, %168, %cst_59 [1] : vector<8x8xf32> to vector<8xf32>
      %170 = vector.shape_cast %169 : vector<8xf32> to vector<8x1xf32>
      %cst_60 = arith.constant 1.000000e-30 : f32
      %171 = vector.broadcast %cst_60 : f32 to vector<8x1xf32>
      %172 = arith.maximumf %170, %171 : vector<8x1xf32>
      %173 = tpu.reciprocal %166 {approx = true} : vector<8x1xf32> -> vector<8x1xf32>
      %174 = arith.mulf %6, %173 : vector<8x1xf32>
      %175 = tpu.reciprocal %172 {approx = true} : vector<8x1xf32> -> vector<8x1xf32>
      %176 = arith.mulf %6, %175 : vector<8x1xf32>
      %177 = vector.broadcast %174 : vector<8x1xf32> to vector<8x8xf32>
      %178 = arith.mulf %155, %177 : vector<8x8xf32>
      %cst_61 = arith.constant dense<0.000000e+00> : vector<8xf32>
      %179 = vector.multi_reduction <add>, %178, %cst_61 [0] : vector<8x8xf32> to vector<8xf32>
      %180 = vector.shape_cast %179 : vector<8xf32> to vector<1x8xf32>
      %cst_62 = arith.constant 1.000000e-30 : f32
      %181 = vector.broadcast %cst_62 : f32 to vector<1x8xf32>
      %182 = arith.maximumf %180, %181 : vector<1x8xf32>
      %183 = vector.broadcast %176 : vector<8x1xf32> to vector<8x8xf32>
      %184 = arith.mulf %158, %183 : vector<8x8xf32>
      %cst_63 = arith.constant dense<0.000000e+00> : vector<8xf32>
      %185 = vector.multi_reduction <add>, %184, %cst_63 [0] : vector<8x8xf32> to vector<8xf32>
      %186 = vector.shape_cast %185 : vector<8xf32> to vector<1x8xf32>
      %cst_64 = arith.constant 1.000000e-30 : f32
      %187 = vector.broadcast %cst_64 : f32 to vector<1x8xf32>
      %188 = arith.maximumf %186, %187 : vector<1x8xf32>
      %189 = tpu.reciprocal %182 {approx = true} : vector<1x8xf32> -> vector<1x8xf32>
      %190 = arith.mulf %7, %189 : vector<1x8xf32>
      %191 = tpu.reciprocal %188 {approx = true} : vector<1x8xf32> -> vector<1x8xf32>
      %192 = arith.mulf %7, %191 : vector<1x8xf32>
      %193 = vector.broadcast %190 : vector<1x8xf32> to vector<8x8xf32>
      %194 = arith.mulf %155, %193 : vector<8x8xf32>
      %cst_65 = arith.constant dense<0.000000e+00> : vector<8xf32>
      %195 = vector.multi_reduction <add>, %194, %cst_65 [1] : vector<8x8xf32> to vector<8xf32>
      %196 = vector.shape_cast %195 : vector<8xf32> to vector<8x1xf32>
      %cst_66 = arith.constant 1.000000e-30 : f32
      %197 = vector.broadcast %cst_66 : f32 to vector<8x1xf32>
      %198 = arith.maximumf %196, %197 : vector<8x1xf32>
      %199 = vector.broadcast %192 : vector<1x8xf32> to vector<8x8xf32>
      %200 = arith.mulf %158, %199 : vector<8x8xf32>
      %cst_67 = arith.constant dense<0.000000e+00> : vector<8xf32>
      %201 = vector.multi_reduction <add>, %200, %cst_67 [1] : vector<8x8xf32> to vector<8xf32>
      %202 = vector.shape_cast %201 : vector<8xf32> to vector<8x1xf32>
      %cst_68 = arith.constant 1.000000e-30 : f32
      %203 = vector.broadcast %cst_68 : f32 to vector<8x1xf32>
      %204 = arith.maximumf %202, %203 : vector<8x1xf32>
      %205 = tpu.reciprocal %198 {approx = true} : vector<8x1xf32> -> vector<8x1xf32>
      %206 = arith.mulf %6, %205 : vector<8x1xf32>
      %207 = tpu.reciprocal %204 {approx = true} : vector<8x1xf32> -> vector<8x1xf32>
      %208 = arith.mulf %6, %207 : vector<8x1xf32>
      %209 = vector.broadcast %206 : vector<8x1xf32> to vector<8x8xf32>
      %210 = arith.mulf %155, %209 : vector<8x8xf32>
      %cst_69 = arith.constant dense<0.000000e+00> : vector<8xf32>
      %211 = vector.multi_reduction <add>, %210, %cst_69 [0] : vector<8x8xf32> to vector<8xf32>
      %212 = vector.shape_cast %211 : vector<8xf32> to vector<1x8xf32>
      %cst_70 = arith.constant 1.000000e-30 : f32
      %213 = vector.broadcast %cst_70 : f32 to vector<1x8xf32>
      %214 = arith.maximumf %212, %213 : vector<1x8xf32>
      %215 = vector.broadcast %208 : vector<8x1xf32> to vector<8x8xf32>
      %216 = arith.mulf %158, %215 : vector<8x8xf32>
      %cst_71 = arith.constant dense<0.000000e+00> : vector<8xf32>
      %217 = vector.multi_reduction <add>, %216, %cst_71 [0] : vector<8x8xf32> to vector<8xf32>
      %218 = vector.shape_cast %217 : vector<8xf32> to vector<1x8xf32>
      %cst_72 = arith.constant 1.000000e-30 : f32
      %219 = vector.broadcast %cst_72 : f32 to vector<1x8xf32>
      %220 = arith.maximumf %218, %219 : vector<1x8xf32>
      %221 = tpu.reciprocal %214 {approx = true} : vector<1x8xf32> -> vector<1x8xf32>
      %222 = arith.mulf %7, %221 : vector<1x8xf32>
      %223 = tpu.reciprocal %220 {approx = true} : vector<1x8xf32> -> vector<1x8xf32>
      %224 = arith.mulf %7, %223 : vector<1x8xf32>
      %225 = vector.broadcast %222 : vector<1x8xf32> to vector<8x8xf32>
      %226 = arith.mulf %155, %225 : vector<8x8xf32>
      %cst_73 = arith.constant dense<0.000000e+00> : vector<8xf32>
      %227 = vector.multi_reduction <add>, %226, %cst_73 [1] : vector<8x8xf32> to vector<8xf32>
      %228 = vector.shape_cast %227 : vector<8xf32> to vector<8x1xf32>
      %cst_74 = arith.constant 1.000000e-30 : f32
      %229 = vector.broadcast %cst_74 : f32 to vector<8x1xf32>
      %230 = arith.maximumf %228, %229 : vector<8x1xf32>
      %231 = vector.broadcast %224 : vector<1x8xf32> to vector<8x8xf32>
      %232 = arith.mulf %158, %231 : vector<8x8xf32>
      %cst_75 = arith.constant dense<0.000000e+00> : vector<8xf32>
      %233 = vector.multi_reduction <add>, %232, %cst_75 [1] : vector<8x8xf32> to vector<8xf32>
      %234 = vector.shape_cast %233 : vector<8xf32> to vector<8x1xf32>
      %cst_76 = arith.constant 1.000000e-30 : f32
      %235 = vector.broadcast %cst_76 : f32 to vector<8x1xf32>
      %236 = arith.maximumf %234, %235 : vector<8x1xf32>
      %237 = tpu.reciprocal %230 {approx = true} : vector<8x1xf32> -> vector<8x1xf32>
      %238 = arith.mulf %6, %237 : vector<8x1xf32>
      %239 = tpu.reciprocal %236 {approx = true} : vector<8x1xf32> -> vector<8x1xf32>
      %240 = arith.mulf %6, %239 : vector<8x1xf32>
      %241 = vector.broadcast %238 : vector<8x1xf32> to vector<8x8xf32>
      %242 = arith.mulf %155, %241 : vector<8x8xf32>
      %cst_77 = arith.constant dense<0.000000e+00> : vector<8xf32>
      %243 = vector.multi_reduction <add>, %242, %cst_77 [0] : vector<8x8xf32> to vector<8xf32>
      %244 = vector.shape_cast %243 : vector<8xf32> to vector<1x8xf32>
      %cst_78 = arith.constant 1.000000e-30 : f32
      %245 = vector.broadcast %cst_78 : f32 to vector<1x8xf32>
      %246 = arith.maximumf %244, %245 : vector<1x8xf32>
      %247 = vector.broadcast %240 : vector<8x1xf32> to vector<8x8xf32>
      %248 = arith.mulf %158, %247 : vector<8x8xf32>
      %cst_79 = arith.constant dense<0.000000e+00> : vector<8xf32>
      %249 = vector.multi_reduction <add>, %248, %cst_79 [0] : vector<8x8xf32> to vector<8xf32>
      %250 = vector.shape_cast %249 : vector<8xf32> to vector<1x8xf32>
      %cst_80 = arith.constant 1.000000e-30 : f32
      %251 = vector.broadcast %cst_80 : f32 to vector<1x8xf32>
      %252 = arith.maximumf %250, %251 : vector<1x8xf32>
      %253 = tpu.reciprocal %246 {approx = true} : vector<1x8xf32> -> vector<1x8xf32>
      %254 = arith.mulf %7, %253 : vector<1x8xf32>
      %255 = tpu.reciprocal %252 {approx = true} : vector<1x8xf32> -> vector<1x8xf32>
      %256 = arith.mulf %7, %255 : vector<1x8xf32>
      %257 = vector.broadcast %254 : vector<1x8xf32> to vector<8x8xf32>
      %258 = arith.mulf %155, %257 : vector<8x8xf32>
      %cst_81 = arith.constant dense<0.000000e+00> : vector<8xf32>
      %259 = vector.multi_reduction <add>, %258, %cst_81 [1] : vector<8x8xf32> to vector<8xf32>
      %260 = vector.shape_cast %259 : vector<8xf32> to vector<8x1xf32>
      %cst_82 = arith.constant 1.000000e-30 : f32
      %261 = vector.broadcast %cst_82 : f32 to vector<8x1xf32>
      %262 = arith.maximumf %260, %261 : vector<8x1xf32>
      %263 = vector.broadcast %256 : vector<1x8xf32> to vector<8x8xf32>
      %264 = arith.mulf %158, %263 : vector<8x8xf32>
      %cst_83 = arith.constant dense<0.000000e+00> : vector<8xf32>
      %265 = vector.multi_reduction <add>, %264, %cst_83 [1] : vector<8x8xf32> to vector<8xf32>
      %266 = vector.shape_cast %265 : vector<8xf32> to vector<8x1xf32>
      %cst_84 = arith.constant 1.000000e-30 : f32
      %267 = vector.broadcast %cst_84 : f32 to vector<8x1xf32>
      %268 = arith.maximumf %266, %267 : vector<8x1xf32>
      %269 = tpu.reciprocal %262 {approx = true} : vector<8x1xf32> -> vector<8x1xf32>
      %270 = arith.mulf %6, %269 : vector<8x1xf32>
      %271 = tpu.reciprocal %268 {approx = true} : vector<8x1xf32> -> vector<8x1xf32>
      %272 = arith.mulf %6, %271 : vector<8x1xf32>
      %273 = vector.broadcast %270 : vector<8x1xf32> to vector<8x8xf32>
      %274 = arith.mulf %155, %273 : vector<8x8xf32>
      %cst_85 = arith.constant dense<0.000000e+00> : vector<8xf32>
      %275 = vector.multi_reduction <add>, %274, %cst_85 [0] : vector<8x8xf32> to vector<8xf32>
      %276 = vector.shape_cast %275 : vector<8xf32> to vector<1x8xf32>
      %cst_86 = arith.constant 1.000000e-30 : f32
      %277 = vector.broadcast %cst_86 : f32 to vector<1x8xf32>
      %278 = arith.maximumf %276, %277 : vector<1x8xf32>
      %279 = vector.broadcast %272 : vector<8x1xf32> to vector<8x8xf32>
      %280 = arith.mulf %158, %279 : vector<8x8xf32>
      %cst_87 = arith.constant dense<0.000000e+00> : vector<8xf32>
      %281 = vector.multi_reduction <add>, %280, %cst_87 [0] : vector<8x8xf32> to vector<8xf32>
      %282 = vector.shape_cast %281 : vector<8xf32> to vector<1x8xf32>
      %cst_88 = arith.constant 1.000000e-30 : f32
      %283 = vector.broadcast %cst_88 : f32 to vector<1x8xf32>
      %284 = arith.maximumf %282, %283 : vector<1x8xf32>
      %285 = tpu.reciprocal %278 {approx = true} : vector<1x8xf32> -> vector<1x8xf32>
      %286 = arith.mulf %7, %285 : vector<1x8xf32>
      %287 = tpu.reciprocal %284 {approx = true} : vector<1x8xf32> -> vector<1x8xf32>
      %288 = arith.mulf %7, %287 : vector<1x8xf32>
      %289 = vector.broadcast %286 : vector<1x8xf32> to vector<8x8xf32>
      %290 = arith.mulf %155, %289 : vector<8x8xf32>
      %cst_89 = arith.constant dense<0.000000e+00> : vector<8xf32>
      %291 = vector.multi_reduction <add>, %290, %cst_89 [1] : vector<8x8xf32> to vector<8xf32>
      %292 = vector.shape_cast %291 : vector<8xf32> to vector<8x1xf32>
      %cst_90 = arith.constant 1.000000e-30 : f32
      %293 = vector.broadcast %cst_90 : f32 to vector<8x1xf32>
      %294 = arith.maximumf %292, %293 : vector<8x1xf32>
      %295 = vector.broadcast %288 : vector<1x8xf32> to vector<8x8xf32>
      %296 = arith.mulf %158, %295 : vector<8x8xf32>
      %cst_91 = arith.constant dense<0.000000e+00> : vector<8xf32>
      %297 = vector.multi_reduction <add>, %296, %cst_91 [1] : vector<8x8xf32> to vector<8xf32>
      %298 = vector.shape_cast %297 : vector<8xf32> to vector<8x1xf32>
      %cst_92 = arith.constant 1.000000e-30 : f32
      %299 = vector.broadcast %cst_92 : f32 to vector<8x1xf32>
      %300 = arith.maximumf %298, %299 : vector<8x1xf32>
      %301 = tpu.reciprocal %294 {approx = true} : vector<8x1xf32> -> vector<8x1xf32>
      %302 = arith.mulf %6, %301 : vector<8x1xf32>
      %303 = tpu.reciprocal %300 {approx = true} : vector<8x1xf32> -> vector<8x1xf32>
      %304 = arith.mulf %6, %303 : vector<8x1xf32>
      %305 = vector.broadcast %302 : vector<8x1xf32> to vector<8x8xf32>
      %306 = arith.mulf %155, %305 : vector<8x8xf32>
      %cst_93 = arith.constant dense<0.000000e+00> : vector<8xf32>
      %307 = vector.multi_reduction <add>, %306, %cst_93 [0] : vector<8x8xf32> to vector<8xf32>
      %308 = vector.shape_cast %307 : vector<8xf32> to vector<1x8xf32>
      %cst_94 = arith.constant 1.000000e-30 : f32
      %309 = vector.broadcast %cst_94 : f32 to vector<1x8xf32>
      %310 = arith.maximumf %308, %309 : vector<1x8xf32>
      %311 = vector.broadcast %304 : vector<8x1xf32> to vector<8x8xf32>
      %312 = arith.mulf %158, %311 : vector<8x8xf32>
      %cst_95 = arith.constant dense<0.000000e+00> : vector<8xf32>
      %313 = vector.multi_reduction <add>, %312, %cst_95 [0] : vector<8x8xf32> to vector<8xf32>
      %314 = vector.shape_cast %313 : vector<8xf32> to vector<1x8xf32>
      %cst_96 = arith.constant 1.000000e-30 : f32
      %315 = vector.broadcast %cst_96 : f32 to vector<1x8xf32>
      %316 = arith.maximumf %314, %315 : vector<1x8xf32>
      %317 = tpu.reciprocal %310 {approx = true} : vector<1x8xf32> -> vector<1x8xf32>
      %318 = arith.mulf %7, %317 : vector<1x8xf32>
      %319 = tpu.reciprocal %316 {approx = true} : vector<1x8xf32> -> vector<1x8xf32>
      %320 = arith.mulf %7, %319 : vector<1x8xf32>
      %321 = vector.broadcast %318 : vector<1x8xf32> to vector<8x8xf32>
      %322 = arith.mulf %155, %321 : vector<8x8xf32>
      %cst_97 = arith.constant dense<0.000000e+00> : vector<8xf32>
      %323 = vector.multi_reduction <add>, %322, %cst_97 [1] : vector<8x8xf32> to vector<8xf32>
      %324 = vector.shape_cast %323 : vector<8xf32> to vector<8x1xf32>
      %cst_98 = arith.constant 1.000000e-30 : f32
      %325 = vector.broadcast %cst_98 : f32 to vector<8x1xf32>
      %326 = arith.maximumf %324, %325 : vector<8x1xf32>
      %327 = vector.broadcast %320 : vector<1x8xf32> to vector<8x8xf32>
      %328 = arith.mulf %158, %327 : vector<8x8xf32>
      %cst_99 = arith.constant dense<0.000000e+00> : vector<8xf32>
      %329 = vector.multi_reduction <add>, %328, %cst_99 [1] : vector<8x8xf32> to vector<8xf32>
      %330 = vector.shape_cast %329 : vector<8xf32> to vector<8x1xf32>
      %cst_100 = arith.constant 1.000000e-30 : f32
      %331 = vector.broadcast %cst_100 : f32 to vector<8x1xf32>
      %332 = arith.maximumf %330, %331 : vector<8x1xf32>
      %333 = tpu.reciprocal %326 {approx = true} : vector<8x1xf32> -> vector<8x1xf32>
      %334 = arith.mulf %6, %333 : vector<8x1xf32>
      %335 = tpu.reciprocal %332 {approx = true} : vector<8x1xf32> -> vector<8x1xf32>
      %336 = arith.mulf %6, %335 : vector<8x1xf32>
      %337 = vector.broadcast %334 : vector<8x1xf32> to vector<8x8xf32>
      %338 = arith.mulf %155, %337 : vector<8x8xf32>
      %cst_101 = arith.constant dense<0.000000e+00> : vector<8xf32>
      %339 = vector.multi_reduction <add>, %338, %cst_101 [0] : vector<8x8xf32> to vector<8xf32>
      %340 = vector.shape_cast %339 : vector<8xf32> to vector<1x8xf32>
      %cst_102 = arith.constant 1.000000e-30 : f32
      %341 = vector.broadcast %cst_102 : f32 to vector<1x8xf32>
      %342 = arith.maximumf %340, %341 : vector<1x8xf32>
      %343 = vector.broadcast %336 : vector<8x1xf32> to vector<8x8xf32>
      %344 = arith.mulf %158, %343 : vector<8x8xf32>
      %cst_103 = arith.constant dense<0.000000e+00> : vector<8xf32>
      %345 = vector.multi_reduction <add>, %344, %cst_103 [0] : vector<8x8xf32> to vector<8xf32>
      %346 = vector.shape_cast %345 : vector<8xf32> to vector<1x8xf32>
      %cst_104 = arith.constant 1.000000e-30 : f32
      %347 = vector.broadcast %cst_104 : f32 to vector<1x8xf32>
      %348 = arith.maximumf %346, %347 : vector<1x8xf32>
      %349 = tpu.reciprocal %342 {approx = true} : vector<1x8xf32> -> vector<1x8xf32>
      %350 = arith.mulf %7, %349 : vector<1x8xf32>
      %351 = tpu.reciprocal %348 {approx = true} : vector<1x8xf32> -> vector<1x8xf32>
      %352 = arith.mulf %7, %351 : vector<1x8xf32>
      %353 = vector.broadcast %350 : vector<1x8xf32> to vector<8x8xf32>
      %354 = arith.mulf %155, %353 : vector<8x8xf32>
      %cst_105 = arith.constant dense<0.000000e+00> : vector<8xf32>
      %355 = vector.multi_reduction <add>, %354, %cst_105 [1] : vector<8x8xf32> to vector<8xf32>
      %356 = vector.shape_cast %355 : vector<8xf32> to vector<8x1xf32>
      %cst_106 = arith.constant 1.000000e-30 : f32
      %357 = vector.broadcast %cst_106 : f32 to vector<8x1xf32>
      %358 = arith.maximumf %356, %357 : vector<8x1xf32>
      %359 = vector.broadcast %352 : vector<1x8xf32> to vector<8x8xf32>
      %360 = arith.mulf %158, %359 : vector<8x8xf32>
      %cst_107 = arith.constant dense<0.000000e+00> : vector<8xf32>
      %361 = vector.multi_reduction <add>, %360, %cst_107 [1] : vector<8x8xf32> to vector<8xf32>
      %362 = vector.shape_cast %361 : vector<8xf32> to vector<8x1xf32>
      %cst_108 = arith.constant 1.000000e-30 : f32
      %363 = vector.broadcast %cst_108 : f32 to vector<8x1xf32>
      %364 = arith.maximumf %362, %363 : vector<8x1xf32>
      %365 = tpu.reciprocal %358 {approx = true} : vector<8x1xf32> -> vector<8x1xf32>
      %366 = arith.mulf %6, %365 : vector<8x1xf32>
      %367 = tpu.reciprocal %364 {approx = true} : vector<8x1xf32> -> vector<8x1xf32>
      %368 = arith.mulf %6, %367 : vector<8x1xf32>
      %369 = vector.broadcast %366 : vector<8x1xf32> to vector<8x8xf32>
      %370 = arith.mulf %155, %369 : vector<8x8xf32>
      %cst_109 = arith.constant dense<0.000000e+00> : vector<8xf32>
      %371 = vector.multi_reduction <add>, %370, %cst_109 [0] : vector<8x8xf32> to vector<8xf32>
      %372 = vector.shape_cast %371 : vector<8xf32> to vector<1x8xf32>
      %cst_110 = arith.constant 1.000000e-30 : f32
      %373 = vector.broadcast %cst_110 : f32 to vector<1x8xf32>
      %374 = arith.maximumf %372, %373 : vector<1x8xf32>
      %375 = vector.broadcast %368 : vector<8x1xf32> to vector<8x8xf32>
      %376 = arith.mulf %158, %375 : vector<8x8xf32>
      %cst_111 = arith.constant dense<0.000000e+00> : vector<8xf32>
      %377 = vector.multi_reduction <add>, %376, %cst_111 [0] : vector<8x8xf32> to vector<8xf32>
      %378 = vector.shape_cast %377 : vector<8xf32> to vector<1x8xf32>
      %cst_112 = arith.constant 1.000000e-30 : f32
      %379 = vector.broadcast %cst_112 : f32 to vector<1x8xf32>
      %380 = arith.maximumf %378, %379 : vector<1x8xf32>
      %381 = tpu.reciprocal %374 {approx = true} : vector<1x8xf32> -> vector<1x8xf32>
      %382 = arith.mulf %7, %381 : vector<1x8xf32>
      %383 = tpu.reciprocal %380 {approx = true} : vector<1x8xf32> -> vector<1x8xf32>
      %384 = arith.mulf %7, %383 : vector<1x8xf32>
      %385 = vector.broadcast %382 : vector<1x8xf32> to vector<8x8xf32>
      %386 = arith.mulf %155, %385 : vector<8x8xf32>
      %cst_113 = arith.constant dense<0.000000e+00> : vector<8xf32>
      %387 = vector.multi_reduction <add>, %386, %cst_113 [1] : vector<8x8xf32> to vector<8xf32>
      %388 = vector.shape_cast %387 : vector<8xf32> to vector<8x1xf32>
      %cst_114 = arith.constant 1.000000e-30 : f32
      %389 = vector.broadcast %cst_114 : f32 to vector<8x1xf32>
      %390 = arith.maximumf %388, %389 : vector<8x1xf32>
      %391 = vector.broadcast %384 : vector<1x8xf32> to vector<8x8xf32>
      %392 = arith.mulf %158, %391 : vector<8x8xf32>
      %cst_115 = arith.constant dense<0.000000e+00> : vector<8xf32>
      %393 = vector.multi_reduction <add>, %392, %cst_115 [1] : vector<8x8xf32> to vector<8xf32>
      %394 = vector.shape_cast %393 : vector<8xf32> to vector<8x1xf32>
      %cst_116 = arith.constant 1.000000e-30 : f32
      %395 = vector.broadcast %cst_116 : f32 to vector<8x1xf32>
      %396 = arith.maximumf %394, %395 : vector<8x1xf32>
      %397 = tpu.reciprocal %390 {approx = true} : vector<8x1xf32> -> vector<8x1xf32>
      %398 = arith.mulf %6, %397 : vector<8x1xf32>
      %399 = tpu.reciprocal %396 {approx = true} : vector<8x1xf32> -> vector<8x1xf32>
      %400 = arith.mulf %6, %399 : vector<8x1xf32>
      %401 = vector.broadcast %398 : vector<8x1xf32> to vector<8x8xf32>
      %402 = arith.mulf %155, %401 : vector<8x8xf32>
      %cst_117 = arith.constant dense<0.000000e+00> : vector<8xf32>
      %403 = vector.multi_reduction <add>, %402, %cst_117 [0] : vector<8x8xf32> to vector<8xf32>
      %404 = vector.shape_cast %403 : vector<8xf32> to vector<1x8xf32>
      %cst_118 = arith.constant 1.000000e-30 : f32
      %405 = vector.broadcast %cst_118 : f32 to vector<1x8xf32>
      %406 = arith.maximumf %404, %405 : vector<1x8xf32>
      %407 = vector.broadcast %400 : vector<8x1xf32> to vector<8x8xf32>
      %408 = arith.mulf %158, %407 : vector<8x8xf32>
      %cst_119 = arith.constant dense<0.000000e+00> : vector<8xf32>
      %409 = vector.multi_reduction <add>, %408, %cst_119 [0] : vector<8x8xf32> to vector<8xf32>
      %410 = vector.shape_cast %409 : vector<8xf32> to vector<1x8xf32>
      %cst_120 = arith.constant 1.000000e-30 : f32
      %411 = vector.broadcast %cst_120 : f32 to vector<1x8xf32>
      %412 = arith.maximumf %410, %411 : vector<1x8xf32>
      %413 = tpu.reciprocal %406 {approx = true} : vector<1x8xf32> -> vector<1x8xf32>
      %414 = arith.mulf %7, %413 : vector<1x8xf32>
      %415 = tpu.reciprocal %412 {approx = true} : vector<1x8xf32> -> vector<1x8xf32>
      %416 = arith.mulf %7, %415 : vector<1x8xf32>
      %417 = vector.broadcast %414 : vector<1x8xf32> to vector<8x8xf32>
      %418 = arith.mulf %155, %417 : vector<8x8xf32>
      %cst_121 = arith.constant dense<0.000000e+00> : vector<8xf32>
      %419 = vector.multi_reduction <add>, %418, %cst_121 [1] : vector<8x8xf32> to vector<8xf32>
      %420 = vector.shape_cast %419 : vector<8xf32> to vector<8x1xf32>
      %cst_122 = arith.constant 1.000000e-30 : f32
      %421 = vector.broadcast %cst_122 : f32 to vector<8x1xf32>
      %422 = arith.maximumf %420, %421 : vector<8x1xf32>
      %423 = vector.broadcast %416 : vector<1x8xf32> to vector<8x8xf32>
      %424 = arith.mulf %158, %423 : vector<8x8xf32>
      %cst_123 = arith.constant dense<0.000000e+00> : vector<8xf32>
      %425 = vector.multi_reduction <add>, %424, %cst_123 [1] : vector<8x8xf32> to vector<8xf32>
      %426 = vector.shape_cast %425 : vector<8xf32> to vector<8x1xf32>
      %cst_124 = arith.constant 1.000000e-30 : f32
      %427 = vector.broadcast %cst_124 : f32 to vector<8x1xf32>
      %428 = arith.maximumf %426, %427 : vector<8x1xf32>
      %429 = tpu.reciprocal %422 {approx = true} : vector<8x1xf32> -> vector<8x1xf32>
      %430 = arith.mulf %6, %429 : vector<8x1xf32>
      %431 = tpu.reciprocal %428 {approx = true} : vector<8x1xf32> -> vector<8x1xf32>
      %432 = arith.mulf %6, %431 : vector<8x1xf32>
      %433 = vector.broadcast %430 : vector<8x1xf32> to vector<8x8xf32>
      %434 = arith.mulf %155, %433 : vector<8x8xf32>
      %cst_125 = arith.constant dense<0.000000e+00> : vector<8xf32>
      %435 = vector.multi_reduction <add>, %434, %cst_125 [0] : vector<8x8xf32> to vector<8xf32>
      %436 = vector.shape_cast %435 : vector<8xf32> to vector<1x8xf32>
      %cst_126 = arith.constant 1.000000e-30 : f32
      %437 = vector.broadcast %cst_126 : f32 to vector<1x8xf32>
      %438 = arith.maximumf %436, %437 : vector<1x8xf32>
      %439 = vector.broadcast %432 : vector<8x1xf32> to vector<8x8xf32>
      %440 = arith.mulf %158, %439 : vector<8x8xf32>
      %cst_127 = arith.constant dense<0.000000e+00> : vector<8xf32>
      %441 = vector.multi_reduction <add>, %440, %cst_127 [0] : vector<8x8xf32> to vector<8xf32>
      %442 = vector.shape_cast %441 : vector<8xf32> to vector<1x8xf32>
      %cst_128 = arith.constant 1.000000e-30 : f32
      %443 = vector.broadcast %cst_128 : f32 to vector<1x8xf32>
      %444 = arith.maximumf %442, %443 : vector<1x8xf32>
      %445 = tpu.reciprocal %438 {approx = true} : vector<1x8xf32> -> vector<1x8xf32>
      %446 = arith.mulf %7, %445 : vector<1x8xf32>
      %447 = tpu.reciprocal %444 {approx = true} : vector<1x8xf32> -> vector<1x8xf32>
      %448 = arith.mulf %7, %447 : vector<1x8xf32>
      %449 = vector.broadcast %446 : vector<1x8xf32> to vector<8x8xf32>
      %450 = arith.mulf %155, %449 : vector<8x8xf32>
      %cst_129 = arith.constant dense<0.000000e+00> : vector<8xf32>
      %451 = vector.multi_reduction <add>, %450, %cst_129 [1] : vector<8x8xf32> to vector<8xf32>
      %452 = vector.shape_cast %451 : vector<8xf32> to vector<8x1xf32>
      %cst_130 = arith.constant 1.000000e-30 : f32
      %453 = vector.broadcast %cst_130 : f32 to vector<8x1xf32>
      %454 = arith.maximumf %452, %453 : vector<8x1xf32>
      %455 = vector.broadcast %448 : vector<1x8xf32> to vector<8x8xf32>
      %456 = arith.mulf %158, %455 : vector<8x8xf32>
      %cst_131 = arith.constant dense<0.000000e+00> : vector<8xf32>
      %457 = vector.multi_reduction <add>, %456, %cst_131 [1] : vector<8x8xf32> to vector<8xf32>
      %458 = vector.shape_cast %457 : vector<8xf32> to vector<8x1xf32>
      %cst_132 = arith.constant 1.000000e-30 : f32
      %459 = vector.broadcast %cst_132 : f32 to vector<8x1xf32>
      %460 = arith.maximumf %458, %459 : vector<8x1xf32>
      %461 = tpu.reciprocal %454 {approx = true} : vector<8x1xf32> -> vector<8x1xf32>
      %462 = arith.mulf %6, %461 : vector<8x1xf32>
      %463 = tpu.reciprocal %460 {approx = true} : vector<8x1xf32> -> vector<8x1xf32>
      %464 = arith.mulf %6, %463 : vector<8x1xf32>
      %465 = vector.broadcast %462 : vector<8x1xf32> to vector<8x8xf32>
      %466 = arith.mulf %155, %465 : vector<8x8xf32>
      %cst_133 = arith.constant dense<0.000000e+00> : vector<8xf32>
      %467 = vector.multi_reduction <add>, %466, %cst_133 [0] : vector<8x8xf32> to vector<8xf32>
      %468 = vector.shape_cast %467 : vector<8xf32> to vector<1x8xf32>
      %cst_134 = arith.constant 1.000000e-30 : f32
      %469 = vector.broadcast %cst_134 : f32 to vector<1x8xf32>
      %470 = arith.maximumf %468, %469 : vector<1x8xf32>
      %471 = vector.broadcast %464 : vector<8x1xf32> to vector<8x8xf32>
      %472 = arith.mulf %158, %471 : vector<8x8xf32>
      %cst_135 = arith.constant dense<0.000000e+00> : vector<8xf32>
      %473 = vector.multi_reduction <add>, %472, %cst_135 [0] : vector<8x8xf32> to vector<8xf32>
      %474 = vector.shape_cast %473 : vector<8xf32> to vector<1x8xf32>
      %cst_136 = arith.constant 1.000000e-30 : f32
      %475 = vector.broadcast %cst_136 : f32 to vector<1x8xf32>
      %476 = arith.maximumf %474, %475 : vector<1x8xf32>
      %477 = tpu.reciprocal %470 {approx = true} : vector<1x8xf32> -> vector<1x8xf32>
      %478 = arith.mulf %7, %477 : vector<1x8xf32>
      %479 = tpu.reciprocal %476 {approx = true} : vector<1x8xf32> -> vector<1x8xf32>
      %480 = arith.mulf %7, %479 : vector<1x8xf32>
      %481 = vector.broadcast %478 : vector<1x8xf32> to vector<8x8xf32>
      %482 = arith.mulf %155, %481 : vector<8x8xf32>
      %cst_137 = arith.constant dense<0.000000e+00> : vector<8xf32>
      %483 = vector.multi_reduction <add>, %482, %cst_137 [1] : vector<8x8xf32> to vector<8xf32>
      %484 = vector.shape_cast %483 : vector<8xf32> to vector<8x1xf32>
      %cst_138 = arith.constant 1.000000e-30 : f32
      %485 = vector.broadcast %cst_138 : f32 to vector<8x1xf32>
      %486 = arith.maximumf %484, %485 : vector<8x1xf32>
      %487 = vector.broadcast %480 : vector<1x8xf32> to vector<8x8xf32>
      %488 = arith.mulf %158, %487 : vector<8x8xf32>
      %cst_139 = arith.constant dense<0.000000e+00> : vector<8xf32>
      %489 = vector.multi_reduction <add>, %488, %cst_139 [1] : vector<8x8xf32> to vector<8xf32>
      %490 = vector.shape_cast %489 : vector<8xf32> to vector<8x1xf32>
      %cst_140 = arith.constant 1.000000e-30 : f32
      %491 = vector.broadcast %cst_140 : f32 to vector<8x1xf32>
      %492 = arith.maximumf %490, %491 : vector<8x1xf32>
      %493 = tpu.reciprocal %486 {approx = true} : vector<8x1xf32> -> vector<8x1xf32>
      %494 = arith.mulf %6, %493 : vector<8x1xf32>
      %495 = tpu.reciprocal %492 {approx = true} : vector<8x1xf32> -> vector<8x1xf32>
      %496 = arith.mulf %6, %495 : vector<8x1xf32>
      %497 = vector.broadcast %494 : vector<8x1xf32> to vector<8x8xf32>
      %498 = arith.mulf %155, %497 : vector<8x8xf32>
      %cst_141 = arith.constant dense<0.000000e+00> : vector<8xf32>
      %499 = vector.multi_reduction <add>, %498, %cst_141 [0] : vector<8x8xf32> to vector<8xf32>
      %500 = vector.shape_cast %499 : vector<8xf32> to vector<1x8xf32>
      %cst_142 = arith.constant 1.000000e-30 : f32
      %501 = vector.broadcast %cst_142 : f32 to vector<1x8xf32>
      %502 = arith.maximumf %500, %501 : vector<1x8xf32>
      %503 = vector.broadcast %496 : vector<8x1xf32> to vector<8x8xf32>
      %504 = arith.mulf %158, %503 : vector<8x8xf32>
      %cst_143 = arith.constant dense<0.000000e+00> : vector<8xf32>
      %505 = vector.multi_reduction <add>, %504, %cst_143 [0] : vector<8x8xf32> to vector<8xf32>
      %506 = vector.shape_cast %505 : vector<8xf32> to vector<1x8xf32>
      %cst_144 = arith.constant 1.000000e-30 : f32
      %507 = vector.broadcast %cst_144 : f32 to vector<1x8xf32>
      %508 = arith.maximumf %506, %507 : vector<1x8xf32>
      %509 = tpu.reciprocal %502 {approx = true} : vector<1x8xf32> -> vector<1x8xf32>
      %510 = arith.mulf %7, %509 : vector<1x8xf32>
      %511 = tpu.reciprocal %508 {approx = true} : vector<1x8xf32> -> vector<1x8xf32>
      %512 = arith.mulf %7, %511 : vector<1x8xf32>
      %513 = vector.broadcast %510 : vector<1x8xf32> to vector<8x8xf32>
      %514 = arith.mulf %155, %513 : vector<8x8xf32>
      %cst_145 = arith.constant dense<0.000000e+00> : vector<8xf32>
      %515 = vector.multi_reduction <add>, %514, %cst_145 [1] : vector<8x8xf32> to vector<8xf32>
      %516 = vector.shape_cast %515 : vector<8xf32> to vector<8x1xf32>
      %cst_146 = arith.constant 1.000000e-30 : f32
      %517 = vector.broadcast %cst_146 : f32 to vector<8x1xf32>
      %518 = arith.maximumf %516, %517 : vector<8x1xf32>
      %519 = vector.broadcast %512 : vector<1x8xf32> to vector<8x8xf32>
      %520 = arith.mulf %158, %519 : vector<8x8xf32>
      %cst_147 = arith.constant dense<0.000000e+00> : vector<8xf32>
      %521 = vector.multi_reduction <add>, %520, %cst_147 [1] : vector<8x8xf32> to vector<8xf32>
      %522 = vector.shape_cast %521 : vector<8xf32> to vector<8x1xf32>
      %cst_148 = arith.constant 1.000000e-30 : f32
      %523 = vector.broadcast %cst_148 : f32 to vector<8x1xf32>
      %524 = arith.maximumf %522, %523 : vector<8x1xf32>
      %525 = tpu.reciprocal %518 {approx = true} : vector<8x1xf32> -> vector<8x1xf32>
      %526 = arith.mulf %6, %525 : vector<8x1xf32>
      %527 = tpu.reciprocal %524 {approx = true} : vector<8x1xf32> -> vector<8x1xf32>
      %528 = arith.mulf %6, %527 : vector<8x1xf32>
      %529 = vector.broadcast %526 : vector<8x1xf32> to vector<8x8xf32>
      %530 = arith.mulf %155, %529 : vector<8x8xf32>
      %cst_149 = arith.constant dense<0.000000e+00> : vector<8xf32>
      %531 = vector.multi_reduction <add>, %530, %cst_149 [0] : vector<8x8xf32> to vector<8xf32>
      %532 = vector.shape_cast %531 : vector<8xf32> to vector<1x8xf32>
      %cst_150 = arith.constant 1.000000e-30 : f32
      %533 = vector.broadcast %cst_150 : f32 to vector<1x8xf32>
      %534 = arith.maximumf %532, %533 : vector<1x8xf32>
      %535 = vector.broadcast %528 : vector<8x1xf32> to vector<8x8xf32>
      %536 = arith.mulf %158, %535 : vector<8x8xf32>
      %cst_151 = arith.constant dense<0.000000e+00> : vector<8xf32>
      %537 = vector.multi_reduction <add>, %536, %cst_151 [0] : vector<8x8xf32> to vector<8xf32>
      %538 = vector.shape_cast %537 : vector<8xf32> to vector<1x8xf32>
      %cst_152 = arith.constant 1.000000e-30 : f32
      %539 = vector.broadcast %cst_152 : f32 to vector<1x8xf32>
      %540 = arith.maximumf %538, %539 : vector<1x8xf32>
      %541 = tpu.reciprocal %534 {approx = true} : vector<1x8xf32> -> vector<1x8xf32>
      %542 = arith.mulf %7, %541 : vector<1x8xf32>
      %543 = tpu.reciprocal %540 {approx = true} : vector<1x8xf32> -> vector<1x8xf32>
      %544 = arith.mulf %7, %543 : vector<1x8xf32>
      %545 = vector.broadcast %542 : vector<1x8xf32> to vector<8x8xf32>
      %546 = arith.mulf %155, %545 : vector<8x8xf32>
      %cst_153 = arith.constant dense<0.000000e+00> : vector<8xf32>
      %547 = vector.multi_reduction <add>, %546, %cst_153 [1] : vector<8x8xf32> to vector<8xf32>
      %548 = vector.shape_cast %547 : vector<8xf32> to vector<8x1xf32>
      %cst_154 = arith.constant 1.000000e-30 : f32
      %549 = vector.broadcast %cst_154 : f32 to vector<8x1xf32>
      %550 = arith.maximumf %548, %549 : vector<8x1xf32>
      %551 = vector.broadcast %544 : vector<1x8xf32> to vector<8x8xf32>
      %552 = arith.mulf %158, %551 : vector<8x8xf32>
      %cst_155 = arith.constant dense<0.000000e+00> : vector<8xf32>
      %553 = vector.multi_reduction <add>, %552, %cst_155 [1] : vector<8x8xf32> to vector<8xf32>
      %554 = vector.shape_cast %553 : vector<8xf32> to vector<8x1xf32>
      %cst_156 = arith.constant 1.000000e-30 : f32
      %555 = vector.broadcast %cst_156 : f32 to vector<8x1xf32>
      %556 = arith.maximumf %554, %555 : vector<8x1xf32>
      %557 = tpu.reciprocal %550 {approx = true} : vector<8x1xf32> -> vector<8x1xf32>
      %558 = arith.mulf %6, %557 : vector<8x1xf32>
      %559 = tpu.reciprocal %556 {approx = true} : vector<8x1xf32> -> vector<8x1xf32>
      %560 = arith.mulf %6, %559 : vector<8x1xf32>
      %561 = vector.broadcast %558 : vector<8x1xf32> to vector<8x8xf32>
      %562 = arith.mulf %155, %561 : vector<8x8xf32>
      %cst_157 = arith.constant dense<0.000000e+00> : vector<8xf32>
      %563 = vector.multi_reduction <add>, %562, %cst_157 [0] : vector<8x8xf32> to vector<8xf32>
      %564 = vector.shape_cast %563 : vector<8xf32> to vector<1x8xf32>
      %cst_158 = arith.constant 1.000000e-30 : f32
      %565 = vector.broadcast %cst_158 : f32 to vector<1x8xf32>
      %566 = arith.maximumf %564, %565 : vector<1x8xf32>
      %567 = vector.broadcast %560 : vector<8x1xf32> to vector<8x8xf32>
      %568 = arith.mulf %158, %567 : vector<8x8xf32>
      %cst_159 = arith.constant dense<0.000000e+00> : vector<8xf32>
      %569 = vector.multi_reduction <add>, %568, %cst_159 [0] : vector<8x8xf32> to vector<8xf32>
      %570 = vector.shape_cast %569 : vector<8xf32> to vector<1x8xf32>
      %cst_160 = arith.constant 1.000000e-30 : f32
      %571 = vector.broadcast %cst_160 : f32 to vector<1x8xf32>
      %572 = arith.maximumf %570, %571 : vector<1x8xf32>
      %573 = tpu.reciprocal %566 {approx = true} : vector<1x8xf32> -> vector<1x8xf32>
      %574 = arith.mulf %7, %573 : vector<1x8xf32>
      %575 = tpu.reciprocal %572 {approx = true} : vector<1x8xf32> -> vector<1x8xf32>
      %576 = arith.mulf %7, %575 : vector<1x8xf32>
      %577 = vector.broadcast %574 : vector<1x8xf32> to vector<8x8xf32>
      %578 = arith.mulf %155, %577 : vector<8x8xf32>
      %cst_161 = arith.constant dense<0.000000e+00> : vector<8xf32>
      %579 = vector.multi_reduction <add>, %578, %cst_161 [1] : vector<8x8xf32> to vector<8xf32>
      %580 = vector.shape_cast %579 : vector<8xf32> to vector<8x1xf32>
      %cst_162 = arith.constant 1.000000e-30 : f32
      %581 = vector.broadcast %cst_162 : f32 to vector<8x1xf32>
      %582 = arith.maximumf %580, %581 : vector<8x1xf32>
      %583 = vector.broadcast %576 : vector<1x8xf32> to vector<8x8xf32>
      %584 = arith.mulf %158, %583 : vector<8x8xf32>
      %cst_163 = arith.constant dense<0.000000e+00> : vector<8xf32>
      %585 = vector.multi_reduction <add>, %584, %cst_163 [1] : vector<8x8xf32> to vector<8xf32>
      %586 = vector.shape_cast %585 : vector<8xf32> to vector<8x1xf32>
      %cst_164 = arith.constant 1.000000e-30 : f32
      %587 = vector.broadcast %cst_164 : f32 to vector<8x1xf32>
      %588 = arith.maximumf %586, %587 : vector<8x1xf32>
      %589 = tpu.reciprocal %582 {approx = true} : vector<8x1xf32> -> vector<8x1xf32>
      %590 = arith.mulf %6, %589 : vector<8x1xf32>
      %591 = tpu.reciprocal %588 {approx = true} : vector<8x1xf32> -> vector<8x1xf32>
      %592 = arith.mulf %6, %591 : vector<8x1xf32>
      %593 = vector.broadcast %590 : vector<8x1xf32> to vector<8x8xf32>
      %594 = arith.mulf %155, %593 : vector<8x8xf32>
      %cst_165 = arith.constant dense<0.000000e+00> : vector<8xf32>
      %595 = vector.multi_reduction <add>, %594, %cst_165 [0] : vector<8x8xf32> to vector<8xf32>
      %596 = vector.shape_cast %595 : vector<8xf32> to vector<1x8xf32>
      %cst_166 = arith.constant 1.000000e-30 : f32
      %597 = vector.broadcast %cst_166 : f32 to vector<1x8xf32>
      %598 = arith.maximumf %596, %597 : vector<1x8xf32>
      %599 = vector.broadcast %592 : vector<8x1xf32> to vector<8x8xf32>
      %600 = arith.mulf %158, %599 : vector<8x8xf32>
      %cst_167 = arith.constant dense<0.000000e+00> : vector<8xf32>
      %601 = vector.multi_reduction <add>, %600, %cst_167 [0] : vector<8x8xf32> to vector<8xf32>
      %602 = vector.shape_cast %601 : vector<8xf32> to vector<1x8xf32>
      %cst_168 = arith.constant 1.000000e-30 : f32
      %603 = vector.broadcast %cst_168 : f32 to vector<1x8xf32>
      %604 = arith.maximumf %602, %603 : vector<1x8xf32>
      %605 = tpu.reciprocal %598 {approx = true} : vector<1x8xf32> -> vector<1x8xf32>
      %606 = arith.mulf %7, %605 : vector<1x8xf32>
      %607 = tpu.reciprocal %604 {approx = true} : vector<1x8xf32> -> vector<1x8xf32>
      %608 = arith.mulf %7, %607 : vector<1x8xf32>
      %609 = vector.broadcast %606 : vector<1x8xf32> to vector<8x8xf32>
      %610 = arith.mulf %155, %609 : vector<8x8xf32>
      %cst_169 = arith.constant dense<0.000000e+00> : vector<8xf32>
      %611 = vector.multi_reduction <add>, %610, %cst_169 [1] : vector<8x8xf32> to vector<8xf32>
      %612 = vector.shape_cast %611 : vector<8xf32> to vector<8x1xf32>
      %cst_170 = arith.constant 1.000000e-30 : f32
      %613 = vector.broadcast %cst_170 : f32 to vector<8x1xf32>
      %614 = arith.maximumf %612, %613 : vector<8x1xf32>
      %615 = vector.broadcast %608 : vector<1x8xf32> to vector<8x8xf32>
      %616 = arith.mulf %158, %615 : vector<8x8xf32>
      %cst_171 = arith.constant dense<0.000000e+00> : vector<8xf32>
      %617 = vector.multi_reduction <add>, %616, %cst_171 [1] : vector<8x8xf32> to vector<8xf32>
      %618 = vector.shape_cast %617 : vector<8xf32> to vector<8x1xf32>
      %cst_172 = arith.constant 1.000000e-30 : f32
      %619 = vector.broadcast %cst_172 : f32 to vector<8x1xf32>
      %620 = arith.maximumf %618, %619 : vector<8x1xf32>
      %621 = tpu.reciprocal %614 {approx = true} : vector<8x1xf32> -> vector<8x1xf32>
      %622 = arith.mulf %6, %621 : vector<8x1xf32>
      %623 = tpu.reciprocal %620 {approx = true} : vector<8x1xf32> -> vector<8x1xf32>
      %624 = arith.mulf %6, %623 : vector<8x1xf32>
      %625 = vector.broadcast %622 : vector<8x1xf32> to vector<8x8xf32>
      %626 = arith.mulf %155, %625 : vector<8x8xf32>
      %cst_173 = arith.constant dense<0.000000e+00> : vector<8xf32>
      %627 = vector.multi_reduction <add>, %626, %cst_173 [0] : vector<8x8xf32> to vector<8xf32>
      %628 = vector.shape_cast %627 : vector<8xf32> to vector<1x8xf32>
      %cst_174 = arith.constant 1.000000e-30 : f32
      %629 = vector.broadcast %cst_174 : f32 to vector<1x8xf32>
      %630 = arith.maximumf %628, %629 : vector<1x8xf32>
      %631 = vector.broadcast %624 : vector<8x1xf32> to vector<8x8xf32>
      %632 = arith.mulf %158, %631 : vector<8x8xf32>
      %cst_175 = arith.constant dense<0.000000e+00> : vector<8xf32>
      %633 = vector.multi_reduction <add>, %632, %cst_175 [0] : vector<8x8xf32> to vector<8xf32>
      %634 = vector.shape_cast %633 : vector<8xf32> to vector<1x8xf32>
      %cst_176 = arith.constant 1.000000e-30 : f32
      %635 = vector.broadcast %cst_176 : f32 to vector<1x8xf32>
      %636 = arith.maximumf %634, %635 : vector<1x8xf32>
      %637 = tpu.reciprocal %630 {approx = true} : vector<1x8xf32> -> vector<1x8xf32>
      %638 = arith.mulf %7, %637 : vector<1x8xf32>
      %639 = tpu.reciprocal %636 {approx = true} : vector<1x8xf32> -> vector<1x8xf32>
      %640 = arith.mulf %7, %639 : vector<1x8xf32>
      %641 = vector.broadcast %638 : vector<1x8xf32> to vector<8x8xf32>
      %642 = arith.mulf %155, %641 : vector<8x8xf32>
      %cst_177 = arith.constant dense<0.000000e+00> : vector<8xf32>
      %643 = vector.multi_reduction <add>, %642, %cst_177 [1] : vector<8x8xf32> to vector<8xf32>
      %644 = vector.shape_cast %643 : vector<8xf32> to vector<8x1xf32>
      %cst_178 = arith.constant 1.000000e-30 : f32
      %645 = vector.broadcast %cst_178 : f32 to vector<8x1xf32>
      %646 = arith.maximumf %644, %645 : vector<8x1xf32>
      %647 = vector.broadcast %640 : vector<1x8xf32> to vector<8x8xf32>
      %648 = arith.mulf %158, %647 : vector<8x8xf32>
      %cst_179 = arith.constant dense<0.000000e+00> : vector<8xf32>
      %649 = vector.multi_reduction <add>, %648, %cst_179 [1] : vector<8x8xf32> to vector<8xf32>
      %650 = vector.shape_cast %649 : vector<8xf32> to vector<8x1xf32>
      %cst_180 = arith.constant 1.000000e-30 : f32
      %651 = vector.broadcast %cst_180 : f32 to vector<8x1xf32>
      %652 = arith.maximumf %650, %651 : vector<8x1xf32>
      %653 = tpu.reciprocal %646 {approx = true} : vector<8x1xf32> -> vector<8x1xf32>
      %654 = arith.mulf %6, %653 : vector<8x1xf32>
      %655 = tpu.reciprocal %652 {approx = true} : vector<8x1xf32> -> vector<8x1xf32>
      %656 = arith.mulf %6, %655 : vector<8x1xf32>
      %657 = vector.broadcast %654 : vector<8x1xf32> to vector<8x8xf32>
      %658 = arith.mulf %155, %657 : vector<8x8xf32>
      %cst_181 = arith.constant dense<0.000000e+00> : vector<8xf32>
      %659 = vector.multi_reduction <add>, %658, %cst_181 [0] : vector<8x8xf32> to vector<8xf32>
      %660 = vector.shape_cast %659 : vector<8xf32> to vector<1x8xf32>
      %cst_182 = arith.constant 1.000000e-30 : f32
      %661 = vector.broadcast %cst_182 : f32 to vector<1x8xf32>
      %662 = arith.maximumf %660, %661 : vector<1x8xf32>
      %663 = vector.broadcast %656 : vector<8x1xf32> to vector<8x8xf32>
      %664 = arith.mulf %158, %663 : vector<8x8xf32>
      %cst_183 = arith.constant dense<0.000000e+00> : vector<8xf32>
      %665 = vector.multi_reduction <add>, %664, %cst_183 [0] : vector<8x8xf32> to vector<8xf32>
      %666 = vector.shape_cast %665 : vector<8xf32> to vector<1x8xf32>
      %cst_184 = arith.constant 1.000000e-30 : f32
      %667 = vector.broadcast %cst_184 : f32 to vector<1x8xf32>
      %668 = arith.maximumf %666, %667 : vector<1x8xf32>
      %669 = tpu.reciprocal %662 {approx = true} : vector<1x8xf32> -> vector<1x8xf32>
      %670 = arith.mulf %7, %669 : vector<1x8xf32>
      %671 = tpu.reciprocal %668 {approx = true} : vector<1x8xf32> -> vector<1x8xf32>
      %672 = arith.mulf %7, %671 : vector<1x8xf32>
      %673 = vector.broadcast %670 : vector<1x8xf32> to vector<8x8xf32>
      %674 = arith.mulf %155, %673 : vector<8x8xf32>
      %cst_185 = arith.constant dense<0.000000e+00> : vector<8xf32>
      %675 = vector.multi_reduction <add>, %674, %cst_185 [1] : vector<8x8xf32> to vector<8xf32>
      %676 = vector.shape_cast %675 : vector<8xf32> to vector<8x1xf32>
      %cst_186 = arith.constant 1.000000e-30 : f32
      %677 = vector.broadcast %cst_186 : f32 to vector<8x1xf32>
      %678 = arith.maximumf %676, %677 : vector<8x1xf32>
      %679 = vector.broadcast %672 : vector<1x8xf32> to vector<8x8xf32>
      %680 = arith.mulf %158, %679 : vector<8x8xf32>
      %cst_187 = arith.constant dense<0.000000e+00> : vector<8xf32>
      %681 = vector.multi_reduction <add>, %680, %cst_187 [1] : vector<8x8xf32> to vector<8xf32>
      %682 = vector.shape_cast %681 : vector<8xf32> to vector<8x1xf32>
      %cst_188 = arith.constant 1.000000e-30 : f32
      %683 = vector.broadcast %cst_188 : f32 to vector<8x1xf32>
      %684 = arith.maximumf %682, %683 : vector<8x1xf32>
      %685 = tpu.reciprocal %678 {approx = true} : vector<8x1xf32> -> vector<8x1xf32>
      %686 = arith.mulf %6, %685 : vector<8x1xf32>
      %687 = tpu.reciprocal %684 {approx = true} : vector<8x1xf32> -> vector<8x1xf32>
      %688 = arith.mulf %6, %687 : vector<8x1xf32>
      %689 = vector.broadcast %686 : vector<8x1xf32> to vector<8x8xf32>
      %690 = arith.mulf %155, %689 : vector<8x8xf32>
      %cst_189 = arith.constant dense<0.000000e+00> : vector<8xf32>
      %691 = vector.multi_reduction <add>, %690, %cst_189 [0] : vector<8x8xf32> to vector<8xf32>
      %692 = vector.shape_cast %691 : vector<8xf32> to vector<1x8xf32>
      %cst_190 = arith.constant 1.000000e-30 : f32
      %693 = vector.broadcast %cst_190 : f32 to vector<1x8xf32>
      %694 = arith.maximumf %692, %693 : vector<1x8xf32>
      %695 = vector.broadcast %688 : vector<8x1xf32> to vector<8x8xf32>
      %696 = arith.mulf %158, %695 : vector<8x8xf32>
      %cst_191 = arith.constant dense<0.000000e+00> : vector<8xf32>
      %697 = vector.multi_reduction <add>, %696, %cst_191 [0] : vector<8x8xf32> to vector<8xf32>
      %698 = vector.shape_cast %697 : vector<8xf32> to vector<1x8xf32>
      %cst_192 = arith.constant 1.000000e-30 : f32
      %699 = vector.broadcast %cst_192 : f32 to vector<1x8xf32>
      %700 = arith.maximumf %698, %699 : vector<1x8xf32>
      %701 = tpu.reciprocal %694 {approx = true} : vector<1x8xf32> -> vector<1x8xf32>
      %702 = arith.mulf %7, %701 : vector<1x8xf32>
      %703 = tpu.reciprocal %700 {approx = true} : vector<1x8xf32> -> vector<1x8xf32>
      %704 = arith.mulf %7, %703 : vector<1x8xf32>
      %705 = vector.broadcast %702 : vector<1x8xf32> to vector<8x8xf32>
      %706 = arith.mulf %155, %705 : vector<8x8xf32>
      %cst_193 = arith.constant dense<0.000000e+00> : vector<8xf32>
      %707 = vector.multi_reduction <add>, %706, %cst_193 [1] : vector<8x8xf32> to vector<8xf32>
      %708 = vector.shape_cast %707 : vector<8xf32> to vector<8x1xf32>
      %cst_194 = arith.constant 1.000000e-30 : f32
      %709 = vector.broadcast %cst_194 : f32 to vector<8x1xf32>
      %710 = arith.maximumf %708, %709 : vector<8x1xf32>
      %711 = vector.broadcast %704 : vector<1x8xf32> to vector<8x8xf32>
      %712 = arith.mulf %158, %711 : vector<8x8xf32>
      %cst_195 = arith.constant dense<0.000000e+00> : vector<8xf32>
      %713 = vector.multi_reduction <add>, %712, %cst_195 [1] : vector<8x8xf32> to vector<8xf32>
      %714 = vector.shape_cast %713 : vector<8xf32> to vector<8x1xf32>
      %cst_196 = arith.constant 1.000000e-30 : f32
      %715 = vector.broadcast %cst_196 : f32 to vector<8x1xf32>
      %716 = arith.maximumf %714, %715 : vector<8x1xf32>
      %717 = tpu.reciprocal %710 {approx = true} : vector<8x1xf32> -> vector<8x1xf32>
      %718 = arith.mulf %6, %717 : vector<8x1xf32>
      %719 = tpu.reciprocal %716 {approx = true} : vector<8x1xf32> -> vector<8x1xf32>
      %720 = arith.mulf %6, %719 : vector<8x1xf32>
      %721 = vector.broadcast %718 : vector<8x1xf32> to vector<8x8xf32>
      %722 = arith.mulf %155, %721 : vector<8x8xf32>
      %cst_197 = arith.constant dense<0.000000e+00> : vector<8xf32>
      %723 = vector.multi_reduction <add>, %722, %cst_197 [0] : vector<8x8xf32> to vector<8xf32>
      %724 = vector.shape_cast %723 : vector<8xf32> to vector<1x8xf32>
      %cst_198 = arith.constant 1.000000e-30 : f32
      %725 = vector.broadcast %cst_198 : f32 to vector<1x8xf32>
      %726 = arith.maximumf %724, %725 : vector<1x8xf32>
      %727 = vector.broadcast %720 : vector<8x1xf32> to vector<8x8xf32>
      %728 = arith.mulf %158, %727 : vector<8x8xf32>
      %cst_199 = arith.constant dense<0.000000e+00> : vector<8xf32>
      %729 = vector.multi_reduction <add>, %728, %cst_199 [0] : vector<8x8xf32> to vector<8xf32>
      %730 = vector.shape_cast %729 : vector<8xf32> to vector<1x8xf32>
      %cst_200 = arith.constant 1.000000e-30 : f32
      %731 = vector.broadcast %cst_200 : f32 to vector<1x8xf32>
      %732 = arith.maximumf %730, %731 : vector<1x8xf32>
      %733 = tpu.reciprocal %726 {approx = true} : vector<1x8xf32> -> vector<1x8xf32>
      %734 = arith.mulf %7, %733 : vector<1x8xf32>
      %735 = tpu.reciprocal %732 {approx = true} : vector<1x8xf32> -> vector<1x8xf32>
      %736 = arith.mulf %7, %735 : vector<1x8xf32>
      %737 = vector.broadcast %734 : vector<1x8xf32> to vector<8x8xf32>
      %738 = arith.mulf %155, %737 : vector<8x8xf32>
      %cst_201 = arith.constant dense<0.000000e+00> : vector<8xf32>
      %739 = vector.multi_reduction <add>, %738, %cst_201 [1] : vector<8x8xf32> to vector<8xf32>
      %740 = vector.shape_cast %739 : vector<8xf32> to vector<8x1xf32>
      %cst_202 = arith.constant 1.000000e-30 : f32
      %741 = vector.broadcast %cst_202 : f32 to vector<8x1xf32>
      %742 = arith.maximumf %740, %741 : vector<8x1xf32>
      %743 = vector.broadcast %736 : vector<1x8xf32> to vector<8x8xf32>
      %744 = arith.mulf %158, %743 : vector<8x8xf32>
      %cst_203 = arith.constant dense<0.000000e+00> : vector<8xf32>
      %745 = vector.multi_reduction <add>, %744, %cst_203 [1] : vector<8x8xf32> to vector<8xf32>
      %746 = vector.shape_cast %745 : vector<8xf32> to vector<8x1xf32>
      %cst_204 = arith.constant 1.000000e-30 : f32
      %747 = vector.broadcast %cst_204 : f32 to vector<8x1xf32>
      %748 = arith.maximumf %746, %747 : vector<8x1xf32>
      %749 = tpu.reciprocal %742 {approx = true} : vector<8x1xf32> -> vector<8x1xf32>
      %750 = arith.mulf %6, %749 : vector<8x1xf32>
      %751 = tpu.reciprocal %748 {approx = true} : vector<8x1xf32> -> vector<8x1xf32>
      %752 = arith.mulf %6, %751 : vector<8x1xf32>
      %753 = vector.broadcast %750 : vector<8x1xf32> to vector<8x8xf32>
      %754 = arith.mulf %155, %753 : vector<8x8xf32>
      %cst_205 = arith.constant dense<0.000000e+00> : vector<8xf32>
      %755 = vector.multi_reduction <add>, %754, %cst_205 [0] : vector<8x8xf32> to vector<8xf32>
      %756 = vector.shape_cast %755 : vector<8xf32> to vector<1x8xf32>
      %cst_206 = arith.constant 1.000000e-30 : f32
      %757 = vector.broadcast %cst_206 : f32 to vector<1x8xf32>
      %758 = arith.maximumf %756, %757 : vector<1x8xf32>
      %759 = vector.broadcast %752 : vector<8x1xf32> to vector<8x8xf32>
      %760 = arith.mulf %158, %759 : vector<8x8xf32>
      %cst_207 = arith.constant dense<0.000000e+00> : vector<8xf32>
      %761 = vector.multi_reduction <add>, %760, %cst_207 [0] : vector<8x8xf32> to vector<8xf32>
      %762 = vector.shape_cast %761 : vector<8xf32> to vector<1x8xf32>
      %cst_208 = arith.constant 1.000000e-30 : f32
      %763 = vector.broadcast %cst_208 : f32 to vector<1x8xf32>
      %764 = arith.maximumf %762, %763 : vector<1x8xf32>
      %765 = tpu.reciprocal %758 {approx = true} : vector<1x8xf32> -> vector<1x8xf32>
      %766 = arith.mulf %7, %765 : vector<1x8xf32>
      %767 = tpu.reciprocal %764 {approx = true} : vector<1x8xf32> -> vector<1x8xf32>
      %768 = arith.mulf %7, %767 : vector<1x8xf32>
      %769 = vector.broadcast %766 : vector<1x8xf32> to vector<8x8xf32>
      %770 = arith.mulf %155, %769 : vector<8x8xf32>
      %cst_209 = arith.constant dense<0.000000e+00> : vector<8xf32>
      %771 = vector.multi_reduction <add>, %770, %cst_209 [1] : vector<8x8xf32> to vector<8xf32>
      %772 = vector.shape_cast %771 : vector<8xf32> to vector<8x1xf32>
      %cst_210 = arith.constant 1.000000e-30 : f32
      %773 = vector.broadcast %cst_210 : f32 to vector<8x1xf32>
      %774 = arith.maximumf %772, %773 : vector<8x1xf32>
      %775 = vector.broadcast %768 : vector<1x8xf32> to vector<8x8xf32>
      %776 = arith.mulf %158, %775 : vector<8x8xf32>
      %cst_211 = arith.constant dense<0.000000e+00> : vector<8xf32>
      %777 = vector.multi_reduction <add>, %776, %cst_211 [1] : vector<8x8xf32> to vector<8xf32>
      %778 = vector.shape_cast %777 : vector<8xf32> to vector<8x1xf32>
      %cst_212 = arith.constant 1.000000e-30 : f32
      %779 = vector.broadcast %cst_212 : f32 to vector<8x1xf32>
      %780 = arith.maximumf %778, %779 : vector<8x1xf32>
      %781 = tpu.reciprocal %774 {approx = true} : vector<8x1xf32> -> vector<8x1xf32>
      %782 = arith.mulf %6, %781 : vector<8x1xf32>
      %783 = tpu.reciprocal %780 {approx = true} : vector<8x1xf32> -> vector<8x1xf32>
      %784 = arith.mulf %6, %783 : vector<8x1xf32>
      %785 = vector.broadcast %782 : vector<8x1xf32> to vector<8x8xf32>
      %786 = arith.mulf %155, %785 : vector<8x8xf32>
      %cst_213 = arith.constant dense<0.000000e+00> : vector<8xf32>
      %787 = vector.multi_reduction <add>, %786, %cst_213 [0] : vector<8x8xf32> to vector<8xf32>
      %788 = vector.shape_cast %787 : vector<8xf32> to vector<1x8xf32>
      %cst_214 = arith.constant 1.000000e-30 : f32
      %789 = vector.broadcast %cst_214 : f32 to vector<1x8xf32>
      %790 = arith.maximumf %788, %789 : vector<1x8xf32>
      %791 = vector.broadcast %784 : vector<8x1xf32> to vector<8x8xf32>
      %792 = arith.mulf %158, %791 : vector<8x8xf32>
      %cst_215 = arith.constant dense<0.000000e+00> : vector<8xf32>
      %793 = vector.multi_reduction <add>, %792, %cst_215 [0] : vector<8x8xf32> to vector<8xf32>
      %794 = vector.shape_cast %793 : vector<8xf32> to vector<1x8xf32>
      %cst_216 = arith.constant 1.000000e-30 : f32
      %795 = vector.broadcast %cst_216 : f32 to vector<1x8xf32>
      %796 = arith.maximumf %794, %795 : vector<1x8xf32>
      %797 = tpu.reciprocal %790 {approx = true} : vector<1x8xf32> -> vector<1x8xf32>
      %798 = arith.mulf %7, %797 : vector<1x8xf32>
      %799 = tpu.reciprocal %796 {approx = true} : vector<1x8xf32> -> vector<1x8xf32>
      %800 = arith.mulf %7, %799 : vector<1x8xf32>
      %801 = vector.broadcast %798 : vector<1x8xf32> to vector<8x8xf32>
      %802 = arith.mulf %155, %801 : vector<8x8xf32>
      %cst_217 = arith.constant dense<0.000000e+00> : vector<8xf32>
      %803 = vector.multi_reduction <add>, %802, %cst_217 [1] : vector<8x8xf32> to vector<8xf32>
      %804 = vector.shape_cast %803 : vector<8xf32> to vector<8x1xf32>
      %cst_218 = arith.constant 1.000000e-30 : f32
      %805 = vector.broadcast %cst_218 : f32 to vector<8x1xf32>
      %806 = arith.maximumf %804, %805 : vector<8x1xf32>
      %807 = vector.broadcast %800 : vector<1x8xf32> to vector<8x8xf32>
      %808 = arith.mulf %158, %807 : vector<8x8xf32>
      %cst_219 = arith.constant dense<0.000000e+00> : vector<8xf32>
      %809 = vector.multi_reduction <add>, %808, %cst_219 [1] : vector<8x8xf32> to vector<8xf32>
      %810 = vector.shape_cast %809 : vector<8xf32> to vector<8x1xf32>
      %cst_220 = arith.constant 1.000000e-30 : f32
      %811 = vector.broadcast %cst_220 : f32 to vector<8x1xf32>
      %812 = arith.maximumf %810, %811 : vector<8x1xf32>
      %813 = tpu.reciprocal %806 {approx = true} : vector<8x1xf32> -> vector<8x1xf32>
      %814 = arith.mulf %6, %813 : vector<8x1xf32>
      %815 = tpu.reciprocal %812 {approx = true} : vector<8x1xf32> -> vector<8x1xf32>
      %816 = arith.mulf %6, %815 : vector<8x1xf32>
      %817 = vector.broadcast %814 : vector<8x1xf32> to vector<8x8xf32>
      %818 = arith.mulf %155, %817 : vector<8x8xf32>
      %cst_221 = arith.constant dense<0.000000e+00> : vector<8xf32>
      %819 = vector.multi_reduction <add>, %818, %cst_221 [0] : vector<8x8xf32> to vector<8xf32>
      %820 = vector.shape_cast %819 : vector<8xf32> to vector<1x8xf32>
      %cst_222 = arith.constant 1.000000e-30 : f32
      %821 = vector.broadcast %cst_222 : f32 to vector<1x8xf32>
      %822 = arith.maximumf %820, %821 : vector<1x8xf32>
      %823 = vector.broadcast %816 : vector<8x1xf32> to vector<8x8xf32>
      %824 = arith.mulf %158, %823 : vector<8x8xf32>
      %cst_223 = arith.constant dense<0.000000e+00> : vector<8xf32>
      %825 = vector.multi_reduction <add>, %824, %cst_223 [0] : vector<8x8xf32> to vector<8xf32>
      %826 = vector.shape_cast %825 : vector<8xf32> to vector<1x8xf32>
      %cst_224 = arith.constant 1.000000e-30 : f32
      %827 = vector.broadcast %cst_224 : f32 to vector<1x8xf32>
      %828 = arith.maximumf %826, %827 : vector<1x8xf32>
      %829 = tpu.reciprocal %822 {approx = true} : vector<1x8xf32> -> vector<1x8xf32>
      %830 = arith.mulf %7, %829 : vector<1x8xf32>
      %831 = tpu.reciprocal %828 {approx = true} : vector<1x8xf32> -> vector<1x8xf32>
      %832 = arith.mulf %7, %831 : vector<1x8xf32>
      %833 = vector.broadcast %830 : vector<1x8xf32> to vector<8x8xf32>
      %834 = arith.mulf %155, %833 : vector<8x8xf32>
      %cst_225 = arith.constant dense<0.000000e+00> : vector<8xf32>
      %835 = vector.multi_reduction <add>, %834, %cst_225 [1] : vector<8x8xf32> to vector<8xf32>
      %836 = vector.shape_cast %835 : vector<8xf32> to vector<8x1xf32>
      %cst_226 = arith.constant 1.000000e-30 : f32
      %837 = vector.broadcast %cst_226 : f32 to vector<8x1xf32>
      %838 = arith.maximumf %836, %837 : vector<8x1xf32>
      %839 = vector.broadcast %832 : vector<1x8xf32> to vector<8x8xf32>
      %840 = arith.mulf %158, %839 : vector<8x8xf32>
      %cst_227 = arith.constant dense<0.000000e+00> : vector<8xf32>
      %841 = vector.multi_reduction <add>, %840, %cst_227 [1] : vector<8x8xf32> to vector<8xf32>
      %842 = vector.shape_cast %841 : vector<8xf32> to vector<8x1xf32>
      %cst_228 = arith.constant 1.000000e-30 : f32
      %843 = vector.broadcast %cst_228 : f32 to vector<8x1xf32>
      %844 = arith.maximumf %842, %843 : vector<8x1xf32>
      %845 = tpu.reciprocal %838 {approx = true} : vector<8x1xf32> -> vector<8x1xf32>
      %846 = arith.mulf %6, %845 : vector<8x1xf32>
      %847 = tpu.reciprocal %844 {approx = true} : vector<8x1xf32> -> vector<8x1xf32>
      %848 = arith.mulf %6, %847 : vector<8x1xf32>
      %849 = vector.broadcast %846 : vector<8x1xf32> to vector<8x8xf32>
      %850 = arith.mulf %155, %849 : vector<8x8xf32>
      %cst_229 = arith.constant dense<0.000000e+00> : vector<8xf32>
      %851 = vector.multi_reduction <add>, %850, %cst_229 [0] : vector<8x8xf32> to vector<8xf32>
      %852 = vector.shape_cast %851 : vector<8xf32> to vector<1x8xf32>
      %cst_230 = arith.constant 1.000000e-30 : f32
      %853 = vector.broadcast %cst_230 : f32 to vector<1x8xf32>
      %854 = arith.maximumf %852, %853 : vector<1x8xf32>
      %855 = vector.broadcast %848 : vector<8x1xf32> to vector<8x8xf32>
      %856 = arith.mulf %158, %855 : vector<8x8xf32>
      %cst_231 = arith.constant dense<0.000000e+00> : vector<8xf32>
      %857 = vector.multi_reduction <add>, %856, %cst_231 [0] : vector<8x8xf32> to vector<8xf32>
      %858 = vector.shape_cast %857 : vector<8xf32> to vector<1x8xf32>
      %cst_232 = arith.constant 1.000000e-30 : f32
      %859 = vector.broadcast %cst_232 : f32 to vector<1x8xf32>
      %860 = arith.maximumf %858, %859 : vector<1x8xf32>
      %861 = tpu.reciprocal %854 {approx = true} : vector<1x8xf32> -> vector<1x8xf32>
      %862 = arith.mulf %7, %861 : vector<1x8xf32>
      %863 = tpu.reciprocal %860 {approx = true} : vector<1x8xf32> -> vector<1x8xf32>
      %864 = arith.mulf %7, %863 : vector<1x8xf32>
      %865 = vector.broadcast %862 : vector<1x8xf32> to vector<8x8xf32>
      %866 = arith.mulf %155, %865 : vector<8x8xf32>
      %cst_233 = arith.constant dense<0.000000e+00> : vector<8xf32>
      %867 = vector.multi_reduction <add>, %866, %cst_233 [1] : vector<8x8xf32> to vector<8xf32>
      %868 = vector.shape_cast %867 : vector<8xf32> to vector<8x1xf32>
      %cst_234 = arith.constant 1.000000e-30 : f32
      %869 = vector.broadcast %cst_234 : f32 to vector<8x1xf32>
      %870 = arith.maximumf %868, %869 : vector<8x1xf32>
      %871 = vector.broadcast %864 : vector<1x8xf32> to vector<8x8xf32>
      %872 = arith.mulf %158, %871 : vector<8x8xf32>
      %cst_235 = arith.constant dense<0.000000e+00> : vector<8xf32>
      %873 = vector.multi_reduction <add>, %872, %cst_235 [1] : vector<8x8xf32> to vector<8xf32>
      %874 = vector.shape_cast %873 : vector<8xf32> to vector<8x1xf32>
      %cst_236 = arith.constant 1.000000e-30 : f32
      %875 = vector.broadcast %cst_236 : f32 to vector<8x1xf32>
      %876 = arith.maximumf %874, %875 : vector<8x1xf32>
      %877 = tpu.reciprocal %870 {approx = true} : vector<8x1xf32> -> vector<8x1xf32>
      %878 = arith.mulf %6, %877 : vector<8x1xf32>
      %879 = tpu.reciprocal %876 {approx = true} : vector<8x1xf32> -> vector<8x1xf32>
      %880 = arith.mulf %6, %879 : vector<8x1xf32>
      %881 = vector.broadcast %878 : vector<8x1xf32> to vector<8x8xf32>
      %882 = arith.mulf %155, %881 : vector<8x8xf32>
      %cst_237 = arith.constant dense<0.000000e+00> : vector<8xf32>
      %883 = vector.multi_reduction <add>, %882, %cst_237 [0] : vector<8x8xf32> to vector<8xf32>
      %884 = vector.shape_cast %883 : vector<8xf32> to vector<1x8xf32>
      %cst_238 = arith.constant 1.000000e-30 : f32
      %885 = vector.broadcast %cst_238 : f32 to vector<1x8xf32>
      %886 = arith.maximumf %884, %885 : vector<1x8xf32>
      %887 = vector.broadcast %880 : vector<8x1xf32> to vector<8x8xf32>
      %888 = arith.mulf %158, %887 : vector<8x8xf32>
      %cst_239 = arith.constant dense<0.000000e+00> : vector<8xf32>
      %889 = vector.multi_reduction <add>, %888, %cst_239 [0] : vector<8x8xf32> to vector<8xf32>
      %890 = vector.shape_cast %889 : vector<8xf32> to vector<1x8xf32>
      %cst_240 = arith.constant 1.000000e-30 : f32
      %891 = vector.broadcast %cst_240 : f32 to vector<1x8xf32>
      %892 = arith.maximumf %890, %891 : vector<1x8xf32>
      %893 = tpu.reciprocal %886 {approx = true} : vector<1x8xf32> -> vector<1x8xf32>
      %894 = arith.mulf %7, %893 : vector<1x8xf32>
      %895 = tpu.reciprocal %892 {approx = true} : vector<1x8xf32> -> vector<1x8xf32>
      %896 = arith.mulf %7, %895 : vector<1x8xf32>
      %897 = vector.broadcast %894 : vector<1x8xf32> to vector<8x8xf32>
      %898 = arith.mulf %155, %897 : vector<8x8xf32>
      %cst_241 = arith.constant dense<0.000000e+00> : vector<8xf32>
      %899 = vector.multi_reduction <add>, %898, %cst_241 [1] : vector<8x8xf32> to vector<8xf32>
      %900 = vector.shape_cast %899 : vector<8xf32> to vector<8x1xf32>
      %cst_242 = arith.constant 1.000000e-30 : f32
      %901 = vector.broadcast %cst_242 : f32 to vector<8x1xf32>
      %902 = arith.maximumf %900, %901 : vector<8x1xf32>
      %903 = vector.broadcast %896 : vector<1x8xf32> to vector<8x8xf32>
      %904 = arith.mulf %158, %903 : vector<8x8xf32>
      %cst_243 = arith.constant dense<0.000000e+00> : vector<8xf32>
      %905 = vector.multi_reduction <add>, %904, %cst_243 [1] : vector<8x8xf32> to vector<8xf32>
      %906 = vector.shape_cast %905 : vector<8xf32> to vector<8x1xf32>
      %cst_244 = arith.constant 1.000000e-30 : f32
      %907 = vector.broadcast %cst_244 : f32 to vector<8x1xf32>
      %908 = arith.maximumf %906, %907 : vector<8x1xf32>
      %909 = tpu.reciprocal %902 {approx = true} : vector<8x1xf32> -> vector<8x1xf32>
      %910 = arith.mulf %6, %909 : vector<8x1xf32>
      %911 = tpu.reciprocal %908 {approx = true} : vector<8x1xf32> -> vector<8x1xf32>
      %912 = arith.mulf %6, %911 : vector<8x1xf32>
      %913 = vector.broadcast %910 : vector<8x1xf32> to vector<8x8xf32>
      %914 = arith.mulf %155, %913 : vector<8x8xf32>
      %cst_245 = arith.constant dense<0.000000e+00> : vector<8xf32>
      %915 = vector.multi_reduction <add>, %914, %cst_245 [0] : vector<8x8xf32> to vector<8xf32>
      %916 = vector.shape_cast %915 : vector<8xf32> to vector<1x8xf32>
      %cst_246 = arith.constant 1.000000e-30 : f32
      %917 = vector.broadcast %cst_246 : f32 to vector<1x8xf32>
      %918 = arith.maximumf %916, %917 : vector<1x8xf32>
      %919 = vector.broadcast %912 : vector<8x1xf32> to vector<8x8xf32>
      %920 = arith.mulf %158, %919 : vector<8x8xf32>
      %cst_247 = arith.constant dense<0.000000e+00> : vector<8xf32>
      %921 = vector.multi_reduction <add>, %920, %cst_247 [0] : vector<8x8xf32> to vector<8xf32>
      %922 = vector.shape_cast %921 : vector<8xf32> to vector<1x8xf32>
      %cst_248 = arith.constant 1.000000e-30 : f32
      %923 = vector.broadcast %cst_248 : f32 to vector<1x8xf32>
      %924 = arith.maximumf %922, %923 : vector<1x8xf32>
      %925 = tpu.reciprocal %918 {approx = true} : vector<1x8xf32> -> vector<1x8xf32>
      %926 = arith.mulf %7, %925 : vector<1x8xf32>
      %927 = tpu.reciprocal %924 {approx = true} : vector<1x8xf32> -> vector<1x8xf32>
      %928 = arith.mulf %7, %927 : vector<1x8xf32>
      %929 = vector.broadcast %926 : vector<1x8xf32> to vector<8x8xf32>
      %930 = arith.mulf %155, %929 : vector<8x8xf32>
      %cst_249 = arith.constant dense<0.000000e+00> : vector<8xf32>
      %931 = vector.multi_reduction <add>, %930, %cst_249 [1] : vector<8x8xf32> to vector<8xf32>
      %932 = vector.shape_cast %931 : vector<8xf32> to vector<8x1xf32>
      %cst_250 = arith.constant 1.000000e-30 : f32
      %933 = vector.broadcast %cst_250 : f32 to vector<8x1xf32>
      %934 = arith.maximumf %932, %933 : vector<8x1xf32>
      %935 = vector.broadcast %928 : vector<1x8xf32> to vector<8x8xf32>
      %936 = arith.mulf %158, %935 : vector<8x8xf32>
      %cst_251 = arith.constant dense<0.000000e+00> : vector<8xf32>
      %937 = vector.multi_reduction <add>, %936, %cst_251 [1] : vector<8x8xf32> to vector<8xf32>
      %938 = vector.shape_cast %937 : vector<8xf32> to vector<8x1xf32>
      %cst_252 = arith.constant 1.000000e-30 : f32
      %939 = vector.broadcast %cst_252 : f32 to vector<8x1xf32>
      %940 = arith.maximumf %938, %939 : vector<8x1xf32>
      %941 = tpu.reciprocal %934 {approx = true} : vector<8x1xf32> -> vector<8x1xf32>
      %942 = arith.mulf %6, %941 : vector<8x1xf32>
      %943 = tpu.reciprocal %940 {approx = true} : vector<8x1xf32> -> vector<8x1xf32>
      %944 = arith.mulf %6, %943 : vector<8x1xf32>
      %945 = vector.broadcast %942 : vector<8x1xf32> to vector<8x8xf32>
      %946 = arith.mulf %155, %945 : vector<8x8xf32>
      %cst_253 = arith.constant dense<0.000000e+00> : vector<8xf32>
      %947 = vector.multi_reduction <add>, %946, %cst_253 [0] : vector<8x8xf32> to vector<8xf32>
      %948 = vector.shape_cast %947 : vector<8xf32> to vector<1x8xf32>
      %cst_254 = arith.constant 1.000000e-30 : f32
      %949 = vector.broadcast %cst_254 : f32 to vector<1x8xf32>
      %950 = arith.maximumf %948, %949 : vector<1x8xf32>
      %951 = vector.broadcast %944 : vector<8x1xf32> to vector<8x8xf32>
      %952 = arith.mulf %158, %951 : vector<8x8xf32>
      %cst_255 = arith.constant dense<0.000000e+00> : vector<8xf32>
      %953 = vector.multi_reduction <add>, %952, %cst_255 [0] : vector<8x8xf32> to vector<8xf32>
      %954 = vector.shape_cast %953 : vector<8xf32> to vector<1x8xf32>
      %cst_256 = arith.constant 1.000000e-30 : f32
      %955 = vector.broadcast %cst_256 : f32 to vector<1x8xf32>
      %956 = arith.maximumf %954, %955 : vector<1x8xf32>
      %957 = tpu.reciprocal %950 {approx = true} : vector<1x8xf32> -> vector<1x8xf32>
      %958 = arith.mulf %7, %957 : vector<1x8xf32>
      %959 = tpu.reciprocal %956 {approx = true} : vector<1x8xf32> -> vector<1x8xf32>
      %960 = arith.mulf %7, %959 : vector<1x8xf32>
      %961 = vector.broadcast %958 : vector<1x8xf32> to vector<8x8xf32>
      %962 = arith.mulf %155, %961 : vector<8x8xf32>
      %cst_257 = arith.constant dense<0.000000e+00> : vector<8xf32>
      %963 = vector.multi_reduction <add>, %962, %cst_257 [1] : vector<8x8xf32> to vector<8xf32>
      %964 = vector.shape_cast %963 : vector<8xf32> to vector<8x1xf32>
      %cst_258 = arith.constant 1.000000e-30 : f32
      %965 = vector.broadcast %cst_258 : f32 to vector<8x1xf32>
      %966 = arith.maximumf %964, %965 : vector<8x1xf32>
      %967 = vector.broadcast %960 : vector<1x8xf32> to vector<8x8xf32>
      %968 = arith.mulf %158, %967 : vector<8x8xf32>
      %cst_259 = arith.constant dense<0.000000e+00> : vector<8xf32>
      %969 = vector.multi_reduction <add>, %968, %cst_259 [1] : vector<8x8xf32> to vector<8xf32>
      %970 = vector.shape_cast %969 : vector<8xf32> to vector<8x1xf32>
      %cst_260 = arith.constant 1.000000e-30 : f32
      %971 = vector.broadcast %cst_260 : f32 to vector<8x1xf32>
      %972 = arith.maximumf %970, %971 : vector<8x1xf32>
      %973 = tpu.reciprocal %966 {approx = true} : vector<8x1xf32> -> vector<8x1xf32>
      %974 = arith.mulf %6, %973 : vector<8x1xf32>
      %975 = tpu.reciprocal %972 {approx = true} : vector<8x1xf32> -> vector<8x1xf32>
      %976 = arith.mulf %6, %975 : vector<8x1xf32>
      %977 = vector.broadcast %974 : vector<8x1xf32> to vector<8x8xf32>
      %978 = arith.mulf %155, %977 : vector<8x8xf32>
      %cst_261 = arith.constant dense<0.000000e+00> : vector<8xf32>
      %979 = vector.multi_reduction <add>, %978, %cst_261 [0] : vector<8x8xf32> to vector<8xf32>
      %980 = vector.shape_cast %979 : vector<8xf32> to vector<1x8xf32>
      %cst_262 = arith.constant 1.000000e-30 : f32
      %981 = vector.broadcast %cst_262 : f32 to vector<1x8xf32>
      %982 = arith.maximumf %980, %981 : vector<1x8xf32>
      %983 = vector.broadcast %976 : vector<8x1xf32> to vector<8x8xf32>
      %984 = arith.mulf %158, %983 : vector<8x8xf32>
      %cst_263 = arith.constant dense<0.000000e+00> : vector<8xf32>
      %985 = vector.multi_reduction <add>, %984, %cst_263 [0] : vector<8x8xf32> to vector<8xf32>
      %986 = vector.shape_cast %985 : vector<8xf32> to vector<1x8xf32>
      %cst_264 = arith.constant 1.000000e-30 : f32
      %987 = vector.broadcast %cst_264 : f32 to vector<1x8xf32>
      %988 = arith.maximumf %986, %987 : vector<1x8xf32>
      %989 = tpu.reciprocal %982 {approx = true} : vector<1x8xf32> -> vector<1x8xf32>
      %990 = arith.mulf %7, %989 : vector<1x8xf32>
      %991 = tpu.reciprocal %988 {approx = true} : vector<1x8xf32> -> vector<1x8xf32>
      %992 = arith.mulf %7, %991 : vector<1x8xf32>
      %993 = vector.broadcast %990 : vector<1x8xf32> to vector<8x8xf32>
      %994 = arith.mulf %155, %993 : vector<8x8xf32>
      %cst_265 = arith.constant dense<0.000000e+00> : vector<8xf32>
      %995 = vector.multi_reduction <add>, %994, %cst_265 [1] : vector<8x8xf32> to vector<8xf32>
      %996 = vector.shape_cast %995 : vector<8xf32> to vector<8x1xf32>
      %cst_266 = arith.constant 1.000000e-30 : f32
      %997 = vector.broadcast %cst_266 : f32 to vector<8x1xf32>
      %998 = arith.maximumf %996, %997 : vector<8x1xf32>
      %999 = vector.broadcast %992 : vector<1x8xf32> to vector<8x8xf32>
      %1000 = arith.mulf %158, %999 : vector<8x8xf32>
      %cst_267 = arith.constant dense<0.000000e+00> : vector<8xf32>
      %1001 = vector.multi_reduction <add>, %1000, %cst_267 [1] : vector<8x8xf32> to vector<8xf32>
      %1002 = vector.shape_cast %1001 : vector<8xf32> to vector<8x1xf32>
      %cst_268 = arith.constant 1.000000e-30 : f32
      %1003 = vector.broadcast %cst_268 : f32 to vector<8x1xf32>
      %1004 = arith.maximumf %1002, %1003 : vector<8x1xf32>
      %1005 = tpu.reciprocal %998 {approx = true} : vector<8x1xf32> -> vector<8x1xf32>
      %1006 = arith.mulf %6, %1005 : vector<8x1xf32>
      %1007 = tpu.reciprocal %1004 {approx = true} : vector<8x1xf32> -> vector<8x1xf32>
      %1008 = arith.mulf %6, %1007 : vector<8x1xf32>
      %1009 = vector.broadcast %1006 : vector<8x1xf32> to vector<8x8xf32>
      %1010 = arith.mulf %155, %1009 : vector<8x8xf32>
      %cst_269 = arith.constant dense<0.000000e+00> : vector<8xf32>
      %1011 = vector.multi_reduction <add>, %1010, %cst_269 [0] : vector<8x8xf32> to vector<8xf32>
      %1012 = vector.shape_cast %1011 : vector<8xf32> to vector<1x8xf32>
      %cst_270 = arith.constant 1.000000e-30 : f32
      %1013 = vector.broadcast %cst_270 : f32 to vector<1x8xf32>
      %1014 = arith.maximumf %1012, %1013 : vector<1x8xf32>
      %1015 = vector.broadcast %1008 : vector<8x1xf32> to vector<8x8xf32>
      %1016 = arith.mulf %158, %1015 : vector<8x8xf32>
      %cst_271 = arith.constant dense<0.000000e+00> : vector<8xf32>
      %1017 = vector.multi_reduction <add>, %1016, %cst_271 [0] : vector<8x8xf32> to vector<8xf32>
      %1018 = vector.shape_cast %1017 : vector<8xf32> to vector<1x8xf32>
      %cst_272 = arith.constant 1.000000e-30 : f32
      %1019 = vector.broadcast %cst_272 : f32 to vector<1x8xf32>
      %1020 = arith.maximumf %1018, %1019 : vector<1x8xf32>
      %1021 = tpu.reciprocal %1014 {approx = true} : vector<1x8xf32> -> vector<1x8xf32>
      %1022 = arith.mulf %7, %1021 : vector<1x8xf32>
      %1023 = tpu.reciprocal %1020 {approx = true} : vector<1x8xf32> -> vector<1x8xf32>
      %1024 = arith.mulf %7, %1023 : vector<1x8xf32>
      %1025 = vector.broadcast %1022 : vector<1x8xf32> to vector<8x8xf32>
      %1026 = arith.mulf %155, %1025 : vector<8x8xf32>
      %cst_273 = arith.constant dense<0.000000e+00> : vector<8xf32>
      %1027 = vector.multi_reduction <add>, %1026, %cst_273 [1] : vector<8x8xf32> to vector<8xf32>
      %1028 = vector.shape_cast %1027 : vector<8xf32> to vector<8x1xf32>
      %cst_274 = arith.constant 1.000000e-30 : f32
      %1029 = vector.broadcast %cst_274 : f32 to vector<8x1xf32>
      %1030 = arith.maximumf %1028, %1029 : vector<8x1xf32>
      %1031 = vector.broadcast %1024 : vector<1x8xf32> to vector<8x8xf32>
      %1032 = arith.mulf %158, %1031 : vector<8x8xf32>
      %cst_275 = arith.constant dense<0.000000e+00> : vector<8xf32>
      %1033 = vector.multi_reduction <add>, %1032, %cst_275 [1] : vector<8x8xf32> to vector<8xf32>
      %1034 = vector.shape_cast %1033 : vector<8xf32> to vector<8x1xf32>
      %cst_276 = arith.constant 1.000000e-30 : f32
      %1035 = vector.broadcast %cst_276 : f32 to vector<8x1xf32>
      %1036 = arith.maximumf %1034, %1035 : vector<8x1xf32>
      %1037 = tpu.reciprocal %1030 {approx = true} : vector<8x1xf32> -> vector<8x1xf32>
      %1038 = arith.mulf %6, %1037 : vector<8x1xf32>
      %1039 = tpu.reciprocal %1036 {approx = true} : vector<8x1xf32> -> vector<8x1xf32>
      %1040 = arith.mulf %6, %1039 : vector<8x1xf32>
      %1041 = vector.broadcast %1038 : vector<8x1xf32> to vector<8x8xf32>
      %1042 = arith.mulf %155, %1041 : vector<8x8xf32>
      %cst_277 = arith.constant dense<0.000000e+00> : vector<8xf32>
      %1043 = vector.multi_reduction <add>, %1042, %cst_277 [0] : vector<8x8xf32> to vector<8xf32>
      %1044 = vector.shape_cast %1043 : vector<8xf32> to vector<1x8xf32>
      %cst_278 = arith.constant 1.000000e-30 : f32
      %1045 = vector.broadcast %cst_278 : f32 to vector<1x8xf32>
      %1046 = arith.maximumf %1044, %1045 : vector<1x8xf32>
      %1047 = vector.broadcast %1040 : vector<8x1xf32> to vector<8x8xf32>
      %1048 = arith.mulf %158, %1047 : vector<8x8xf32>
      %cst_279 = arith.constant dense<0.000000e+00> : vector<8xf32>
      %1049 = vector.multi_reduction <add>, %1048, %cst_279 [0] : vector<8x8xf32> to vector<8xf32>
      %1050 = vector.shape_cast %1049 : vector<8xf32> to vector<1x8xf32>
      %cst_280 = arith.constant 1.000000e-30 : f32
      %1051 = vector.broadcast %cst_280 : f32 to vector<1x8xf32>
      %1052 = arith.maximumf %1050, %1051 : vector<1x8xf32>
      %1053 = tpu.reciprocal %1046 {approx = true} : vector<1x8xf32> -> vector<1x8xf32>
      %1054 = arith.mulf %7, %1053 : vector<1x8xf32>
      %1055 = tpu.reciprocal %1052 {approx = true} : vector<1x8xf32> -> vector<1x8xf32>
      %1056 = arith.mulf %7, %1055 : vector<1x8xf32>
      %1057 = vector.broadcast %1054 : vector<1x8xf32> to vector<8x8xf32>
      %1058 = arith.mulf %155, %1057 : vector<8x8xf32>
      %cst_281 = arith.constant dense<0.000000e+00> : vector<8xf32>
      %1059 = vector.multi_reduction <add>, %1058, %cst_281 [1] : vector<8x8xf32> to vector<8xf32>
      %1060 = vector.shape_cast %1059 : vector<8xf32> to vector<8x1xf32>
      %cst_282 = arith.constant 1.000000e-30 : f32
      %1061 = vector.broadcast %cst_282 : f32 to vector<8x1xf32>
      %1062 = arith.maximumf %1060, %1061 : vector<8x1xf32>
      %1063 = vector.broadcast %1056 : vector<1x8xf32> to vector<8x8xf32>
      %1064 = arith.mulf %158, %1063 : vector<8x8xf32>
      %cst_283 = arith.constant dense<0.000000e+00> : vector<8xf32>
      %1065 = vector.multi_reduction <add>, %1064, %cst_283 [1] : vector<8x8xf32> to vector<8xf32>
      %1066 = vector.shape_cast %1065 : vector<8xf32> to vector<8x1xf32>
      %cst_284 = arith.constant 1.000000e-30 : f32
      %1067 = vector.broadcast %cst_284 : f32 to vector<8x1xf32>
      %1068 = arith.maximumf %1066, %1067 : vector<8x1xf32>
      %1069 = tpu.reciprocal %1062 {approx = true} : vector<8x1xf32> -> vector<8x1xf32>
      %1070 = arith.mulf %6, %1069 : vector<8x1xf32>
      %1071 = tpu.reciprocal %1068 {approx = true} : vector<8x1xf32> -> vector<8x1xf32>
      %1072 = arith.mulf %6, %1071 : vector<8x1xf32>
      %1073 = vector.broadcast %1070 : vector<8x1xf32> to vector<8x8xf32>
      %1074 = arith.mulf %155, %1073 : vector<8x8xf32>
      %cst_285 = arith.constant dense<0.000000e+00> : vector<8xf32>
      %1075 = vector.multi_reduction <add>, %1074, %cst_285 [0] : vector<8x8xf32> to vector<8xf32>
      %1076 = vector.shape_cast %1075 : vector<8xf32> to vector<1x8xf32>
      %cst_286 = arith.constant 1.000000e-30 : f32
      %1077 = vector.broadcast %cst_286 : f32 to vector<1x8xf32>
      %1078 = arith.maximumf %1076, %1077 : vector<1x8xf32>
      %1079 = vector.broadcast %1072 : vector<8x1xf32> to vector<8x8xf32>
      %1080 = arith.mulf %158, %1079 : vector<8x8xf32>
      %cst_287 = arith.constant dense<0.000000e+00> : vector<8xf32>
      %1081 = vector.multi_reduction <add>, %1080, %cst_287 [0] : vector<8x8xf32> to vector<8xf32>
      %1082 = vector.shape_cast %1081 : vector<8xf32> to vector<1x8xf32>
      %cst_288 = arith.constant 1.000000e-30 : f32
      %1083 = vector.broadcast %cst_288 : f32 to vector<1x8xf32>
      %1084 = arith.maximumf %1082, %1083 : vector<1x8xf32>
      %1085 = tpu.reciprocal %1078 {approx = true} : vector<1x8xf32> -> vector<1x8xf32>
      %1086 = arith.mulf %7, %1085 : vector<1x8xf32>
      %1087 = tpu.reciprocal %1084 {approx = true} : vector<1x8xf32> -> vector<1x8xf32>
      %1088 = arith.mulf %7, %1087 : vector<1x8xf32>
      %1089 = vector.broadcast %1086 : vector<1x8xf32> to vector<8x8xf32>
      %1090 = arith.mulf %155, %1089 : vector<8x8xf32>
      %cst_289 = arith.constant dense<0.000000e+00> : vector<8xf32>
      %1091 = vector.multi_reduction <add>, %1090, %cst_289 [1] : vector<8x8xf32> to vector<8xf32>
      %1092 = vector.shape_cast %1091 : vector<8xf32> to vector<8x1xf32>
      %cst_290 = arith.constant 1.000000e-30 : f32
      %1093 = vector.broadcast %cst_290 : f32 to vector<8x1xf32>
      %1094 = arith.maximumf %1092, %1093 : vector<8x1xf32>
      %1095 = vector.broadcast %1088 : vector<1x8xf32> to vector<8x8xf32>
      %1096 = arith.mulf %158, %1095 : vector<8x8xf32>
      %cst_291 = arith.constant dense<0.000000e+00> : vector<8xf32>
      %1097 = vector.multi_reduction <add>, %1096, %cst_291 [1] : vector<8x8xf32> to vector<8xf32>
      %1098 = vector.shape_cast %1097 : vector<8xf32> to vector<8x1xf32>
      %cst_292 = arith.constant 1.000000e-30 : f32
      %1099 = vector.broadcast %cst_292 : f32 to vector<8x1xf32>
      %1100 = arith.maximumf %1098, %1099 : vector<8x1xf32>
      %1101 = tpu.reciprocal %1094 {approx = true} : vector<8x1xf32> -> vector<8x1xf32>
      %1102 = arith.mulf %6, %1101 : vector<8x1xf32>
      %1103 = tpu.reciprocal %1100 {approx = true} : vector<8x1xf32> -> vector<8x1xf32>
      %1104 = arith.mulf %6, %1103 : vector<8x1xf32>
      %1105 = vector.broadcast %1102 : vector<8x1xf32> to vector<8x8xf32>
      %1106 = arith.mulf %155, %1105 : vector<8x8xf32>
      %cst_293 = arith.constant dense<0.000000e+00> : vector<8xf32>
      %1107 = vector.multi_reduction <add>, %1106, %cst_293 [0] : vector<8x8xf32> to vector<8xf32>
      %1108 = vector.shape_cast %1107 : vector<8xf32> to vector<1x8xf32>
      %cst_294 = arith.constant 1.000000e-30 : f32
      %1109 = vector.broadcast %cst_294 : f32 to vector<1x8xf32>
      %1110 = arith.maximumf %1108, %1109 : vector<1x8xf32>
      %1111 = vector.broadcast %1104 : vector<8x1xf32> to vector<8x8xf32>
      %1112 = arith.mulf %158, %1111 : vector<8x8xf32>
      %cst_295 = arith.constant dense<0.000000e+00> : vector<8xf32>
      %1113 = vector.multi_reduction <add>, %1112, %cst_295 [0] : vector<8x8xf32> to vector<8xf32>
      %1114 = vector.shape_cast %1113 : vector<8xf32> to vector<1x8xf32>
      %cst_296 = arith.constant 1.000000e-30 : f32
      %1115 = vector.broadcast %cst_296 : f32 to vector<1x8xf32>
      %1116 = arith.maximumf %1114, %1115 : vector<1x8xf32>
      %1117 = tpu.reciprocal %1110 {approx = true} : vector<1x8xf32> -> vector<1x8xf32>
      %1118 = arith.mulf %7, %1117 : vector<1x8xf32>
      %1119 = tpu.reciprocal %1116 {approx = true} : vector<1x8xf32> -> vector<1x8xf32>
      %1120 = arith.mulf %7, %1119 : vector<1x8xf32>
      %1121 = vector.broadcast %1118 : vector<1x8xf32> to vector<8x8xf32>
      %1122 = arith.mulf %155, %1121 : vector<8x8xf32>
      %cst_297 = arith.constant dense<0.000000e+00> : vector<8xf32>
      %1123 = vector.multi_reduction <add>, %1122, %cst_297 [1] : vector<8x8xf32> to vector<8xf32>
      %1124 = vector.shape_cast %1123 : vector<8xf32> to vector<8x1xf32>
      %cst_298 = arith.constant 1.000000e-30 : f32
      %1125 = vector.broadcast %cst_298 : f32 to vector<8x1xf32>
      %1126 = arith.maximumf %1124, %1125 : vector<8x1xf32>
      %1127 = vector.broadcast %1120 : vector<1x8xf32> to vector<8x8xf32>
      %1128 = arith.mulf %158, %1127 : vector<8x8xf32>
      %cst_299 = arith.constant dense<0.000000e+00> : vector<8xf32>
      %1129 = vector.multi_reduction <add>, %1128, %cst_299 [1] : vector<8x8xf32> to vector<8xf32>
      %1130 = vector.shape_cast %1129 : vector<8xf32> to vector<8x1xf32>
      %cst_300 = arith.constant 1.000000e-30 : f32
      %1131 = vector.broadcast %cst_300 : f32 to vector<8x1xf32>
      %1132 = arith.maximumf %1130, %1131 : vector<8x1xf32>
      %1133 = tpu.reciprocal %1126 {approx = true} : vector<8x1xf32> -> vector<8x1xf32>
      %1134 = arith.mulf %6, %1133 : vector<8x1xf32>
      %1135 = tpu.reciprocal %1132 {approx = true} : vector<8x1xf32> -> vector<8x1xf32>
      %1136 = arith.mulf %6, %1135 : vector<8x1xf32>
      %1137 = vector.broadcast %1134 : vector<8x1xf32> to vector<8x8xf32>
      %1138 = arith.mulf %155, %1137 : vector<8x8xf32>
      %cst_301 = arith.constant dense<0.000000e+00> : vector<8xf32>
      %1139 = vector.multi_reduction <add>, %1138, %cst_301 [0] : vector<8x8xf32> to vector<8xf32>
      %1140 = vector.shape_cast %1139 : vector<8xf32> to vector<1x8xf32>
      %cst_302 = arith.constant 1.000000e-30 : f32
      %1141 = vector.broadcast %cst_302 : f32 to vector<1x8xf32>
      %1142 = arith.maximumf %1140, %1141 : vector<1x8xf32>
      %1143 = vector.broadcast %1136 : vector<8x1xf32> to vector<8x8xf32>
      %1144 = arith.mulf %158, %1143 : vector<8x8xf32>
      %cst_303 = arith.constant dense<0.000000e+00> : vector<8xf32>
      %1145 = vector.multi_reduction <add>, %1144, %cst_303 [0] : vector<8x8xf32> to vector<8xf32>
      %1146 = vector.shape_cast %1145 : vector<8xf32> to vector<1x8xf32>
      %cst_304 = arith.constant 1.000000e-30 : f32
      %1147 = vector.broadcast %cst_304 : f32 to vector<1x8xf32>
      %1148 = arith.maximumf %1146, %1147 : vector<1x8xf32>
      %1149 = tpu.reciprocal %1142 {approx = true} : vector<1x8xf32> -> vector<1x8xf32>
      %1150 = arith.mulf %7, %1149 : vector<1x8xf32>
      %1151 = tpu.reciprocal %1148 {approx = true} : vector<1x8xf32> -> vector<1x8xf32>
      %1152 = arith.mulf %7, %1151 : vector<1x8xf32>
      %1153 = vector.broadcast %1150 : vector<1x8xf32> to vector<8x8xf32>
      %1154 = arith.mulf %155, %1153 : vector<8x8xf32>
      %cst_305 = arith.constant dense<0.000000e+00> : vector<8xf32>
      %1155 = vector.multi_reduction <add>, %1154, %cst_305 [1] : vector<8x8xf32> to vector<8xf32>
      %1156 = vector.shape_cast %1155 : vector<8xf32> to vector<8x1xf32>
      %cst_306 = arith.constant 1.000000e-30 : f32
      %1157 = vector.broadcast %cst_306 : f32 to vector<8x1xf32>
      %1158 = arith.maximumf %1156, %1157 : vector<8x1xf32>
      %1159 = vector.broadcast %1152 : vector<1x8xf32> to vector<8x8xf32>
      %1160 = arith.mulf %158, %1159 : vector<8x8xf32>
      %cst_307 = arith.constant dense<0.000000e+00> : vector<8xf32>
      %1161 = vector.multi_reduction <add>, %1160, %cst_307 [1] : vector<8x8xf32> to vector<8xf32>
      %1162 = vector.shape_cast %1161 : vector<8xf32> to vector<8x1xf32>
      %cst_308 = arith.constant 1.000000e-30 : f32
      %1163 = vector.broadcast %cst_308 : f32 to vector<8x1xf32>
      %1164 = arith.maximumf %1162, %1163 : vector<8x1xf32>
      %1165 = tpu.reciprocal %1158 {approx = true} : vector<8x1xf32> -> vector<8x1xf32>
      %1166 = arith.mulf %6, %1165 : vector<8x1xf32>
      %1167 = tpu.reciprocal %1164 {approx = true} : vector<8x1xf32> -> vector<8x1xf32>
      %1168 = arith.mulf %6, %1167 : vector<8x1xf32>
      %1169 = vector.broadcast %1166 : vector<8x1xf32> to vector<8x8xf32>
      %1170 = arith.mulf %155, %1169 : vector<8x8xf32>
      %cst_309 = arith.constant dense<0.000000e+00> : vector<8xf32>
      %1171 = vector.multi_reduction <add>, %1170, %cst_309 [0] : vector<8x8xf32> to vector<8xf32>
      %1172 = vector.shape_cast %1171 : vector<8xf32> to vector<1x8xf32>
      %cst_310 = arith.constant 1.000000e-30 : f32
      %1173 = vector.broadcast %cst_310 : f32 to vector<1x8xf32>
      %1174 = arith.maximumf %1172, %1173 : vector<1x8xf32>
      %1175 = vector.broadcast %1168 : vector<8x1xf32> to vector<8x8xf32>
      %1176 = arith.mulf %158, %1175 : vector<8x8xf32>
      %cst_311 = arith.constant dense<0.000000e+00> : vector<8xf32>
      %1177 = vector.multi_reduction <add>, %1176, %cst_311 [0] : vector<8x8xf32> to vector<8xf32>
      %1178 = vector.shape_cast %1177 : vector<8xf32> to vector<1x8xf32>
      %cst_312 = arith.constant 1.000000e-30 : f32
      %1179 = vector.broadcast %cst_312 : f32 to vector<1x8xf32>
      %1180 = arith.maximumf %1178, %1179 : vector<1x8xf32>
      %1181 = tpu.reciprocal %1174 {approx = true} : vector<1x8xf32> -> vector<1x8xf32>
      %1182 = arith.mulf %7, %1181 : vector<1x8xf32>
      %1183 = tpu.reciprocal %1180 {approx = true} : vector<1x8xf32> -> vector<1x8xf32>
      %1184 = arith.mulf %7, %1183 : vector<1x8xf32>
      %1185 = vector.broadcast %1182 : vector<1x8xf32> to vector<8x8xf32>
      %1186 = arith.mulf %155, %1185 : vector<8x8xf32>
      %cst_313 = arith.constant dense<0.000000e+00> : vector<8xf32>
      %1187 = vector.multi_reduction <add>, %1186, %cst_313 [1] : vector<8x8xf32> to vector<8xf32>
      %1188 = vector.shape_cast %1187 : vector<8xf32> to vector<8x1xf32>
      %cst_314 = arith.constant 1.000000e-30 : f32
      %1189 = vector.broadcast %cst_314 : f32 to vector<8x1xf32>
      %1190 = arith.maximumf %1188, %1189 : vector<8x1xf32>
      %1191 = vector.broadcast %1184 : vector<1x8xf32> to vector<8x8xf32>
      %1192 = arith.mulf %158, %1191 : vector<8x8xf32>
      %cst_315 = arith.constant dense<0.000000e+00> : vector<8xf32>
      %1193 = vector.multi_reduction <add>, %1192, %cst_315 [1] : vector<8x8xf32> to vector<8xf32>
      %1194 = vector.shape_cast %1193 : vector<8xf32> to vector<8x1xf32>
      %cst_316 = arith.constant 1.000000e-30 : f32
      %1195 = vector.broadcast %cst_316 : f32 to vector<8x1xf32>
      %1196 = arith.maximumf %1194, %1195 : vector<8x1xf32>
      %1197 = tpu.reciprocal %1190 {approx = true} : vector<8x1xf32> -> vector<8x1xf32>
      %1198 = arith.mulf %6, %1197 : vector<8x1xf32>
      %1199 = tpu.reciprocal %1196 {approx = true} : vector<8x1xf32> -> vector<8x1xf32>
      %1200 = arith.mulf %6, %1199 : vector<8x1xf32>
      %1201 = vector.broadcast %1198 : vector<8x1xf32> to vector<8x8xf32>
      %1202 = arith.mulf %155, %1201 : vector<8x8xf32>
      %cst_317 = arith.constant dense<0.000000e+00> : vector<8xf32>
      %1203 = vector.multi_reduction <add>, %1202, %cst_317 [0] : vector<8x8xf32> to vector<8xf32>
      %1204 = vector.shape_cast %1203 : vector<8xf32> to vector<1x8xf32>
      %cst_318 = arith.constant 1.000000e-30 : f32
      %1205 = vector.broadcast %cst_318 : f32 to vector<1x8xf32>
      %1206 = arith.maximumf %1204, %1205 : vector<1x8xf32>
      %1207 = vector.broadcast %1200 : vector<8x1xf32> to vector<8x8xf32>
      %1208 = arith.mulf %158, %1207 : vector<8x8xf32>
      %cst_319 = arith.constant dense<0.000000e+00> : vector<8xf32>
      %1209 = vector.multi_reduction <add>, %1208, %cst_319 [0] : vector<8x8xf32> to vector<8xf32>
      %1210 = vector.shape_cast %1209 : vector<8xf32> to vector<1x8xf32>
      %cst_320 = arith.constant 1.000000e-30 : f32
      %1211 = vector.broadcast %cst_320 : f32 to vector<1x8xf32>
      %1212 = arith.maximumf %1210, %1211 : vector<1x8xf32>
      %1213 = tpu.reciprocal %1206 {approx = true} : vector<1x8xf32> -> vector<1x8xf32>
      %1214 = arith.mulf %7, %1213 : vector<1x8xf32>
      %1215 = tpu.reciprocal %1212 {approx = true} : vector<1x8xf32> -> vector<1x8xf32>
      %1216 = arith.mulf %7, %1215 : vector<1x8xf32>
      %1217 = vector.broadcast %1214 : vector<1x8xf32> to vector<8x8xf32>
      %1218 = arith.mulf %155, %1217 : vector<8x8xf32>
      %cst_321 = arith.constant dense<0.000000e+00> : vector<8xf32>
      %1219 = vector.multi_reduction <add>, %1218, %cst_321 [1] : vector<8x8xf32> to vector<8xf32>
      %1220 = vector.shape_cast %1219 : vector<8xf32> to vector<8x1xf32>
      %cst_322 = arith.constant 1.000000e-30 : f32
      %1221 = vector.broadcast %cst_322 : f32 to vector<8x1xf32>
      %1222 = arith.maximumf %1220, %1221 : vector<8x1xf32>
      %1223 = vector.broadcast %1216 : vector<1x8xf32> to vector<8x8xf32>
      %1224 = arith.mulf %158, %1223 : vector<8x8xf32>
      %cst_323 = arith.constant dense<0.000000e+00> : vector<8xf32>
      %1225 = vector.multi_reduction <add>, %1224, %cst_323 [1] : vector<8x8xf32> to vector<8xf32>
      %1226 = vector.shape_cast %1225 : vector<8xf32> to vector<8x1xf32>
      %cst_324 = arith.constant 1.000000e-30 : f32
      %1227 = vector.broadcast %cst_324 : f32 to vector<8x1xf32>
      %1228 = arith.maximumf %1226, %1227 : vector<8x1xf32>
      %1229 = tpu.reciprocal %1222 {approx = true} : vector<8x1xf32> -> vector<8x1xf32>
      %1230 = arith.mulf %6, %1229 : vector<8x1xf32>
      %1231 = tpu.reciprocal %1228 {approx = true} : vector<8x1xf32> -> vector<8x1xf32>
      %1232 = arith.mulf %6, %1231 : vector<8x1xf32>
      %1233 = vector.broadcast %1230 : vector<8x1xf32> to vector<8x8xf32>
      %1234 = arith.mulf %155, %1233 : vector<8x8xf32>
      %cst_325 = arith.constant dense<0.000000e+00> : vector<8xf32>
      %1235 = vector.multi_reduction <add>, %1234, %cst_325 [0] : vector<8x8xf32> to vector<8xf32>
      %1236 = vector.shape_cast %1235 : vector<8xf32> to vector<1x8xf32>
      %cst_326 = arith.constant 1.000000e-30 : f32
      %1237 = vector.broadcast %cst_326 : f32 to vector<1x8xf32>
      %1238 = arith.maximumf %1236, %1237 : vector<1x8xf32>
      %1239 = vector.broadcast %1232 : vector<8x1xf32> to vector<8x8xf32>
      %1240 = arith.mulf %158, %1239 : vector<8x8xf32>
      %cst_327 = arith.constant dense<0.000000e+00> : vector<8xf32>
      %1241 = vector.multi_reduction <add>, %1240, %cst_327 [0] : vector<8x8xf32> to vector<8xf32>
      %1242 = vector.shape_cast %1241 : vector<8xf32> to vector<1x8xf32>
      %cst_328 = arith.constant 1.000000e-30 : f32
      %1243 = vector.broadcast %cst_328 : f32 to vector<1x8xf32>
      %1244 = arith.maximumf %1242, %1243 : vector<1x8xf32>
      %1245 = tpu.reciprocal %1238 {approx = true} : vector<1x8xf32> -> vector<1x8xf32>
      %1246 = arith.mulf %7, %1245 : vector<1x8xf32>
      %1247 = tpu.reciprocal %1244 {approx = true} : vector<1x8xf32> -> vector<1x8xf32>
      %1248 = arith.mulf %7, %1247 : vector<1x8xf32>
      %1249 = vector.broadcast %1246 : vector<1x8xf32> to vector<8x8xf32>
      %1250 = arith.mulf %155, %1249 : vector<8x8xf32>
      %cst_329 = arith.constant dense<0.000000e+00> : vector<8xf32>
      %1251 = vector.multi_reduction <add>, %1250, %cst_329 [1] : vector<8x8xf32> to vector<8xf32>
      %1252 = vector.shape_cast %1251 : vector<8xf32> to vector<8x1xf32>
      %cst_330 = arith.constant 1.000000e-30 : f32
      %1253 = vector.broadcast %cst_330 : f32 to vector<8x1xf32>
      %1254 = arith.maximumf %1252, %1253 : vector<8x1xf32>
      %1255 = vector.broadcast %1248 : vector<1x8xf32> to vector<8x8xf32>
      %1256 = arith.mulf %158, %1255 : vector<8x8xf32>
      %cst_331 = arith.constant dense<0.000000e+00> : vector<8xf32>
      %1257 = vector.multi_reduction <add>, %1256, %cst_331 [1] : vector<8x8xf32> to vector<8xf32>
      %1258 = vector.shape_cast %1257 : vector<8xf32> to vector<8x1xf32>
      %cst_332 = arith.constant 1.000000e-30 : f32
      %1259 = vector.broadcast %cst_332 : f32 to vector<8x1xf32>
      %1260 = arith.maximumf %1258, %1259 : vector<8x1xf32>
      %1261 = tpu.reciprocal %1254 {approx = true} : vector<8x1xf32> -> vector<8x1xf32>
      %1262 = arith.mulf %6, %1261 : vector<8x1xf32>
      %1263 = tpu.reciprocal %1260 {approx = true} : vector<8x1xf32> -> vector<8x1xf32>
      %1264 = arith.mulf %6, %1263 : vector<8x1xf32>
      %1265 = vector.broadcast %1262 : vector<8x1xf32> to vector<8x8xf32>
      %1266 = arith.mulf %155, %1265 : vector<8x8xf32>
      %cst_333 = arith.constant dense<0.000000e+00> : vector<8xf32>
      %1267 = vector.multi_reduction <add>, %1266, %cst_333 [0] : vector<8x8xf32> to vector<8xf32>
      %1268 = vector.shape_cast %1267 : vector<8xf32> to vector<1x8xf32>
      %cst_334 = arith.constant 1.000000e-30 : f32
      %1269 = vector.broadcast %cst_334 : f32 to vector<1x8xf32>
      %1270 = arith.maximumf %1268, %1269 : vector<1x8xf32>
      %1271 = vector.broadcast %1264 : vector<8x1xf32> to vector<8x8xf32>
      %1272 = arith.mulf %158, %1271 : vector<8x8xf32>
      %cst_335 = arith.constant dense<0.000000e+00> : vector<8xf32>
      %1273 = vector.multi_reduction <add>, %1272, %cst_335 [0] : vector<8x8xf32> to vector<8xf32>
      %1274 = vector.shape_cast %1273 : vector<8xf32> to vector<1x8xf32>
      %cst_336 = arith.constant 1.000000e-30 : f32
      %1275 = vector.broadcast %cst_336 : f32 to vector<1x8xf32>
      %1276 = arith.maximumf %1274, %1275 : vector<1x8xf32>
      %1277 = tpu.reciprocal %1270 {approx = true} : vector<1x8xf32> -> vector<1x8xf32>
      %1278 = arith.mulf %7, %1277 : vector<1x8xf32>
      %1279 = tpu.reciprocal %1276 {approx = true} : vector<1x8xf32> -> vector<1x8xf32>
      %1280 = arith.mulf %7, %1279 : vector<1x8xf32>
      %1281 = vector.broadcast %1278 : vector<1x8xf32> to vector<8x8xf32>
      %1282 = arith.mulf %155, %1281 : vector<8x8xf32>
      %cst_337 = arith.constant dense<0.000000e+00> : vector<8xf32>
      %1283 = vector.multi_reduction <add>, %1282, %cst_337 [1] : vector<8x8xf32> to vector<8xf32>
      %1284 = vector.shape_cast %1283 : vector<8xf32> to vector<8x1xf32>
      %cst_338 = arith.constant 1.000000e-30 : f32
      %1285 = vector.broadcast %cst_338 : f32 to vector<8x1xf32>
      %1286 = arith.maximumf %1284, %1285 : vector<8x1xf32>
      %1287 = vector.broadcast %1280 : vector<1x8xf32> to vector<8x8xf32>
      %1288 = arith.mulf %158, %1287 : vector<8x8xf32>
      %cst_339 = arith.constant dense<0.000000e+00> : vector<8xf32>
      %1289 = vector.multi_reduction <add>, %1288, %cst_339 [1] : vector<8x8xf32> to vector<8xf32>
      %1290 = vector.shape_cast %1289 : vector<8xf32> to vector<8x1xf32>
      %cst_340 = arith.constant 1.000000e-30 : f32
      %1291 = vector.broadcast %cst_340 : f32 to vector<8x1xf32>
      %1292 = arith.maximumf %1290, %1291 : vector<8x1xf32>
      %1293 = tpu.reciprocal %1286 {approx = true} : vector<8x1xf32> -> vector<8x1xf32>
      %1294 = arith.mulf %6, %1293 : vector<8x1xf32>
      %1295 = tpu.reciprocal %1292 {approx = true} : vector<8x1xf32> -> vector<8x1xf32>
      %1296 = arith.mulf %6, %1295 : vector<8x1xf32>
      %1297 = vector.broadcast %1294 : vector<8x1xf32> to vector<8x8xf32>
      %1298 = arith.mulf %155, %1297 : vector<8x8xf32>
      %cst_341 = arith.constant dense<0.000000e+00> : vector<8xf32>
      %1299 = vector.multi_reduction <add>, %1298, %cst_341 [0] : vector<8x8xf32> to vector<8xf32>
      %1300 = vector.shape_cast %1299 : vector<8xf32> to vector<1x8xf32>
      %cst_342 = arith.constant 1.000000e-30 : f32
      %1301 = vector.broadcast %cst_342 : f32 to vector<1x8xf32>
      %1302 = arith.maximumf %1300, %1301 : vector<1x8xf32>
      %1303 = vector.broadcast %1296 : vector<8x1xf32> to vector<8x8xf32>
      %1304 = arith.mulf %158, %1303 : vector<8x8xf32>
      %cst_343 = arith.constant dense<0.000000e+00> : vector<8xf32>
      %1305 = vector.multi_reduction <add>, %1304, %cst_343 [0] : vector<8x8xf32> to vector<8xf32>
      %1306 = vector.shape_cast %1305 : vector<8xf32> to vector<1x8xf32>
      %cst_344 = arith.constant 1.000000e-30 : f32
      %1307 = vector.broadcast %cst_344 : f32 to vector<1x8xf32>
      %1308 = arith.maximumf %1306, %1307 : vector<1x8xf32>
      %1309 = tpu.reciprocal %1302 {approx = true} : vector<1x8xf32> -> vector<1x8xf32>
      %1310 = arith.mulf %7, %1309 : vector<1x8xf32>
      %1311 = tpu.reciprocal %1308 {approx = true} : vector<1x8xf32> -> vector<1x8xf32>
      %1312 = arith.mulf %7, %1311 : vector<1x8xf32>
      %1313 = vector.broadcast %1310 : vector<1x8xf32> to vector<8x8xf32>
      %1314 = arith.mulf %155, %1313 : vector<8x8xf32>
      %cst_345 = arith.constant dense<0.000000e+00> : vector<8xf32>
      %1315 = vector.multi_reduction <add>, %1314, %cst_345 [1] : vector<8x8xf32> to vector<8xf32>
      %1316 = vector.shape_cast %1315 : vector<8xf32> to vector<8x1xf32>
      %cst_346 = arith.constant 1.000000e-30 : f32
      %1317 = vector.broadcast %cst_346 : f32 to vector<8x1xf32>
      %1318 = arith.maximumf %1316, %1317 : vector<8x1xf32>
      %1319 = vector.broadcast %1312 : vector<1x8xf32> to vector<8x8xf32>
      %1320 = arith.mulf %158, %1319 : vector<8x8xf32>
      %cst_347 = arith.constant dense<0.000000e+00> : vector<8xf32>
      %1321 = vector.multi_reduction <add>, %1320, %cst_347 [1] : vector<8x8xf32> to vector<8xf32>
      %1322 = vector.shape_cast %1321 : vector<8xf32> to vector<8x1xf32>
      %cst_348 = arith.constant 1.000000e-30 : f32
      %1323 = vector.broadcast %cst_348 : f32 to vector<8x1xf32>
      %1324 = arith.maximumf %1322, %1323 : vector<8x1xf32>
      %1325 = tpu.reciprocal %1318 {approx = true} : vector<8x1xf32> -> vector<8x1xf32>
      %1326 = arith.mulf %6, %1325 : vector<8x1xf32>
      %1327 = tpu.reciprocal %1324 {approx = true} : vector<8x1xf32> -> vector<8x1xf32>
      %1328 = arith.mulf %6, %1327 : vector<8x1xf32>
      %1329 = vector.broadcast %1326 : vector<8x1xf32> to vector<8x8xf32>
      %1330 = arith.mulf %155, %1329 : vector<8x8xf32>
      %cst_349 = arith.constant dense<0.000000e+00> : vector<8xf32>
      %1331 = vector.multi_reduction <add>, %1330, %cst_349 [0] : vector<8x8xf32> to vector<8xf32>
      %1332 = vector.shape_cast %1331 : vector<8xf32> to vector<1x8xf32>
      %cst_350 = arith.constant 1.000000e-30 : f32
      %1333 = vector.broadcast %cst_350 : f32 to vector<1x8xf32>
      %1334 = arith.maximumf %1332, %1333 : vector<1x8xf32>
      %1335 = vector.broadcast %1328 : vector<8x1xf32> to vector<8x8xf32>
      %1336 = arith.mulf %158, %1335 : vector<8x8xf32>
      %cst_351 = arith.constant dense<0.000000e+00> : vector<8xf32>
      %1337 = vector.multi_reduction <add>, %1336, %cst_351 [0] : vector<8x8xf32> to vector<8xf32>
      %1338 = vector.shape_cast %1337 : vector<8xf32> to vector<1x8xf32>
      %cst_352 = arith.constant 1.000000e-30 : f32
      %1339 = vector.broadcast %cst_352 : f32 to vector<1x8xf32>
      %1340 = arith.maximumf %1338, %1339 : vector<1x8xf32>
      %1341 = tpu.reciprocal %1334 {approx = true} : vector<1x8xf32> -> vector<1x8xf32>
      %1342 = arith.mulf %7, %1341 : vector<1x8xf32>
      %1343 = tpu.reciprocal %1340 {approx = true} : vector<1x8xf32> -> vector<1x8xf32>
      %1344 = arith.mulf %7, %1343 : vector<1x8xf32>
      %1345 = vector.broadcast %1342 : vector<1x8xf32> to vector<8x8xf32>
      %1346 = arith.mulf %155, %1345 : vector<8x8xf32>
      %cst_353 = arith.constant dense<0.000000e+00> : vector<8xf32>
      %1347 = vector.multi_reduction <add>, %1346, %cst_353 [1] : vector<8x8xf32> to vector<8xf32>
      %1348 = vector.shape_cast %1347 : vector<8xf32> to vector<8x1xf32>
      %cst_354 = arith.constant 1.000000e-30 : f32
      %1349 = vector.broadcast %cst_354 : f32 to vector<8x1xf32>
      %1350 = arith.maximumf %1348, %1349 : vector<8x1xf32>
      %1351 = vector.broadcast %1344 : vector<1x8xf32> to vector<8x8xf32>
      %1352 = arith.mulf %158, %1351 : vector<8x8xf32>
      %cst_355 = arith.constant dense<0.000000e+00> : vector<8xf32>
      %1353 = vector.multi_reduction <add>, %1352, %cst_355 [1] : vector<8x8xf32> to vector<8xf32>
      %1354 = vector.shape_cast %1353 : vector<8xf32> to vector<8x1xf32>
      %cst_356 = arith.constant 1.000000e-30 : f32
      %1355 = vector.broadcast %cst_356 : f32 to vector<8x1xf32>
      %1356 = arith.maximumf %1354, %1355 : vector<8x1xf32>
      %1357 = tpu.reciprocal %1350 {approx = true} : vector<8x1xf32> -> vector<8x1xf32>
      %1358 = arith.mulf %6, %1357 : vector<8x1xf32>
      %1359 = tpu.reciprocal %1356 {approx = true} : vector<8x1xf32> -> vector<8x1xf32>
      %1360 = arith.mulf %6, %1359 : vector<8x1xf32>
      %1361 = vector.broadcast %1358 : vector<8x1xf32> to vector<8x8xf32>
      %1362 = arith.mulf %155, %1361 : vector<8x8xf32>
      %cst_357 = arith.constant dense<0.000000e+00> : vector<8xf32>
      %1363 = vector.multi_reduction <add>, %1362, %cst_357 [0] : vector<8x8xf32> to vector<8xf32>
      %1364 = vector.shape_cast %1363 : vector<8xf32> to vector<1x8xf32>
      %cst_358 = arith.constant 1.000000e-30 : f32
      %1365 = vector.broadcast %cst_358 : f32 to vector<1x8xf32>
      %1366 = arith.maximumf %1364, %1365 : vector<1x8xf32>
      %1367 = vector.broadcast %1360 : vector<8x1xf32> to vector<8x8xf32>
      %1368 = arith.mulf %158, %1367 : vector<8x8xf32>
      %cst_359 = arith.constant dense<0.000000e+00> : vector<8xf32>
      %1369 = vector.multi_reduction <add>, %1368, %cst_359 [0] : vector<8x8xf32> to vector<8xf32>
      %1370 = vector.shape_cast %1369 : vector<8xf32> to vector<1x8xf32>
      %cst_360 = arith.constant 1.000000e-30 : f32
      %1371 = vector.broadcast %cst_360 : f32 to vector<1x8xf32>
      %1372 = arith.maximumf %1370, %1371 : vector<1x8xf32>
      %1373 = tpu.reciprocal %1366 {approx = true} : vector<1x8xf32> -> vector<1x8xf32>
      %1374 = arith.mulf %7, %1373 : vector<1x8xf32>
      %1375 = tpu.reciprocal %1372 {approx = true} : vector<1x8xf32> -> vector<1x8xf32>
      %1376 = arith.mulf %7, %1375 : vector<1x8xf32>
      %1377 = vector.broadcast %1374 : vector<1x8xf32> to vector<8x8xf32>
      %1378 = arith.mulf %155, %1377 : vector<8x8xf32>
      %cst_361 = arith.constant dense<0.000000e+00> : vector<8xf32>
      %1379 = vector.multi_reduction <add>, %1378, %cst_361 [1] : vector<8x8xf32> to vector<8xf32>
      %1380 = vector.shape_cast %1379 : vector<8xf32> to vector<8x1xf32>
      %cst_362 = arith.constant 1.000000e-30 : f32
      %1381 = vector.broadcast %cst_362 : f32 to vector<8x1xf32>
      %1382 = arith.maximumf %1380, %1381 : vector<8x1xf32>
      %1383 = vector.broadcast %1376 : vector<1x8xf32> to vector<8x8xf32>
      %1384 = arith.mulf %158, %1383 : vector<8x8xf32>
      %cst_363 = arith.constant dense<0.000000e+00> : vector<8xf32>
      %1385 = vector.multi_reduction <add>, %1384, %cst_363 [1] : vector<8x8xf32> to vector<8xf32>
      %1386 = vector.shape_cast %1385 : vector<8xf32> to vector<8x1xf32>
      %cst_364 = arith.constant 1.000000e-30 : f32
      %1387 = vector.broadcast %cst_364 : f32 to vector<8x1xf32>
      %1388 = arith.maximumf %1386, %1387 : vector<8x1xf32>
      %1389 = tpu.reciprocal %1382 {approx = true} : vector<8x1xf32> -> vector<8x1xf32>
      %1390 = arith.mulf %6, %1389 : vector<8x1xf32>
      %1391 = tpu.reciprocal %1388 {approx = true} : vector<8x1xf32> -> vector<8x1xf32>
      %1392 = arith.mulf %6, %1391 : vector<8x1xf32>
      %1393 = vector.broadcast %1390 : vector<8x1xf32> to vector<8x8xf32>
      %1394 = arith.mulf %155, %1393 : vector<8x8xf32>
      %cst_365 = arith.constant dense<0.000000e+00> : vector<8xf32>
      %1395 = vector.multi_reduction <add>, %1394, %cst_365 [0] : vector<8x8xf32> to vector<8xf32>
      %1396 = vector.shape_cast %1395 : vector<8xf32> to vector<1x8xf32>
      %cst_366 = arith.constant 1.000000e-30 : f32
      %1397 = vector.broadcast %cst_366 : f32 to vector<1x8xf32>
      %1398 = arith.maximumf %1396, %1397 : vector<1x8xf32>
      %1399 = vector.broadcast %1392 : vector<8x1xf32> to vector<8x8xf32>
      %1400 = arith.mulf %158, %1399 : vector<8x8xf32>
      %cst_367 = arith.constant dense<0.000000e+00> : vector<8xf32>
      %1401 = vector.multi_reduction <add>, %1400, %cst_367 [0] : vector<8x8xf32> to vector<8xf32>
      %1402 = vector.shape_cast %1401 : vector<8xf32> to vector<1x8xf32>
      %cst_368 = arith.constant 1.000000e-30 : f32
      %1403 = vector.broadcast %cst_368 : f32 to vector<1x8xf32>
      %1404 = arith.maximumf %1402, %1403 : vector<1x8xf32>
      %1405 = tpu.reciprocal %1398 {approx = true} : vector<1x8xf32> -> vector<1x8xf32>
      %1406 = arith.mulf %7, %1405 : vector<1x8xf32>
      %1407 = tpu.reciprocal %1404 {approx = true} : vector<1x8xf32> -> vector<1x8xf32>
      %1408 = arith.mulf %7, %1407 : vector<1x8xf32>
      %1409 = vector.broadcast %1406 : vector<1x8xf32> to vector<8x8xf32>
      %1410 = arith.mulf %155, %1409 : vector<8x8xf32>
      %cst_369 = arith.constant dense<0.000000e+00> : vector<8xf32>
      %1411 = vector.multi_reduction <add>, %1410, %cst_369 [1] : vector<8x8xf32> to vector<8xf32>
      %1412 = vector.shape_cast %1411 : vector<8xf32> to vector<8x1xf32>
      %cst_370 = arith.constant 1.000000e-30 : f32
      %1413 = vector.broadcast %cst_370 : f32 to vector<8x1xf32>
      %1414 = arith.maximumf %1412, %1413 : vector<8x1xf32>
      %1415 = vector.broadcast %1408 : vector<1x8xf32> to vector<8x8xf32>
      %1416 = arith.mulf %158, %1415 : vector<8x8xf32>
      %cst_371 = arith.constant dense<0.000000e+00> : vector<8xf32>
      %1417 = vector.multi_reduction <add>, %1416, %cst_371 [1] : vector<8x8xf32> to vector<8xf32>
      %1418 = vector.shape_cast %1417 : vector<8xf32> to vector<8x1xf32>
      %cst_372 = arith.constant 1.000000e-30 : f32
      %1419 = vector.broadcast %cst_372 : f32 to vector<8x1xf32>
      %1420 = arith.maximumf %1418, %1419 : vector<8x1xf32>
      %1421 = tpu.reciprocal %1414 {approx = true} : vector<8x1xf32> -> vector<8x1xf32>
      %1422 = arith.mulf %6, %1421 : vector<8x1xf32>
      %1423 = tpu.reciprocal %1420 {approx = true} : vector<8x1xf32> -> vector<8x1xf32>
      %1424 = arith.mulf %6, %1423 : vector<8x1xf32>
      %1425 = vector.broadcast %1422 : vector<8x1xf32> to vector<8x8xf32>
      %1426 = arith.mulf %155, %1425 : vector<8x8xf32>
      %cst_373 = arith.constant dense<0.000000e+00> : vector<8xf32>
      %1427 = vector.multi_reduction <add>, %1426, %cst_373 [0] : vector<8x8xf32> to vector<8xf32>
      %1428 = vector.shape_cast %1427 : vector<8xf32> to vector<1x8xf32>
      %cst_374 = arith.constant 1.000000e-30 : f32
      %1429 = vector.broadcast %cst_374 : f32 to vector<1x8xf32>
      %1430 = arith.maximumf %1428, %1429 : vector<1x8xf32>
      %1431 = vector.broadcast %1424 : vector<8x1xf32> to vector<8x8xf32>
      %1432 = arith.mulf %158, %1431 : vector<8x8xf32>
      %cst_375 = arith.constant dense<0.000000e+00> : vector<8xf32>
      %1433 = vector.multi_reduction <add>, %1432, %cst_375 [0] : vector<8x8xf32> to vector<8xf32>
      %1434 = vector.shape_cast %1433 : vector<8xf32> to vector<1x8xf32>
      %cst_376 = arith.constant 1.000000e-30 : f32
      %1435 = vector.broadcast %cst_376 : f32 to vector<1x8xf32>
      %1436 = arith.maximumf %1434, %1435 : vector<1x8xf32>
      %1437 = tpu.reciprocal %1430 {approx = true} : vector<1x8xf32> -> vector<1x8xf32>
      %1438 = arith.mulf %7, %1437 : vector<1x8xf32>
      %1439 = tpu.reciprocal %1436 {approx = true} : vector<1x8xf32> -> vector<1x8xf32>
      %1440 = arith.mulf %7, %1439 : vector<1x8xf32>
      %1441 = vector.broadcast %1438 : vector<1x8xf32> to vector<8x8xf32>
      %1442 = arith.mulf %155, %1441 : vector<8x8xf32>
      %cst_377 = arith.constant dense<0.000000e+00> : vector<8xf32>
      %1443 = vector.multi_reduction <add>, %1442, %cst_377 [1] : vector<8x8xf32> to vector<8xf32>
      %1444 = vector.shape_cast %1443 : vector<8xf32> to vector<8x1xf32>
      %cst_378 = arith.constant 1.000000e-30 : f32
      %1445 = vector.broadcast %cst_378 : f32 to vector<8x1xf32>
      %1446 = arith.maximumf %1444, %1445 : vector<8x1xf32>
      %1447 = vector.broadcast %1440 : vector<1x8xf32> to vector<8x8xf32>
      %1448 = arith.mulf %158, %1447 : vector<8x8xf32>
      %cst_379 = arith.constant dense<0.000000e+00> : vector<8xf32>
      %1449 = vector.multi_reduction <add>, %1448, %cst_379 [1] : vector<8x8xf32> to vector<8xf32>
      %1450 = vector.shape_cast %1449 : vector<8xf32> to vector<8x1xf32>
      %cst_380 = arith.constant 1.000000e-30 : f32
      %1451 = vector.broadcast %cst_380 : f32 to vector<8x1xf32>
      %1452 = arith.maximumf %1450, %1451 : vector<8x1xf32>
      %1453 = tpu.reciprocal %1446 {approx = true} : vector<8x1xf32> -> vector<8x1xf32>
      %1454 = arith.mulf %6, %1453 : vector<8x1xf32>
      %1455 = tpu.reciprocal %1452 {approx = true} : vector<8x1xf32> -> vector<8x1xf32>
      %1456 = arith.mulf %6, %1455 : vector<8x1xf32>
      %1457 = vector.broadcast %1454 : vector<8x1xf32> to vector<8x8xf32>
      %1458 = arith.mulf %155, %1457 : vector<8x8xf32>
      %cst_381 = arith.constant dense<0.000000e+00> : vector<8xf32>
      %1459 = vector.multi_reduction <add>, %1458, %cst_381 [0] : vector<8x8xf32> to vector<8xf32>
      %1460 = vector.shape_cast %1459 : vector<8xf32> to vector<1x8xf32>
      %cst_382 = arith.constant 1.000000e-30 : f32
      %1461 = vector.broadcast %cst_382 : f32 to vector<1x8xf32>
      %1462 = arith.maximumf %1460, %1461 : vector<1x8xf32>
      %1463 = vector.broadcast %1456 : vector<8x1xf32> to vector<8x8xf32>
      %1464 = arith.mulf %158, %1463 : vector<8x8xf32>
      %cst_383 = arith.constant dense<0.000000e+00> : vector<8xf32>
      %1465 = vector.multi_reduction <add>, %1464, %cst_383 [0] : vector<8x8xf32> to vector<8xf32>
      %1466 = vector.shape_cast %1465 : vector<8xf32> to vector<1x8xf32>
      %cst_384 = arith.constant 1.000000e-30 : f32
      %1467 = vector.broadcast %cst_384 : f32 to vector<1x8xf32>
      %1468 = arith.maximumf %1466, %1467 : vector<1x8xf32>
      %1469 = tpu.reciprocal %1462 {approx = true} : vector<1x8xf32> -> vector<1x8xf32>
      %1470 = arith.mulf %7, %1469 : vector<1x8xf32>
      %1471 = tpu.reciprocal %1468 {approx = true} : vector<1x8xf32> -> vector<1x8xf32>
      %1472 = arith.mulf %7, %1471 : vector<1x8xf32>
      %1473 = vector.broadcast %1470 : vector<1x8xf32> to vector<8x8xf32>
      %1474 = arith.mulf %155, %1473 : vector<8x8xf32>
      %cst_385 = arith.constant dense<0.000000e+00> : vector<8xf32>
      %1475 = vector.multi_reduction <add>, %1474, %cst_385 [1] : vector<8x8xf32> to vector<8xf32>
      %1476 = vector.shape_cast %1475 : vector<8xf32> to vector<8x1xf32>
      %cst_386 = arith.constant 1.000000e-30 : f32
      %1477 = vector.broadcast %cst_386 : f32 to vector<8x1xf32>
      %1478 = arith.maximumf %1476, %1477 : vector<8x1xf32>
      %1479 = vector.broadcast %1472 : vector<1x8xf32> to vector<8x8xf32>
      %1480 = arith.mulf %158, %1479 : vector<8x8xf32>
      %cst_387 = arith.constant dense<0.000000e+00> : vector<8xf32>
      %1481 = vector.multi_reduction <add>, %1480, %cst_387 [1] : vector<8x8xf32> to vector<8xf32>
      %1482 = vector.shape_cast %1481 : vector<8xf32> to vector<8x1xf32>
      %cst_388 = arith.constant 1.000000e-30 : f32
      %1483 = vector.broadcast %cst_388 : f32 to vector<8x1xf32>
      %1484 = arith.maximumf %1482, %1483 : vector<8x1xf32>
      %1485 = tpu.reciprocal %1478 {approx = true} : vector<8x1xf32> -> vector<8x1xf32>
      %1486 = arith.mulf %6, %1485 : vector<8x1xf32>
      %1487 = tpu.reciprocal %1484 {approx = true} : vector<8x1xf32> -> vector<8x1xf32>
      %1488 = arith.mulf %6, %1487 : vector<8x1xf32>
      %1489 = vector.broadcast %1486 : vector<8x1xf32> to vector<8x8xf32>
      %1490 = arith.mulf %155, %1489 : vector<8x8xf32>
      %cst_389 = arith.constant dense<0.000000e+00> : vector<8xf32>
      %1491 = vector.multi_reduction <add>, %1490, %cst_389 [0] : vector<8x8xf32> to vector<8xf32>
      %1492 = vector.shape_cast %1491 : vector<8xf32> to vector<1x8xf32>
      %cst_390 = arith.constant 1.000000e-30 : f32
      %1493 = vector.broadcast %cst_390 : f32 to vector<1x8xf32>
      %1494 = arith.maximumf %1492, %1493 : vector<1x8xf32>
      %1495 = vector.broadcast %1488 : vector<8x1xf32> to vector<8x8xf32>
      %1496 = arith.mulf %158, %1495 : vector<8x8xf32>
      %cst_391 = arith.constant dense<0.000000e+00> : vector<8xf32>
      %1497 = vector.multi_reduction <add>, %1496, %cst_391 [0] : vector<8x8xf32> to vector<8xf32>
      %1498 = vector.shape_cast %1497 : vector<8xf32> to vector<1x8xf32>
      %cst_392 = arith.constant 1.000000e-30 : f32
      %1499 = vector.broadcast %cst_392 : f32 to vector<1x8xf32>
      %1500 = arith.maximumf %1498, %1499 : vector<1x8xf32>
      %1501 = tpu.reciprocal %1494 {approx = true} : vector<1x8xf32> -> vector<1x8xf32>
      %1502 = arith.mulf %7, %1501 : vector<1x8xf32>
      %1503 = tpu.reciprocal %1500 {approx = true} : vector<1x8xf32> -> vector<1x8xf32>
      %1504 = arith.mulf %7, %1503 : vector<1x8xf32>
      %1505 = vector.broadcast %1502 : vector<1x8xf32> to vector<8x8xf32>
      %1506 = arith.mulf %155, %1505 : vector<8x8xf32>
      %cst_393 = arith.constant dense<0.000000e+00> : vector<8xf32>
      %1507 = vector.multi_reduction <add>, %1506, %cst_393 [1] : vector<8x8xf32> to vector<8xf32>
      %1508 = vector.shape_cast %1507 : vector<8xf32> to vector<8x1xf32>
      %cst_394 = arith.constant 1.000000e-30 : f32
      %1509 = vector.broadcast %cst_394 : f32 to vector<8x1xf32>
      %1510 = arith.maximumf %1508, %1509 : vector<8x1xf32>
      %1511 = vector.broadcast %1504 : vector<1x8xf32> to vector<8x8xf32>
      %1512 = arith.mulf %158, %1511 : vector<8x8xf32>
      %cst_395 = arith.constant dense<0.000000e+00> : vector<8xf32>
      %1513 = vector.multi_reduction <add>, %1512, %cst_395 [1] : vector<8x8xf32> to vector<8xf32>
      %1514 = vector.shape_cast %1513 : vector<8xf32> to vector<8x1xf32>
      %cst_396 = arith.constant 1.000000e-30 : f32
      %1515 = vector.broadcast %cst_396 : f32 to vector<8x1xf32>
      %1516 = arith.maximumf %1514, %1515 : vector<8x1xf32>
      %1517 = tpu.reciprocal %1510 {approx = true} : vector<8x1xf32> -> vector<8x1xf32>
      %1518 = arith.mulf %6, %1517 : vector<8x1xf32>
      %1519 = tpu.reciprocal %1516 {approx = true} : vector<8x1xf32> -> vector<8x1xf32>
      %1520 = arith.mulf %6, %1519 : vector<8x1xf32>
      %1521 = vector.broadcast %1518 : vector<8x1xf32> to vector<8x8xf32>
      %1522 = arith.mulf %155, %1521 : vector<8x8xf32>
      %cst_397 = arith.constant dense<0.000000e+00> : vector<8xf32>
      %1523 = vector.multi_reduction <add>, %1522, %cst_397 [0] : vector<8x8xf32> to vector<8xf32>
      %1524 = vector.shape_cast %1523 : vector<8xf32> to vector<1x8xf32>
      %cst_398 = arith.constant 1.000000e-30 : f32
      %1525 = vector.broadcast %cst_398 : f32 to vector<1x8xf32>
      %1526 = arith.maximumf %1524, %1525 : vector<1x8xf32>
      %1527 = vector.broadcast %1520 : vector<8x1xf32> to vector<8x8xf32>
      %1528 = arith.mulf %158, %1527 : vector<8x8xf32>
      %cst_399 = arith.constant dense<0.000000e+00> : vector<8xf32>
      %1529 = vector.multi_reduction <add>, %1528, %cst_399 [0] : vector<8x8xf32> to vector<8xf32>
      %1530 = vector.shape_cast %1529 : vector<8xf32> to vector<1x8xf32>
      %cst_400 = arith.constant 1.000000e-30 : f32
      %1531 = vector.broadcast %cst_400 : f32 to vector<1x8xf32>
      %1532 = arith.maximumf %1530, %1531 : vector<1x8xf32>
      %1533 = tpu.reciprocal %1526 {approx = true} : vector<1x8xf32> -> vector<1x8xf32>
      %1534 = arith.mulf %7, %1533 : vector<1x8xf32>
      %1535 = tpu.reciprocal %1532 {approx = true} : vector<1x8xf32> -> vector<1x8xf32>
      %1536 = arith.mulf %7, %1535 : vector<1x8xf32>
      %1537 = vector.broadcast %1534 : vector<1x8xf32> to vector<8x8xf32>
      %1538 = arith.mulf %155, %1537 : vector<8x8xf32>
      %cst_401 = arith.constant dense<0.000000e+00> : vector<8xf32>
      %1539 = vector.multi_reduction <add>, %1538, %cst_401 [1] : vector<8x8xf32> to vector<8xf32>
      %1540 = vector.shape_cast %1539 : vector<8xf32> to vector<8x1xf32>
      %cst_402 = arith.constant 1.000000e-30 : f32
      %1541 = vector.broadcast %cst_402 : f32 to vector<8x1xf32>
      %1542 = arith.maximumf %1540, %1541 : vector<8x1xf32>
      %1543 = vector.broadcast %1536 : vector<1x8xf32> to vector<8x8xf32>
      %1544 = arith.mulf %158, %1543 : vector<8x8xf32>
      %cst_403 = arith.constant dense<0.000000e+00> : vector<8xf32>
      %1545 = vector.multi_reduction <add>, %1544, %cst_403 [1] : vector<8x8xf32> to vector<8xf32>
      %1546 = vector.shape_cast %1545 : vector<8xf32> to vector<8x1xf32>
      %cst_404 = arith.constant 1.000000e-30 : f32
      %1547 = vector.broadcast %cst_404 : f32 to vector<8x1xf32>
      %1548 = arith.maximumf %1546, %1547 : vector<8x1xf32>
      %1549 = tpu.reciprocal %1542 {approx = true} : vector<8x1xf32> -> vector<8x1xf32>
      %1550 = arith.mulf %6, %1549 : vector<8x1xf32>
      %1551 = tpu.reciprocal %1548 {approx = true} : vector<8x1xf32> -> vector<8x1xf32>
      %1552 = arith.mulf %6, %1551 : vector<8x1xf32>
      %1553 = vector.broadcast %1550 : vector<8x1xf32> to vector<8x8xf32>
      %1554 = arith.mulf %155, %1553 : vector<8x8xf32>
      %cst_405 = arith.constant dense<0.000000e+00> : vector<8xf32>
      %1555 = vector.multi_reduction <add>, %1554, %cst_405 [0] : vector<8x8xf32> to vector<8xf32>
      %1556 = vector.shape_cast %1555 : vector<8xf32> to vector<1x8xf32>
      %cst_406 = arith.constant 1.000000e-30 : f32
      %1557 = vector.broadcast %cst_406 : f32 to vector<1x8xf32>
      %1558 = arith.maximumf %1556, %1557 : vector<1x8xf32>
      %1559 = vector.broadcast %1552 : vector<8x1xf32> to vector<8x8xf32>
      %1560 = arith.mulf %158, %1559 : vector<8x8xf32>
      %cst_407 = arith.constant dense<0.000000e+00> : vector<8xf32>
      %1561 = vector.multi_reduction <add>, %1560, %cst_407 [0] : vector<8x8xf32> to vector<8xf32>
      %1562 = vector.shape_cast %1561 : vector<8xf32> to vector<1x8xf32>
      %cst_408 = arith.constant 1.000000e-30 : f32
      %1563 = vector.broadcast %cst_408 : f32 to vector<1x8xf32>
      %1564 = arith.maximumf %1562, %1563 : vector<1x8xf32>
      %1565 = tpu.reciprocal %1558 {approx = true} : vector<1x8xf32> -> vector<1x8xf32>
      %1566 = arith.mulf %7, %1565 : vector<1x8xf32>
      %1567 = tpu.reciprocal %1564 {approx = true} : vector<1x8xf32> -> vector<1x8xf32>
      %1568 = arith.mulf %7, %1567 : vector<1x8xf32>
      %1569 = vector.broadcast %1566 : vector<1x8xf32> to vector<8x8xf32>
      %1570 = arith.mulf %155, %1569 : vector<8x8xf32>
      %cst_409 = arith.constant dense<0.000000e+00> : vector<8xf32>
      %1571 = vector.multi_reduction <add>, %1570, %cst_409 [1] : vector<8x8xf32> to vector<8xf32>
      %1572 = vector.shape_cast %1571 : vector<8xf32> to vector<8x1xf32>
      %cst_410 = arith.constant 1.000000e-30 : f32
      %1573 = vector.broadcast %cst_410 : f32 to vector<8x1xf32>
      %1574 = arith.maximumf %1572, %1573 : vector<8x1xf32>
      %1575 = vector.broadcast %1568 : vector<1x8xf32> to vector<8x8xf32>
      %1576 = arith.mulf %158, %1575 : vector<8x8xf32>
      %cst_411 = arith.constant dense<0.000000e+00> : vector<8xf32>
      %1577 = vector.multi_reduction <add>, %1576, %cst_411 [1] : vector<8x8xf32> to vector<8xf32>
      %1578 = vector.shape_cast %1577 : vector<8xf32> to vector<8x1xf32>
      %cst_412 = arith.constant 1.000000e-30 : f32
      %1579 = vector.broadcast %cst_412 : f32 to vector<8x1xf32>
      %1580 = arith.maximumf %1578, %1579 : vector<8x1xf32>
      %1581 = tpu.reciprocal %1574 {approx = true} : vector<8x1xf32> -> vector<8x1xf32>
      %1582 = arith.mulf %6, %1581 : vector<8x1xf32>
      %1583 = tpu.reciprocal %1580 {approx = true} : vector<8x1xf32> -> vector<8x1xf32>
      %1584 = arith.mulf %6, %1583 : vector<8x1xf32>
      %1585 = vector.broadcast %1582 : vector<8x1xf32> to vector<8x8xf32>
      %1586 = arith.mulf %155, %1585 : vector<8x8xf32>
      %cst_413 = arith.constant dense<0.000000e+00> : vector<8xf32>
      %1587 = vector.multi_reduction <add>, %1586, %cst_413 [0] : vector<8x8xf32> to vector<8xf32>
      %1588 = vector.shape_cast %1587 : vector<8xf32> to vector<1x8xf32>
      %cst_414 = arith.constant 1.000000e-30 : f32
      %1589 = vector.broadcast %cst_414 : f32 to vector<1x8xf32>
      %1590 = arith.maximumf %1588, %1589 : vector<1x8xf32>
      %1591 = vector.broadcast %1584 : vector<8x1xf32> to vector<8x8xf32>
      %1592 = arith.mulf %158, %1591 : vector<8x8xf32>
      %cst_415 = arith.constant dense<0.000000e+00> : vector<8xf32>
      %1593 = vector.multi_reduction <add>, %1592, %cst_415 [0] : vector<8x8xf32> to vector<8xf32>
      %1594 = vector.shape_cast %1593 : vector<8xf32> to vector<1x8xf32>
      %cst_416 = arith.constant 1.000000e-30 : f32
      %1595 = vector.broadcast %cst_416 : f32 to vector<1x8xf32>
      %1596 = arith.maximumf %1594, %1595 : vector<1x8xf32>
      %1597 = tpu.reciprocal %1590 {approx = true} : vector<1x8xf32> -> vector<1x8xf32>
      %1598 = arith.mulf %7, %1597 : vector<1x8xf32>
      %1599 = tpu.reciprocal %1596 {approx = true} : vector<1x8xf32> -> vector<1x8xf32>
      %1600 = arith.mulf %7, %1599 : vector<1x8xf32>
      %1601 = vector.broadcast %1598 : vector<1x8xf32> to vector<8x8xf32>
      %1602 = arith.mulf %155, %1601 : vector<8x8xf32>
      %cst_417 = arith.constant dense<0.000000e+00> : vector<8xf32>
      %1603 = vector.multi_reduction <add>, %1602, %cst_417 [1] : vector<8x8xf32> to vector<8xf32>
      %1604 = vector.shape_cast %1603 : vector<8xf32> to vector<8x1xf32>
      %cst_418 = arith.constant 1.000000e-30 : f32
      %1605 = vector.broadcast %cst_418 : f32 to vector<8x1xf32>
      %1606 = arith.maximumf %1604, %1605 : vector<8x1xf32>
      %1607 = vector.broadcast %1600 : vector<1x8xf32> to vector<8x8xf32>
      %1608 = arith.mulf %158, %1607 : vector<8x8xf32>
      %cst_419 = arith.constant dense<0.000000e+00> : vector<8xf32>
      %1609 = vector.multi_reduction <add>, %1608, %cst_419 [1] : vector<8x8xf32> to vector<8xf32>
      %1610 = vector.shape_cast %1609 : vector<8xf32> to vector<8x1xf32>
      %cst_420 = arith.constant 1.000000e-30 : f32
      %1611 = vector.broadcast %cst_420 : f32 to vector<8x1xf32>
      %1612 = arith.maximumf %1610, %1611 : vector<8x1xf32>
      %1613 = tpu.reciprocal %1606 {approx = true} : vector<8x1xf32> -> vector<8x1xf32>
      %1614 = arith.mulf %6, %1613 : vector<8x1xf32>
      %1615 = tpu.reciprocal %1612 {approx = true} : vector<8x1xf32> -> vector<8x1xf32>
      %1616 = arith.mulf %6, %1615 : vector<8x1xf32>
      %1617 = vector.broadcast %1614 : vector<8x1xf32> to vector<8x8xf32>
      %1618 = arith.mulf %155, %1617 : vector<8x8xf32>
      %cst_421 = arith.constant dense<0.000000e+00> : vector<8xf32>
      %1619 = vector.multi_reduction <add>, %1618, %cst_421 [0] : vector<8x8xf32> to vector<8xf32>
      %1620 = vector.shape_cast %1619 : vector<8xf32> to vector<1x8xf32>
      %cst_422 = arith.constant 1.000000e-30 : f32
      %1621 = vector.broadcast %cst_422 : f32 to vector<1x8xf32>
      %1622 = arith.maximumf %1620, %1621 : vector<1x8xf32>
      %1623 = vector.broadcast %1616 : vector<8x1xf32> to vector<8x8xf32>
      %1624 = arith.mulf %158, %1623 : vector<8x8xf32>
      %cst_423 = arith.constant dense<0.000000e+00> : vector<8xf32>
      %1625 = vector.multi_reduction <add>, %1624, %cst_423 [0] : vector<8x8xf32> to vector<8xf32>
      %1626 = vector.shape_cast %1625 : vector<8xf32> to vector<1x8xf32>
      %cst_424 = arith.constant 1.000000e-30 : f32
      %1627 = vector.broadcast %cst_424 : f32 to vector<1x8xf32>
      %1628 = arith.maximumf %1626, %1627 : vector<1x8xf32>
      %1629 = tpu.reciprocal %1622 {approx = true} : vector<1x8xf32> -> vector<1x8xf32>
      %1630 = arith.mulf %7, %1629 : vector<1x8xf32>
      %1631 = tpu.reciprocal %1628 {approx = true} : vector<1x8xf32> -> vector<1x8xf32>
      %1632 = arith.mulf %7, %1631 : vector<1x8xf32>
      %1633 = vector.broadcast %1630 : vector<1x8xf32> to vector<8x8xf32>
      %1634 = arith.mulf %155, %1633 : vector<8x8xf32>
      %cst_425 = arith.constant dense<0.000000e+00> : vector<8xf32>
      %1635 = vector.multi_reduction <add>, %1634, %cst_425 [1] : vector<8x8xf32> to vector<8xf32>
      %1636 = vector.shape_cast %1635 : vector<8xf32> to vector<8x1xf32>
      %cst_426 = arith.constant 1.000000e-30 : f32
      %1637 = vector.broadcast %cst_426 : f32 to vector<8x1xf32>
      %1638 = arith.maximumf %1636, %1637 : vector<8x1xf32>
      %1639 = vector.broadcast %1632 : vector<1x8xf32> to vector<8x8xf32>
      %1640 = arith.mulf %158, %1639 : vector<8x8xf32>
      %cst_427 = arith.constant dense<0.000000e+00> : vector<8xf32>
      %1641 = vector.multi_reduction <add>, %1640, %cst_427 [1] : vector<8x8xf32> to vector<8xf32>
      %1642 = vector.shape_cast %1641 : vector<8xf32> to vector<8x1xf32>
      %cst_428 = arith.constant 1.000000e-30 : f32
      %1643 = vector.broadcast %cst_428 : f32 to vector<8x1xf32>
      %1644 = arith.maximumf %1642, %1643 : vector<8x1xf32>
      %1645 = tpu.reciprocal %1638 {approx = true} : vector<8x1xf32> -> vector<8x1xf32>
      %1646 = arith.mulf %6, %1645 : vector<8x1xf32>
      %1647 = tpu.reciprocal %1644 {approx = true} : vector<8x1xf32> -> vector<8x1xf32>
      %1648 = arith.mulf %6, %1647 : vector<8x1xf32>
      %1649 = vector.broadcast %1646 : vector<8x1xf32> to vector<8x8xf32>
      %1650 = arith.mulf %155, %1649 : vector<8x8xf32>
      %cst_429 = arith.constant dense<0.000000e+00> : vector<8xf32>
      %1651 = vector.multi_reduction <add>, %1650, %cst_429 [0] : vector<8x8xf32> to vector<8xf32>
      %1652 = vector.shape_cast %1651 : vector<8xf32> to vector<1x8xf32>
      %cst_430 = arith.constant 1.000000e-30 : f32
      %1653 = vector.broadcast %cst_430 : f32 to vector<1x8xf32>
      %1654 = arith.maximumf %1652, %1653 : vector<1x8xf32>
      %1655 = vector.broadcast %1648 : vector<8x1xf32> to vector<8x8xf32>
      %1656 = arith.mulf %158, %1655 : vector<8x8xf32>
      %cst_431 = arith.constant dense<0.000000e+00> : vector<8xf32>
      %1657 = vector.multi_reduction <add>, %1656, %cst_431 [0] : vector<8x8xf32> to vector<8xf32>
      %1658 = vector.shape_cast %1657 : vector<8xf32> to vector<1x8xf32>
      %cst_432 = arith.constant 1.000000e-30 : f32
      %1659 = vector.broadcast %cst_432 : f32 to vector<1x8xf32>
      %1660 = arith.maximumf %1658, %1659 : vector<1x8xf32>
      %1661 = tpu.reciprocal %1654 {approx = true} : vector<1x8xf32> -> vector<1x8xf32>
      %1662 = arith.mulf %7, %1661 : vector<1x8xf32>
      %1663 = tpu.reciprocal %1660 {approx = true} : vector<1x8xf32> -> vector<1x8xf32>
      %1664 = arith.mulf %7, %1663 : vector<1x8xf32>
      %1665 = vector.broadcast %1662 : vector<1x8xf32> to vector<8x8xf32>
      %1666 = arith.mulf %155, %1665 : vector<8x8xf32>
      %cst_433 = arith.constant dense<0.000000e+00> : vector<8xf32>
      %1667 = vector.multi_reduction <add>, %1666, %cst_433 [1] : vector<8x8xf32> to vector<8xf32>
      %1668 = vector.shape_cast %1667 : vector<8xf32> to vector<8x1xf32>
      %cst_434 = arith.constant 1.000000e-30 : f32
      %1669 = vector.broadcast %cst_434 : f32 to vector<8x1xf32>
      %1670 = arith.maximumf %1668, %1669 : vector<8x1xf32>
      %1671 = vector.broadcast %1664 : vector<1x8xf32> to vector<8x8xf32>
      %1672 = arith.mulf %158, %1671 : vector<8x8xf32>
      %cst_435 = arith.constant dense<0.000000e+00> : vector<8xf32>
      %1673 = vector.multi_reduction <add>, %1672, %cst_435 [1] : vector<8x8xf32> to vector<8xf32>
      %1674 = vector.shape_cast %1673 : vector<8xf32> to vector<8x1xf32>
      %cst_436 = arith.constant 1.000000e-30 : f32
      %1675 = vector.broadcast %cst_436 : f32 to vector<8x1xf32>
      %1676 = arith.maximumf %1674, %1675 : vector<8x1xf32>
      %1677 = tpu.reciprocal %1670 {approx = true} : vector<8x1xf32> -> vector<8x1xf32>
      %1678 = arith.mulf %6, %1677 : vector<8x1xf32>
      %1679 = tpu.reciprocal %1676 {approx = true} : vector<8x1xf32> -> vector<8x1xf32>
      %1680 = arith.mulf %6, %1679 : vector<8x1xf32>
      %1681 = vector.broadcast %1678 : vector<8x1xf32> to vector<8x8xf32>
      %1682 = arith.mulf %155, %1681 : vector<8x8xf32>
      %cst_437 = arith.constant dense<0.000000e+00> : vector<8xf32>
      %1683 = vector.multi_reduction <add>, %1682, %cst_437 [0] : vector<8x8xf32> to vector<8xf32>
      %1684 = vector.shape_cast %1683 : vector<8xf32> to vector<1x8xf32>
      %cst_438 = arith.constant 1.000000e-30 : f32
      %1685 = vector.broadcast %cst_438 : f32 to vector<1x8xf32>
      %1686 = arith.maximumf %1684, %1685 : vector<1x8xf32>
      %1687 = vector.broadcast %1680 : vector<8x1xf32> to vector<8x8xf32>
      %1688 = arith.mulf %158, %1687 : vector<8x8xf32>
      %cst_439 = arith.constant dense<0.000000e+00> : vector<8xf32>
      %1689 = vector.multi_reduction <add>, %1688, %cst_439 [0] : vector<8x8xf32> to vector<8xf32>
      %1690 = vector.shape_cast %1689 : vector<8xf32> to vector<1x8xf32>
      %cst_440 = arith.constant 1.000000e-30 : f32
      %1691 = vector.broadcast %cst_440 : f32 to vector<1x8xf32>
      %1692 = arith.maximumf %1690, %1691 : vector<1x8xf32>
      %1693 = tpu.reciprocal %1686 {approx = true} : vector<1x8xf32> -> vector<1x8xf32>
      %1694 = arith.mulf %7, %1693 : vector<1x8xf32>
      %1695 = tpu.reciprocal %1692 {approx = true} : vector<1x8xf32> -> vector<1x8xf32>
      %1696 = arith.mulf %7, %1695 : vector<1x8xf32>
      %1697 = vector.broadcast %1694 : vector<1x8xf32> to vector<8x8xf32>
      %1698 = arith.mulf %155, %1697 : vector<8x8xf32>
      %cst_441 = arith.constant dense<0.000000e+00> : vector<8xf32>
      %1699 = vector.multi_reduction <add>, %1698, %cst_441 [1] : vector<8x8xf32> to vector<8xf32>
      %1700 = vector.shape_cast %1699 : vector<8xf32> to vector<8x1xf32>
      %cst_442 = arith.constant 1.000000e-30 : f32
      %1701 = vector.broadcast %cst_442 : f32 to vector<8x1xf32>
      %1702 = arith.maximumf %1700, %1701 : vector<8x1xf32>
      %1703 = vector.broadcast %1696 : vector<1x8xf32> to vector<8x8xf32>
      %1704 = arith.mulf %158, %1703 : vector<8x8xf32>
      %cst_443 = arith.constant dense<0.000000e+00> : vector<8xf32>
      %1705 = vector.multi_reduction <add>, %1704, %cst_443 [1] : vector<8x8xf32> to vector<8xf32>
      %1706 = vector.shape_cast %1705 : vector<8xf32> to vector<8x1xf32>
      %cst_444 = arith.constant 1.000000e-30 : f32
      %1707 = vector.broadcast %cst_444 : f32 to vector<8x1xf32>
      %1708 = arith.maximumf %1706, %1707 : vector<8x1xf32>
      %1709 = tpu.reciprocal %1702 {approx = true} : vector<8x1xf32> -> vector<8x1xf32>
      %1710 = arith.mulf %6, %1709 : vector<8x1xf32>
      %1711 = tpu.reciprocal %1708 {approx = true} : vector<8x1xf32> -> vector<8x1xf32>
      %1712 = arith.mulf %6, %1711 : vector<8x1xf32>
      %1713 = vector.broadcast %1710 : vector<8x1xf32> to vector<8x8xf32>
      %1714 = arith.mulf %155, %1713 : vector<8x8xf32>
      %cst_445 = arith.constant dense<0.000000e+00> : vector<8xf32>
      %1715 = vector.multi_reduction <add>, %1714, %cst_445 [0] : vector<8x8xf32> to vector<8xf32>
      %1716 = vector.shape_cast %1715 : vector<8xf32> to vector<1x8xf32>
      %cst_446 = arith.constant 1.000000e-30 : f32
      %1717 = vector.broadcast %cst_446 : f32 to vector<1x8xf32>
      %1718 = arith.maximumf %1716, %1717 : vector<1x8xf32>
      %1719 = vector.broadcast %1712 : vector<8x1xf32> to vector<8x8xf32>
      %1720 = arith.mulf %158, %1719 : vector<8x8xf32>
      %cst_447 = arith.constant dense<0.000000e+00> : vector<8xf32>
      %1721 = vector.multi_reduction <add>, %1720, %cst_447 [0] : vector<8x8xf32> to vector<8xf32>
      %1722 = vector.shape_cast %1721 : vector<8xf32> to vector<1x8xf32>
      %cst_448 = arith.constant 1.000000e-30 : f32
      %1723 = vector.broadcast %cst_448 : f32 to vector<1x8xf32>
      %1724 = arith.maximumf %1722, %1723 : vector<1x8xf32>
      %1725 = tpu.reciprocal %1718 {approx = true} : vector<1x8xf32> -> vector<1x8xf32>
      %1726 = arith.mulf %7, %1725 : vector<1x8xf32>
      %1727 = tpu.reciprocal %1724 {approx = true} : vector<1x8xf32> -> vector<1x8xf32>
      %1728 = arith.mulf %7, %1727 : vector<1x8xf32>
      %1729 = vector.broadcast %1726 : vector<1x8xf32> to vector<8x8xf32>
      %1730 = arith.mulf %155, %1729 : vector<8x8xf32>
      %cst_449 = arith.constant dense<0.000000e+00> : vector<8xf32>
      %1731 = vector.multi_reduction <add>, %1730, %cst_449 [1] : vector<8x8xf32> to vector<8xf32>
      %1732 = vector.shape_cast %1731 : vector<8xf32> to vector<8x1xf32>
      %cst_450 = arith.constant 1.000000e-30 : f32
      %1733 = vector.broadcast %cst_450 : f32 to vector<8x1xf32>
      %1734 = arith.maximumf %1732, %1733 : vector<8x1xf32>
      %1735 = vector.broadcast %1728 : vector<1x8xf32> to vector<8x8xf32>
      %1736 = arith.mulf %158, %1735 : vector<8x8xf32>
      %cst_451 = arith.constant dense<0.000000e+00> : vector<8xf32>
      %1737 = vector.multi_reduction <add>, %1736, %cst_451 [1] : vector<8x8xf32> to vector<8xf32>
      %1738 = vector.shape_cast %1737 : vector<8xf32> to vector<8x1xf32>
      %cst_452 = arith.constant 1.000000e-30 : f32
      %1739 = vector.broadcast %cst_452 : f32 to vector<8x1xf32>
      %1740 = arith.maximumf %1738, %1739 : vector<8x1xf32>
      %1741 = tpu.reciprocal %1734 {approx = true} : vector<8x1xf32> -> vector<8x1xf32>
      %1742 = arith.mulf %6, %1741 : vector<8x1xf32>
      %1743 = tpu.reciprocal %1740 {approx = true} : vector<8x1xf32> -> vector<8x1xf32>
      %1744 = arith.mulf %6, %1743 : vector<8x1xf32>
      %1745 = vector.broadcast %1742 : vector<8x1xf32> to vector<8x8xf32>
      %1746 = arith.mulf %155, %1745 : vector<8x8xf32>
      %cst_453 = arith.constant dense<0.000000e+00> : vector<8xf32>
      %1747 = vector.multi_reduction <add>, %1746, %cst_453 [0] : vector<8x8xf32> to vector<8xf32>
      %1748 = vector.shape_cast %1747 : vector<8xf32> to vector<1x8xf32>
      %cst_454 = arith.constant 1.000000e-30 : f32
      %1749 = vector.broadcast %cst_454 : f32 to vector<1x8xf32>
      %1750 = arith.maximumf %1748, %1749 : vector<1x8xf32>
      %1751 = vector.broadcast %1744 : vector<8x1xf32> to vector<8x8xf32>
      %1752 = arith.mulf %158, %1751 : vector<8x8xf32>
      %cst_455 = arith.constant dense<0.000000e+00> : vector<8xf32>
      %1753 = vector.multi_reduction <add>, %1752, %cst_455 [0] : vector<8x8xf32> to vector<8xf32>
      %1754 = vector.shape_cast %1753 : vector<8xf32> to vector<1x8xf32>
      %cst_456 = arith.constant 1.000000e-30 : f32
      %1755 = vector.broadcast %cst_456 : f32 to vector<1x8xf32>
      %1756 = arith.maximumf %1754, %1755 : vector<1x8xf32>
      %1757 = tpu.reciprocal %1750 {approx = true} : vector<1x8xf32> -> vector<1x8xf32>
      %1758 = arith.mulf %7, %1757 : vector<1x8xf32>
      %1759 = tpu.reciprocal %1756 {approx = true} : vector<1x8xf32> -> vector<1x8xf32>
      %1760 = arith.mulf %7, %1759 : vector<1x8xf32>
      %1761 = vector.broadcast %1742 : vector<8x1xf32> to vector<8x8xf32>
      %1762 = arith.mulf %1761, %155 : vector<8x8xf32>
      %1763 = vector.broadcast %1758 : vector<1x8xf32> to vector<8x8xf32>
      %1764 = arith.mulf %1762, %1763 : vector<8x8xf32>
      %1765 = vector.broadcast %1744 : vector<8x1xf32> to vector<8x8xf32>
      %1766 = arith.mulf %1765, %158 : vector<8x8xf32>
      %1767 = vector.broadcast %1760 : vector<1x8xf32> to vector<8x8xf32>
      %1768 = arith.mulf %1766, %1767 : vector<8x8xf32>
      scf.yield %1764, %1768 : vector<8x8xf32>, vector<8x8xf32>
    }
    %cst_24 = arith.constant dense<0.000000e+00> : vector<8x8xf32>
    %74 = tpu.matmul %26, %73#0, %cst_24 {dimension_numbers = #tpu.dot_dimension_numbers<[1], [0], [0], [1], [0, 0, 1, 1], [], []>} : vector<8x8xf32>, vector<8x8xf32>, vector<8x8xf32> -> vector<8x8xf32>
    %cst_25 = arith.constant dense<0.000000e+00> : vector<8x8xf32>
    %75 = tpu.matmul %73#0, %74, %cst_25 {dimension_numbers = #tpu.dot_dimension_numbers<[0], [0], [1], [1], [0, 1, 1, 1], [], []>} : vector<8x8xf32>, vector<8x8xf32>, vector<8x8xf32> -> vector<8x8xf32>
    %76 = vector.broadcast %56 : f32 to vector<8x8xf32>
    %77 = arith.mulf %76, %75 : vector<8x8xf32>
    %cst_26 = arith.constant dense<0.000000e+00> : vector<8x8xf32>
    %78 = tpu.matmul %45, %73#1, %cst_26 {dimension_numbers = #tpu.dot_dimension_numbers<[1], [0], [0], [1], [0, 0, 1, 1], [], []>} : vector<8x8xf32>, vector<8x8xf32>, vector<8x8xf32> -> vector<8x8xf32>
    %cst_27 = arith.constant dense<0.000000e+00> : vector<8x8xf32>
    %79 = tpu.matmul %73#1, %78, %cst_27 {dimension_numbers = #tpu.dot_dimension_numbers<[0], [0], [1], [1], [0, 1, 1, 1], [], []>} : vector<8x8xf32>, vector<8x8xf32>, vector<8x8xf32> -> vector<8x8xf32>
    %80 = vector.broadcast %57 : f32 to vector<8x8xf32>
    %81 = arith.mulf %80, %79 : vector<8x8xf32>
    %82 = arith.addf %77, %81 : vector<8x8xf32>
    %83 = vector.broadcast %6 : vector<8x1xf32> to vector<8x8xf32>
    %84 = vector.broadcast %7 : vector<1x8xf32> to vector<8x8xf32>
    %85 = arith.mulf %83, %84 : vector<8x8xf32>
    %86 = arith.divf %82, %85 : vector<8x8xf32>
    %87 = arith.subf %86, %5 : vector<8x8xf32>
    %88 = arith.mulf %87, %87 : vector<8x8xf32>
    %89 = vector.shape_cast %88 : vector<8x8xf32> to vector<1x8x8xf32>
    %cst_28 = arith.constant dense<0.000000e+00> : vector<1xf32>
    %90 = vector.multi_reduction <add>, %89, %cst_28 [1, 2] : vector<1x8x8xf32> to vector<1xf32>
    %91 = vector.shape_cast %90 : vector<1xf32> to vector<1x1x1xf32>
    %92 = vector.extract %91[0, 0, 0] : f32 from vector<1x1x1xf32>
    %cst_29 = arith.constant 1.562500e-02 : f32
    %93 = arith.mulf %92, %cst_29 : f32
    %94 = tpu.iota {dimensions = array<i32: 1>} : vector<1x128xi32>
    %c0_i32_30 = arith.constant 0 : i32
    %95 = vector.broadcast %c0_i32_30 : i32 to vector<1x128xi32>
    %96 = arith.cmpi eq, %94, %95 : vector<1x128xi32>
    %c1_i32_31 = arith.constant 1 : i32
    %97 = vector.broadcast %c1_i32_31 : i32 to vector<1x128xi32>
    %98 = arith.cmpi eq, %94, %97 : vector<1x128xi32>
    %cst_32 = arith.constant 0.000000e+00 : f32
    %99 = vector.broadcast %57 : f32 to vector<1x128xf32>
    %100 = vector.broadcast %cst_32 : f32 to vector<1x128xf32>
    %101 = arith.select %98, %99, %100 : vector<1x128xi1>, vector<1x128xf32>
    %102 = vector.broadcast %56 : f32 to vector<1x128xf32>
    %103 = arith.select %96, %102, %101 : vector<1x128xi1>, vector<1x128xf32>
    %c2_i32 = arith.constant 2 : i32
    %104 = vector.broadcast %c2_i32 : i32 to vector<1x128xi32>
    %105 = arith.cmpi slt, %94, %104 : vector<1x128xi32>
    %cst_33 = arith.constant 1.000000e-10 : f32
    %106 = vector.broadcast %cst_33 : f32 to vector<1x128xf32>
    %107 = arith.addf %103, %106 : vector<1x128xf32>
    %108 = math.log %107 : vector<1x128xf32>
    %109 = arith.mulf %103, %108 : vector<1x128xf32>
    %cst_34 = arith.constant 0.000000e+00 : f32
    %110 = vector.broadcast %cst_34 : f32 to vector<1x128xf32>
    %111 = arith.select %105, %109, %110 : vector<1x128xi1>, vector<1x128xf32>
    %112 = vector.shape_cast %111 : vector<1x128xf32> to vector<1x1x128xf32>
    %cst_35 = arith.constant dense<0.000000e+00> : vector<1xf32>
    %113 = vector.multi_reduction <add>, %112, %cst_35 [1, 2] : vector<1x1x128xf32> to vector<1xf32>
    %114 = vector.shape_cast %113 : vector<1xf32> to vector<1x1x1xf32>
    %115 = vector.extract %114[0, 0, 0] : f32 from vector<1x1x1xf32>
    %cst_36 = arith.constant 1.000000e-01 : f32
    %116 = arith.mulf %cst_36, %115 : f32
    %117 = arith.addf %93, %116 : f32
    %c0_37 = arith.constant 0 : index
    %c0_38 = arith.constant 0 : index
    %118 = memref.load %arg3[%c0_37, %c0_38] : memref<1x1xf32, #tpu.memory_space<smem>>
    memref.store %117, %arg3[%c0_37, %c0_38] : memref<1x1xf32, #tpu.memory_space<smem>>
    return
  }
}

</mosaic_0001>

<bundles_post_ra>
// kernel: tpu_custom_call.1
= control target key start
LH: loop header
LB: loop body
LE: loop exit
PB: predicated region body
PF: predicated region fallthrough
CT: control target
= control target key end

     0   :  { %8 = vsyncpa [#allocation4], 0  ;;  %s4039_s0 = inlined_call_operand.hbm [shape: f32[2], index: 0, kind: input, shape index: {}]   ;;  %s4040_s1 = inlined_call_operand.hbm [shape: f32[8,128], index: 1, kind: input, shape index: {}]   ;;  %s4041_s2 = inlined_call_operand.hbm [shape: f32[8,128], index: 2, kind: input, shape index: {}]   ;;  %s4042_s3 = inlined_call_operand.hbm [shape: f32[1,1], index: 3, kind: output, shape index: {}]  }
   0x1   :  { %9 = vsyncpa [#allocation3], 0 }
   0x2   :  { %10 = vsyncpa [#allocation8], 0 }
   0x3   :  { %11 = vsyncpa [#allocation5], 0  ;;  %s3356_s14 = scalar_lea.hbm %s4039_s0, 16 }
   0x4   :  { %p3357_p0 = scmp.ne.s32.totalorder %s4039_s0, %s3356_s14  ;;  %p3360_p1 = scmp.lt.u32.totalorder %s3356_s14, %s4039_s0 }
   0x6   :  { %p3362_p2 = pnand %p3360_p1, %p3357_p0 }
   0x8   :  { %3365 = shalt.err (!%p3362_p2)
}
   0x9   :  { %s3452_s19 = smov [#allocation2]   ;;  %s3453_s22 = smov [#allocation6]  }
   0xa   :  { %19 = dma.hbm_to_smem %s4039_s0, 16, %s3452_s19, [#allocation4]  }
   0xb   :  { %s26_s23 = sshll.u32 %s3453_s22, 4  ;;  %s3454_s24 = smov [#allocation7]   ;;  %s27_s23 = int_to_ptr.vmem [resolvable:$true] %s26_s23 }
   0xc   :  { %s36_s25 = sshll.u32 %s3454_s24, 4  ;;  %s3366_s28 = scalar_lea.hbm %s4040_s1, 128  ;;  %s37_s25 = int_to_ptr.vmem [resolvable:$true] %s36_s25 }
   0xd   :  { %p3367_p3 = scmp.ne.s32.totalorder %s4040_s1, %s3366_s28  ;;  %p3370_p4 = scmp.lt.u32.totalorder %s3366_s28, %s4040_s1 }
   0xf   :  { %p3372_p5 = pnand %p3370_p4, %p3367_p3 }
  0x11   :  { %3375 = shalt.err (!%p3372_p5)
}
  0x12   :  { %s3376_s0 = scalar_lea.vmem %s27_s23, 128  ;;  %p3381_p7 = scmp.lt.s32.totalorder %s27_s23, %s27_s23 }
  0x13   :  { %p3377_p6 = scmp.ne.s32.totalorder %s27_s23, %s3376_s0  ;;  %p3382_p8 = scmp.lt.s32.totalorder %s3376_s0, %s3376_s0 }
  0x15   :  { %p3383_p9 = por %p3382_p8, %p3381_p7 }
  0x17   :  { %p3384_p10 = pnand %p3383_p9, %p3377_p6 }
  0x19   :  { %3387 = shalt.err (!%p3384_p10)
}
  0x1a   :  { %29 = dma.hbm_to_vmem [thread:$0]  %s4040_s1, 128, %s27_s23, [#allocation3]  }
  0x1b   :  { %s3388_s10 = scalar_lea.hbm %s4041_s2, 128 }
  0x1c   :  { %p3389_p11 = scmp.ne.s32.totalorder %s4041_s2, %s3388_s10  ;;  %p3392_p12 = scmp.lt.u32.totalorder %s3388_s10, %s4041_s2 }
  0x1e   :  { %p3394_p13 = pnand %p3392_p12, %p3389_p11 }
  0x20   :  { %3397 = shalt.err (!%p3394_p13)
}
  0x21   :  { %s3398_s15 = scalar_lea.vmem %s37_s25, 128  ;;  %p3403_p1 = scmp.lt.s32.totalorder %s37_s25, %s37_s25 }
  0x22   :  { %p3399_p0 = scmp.ne.s32.totalorder %s37_s25, %s3398_s15  ;;  %p3404_p2 = scmp.lt.s32.totalorder %s3398_s15, %s3398_s15 }
  0x24   :  { %p3405_p3 = por %p3404_p2, %p3403_p1 }
  0x26   :  { %p3406_p4 = pnand %p3405_p3, %p3399_p0 }
  0x28   :  { %3409 = shalt.err (!%p3406_p4)
}
  0x29   :  { %39 = dma.hbm_to_vmem [thread:$0]  %s4041_s2, 128, %s37_s25, [#allocation8]  }
  0x2a   :  { %3432 = dma.done.wait [#allocation4], 16  }
  0x2b   :  { %3433 = vsyncadd [#allocation4], 4294967280 }
  0x2c   :  { %3434 = dma.done.wait [#allocation3], 128  }
  0x2d   :  { %3435 = vsyncadd [#allocation3], 4294967168 }
  0x2e   :  { %3436 = dma.done.wait [#allocation8], 128  }
  0x2f   :  { %3437 = vsyncadd [#allocation8], 4294967168 }
  0x30   :  { %49 = sfence }
  0x31   :  { %v56_v0 = vld [vmem:[#allocation6] sm:$0xff]  ;;  %v145_v1 = vld [vmem:[#allocation7] sm:$0xff]  ;;  %v3455_v2 = vmov 0.0   ;;  %vm3456_vm0 = vmmov 0   ;;  %v50_v3 = vlaneseq  ;;  %vm128_vm2 = vcmask 64512   ;;  %s3546_s2 = sld [smem:[#allocation2]] }
  0x32   :  { %2855 = vmatprep.subr.mxu0 %v3455_v2  ;;  %2860 = vmatprep.subr.mxu1 %v3455_v2  ;;  %s3548_s17 = sld [smem:[#allocation2 + $0x1]]  ;;  %v3562_v63 = vmov 0.015625   ;;  %s3566_s18 = smov 0  }
  0x33   :  { %2856 = vmatpush3.xpose.msra.mxu0 %v56_v0  ;;  %2861 = vmatpush3.xpose.msra.mxu1 %v145_v1  ;;  %v51_v4 = vshrl.u32 %v50_v3, 7  ;;  %v3523_v5 = vand.u32 127, %v50_v3 }
  0x34   :  { %2857 = vmatprep.mubr.msk.f32.mxu0 %vm3456_vm0, %v3455_v2  ;;  %2862 = vmatprep.mubr.msk.f32.mxu1 %vm3456_vm0, %v3455_v2 }
  0x35   :  { %vm3526_vm1 = vcmp.eq.s32.totalorder %v51_v4, %v3523_v5 }
  0x36   :  { %2858 = vmatmul.mubr.f32.vlgmr.msra.gmra.mrb[0].mxu0 %v56_v0  ;;  %2863 = vmatmul.mubr.f32.vlgmr.msra.gmra.mrb[0].mxu1 %v145_v1  ;;  %v3553_v49 = vsel %vm3526_vm1, 1.0, %v3455_v2  ;;  %v3564_v0 = vmov 0.015625  }
  0x37   :  { %v245_v50 = vmul.f32 %v3553_v49, %v3553_v49 }
  0x39   :  { %v246_v51 = vmul.f32 0.125, %v245_v50 }
  0x3b   :  { %v247_v52 = vsel %vm128_vm2, %v246_v51, 0.0 }
  0x3c   :  { %v248_v53 = vrot.slane %v247_v52, 4 }
  0x3e   :  { %v249_v54 = vadd.f32 %v248_v53, %v247_v52 }
  0x40   :  { %v250_v55 = vrot.slane %v249_v54, 2 }
  0x42   :  { %v251_v56 = vadd.f32 %v250_v55, %v249_v54 }
  0x44   :  { %v252_v57 = vrot.slane %v251_v56, 1 }
  0x46   :  { %v253_v58 = vadd.f32 %v252_v57, %v251_v56 }
 0x109   :  { %v123_v7 = vpop.f32.mrb[0].mxu0  ;;  %v212_v8 = vpop.f32.mrb[0].mxu1 }
 0x10a   :  { %v127_v9 = vsel %vm3526_vm1, %v123_v7, 0.0  ;;  %v2859_v10 = vpop.f32.mrb[1].mxu0  ;;  %v2864_v11 = vpop.f32.mrb[1].mxu1  ;;  %v216_v13 = vsel %vm3526_vm1, %v212_v8, 0.0  ;;  %v139_v27 = vmul.f32 2.0, %v123_v7  ;;  %v227_v32 = vmul.f32 2.0, %v212_v8 }
 0x10b   :  { %v129_v12 = vsel %vm128_vm2, %v127_v9, 0.0  ;;  %v217_v14 = vsel %vm128_vm2, %v216_v13, 0.0 }
 0x10c   :  { %130 = vadd.xlane.f32.xlu0 %v129_v12  ;;  %v132_v15 = vrot.slane %v129_v12, 4  ;;  %v220_v17 = vrot.slane %v217_v14, 4 }
 0x10e   :  { %v133_v16 = vadd.f32 %v132_v15, %v129_v12  ;;  %v221_v19 = vadd.f32 %v220_v17, %v217_v14 }
 0x110   :  { %218 = vadd.xlane.f32.xlu0 %v217_v14  ;;  %v134_v18 = vrot.slane %v133_v16, 2  ;;  %v222_v20 = vrot.slane %v221_v19, 2 }
 0x112   :  { %v135_v21 = vadd.f32 %v134_v18, %v133_v16  ;;  %v223_v23 = vadd.f32 %v222_v20, %v221_v19 }
 0x114   :  { %v136_v22 = vrot.slane %v135_v21, 1  ;;  %v224_v25 = vrot.slane %v223_v23, 1 }
 0x116   :  { %v137_v24 = vadd.f32 %v136_v22, %v135_v21  ;;  %v225_v30 = vadd.f32 %v224_v25, %v223_v23 }
 0x199   :  { %v131_v26 = vpop.xlane.xlu0 %130 }
 0x19a   :  { %v138_v28 = vadd.f32 %v137_v24, %v131_v26 }
 0x19c   :  { %v140_v29 = vsub.f32 %v138_v28, %v139_v27 }
 0x19d   :  { %v219_v31 = vpop.xlane.xlu0 %218 }
 0x19e   :  { %v141_v33 = vmax.f32 %v140_v29, 0.0  ;;  %v226_v34 = vadd.f32 %v225_v30, %v219_v31 }
 0x1a0   :  { %v142_v35 = vmul.f32 -0.15625, %v141_v33  ;;  %v228_v36 = vsub.f32 %v226_v34, %v227_v32 }
 0x1a2   :  { %v143_v37 = vmul.f32 1.442695, %v142_v35  ;;  %v229_v38 = vmax.f32 %v228_v36, 0.0 }
 0x1a4   :  { %2946 = vpow2.f32 %v143_v37  ;;  %v230_v39 = vmul.f32 -0.15625, %v229_v38 }
 0x1a6   :  { %v231_v40 = vmul.f32 1.442695, %v230_v39 }
 0x1a8   :  { %2948 = vpow2.f32 %v231_v40 }
 0x1ae   :  { %v3536_v41 = vpop.eup %2946 }
 0x1af   :  { %v233_v42 = vmul.f32 %v3536_v41, %v3536_v41 }
 0x1b1   :  { %v234_v43 = vmul.f32 0.125, %v233_v42 }
 0x1b2   :  { %v3540_v44 = vpop.eup %2948 }
 0x1b3   :  { %v235_v45 = vsel %vm128_vm2, %v234_v43, 0.0  ;;  %v238_v46 = vmul.f32 %v3540_v44, %v3540_v44 }
 0x1b4   :  { %236 = vadd.xlane.f32.xlu1 %v235_v45 }
 0x1b5   :  { %v239_v47 = vmul.f32 0.125, %v238_v46 }
 0x1b7   :  { %v240_v48 = vsel %vm128_vm2, %v239_v47, 0.0 }
 0x1b8   :  { %241 = vadd.xlane.f32.xlu1 %v240_v48 }
 0x241   :  { %v237_v59 = vpop.xlane.xlu1 %236 }
 0x242   :  { %v3558_v60 = vadd.f32 %v253_v58, %v237_v59 }
 0x245   :  { %v242_v61 = vpop.xlane.xlu1 %241 }
 0x246   :  { %v3560_v62 = vadd.f32 %v253_v58, %v242_v61 }
 0x247 LB: > { %v3457_v1 = vmov 0.0   ;;  %vm3458_vm3 = vmmov 0   ;;  %v3459_v3 = vmov 1.0   ;;  %s261_s18 = sadd.s32 1, %s3450_s18   ;;  %s3450_s18 = sphi %s3566_s18, %s261_s18   ;;  %v3446_v0 = vphi %v3564_v0, %v4046_v0   ;;  %v3442_v63 = vphi %v3562_v63, %v4045_v63  }
 0x248   : > { %2865 = vmatprep.subr.mxu0 %v3457_v1  ;;  %2867 = vmatprep.mubr.msk.f32.mxu0 %vm3458_vm3, %v3457_v1  ;;  %p258_p5 = scmp.ge.s32.totalorder %s261_s18, 10  }
 0x249   : > { %2866 = vmatpush3.msra.mxu0 %v3446_v0  ;;  %2870 = vmatprep.subr.mxu1 %v3457_v1  ;;  %vm2773_vm4 = vcmp.eq.s32.totalorder (%p258_p5), %v3523_v5, 1  ;;  %vm2772_vm5 = vcmp.eq.s32.totalorder (%p258_p5), %v3523_v5, 0  ;;  %vm2776_vm6 = vcmp.lt.s32.totalorder (%p258_p5), %v3523_v5, 2  ;;  %vm2782_vm7 = vcmask (%p258_p5), 1040384   ;;  %s3410_s28 = scalar_lea.hbm (%p258_p5), %s4042_s3, 16 }
 0x24a   : > { %2868 = vmatmul.mubr.msk.f32.vlgmr.msra.gmra.mrb[0].mxu0 %vm128_vm2, %v3536_v41  ;;  %2875 = vmatprep.subr.mxu0 %v3457_v1  ;;  %p3411_p6 = scmp.ne.s32.totalorder (%p258_p5), %s4042_s3, %s3410_s28  ;;  %p3414_p7 = scmp.lt.u32.totalorder (%p258_p5), %s3410_s28, %s4042_s3 }
 0x24b   : > { %2876 = vmatpush3.msra.mxu0 %v3442_v63  ;;  %2877 = vmatprep.mubr.msk.f32.mxu0 %vm3458_vm3, %v3457_v1 }
 0x24c   : > { %2872 = vmatprep.mubr.msk.f32.mxu1 %vm3458_vm3, %v3457_v1  ;;  %2871 = vmatpush3.msk.msra.mxu1 %vm3526_vm1, %v3459_v3  ;;  %p3416_p8 = pnand (%p258_p5), %p3414_p7, %p3411_p6 }
 0x24d   : > { %2880 = vmatprep.subr.mxu1 %v3457_v1  ;;  %2885 = vmatprep.subr.mxu0 (%p258_p5), %v3455_v2 }
 0x24e   : > { %2878 = vmatmul.mubr.msk.f32.vlgmr.msra.gmra.mrb[2].mxu0 %vm128_vm2, %v3540_v44 }
 0x24f   :  { %2887 = vmatprep.mubr.msk.f32.mxu0 (%p258_p5), %vm3456_vm0, %v3455_v2 }
 0x31d   : > { %v333_v4 = vpop.f32.mrb[0].mxu0 }
 0x31e   : > { %v2869_v7 = vpop.f32.mrb[1].mxu0  ;;  %2873 = vmatmul.mubr.msk.f32.vlgmr.msra.gmra.mrb[0].mxu1 %vm128_vm2, %v333_v4 }
 0x31f   : > { %2881 = vmatpush3.msk.msra.mxu1 %vm3526_vm1, %v3459_v3  ;;  %2882 = vmatprep.mubr.msk.f32.mxu1 %vm3458_vm3, %v3457_v1 }
 0x320   :  { %2890 = vmatprep.subr.mxu1 (%p258_p5), %v3455_v2 }
 0x321   : > { %v479_v8 = vpop.f32.mrb[2].mxu0 }
 0x322   : > { %v2879_v9 = vpop.f32.mrb[3].mxu0  ;;  %2883 = vmatmul.mubr.msk.f32.vlgmr.msra.gmra.mrb[2].mxu1 %vm128_vm2, %v479_v8 }
 0x323   :  { %2892 = vmatprep.mubr.msk.f32.mxu1 (%p258_p5), %vm3456_vm0, %v3455_v2 }
 0x3f1   : > { %v406_v10 = vpop.f32.mrb[0].mxu1 }
 0x3f2   : > { %v556_v11 = vmul.f32 2.0, %v406_v10  ;;  %v2874_v12 = vpop.f32.mrb[1].mxu1 }
 0x3f4   : > { %v557_v13 = vsub.f32 %v3558_v60, %v556_v11 }
 0x3f5   : > { %v552_v14 = vpop.f32.mrb[2].mxu1 }
 0x3f6   : > { %v558_v15 = vmul.f32 2.0, %v557_v13  ;;  %v559_v16 = vmul.f32 2.0, %v552_v14  ;;  %v2884_v17 = vpop.f32.mrb[3].mxu1 }
 0x3f8   : > { %v560_v18 = vsub.f32 %v3560_v62, %v559_v16  ;;  %v562_v19 = vsel %vm128_vm2, %v558_v15, inf }
 0x3f9   : > { %563 = vmin.xlane.f32.xlu0 %v562_v19 }
 0x3fa   : > { %v561_v20 = vmul.f32 2.0, %v560_v18 }
 0x3fc   : > { %v576_v21 = vsel %vm128_vm2, %v561_v20, inf }
 0x3fd   : > { %577 = vmin.xlane.f32.xlu0 %v576_v21 }
 0x486   : > { %v564_v22 = vpop.xlane.xlu0 %563 }
 0x487   : > { %v565_v23 = vrot.slane %v564_v22, 4 }
 0x489   : > { %v566_v24 = vmin.f32 %v564_v22, %v565_v23 }
 0x48a   : > { %v578_v25 = vpop.xlane.xlu0 %577 }
 0x48b   : > { %v579_v26 = vrot.slane %v578_v25, 4  ;;  %v567_v27 = vrot.slane %v566_v24, 2 }
 0x48d   : > { %v580_v28 = vmin.f32 %v578_v25, %v579_v26  ;;  %v568_v29 = vmin.f32 %v566_v24, %v567_v27 }
 0x48f   : > { %v569_v30 = vrot.slane %v568_v29, 1  ;;  %v581_v31 = vrot.slane %v580_v28, 2 }
 0x491   : > { %v570_v32 = vmin.f32 %v568_v29, %v569_v30  ;;  %v582_v33 = vmin.f32 %v580_v28, %v581_v31 }
 0x493   : > { %2905 = vpush %v570_v32  ;;  %v583_v34 = vrot.slane %v582_v33, 1 }
 0x495   : > { %v584_v35 = vmin.f32 %v582_v33, %v583_v34 }
 0x497   : > { %2907 = vpush %v584_v35 }
 0x4c4   : > { %s2906_s19 = spop %2905 }
 0x4c5   : > { %v572_v36 = vstv %s2906_s19 }
 0x4c6   : > { %v573_v37 = vsub.f32 %v558_v15, %v572_v36 }
 0x4c8   : > { %v574_v38 = vmul.f32 20.0, %v573_v37  ;;  %s2908_s20 = spop %2907 }
 0x4c9   : > { %v586_v39 = vstv %s2908_s20 }
 0x4ca   : > { %v575_v40 = vmin.f32 %v574_v38, 60.0  ;;  %v587_v42 = vsub.f32 %v561_v20, %v586_v39 }
 0x4cc   : > { %v590_v43 = vsub.f32 0.0, %v575_v40  ;;  %v588_v45 = vmul.f32 20.0, %v587_v42 }
 0x4ce   : > { %v591_v46 = vmul.f32 1.442695, %v590_v43  ;;  %v589_v47 = vmin.f32 %v588_v45, 60.0 }
 0x4d0   : > { %2950 = vpow2.f32 %v591_v46  ;;  %v593_v48 = vsub.f32 0.0, %v589_v47 }
 0x4d2   : > { %v594_v50 = vmul.f32 1.442695, %v593_v48 }
 0x4d4   : > { %2952 = vpow2.f32 %v594_v50 }
 0x4da   : > { %v3591_v51 = vpop.eup %2950 }
 0x4db   : > { %v596_v52 = vsel %vm128_vm2, %v3591_v51, 0.0 }
 0x4dc   : > { %597 = vadd.xlane.f32.xlu1 %v596_v52 }
 0x4de   : > { %v3595_v53 = vpop.eup %2952 }
 0x4df   : > { %v600_v54 = vsel %vm128_vm2, %v3595_v53, 0.0 }
 0x4e0   : > { %601 = vadd.xlane.f32.xlu1 %v600_v54 }
 0x569   : > { %v598_v55 = vpop.xlane.xlu1 %597 }
 0x56a   : > { %v599_v56 = vmax.f32 %v598_v55, 1e-30 }
 0x56c   : > { %2954 = vrcp.f32 %v599_v56 }
 0x56d   : > { %v602_v57 = vpop.xlane.xlu1 %601 }
 0x56e   : > { %v603_v58 = vmax.f32 %v602_v57, 1e-30 }
 0x570   : > { %2956 = vrcp.f32 %v603_v58 }
 0x576   : > { %v2955_v59 = vpop.eup %2954 }
 0x577   : > { %v605_v61 = vmul.f32 0.125, %v2955_v59 }
 0x579   : > { %v608_v63 = vmul.f32 %v3591_v51, %v605_v61 }
 0x57a   : > { %v2957_v0 = vpop.eup %2956 }
 0x57b   : > { %v609_v1 = vsel %vm128_vm2, %v608_v63, 0.0  ;;  %v607_v3 = vmul.f32 0.125, %v2957_v0 }
 0x57c   : > { %v610_v4 = vrot.slane %v609_v1, 4 }
 0x57d   : > { %v617_v7 = vmul.f32 %v3595_v53, %v607_v3 }
 0x57e   : > { %v611_v8 = vadd.f32 %v610_v4, %v609_v1 }
 0x57f   : > { %v618_v9 = vsel %vm128_vm2, %v617_v7, 0.0 }
 0x580   : > { %v612_v10 = vrot.slane %v611_v8, 2  ;;  %v619_v11 = vrot.slane %v618_v9, 4 }
 0x582   : > { %v620_v12 = vadd.f32 %v619_v11, %v618_v9  ;;  %v613_v13 = vadd.f32 %v612_v10, %v611_v8 }
 0x584   : > { %v621_v14 = vrot.slane %v620_v12, 2  ;;  %v614_v15 = vrot.slane %v613_v13, 1 }
 0x586   : > { %v615_v16 = vadd.f32 %v614_v15, %v613_v13  ;;  %v622_v17 = vadd.f32 %v621_v14, %v620_v12 }
 0x588   : > { %v616_v18 = vmax.f32 %v615_v16, 1e-30  ;;  %v623_v19 = vrot.slane %v622_v17, 1 }
 0x58a   : > { %2958 = vrcp.f32 %v616_v18  ;;  %v624_v20 = vadd.f32 %v623_v19, %v622_v17 }
 0x58c   : > { %v625_v21 = vmax.f32 %v624_v20, 1e-30 }
 0x58e   : > { %2960 = vrcp.f32 %v625_v21 }
 0x594   : > { %v2959_v22 = vpop.eup %2958 }
 0x595   : > { %v627_v23 = vmul.f32 0.125, %v2959_v22 }
 0x597   : > { %v630_v24 = vmul.f32 %v3591_v51, %v627_v23 }
 0x598   : > { %v2961_v25 = vpop.eup %2960 }
 0x599   : > { %v631_v26 = vsel %vm128_vm2, %v630_v24, 0.0  ;;  %v629_v27 = vmul.f32 0.125, %v2961_v25 }
 0x59a   : > { %632 = vadd.xlane.f32.xlu0 %v631_v26 }
 0x59b   : > { %v635_v28 = vmul.f32 %v3595_v53, %v629_v27 }
 0x59d   : > { %v636_v29 = vsel %vm128_vm2, %v635_v28, 0.0 }
 0x59e   : > { %637 = vadd.xlane.f32.xlu1 %v636_v29 }
 0x627   : > { %v633_v30 = vpop.xlane.xlu0 %632 }
 0x628   : > { %v634_v31 = vmax.f32 %v633_v30, 1e-30 }
 0x62a   : > { %2962 = vrcp.f32 %v634_v31 }
 0x62b   : > { %v638_v32 = vpop.xlane.xlu1 %637 }
 0x62c   : > { %v639_v33 = vmax.f32 %v638_v32, 1e-30 }
 0x62e   : > { %2964 = vrcp.f32 %v639_v33 }
 0x634   : > { %v2963_v34 = vpop.eup %2962 }
 0x635   : > { %v641_v35 = vmul.f32 0.125, %v2963_v34 }
 0x637   : > { %v644_v36 = vmul.f32 %v3591_v51, %v641_v35 }
 0x638   : > { %v2965_v37 = vpop.eup %2964 }
 0x639   : > { %v645_v38 = vsel %vm128_vm2, %v644_v36, 0.0  ;;  %v643_v39 = vmul.f32 0.125, %v2965_v37 }
 0x63a   : > { %v646_v40 = vrot.slane %v645_v38, 4 }
 0x63b   : > { %v653_v42 = vmul.f32 %v3595_v53, %v643_v39 }
 0x63c   : > { %v647_v43 = vadd.f32 %v646_v40, %v645_v38 }
 0x63d   : > { %v654_v45 = vsel %vm128_vm2, %v653_v42, 0.0 }
 0x63e   : > { %v648_v46 = vrot.slane %v647_v43, 2  ;;  %v655_v47 = vrot.slane %v654_v45, 4 }
 0x640   : > { %v656_v48 = vadd.f32 %v655_v47, %v654_v45  ;;  %v649_v50 = vadd.f32 %v648_v46, %v647_v43 }
 0x642   : > { %v657_v52 = vrot.slane %v656_v48, 2  ;;  %v650_v54 = vrot.slane %v649_v50, 1 }
 0x644   : > { %v651_v55 = vadd.f32 %v650_v54, %v649_v50  ;;  %v658_v56 = vadd.f32 %v657_v52, %v656_v48 }
 0x646   : > { %v652_v57 = vmax.f32 %v651_v55, 1e-30  ;;  %v659_v58 = vrot.slane %v658_v56, 1 }
 0x648   : > { %2966 = vrcp.f32 %v652_v57  ;;  %v660_v59 = vadd.f32 %v659_v58, %v658_v56 }
 0x64a   : > { %v661_v61 = vmax.f32 %v660_v59, 1e-30 }
 0x64c   : > { %2968 = vrcp.f32 %v661_v61 }
 0x652   : > { %v2967_v63 = vpop.eup %2966 }
 0x653   : > { %v663_v0 = vmul.f32 0.125, %v2967_v63 }
 0x655   : > { %v666_v1 = vmul.f32 %v3591_v51, %v663_v0 }
 0x656   : > { %v2969_v3 = vpop.eup %2968 }
 0x657   : > { %v667_v4 = vsel %vm128_vm2, %v666_v1, 0.0  ;;  %v665_v7 = vmul.f32 0.125, %v2969_v3 }
 0x658   : > { %668 = vadd.xlane.f32.xlu0 %v667_v4 }
 0x659   : > { %v671_v8 = vmul.f32 %v3595_v53, %v665_v7 }
 0x65b   : > { %v672_v9 = vsel %vm128_vm2, %v671_v8, 0.0 }
 0x65c   : > { %673 = vadd.xlane.f32.xlu1 %v672_v9 }
 0x6e5   : > { %v669_v10 = vpop.xlane.xlu0 %668 }
 0x6e6   : > { %v670_v11 = vmax.f32 %v669_v10, 1e-30 }
 0x6e8   : > { %2970 = vrcp.f32 %v670_v11 }
 0x6e9   : > { %v674_v12 = vpop.xlane.xlu1 %673 }
 0x6ea   : > { %v675_v13 = vmax.f32 %v674_v12, 1e-30 }
 0x6ec   : > { %2972 = vrcp.f32 %v675_v13 }
 0x6f2   : > { %v2971_v14 = vpop.eup %2970 }
 0x6f3   : > { %v677_v15 = vmul.f32 0.125, %v2971_v14 }
 0x6f5   : > { %v680_v16 = vmul.f32 %v3591_v51, %v677_v15 }
 0x6f6   : > { %v2973_v17 = vpop.eup %2972 }
 0x6f7   : > { %v681_v18 = vsel %vm128_vm2, %v680_v16, 0.0  ;;  %v679_v19 = vmul.f32 0.125, %v2973_v17 }
 0x6f8   : > { %v682_v20 = vrot.slane %v681_v18, 4 }
 0x6f9   : > { %v689_v21 = vmul.f32 %v3595_v53, %v679_v19 }
 0x6fa   : > { %v683_v22 = vadd.f32 %v682_v20, %v681_v18 }
 0x6fb   : > { %v690_v23 = vsel %vm128_vm2, %v689_v21, 0.0 }
 0x6fc   : > { %v684_v24 = vrot.slane %v683_v22, 2  ;;  %v691_v25 = vrot.slane %v690_v23, 4 }
 0x6fe   : > { %v692_v26 = vadd.f32 %v691_v25, %v690_v23  ;;  %v685_v27 = vadd.f32 %v684_v24, %v683_v22 }
 0x700   : > { %v693_v28 = vrot.slane %v692_v26, 2  ;;  %v686_v29 = vrot.slane %v685_v27, 1 }
 0x702   : > { %v687_v30 = vadd.f32 %v686_v29, %v685_v27  ;;  %v694_v31 = vadd.f32 %v693_v28, %v692_v26 }
 0x704   : > { %v688_v32 = vmax.f32 %v687_v30, 1e-30  ;;  %v695_v33 = vrot.slane %v694_v31, 1 }
 0x706   : > { %2974 = vrcp.f32 %v688_v32  ;;  %v696_v34 = vadd.f32 %v695_v33, %v694_v31 }
 0x708   : > { %v697_v35 = vmax.f32 %v696_v34, 1e-30 }
 0x70a   : > { %2976 = vrcp.f32 %v697_v35 }
 0x710   : > { %v2975_v36 = vpop.eup %2974 }
 0x711   : > { %v699_v37 = vmul.f32 0.125, %v2975_v36 }
 0x713   : > { %v702_v38 = vmul.f32 %v3591_v51, %v699_v37 }
 0x714   : > { %v2977_v39 = vpop.eup %2976 }
 0x715   : > { %v703_v40 = vsel %vm128_vm2, %v702_v38, 0.0  ;;  %v701_v42 = vmul.f32 0.125, %v2977_v39 }
 0x716   : > { %704 = vadd.xlane.f32.xlu0 %v703_v40 }
 0x717   : > { %v707_v43 = vmul.f32 %v3595_v53, %v701_v42 }
 0x719   : > { %v708_v45 = vsel %vm128_vm2, %v707_v43, 0.0 }
 0x71a   : > { %709 = vadd.xlane.f32.xlu1 %v708_v45 }
 0x7a3   : > { %v705_v46 = vpop.xlane.xlu0 %704 }
 0x7a4   : > { %v706_v47 = vmax.f32 %v705_v46, 1e-30 }
 0x7a6   : > { %2978 = vrcp.f32 %v706_v47 }
 0x7a7   : > { %v710_v48 = vpop.xlane.xlu1 %709 }
 0x7a8   : > { %v711_v50 = vmax.f32 %v710_v48, 1e-30 }
 0x7aa   : > { %2980 = vrcp.f32 %v711_v50 }
 0x7b0   : > { %v2979_v52 = vpop.eup %2978 }
 0x7b1   : > { %v713_v54 = vmul.f32 0.125, %v2979_v52 }
 0x7b3   : > { %v716_v55 = vmul.f32 %v3591_v51, %v713_v54 }
 0x7b4   : > { %v2981_v56 = vpop.eup %2980 }
 0x7b5   : > { %v717_v57 = vsel %vm128_vm2, %v716_v55, 0.0  ;;  %v715_v58 = vmul.f32 0.125, %v2981_v56 }
 0x7b6   : > { %v718_v59 = vrot.slane %v717_v57, 4 }
 0x7b7   : > { %v725_v61 = vmul.f32 %v3595_v53, %v715_v58 }
 0x7b8   : > { %v719_v63 = vadd.f32 %v718_v59, %v717_v57 }
 0x7b9   : > { %v726_v0 = vsel %vm128_vm2, %v725_v61, 0.0 }
 0x7ba   : > { %v720_v1 = vrot.slane %v719_v63, 2  ;;  %v727_v3 = vrot.slane %v726_v0, 4 }
 0x7bc   : > { %v728_v4 = vadd.f32 %v727_v3, %v726_v0  ;;  %v721_v7 = vadd.f32 %v720_v1, %v719_v63 }
 0x7be   : > { %v729_v8 = vrot.slane %v728_v4, 2  ;;  %v722_v9 = vrot.slane %v721_v7, 1 }
 0x7c0   : > { %v723_v10 = vadd.f32 %v722_v9, %v721_v7  ;;  %v730_v11 = vadd.f32 %v729_v8, %v728_v4 }
 0x7c2   : > { %v724_v12 = vmax.f32 %v723_v10, 1e-30  ;;  %v731_v13 = vrot.slane %v730_v11, 1 }
 0x7c4   : > { %2982 = vrcp.f32 %v724_v12  ;;  %v732_v14 = vadd.f32 %v731_v13, %v730_v11 }
 0x7c6   : > { %v733_v15 = vmax.f32 %v732_v14, 1e-30 }
 0x7c8   : > { %2984 = vrcp.f32 %v733_v15 }
 0x7ce   : > { %v2983_v16 = vpop.eup %2982 }
 0x7cf   : > { %v735_v17 = vmul.f32 0.125, %v2983_v16 }
 0x7d1   : > { %v738_v18 = vmul.f32 %v3591_v51, %v735_v17 }
 0x7d2   : > { %v2985_v19 = vpop.eup %2984 }
 0x7d3   : > { %v739_v20 = vsel %vm128_vm2, %v738_v18, 0.0  ;;  %v737_v21 = vmul.f32 0.125, %v2985_v19 }
 0x7d4   : > { %740 = vadd.xlane.f32.xlu0 %v739_v20 }
 0x7d5   : > { %v743_v22 = vmul.f32 %v3595_v53, %v737_v21 }
 0x7d7   : > { %v744_v23 = vsel %vm128_vm2, %v743_v22, 0.0 }
 0x7d8   : > { %745 = vadd.xlane.f32.xlu1 %v744_v23 }
 0x861   : > { %v741_v24 = vpop.xlane.xlu0 %740 }
 0x862   : > { %v742_v25 = vmax.f32 %v741_v24, 1e-30 }
 0x864   : > { %2986 = vrcp.f32 %v742_v25 }
 0x865   : > { %v746_v26 = vpop.xlane.xlu1 %745 }
 0x866   : > { %v747_v27 = vmax.f32 %v746_v26, 1e-30 }
 0x868   : > { %2988 = vrcp.f32 %v747_v27 }
 0x86e   : > { %v2987_v28 = vpop.eup %2986 }
 0x86f   : > { %v749_v29 = vmul.f32 0.125, %v2987_v28 }
 0x871   : > { %v752_v30 = vmul.f32 %v3591_v51, %v749_v29 }
 0x872   : > { %v2989_v31 = vpop.eup %2988 }
 0x873   : > { %v753_v32 = vsel %vm128_vm2, %v752_v30, 0.0  ;;  %v751_v33 = vmul.f32 0.125, %v2989_v31 }
 0x874   : > { %v754_v34 = vrot.slane %v753_v32, 4 }
 0x875   : > { %v761_v35 = vmul.f32 %v3595_v53, %v751_v33 }
 0x876   : > { %v755_v36 = vadd.f32 %v754_v34, %v753_v32 }
 0x877   : > { %v762_v37 = vsel %vm128_vm2, %v761_v35, 0.0 }
 0x878   : > { %v756_v38 = vrot.slane %v755_v36, 2  ;;  %v763_v39 = vrot.slane %v762_v37, 4 }
 0x87a   : > { %v764_v40 = vadd.f32 %v763_v39, %v762_v37  ;;  %v757_v42 = vadd.f32 %v756_v38, %v755_v36 }
 0x87c   : > { %v765_v43 = vrot.slane %v764_v40, 2  ;;  %v758_v45 = vrot.slane %v757_v42, 1 }
 0x87e   : > { %v759_v46 = vadd.f32 %v758_v45, %v757_v42  ;;  %v766_v47 = vadd.f32 %v765_v43, %v764_v40 }
 0x880   : > { %v760_v48 = vmax.f32 %v759_v46, 1e-30  ;;  %v767_v50 = vrot.slane %v766_v47, 1 }
 0x882   : > { %2990 = vrcp.f32 %v760_v48  ;;  %v768_v52 = vadd.f32 %v767_v50, %v766_v47 }
 0x884   : > { %v769_v54 = vmax.f32 %v768_v52, 1e-30 }
 0x886   : > { %2992 = vrcp.f32 %v769_v54 }
 0x88c   : > { %v2991_v55 = vpop.eup %2990 }
 0x88d   : > { %v771_v56 = vmul.f32 0.125, %v2991_v55 }
 0x88f   : > { %v774_v57 = vmul.f32 %v3591_v51, %v771_v56 }
 0x890   : > { %v2993_v58 = vpop.eup %2992 }
 0x891   : > { %v775_v59 = vsel %vm128_vm2, %v774_v57, 0.0  ;;  %v773_v61 = vmul.f32 0.125, %v2993_v58 }
 0x892   : > { %776 = vadd.xlane.f32.xlu0 %v775_v59 }
 0x893   : > { %v779_v63 = vmul.f32 %v3595_v53, %v773_v61 }
 0x895   : > { %v780_v0 = vsel %vm128_vm2, %v779_v63, 0.0 }
 0x896   : > { %781 = vadd.xlane.f32.xlu1 %v780_v0 }
 0x91f   : > { %v777_v1 = vpop.xlane.xlu0 %776 }
 0x920   : > { %v778_v3 = vmax.f32 %v777_v1, 1e-30 }
 0x922   : > { %2994 = vrcp.f32 %v778_v3 }
 0x923   : > { %v782_v4 = vpop.xlane.xlu1 %781 }
 0x924   : > { %v783_v7 = vmax.f32 %v782_v4, 1e-30 }
 0x926   : > { %2996 = vrcp.f32 %v783_v7 }
 0x92c   : > { %v2995_v8 = vpop.eup %2994 }
 0x92d   : > { %v785_v9 = vmul.f32 0.125, %v2995_v8 }
 0x92f   : > { %v788_v10 = vmul.f32 %v3591_v51, %v785_v9 }
 0x930   : > { %v2997_v11 = vpop.eup %2996 }
 0x931   : > { %v789_v12 = vsel %vm128_vm2, %v788_v10, 0.0  ;;  %v787_v13 = vmul.f32 0.125, %v2997_v11 }
 0x932   : > { %v790_v14 = vrot.slane %v789_v12, 4 }
 0x933   : > { %v797_v15 = vmul.f32 %v3595_v53, %v787_v13 }
 0x934   : > { %v791_v16 = vadd.f32 %v790_v14, %v789_v12 }
 0x935   : > { %v798_v17 = vsel %vm128_vm2, %v797_v15, 0.0 }
 0x936   : > { %v792_v18 = vrot.slane %v791_v16, 2  ;;  %v799_v19 = vrot.slane %v798_v17, 4 }
 0x938   : > { %v800_v20 = vadd.f32 %v799_v19, %v798_v17  ;;  %v793_v21 = vadd.f32 %v792_v18, %v791_v16 }
 0x93a   : > { %v801_v22 = vrot.slane %v800_v20, 2  ;;  %v794_v23 = vrot.slane %v793_v21, 1 }
 0x93c   : > { %v795_v24 = vadd.f32 %v794_v23, %v793_v21  ;;  %v802_v25 = vadd.f32 %v801_v22, %v800_v20 }
 0x93e   : > { %v796_v26 = vmax.f32 %v795_v24, 1e-30  ;;  %v803_v27 = vrot.slane %v802_v25, 1 }
 0x940   : > { %2998 = vrcp.f32 %v796_v26  ;;  %v804_v28 = vadd.f32 %v803_v27, %v802_v25 }
 0x942   : > { %v805_v29 = vmax.f32 %v804_v28, 1e-30 }
 0x944   : > { %3000 = vrcp.f32 %v805_v29 }
 0x94a   : > { %v2999_v30 = vpop.eup %2998 }
 0x94b   : > { %v807_v31 = vmul.f32 0.125, %v2999_v30 }
 0x94d   : > { %v810_v32 = vmul.f32 %v3591_v51, %v807_v31 }
 0x94e   : > { %v3001_v33 = vpop.eup %3000 }
 0x94f   : > { %v811_v34 = vsel %vm128_vm2, %v810_v32, 0.0  ;;  %v809_v35 = vmul.f32 0.125, %v3001_v33 }
 0x950   : > { %812 = vadd.xlane.f32.xlu0 %v811_v34 }
 0x951   : > { %v815_v36 = vmul.f32 %v3595_v53, %v809_v35 }
 0x953   : > { %v816_v37 = vsel %vm128_vm2, %v815_v36, 0.0 }
 0x954   : > { %817 = vadd.xlane.f32.xlu1 %v816_v37 }
 0x9dd   : > { %v813_v38 = vpop.xlane.xlu0 %812 }
 0x9de   : > { %v814_v39 = vmax.f32 %v813_v38, 1e-30 }
 0x9e0   : > { %3002 = vrcp.f32 %v814_v39 }
 0x9e1   : > { %v818_v40 = vpop.xlane.xlu1 %817 }
 0x9e2   : > { %v819_v42 = vmax.f32 %v818_v40, 1e-30 }
 0x9e4   : > { %3004 = vrcp.f32 %v819_v42 }
 0x9ea   : > { %v3003_v43 = vpop.eup %3002 }
 0x9eb   : > { %v821_v45 = vmul.f32 0.125, %v3003_v43 }
 0x9ed   : > { %v824_v46 = vmul.f32 %v3591_v51, %v821_v45 }
 0x9ee   : > { %v3005_v47 = vpop.eup %3004 }
 0x9ef   : > { %v825_v48 = vsel %vm128_vm2, %v824_v46, 0.0  ;;  %v823_v50 = vmul.f32 0.125, %v3005_v47 }
 0x9f0   : > { %v826_v52 = vrot.slane %v825_v48, 4 }
 0x9f1   : > { %v833_v54 = vmul.f32 %v3595_v53, %v823_v50 }
 0x9f2   : > { %v827_v55 = vadd.f32 %v826_v52, %v825_v48 }
 0x9f3   : > { %v834_v56 = vsel %vm128_vm2, %v833_v54, 0.0 }
 0x9f4   : > { %v828_v57 = vrot.slane %v827_v55, 2  ;;  %v835_v58 = vrot.slane %v834_v56, 4 }
 0x9f6   : > { %v836_v59 = vadd.f32 %v835_v58, %v834_v56  ;;  %v829_v61 = vadd.f32 %v828_v57, %v827_v55 }
 0x9f8   : > { %v837_v63 = vrot.slane %v836_v59, 2  ;;  %v830_v0 = vrot.slane %v829_v61, 1 }
 0x9fa   : > { %v831_v1 = vadd.f32 %v830_v0, %v829_v61  ;;  %v838_v3 = vadd.f32 %v837_v63, %v836_v59 }
 0x9fc   : > { %v832_v4 = vmax.f32 %v831_v1, 1e-30  ;;  %v839_v7 = vrot.slane %v838_v3, 1 }
 0x9fe   : > { %3006 = vrcp.f32 %v832_v4  ;;  %v840_v8 = vadd.f32 %v839_v7, %v838_v3 }
 0xa00   : > { %v841_v9 = vmax.f32 %v840_v8, 1e-30 }
 0xa02   : > { %3008 = vrcp.f32 %v841_v9 }
 0xa08   : > { %v3007_v10 = vpop.eup %3006 }
 0xa09   : > { %v843_v11 = vmul.f32 0.125, %v3007_v10 }
 0xa0b   : > { %v846_v12 = vmul.f32 %v3591_v51, %v843_v11 }
 0xa0c   : > { %v3009_v13 = vpop.eup %3008 }
 0xa0d   : > { %v847_v14 = vsel %vm128_vm2, %v846_v12, 0.0  ;;  %v845_v15 = vmul.f32 0.125, %v3009_v13 }
 0xa0e   : > { %848 = vadd.xlane.f32.xlu0 %v847_v14 }
 0xa0f   : > { %v851_v16 = vmul.f32 %v3595_v53, %v845_v15 }
 0xa11   : > { %v852_v17 = vsel %vm128_vm2, %v851_v16, 0.0 }
 0xa12   : > { %853 = vadd.xlane.f32.xlu1 %v852_v17 }
 0xa9b   : > { %v849_v18 = vpop.xlane.xlu0 %848 }
 0xa9c   : > { %v850_v19 = vmax.f32 %v849_v18, 1e-30 }
 0xa9e   : > { %3010 = vrcp.f32 %v850_v19 }
 0xa9f   : > { %v854_v20 = vpop.xlane.xlu1 %853 }
 0xaa0   : > { %v855_v21 = vmax.f32 %v854_v20, 1e-30 }
 0xaa2   : > { %3012 = vrcp.f32 %v855_v21 }
 0xaa8   : > { %v3011_v22 = vpop.eup %3010 }
 0xaa9   : > { %v857_v23 = vmul.f32 0.125, %v3011_v22 }
 0xaab   : > { %v860_v24 = vmul.f32 %v3591_v51, %v857_v23 }
 0xaac   : > { %v3013_v25 = vpop.eup %3012 }
 0xaad   : > { %v861_v26 = vsel %vm128_vm2, %v860_v24, 0.0  ;;  %v859_v27 = vmul.f32 0.125, %v3013_v25 }
 0xaae   : > { %v862_v28 = vrot.slane %v861_v26, 4 }
 0xaaf   : > { %v869_v29 = vmul.f32 %v3595_v53, %v859_v27 }
 0xab0   : > { %v863_v30 = vadd.f32 %v862_v28, %v861_v26 }
 0xab1   : > { %v870_v31 = vsel %vm128_vm2, %v869_v29, 0.0 }
 0xab2   : > { %v864_v32 = vrot.slane %v863_v30, 2  ;;  %v871_v33 = vrot.slane %v870_v31, 4 }
 0xab4   : > { %v872_v34 = vadd.f32 %v871_v33, %v870_v31  ;;  %v865_v35 = vadd.f32 %v864_v32, %v863_v30 }
 0xab6   : > { %v873_v36 = vrot.slane %v872_v34, 2  ;;  %v866_v37 = vrot.slane %v865_v35, 1 }
 0xab8   : > { %v867_v38 = vadd.f32 %v866_v37, %v865_v35  ;;  %v874_v39 = vadd.f32 %v873_v36, %v872_v34 }
 0xaba   : > { %v868_v40 = vmax.f32 %v867_v38, 1e-30  ;;  %v875_v42 = vrot.slane %v874_v39, 1 }
 0xabc   : > { %3014 = vrcp.f32 %v868_v40  ;;  %v876_v43 = vadd.f32 %v875_v42, %v874_v39 }
 0xabe   : > { %v877_v45 = vmax.f32 %v876_v43, 1e-30 }
 0xac0   : > { %3016 = vrcp.f32 %v877_v45 }
 0xac6   : > { %v3015_v46 = vpop.eup %3014 }
 0xac7   : > { %v879_v47 = vmul.f32 0.125, %v3015_v46 }
 0xac9   : > { %v882_v48 = vmul.f32 %v3591_v51, %v879_v47 }
 0xaca   : > { %v3017_v50 = vpop.eup %3016 }
 0xacb   : > { %v883_v52 = vsel %vm128_vm2, %v882_v48, 0.0  ;;  %v881_v54 = vmul.f32 0.125, %v3017_v50 }
 0xacc   : > { %884 = vadd.xlane.f32.xlu0 %v883_v52 }
 0xacd   : > { %v887_v55 = vmul.f32 %v3595_v53, %v881_v54 }
 0xacf   : > { %v888_v56 = vsel %vm128_vm2, %v887_v55, 0.0 }
 0xad0   : > { %889 = vadd.xlane.f32.xlu1 %v888_v56 }
 0xb59   : > { %v885_v57 = vpop.xlane.xlu0 %884 }
 0xb5a   : > { %v886_v58 = vmax.f32 %v885_v57, 1e-30 }
 0xb5c   : > { %3018 = vrcp.f32 %v886_v58 }
 0xb5d   : > { %v890_v59 = vpop.xlane.xlu1 %889 }
 0xb5e   : > { %v891_v61 = vmax.f32 %v890_v59, 1e-30 }
 0xb60   : > { %3020 = vrcp.f32 %v891_v61 }
 0xb66   : > { %v3019_v63 = vpop.eup %3018 }
 0xb67   : > { %v893_v0 = vmul.f32 0.125, %v3019_v63 }
 0xb69   : > { %v896_v1 = vmul.f32 %v3591_v51, %v893_v0 }
 0xb6a   : > { %v3021_v3 = vpop.eup %3020 }
 0xb6b   : > { %v897_v4 = vsel %vm128_vm2, %v896_v1, 0.0  ;;  %v895_v7 = vmul.f32 0.125, %v3021_v3 }
 0xb6c   : > { %v898_v8 = vrot.slane %v897_v4, 4 }
 0xb6d   : > { %v905_v9 = vmul.f32 %v3595_v53, %v895_v7 }
 0xb6e   : > { %v899_v10 = vadd.f32 %v898_v8, %v897_v4 }
 0xb6f   : > { %v906_v11 = vsel %vm128_vm2, %v905_v9, 0.0 }
 0xb70   : > { %v900_v12 = vrot.slane %v899_v10, 2  ;;  %v907_v13 = vrot.slane %v906_v11, 4 }
 0xb72   : > { %v908_v14 = vadd.f32 %v907_v13, %v906_v11  ;;  %v901_v15 = vadd.f32 %v900_v12, %v899_v10 }
 0xb74   : > { %v909_v16 = vrot.slane %v908_v14, 2  ;;  %v902_v17 = vrot.slane %v901_v15, 1 }
 0xb76   : > { %v903_v18 = vadd.f32 %v902_v17, %v901_v15  ;;  %v910_v19 = vadd.f32 %v909_v16, %v908_v14 }
 0xb78   : > { %v904_v20 = vmax.f32 %v903_v18, 1e-30  ;;  %v911_v21 = vrot.slane %v910_v19, 1 }
 0xb7a   : > { %3022 = vrcp.f32 %v904_v20  ;;  %v912_v22 = vadd.f32 %v911_v21, %v910_v19 }
 0xb7c   : > { %v913_v23 = vmax.f32 %v912_v22, 1e-30 }
 0xb7e   : > { %3024 = vrcp.f32 %v913_v23 }
 0xb84   : > { %v3023_v24 = vpop.eup %3022 }
 0xb85   : > { %v915_v25 = vmul.f32 0.125, %v3023_v24 }
 0xb87   : > { %v918_v26 = vmul.f32 %v3591_v51, %v915_v25 }
 0xb88   : > { %v3025_v27 = vpop.eup %3024 }
 0xb89   : > { %v919_v28 = vsel %vm128_vm2, %v918_v26, 0.0  ;;  %v917_v29 = vmul.f32 0.125, %v3025_v27 }
 0xb8a   : > { %920 = vadd.xlane.f32.xlu0 %v919_v28 }
 0xb8b   : > { %v923_v30 = vmul.f32 %v3595_v53, %v917_v29 }
 0xb8d   : > { %v924_v31 = vsel %vm128_vm2, %v923_v30, 0.0 }
 0xb8e   : > { %925 = vadd.xlane.f32.xlu1 %v924_v31 }
 0xc17   : > { %v921_v32 = vpop.xlane.xlu0 %920 }
 0xc18   : > { %v922_v33 = vmax.f32 %v921_v32, 1e-30 }
 0xc1a   : > { %3026 = vrcp.f32 %v922_v33 }
 0xc1b   : > { %v926_v34 = vpop.xlane.xlu1 %925 }
 0xc1c   : > { %v927_v35 = vmax.f32 %v926_v34, 1e-30 }
 0xc1e   : > { %3028 = vrcp.f32 %v927_v35 }
 0xc24   : > { %v3027_v36 = vpop.eup %3026 }
 0xc25   : > { %v929_v37 = vmul.f32 0.125, %v3027_v36 }
 0xc27   : > { %v932_v38 = vmul.f32 %v3591_v51, %v929_v37 }
 0xc28   : > { %v3029_v39 = vpop.eup %3028 }
 0xc29   : > { %v933_v40 = vsel %vm128_vm2, %v932_v38, 0.0  ;;  %v931_v42 = vmul.f32 0.125, %v3029_v39 }
 0xc2a   : > { %v934_v43 = vrot.slane %v933_v40, 4 }
 0xc2b   : > { %v941_v45 = vmul.f32 %v3595_v53, %v931_v42 }
 0xc2c   : > { %v935_v46 = vadd.f32 %v934_v43, %v933_v40 }
 0xc2d   : > { %v942_v47 = vsel %vm128_vm2, %v941_v45, 0.0 }
 0xc2e   : > { %v936_v48 = vrot.slane %v935_v46, 2  ;;  %v943_v50 = vrot.slane %v942_v47, 4 }
 0xc30   : > { %v944_v52 = vadd.f32 %v943_v50, %v942_v47  ;;  %v937_v54 = vadd.f32 %v936_v48, %v935_v46 }
 0xc32   : > { %v945_v55 = vrot.slane %v944_v52, 2  ;;  %v938_v56 = vrot.slane %v937_v54, 1 }
 0xc34   : > { %v939_v57 = vadd.f32 %v938_v56, %v937_v54  ;;  %v946_v58 = vadd.f32 %v945_v55, %v944_v52 }
 0xc36   : > { %v940_v59 = vmax.f32 %v939_v57, 1e-30  ;;  %v947_v61 = vrot.slane %v946_v58, 1 }
 0xc38   : > { %3030 = vrcp.f32 %v940_v59  ;;  %v948_v63 = vadd.f32 %v947_v61, %v946_v58 }
 0xc3a   : > { %v949_v0 = vmax.f32 %v948_v63, 1e-30 }
 0xc3c   : > { %3032 = vrcp.f32 %v949_v0 }
 0xc42   : > { %v3031_v1 = vpop.eup %3030 }
 0xc43   : > { %v951_v3 = vmul.f32 0.125, %v3031_v1 }
 0xc45   : > { %v954_v4 = vmul.f32 %v3591_v51, %v951_v3 }
 0xc46   : > { %v3033_v7 = vpop.eup %3032 }
 0xc47   : > { %v955_v8 = vsel %vm128_vm2, %v954_v4, 0.0  ;;  %v953_v9 = vmul.f32 0.125, %v3033_v7 }
 0xc48   : > { %956 = vadd.xlane.f32.xlu0 %v955_v8 }
 0xc49   : > { %v959_v10 = vmul.f32 %v3595_v53, %v953_v9 }
 0xc4b   : > { %v960_v11 = vsel %vm128_vm2, %v959_v10, 0.0 }
 0xc4c   : > { %961 = vadd.xlane.f32.xlu1 %v960_v11 }
 0xcd5   : > { %v957_v12 = vpop.xlane.xlu0 %956 }
 0xcd6   : > { %v958_v13 = vmax.f32 %v957_v12, 1e-30 }
 0xcd8   : > { %3034 = vrcp.f32 %v958_v13 }
 0xcd9   : > { %v962_v14 = vpop.xlane.xlu1 %961 }
 0xcda   : > { %v963_v15 = vmax.f32 %v962_v14, 1e-30 }
 0xcdc   : > { %3036 = vrcp.f32 %v963_v15 }
 0xce2   : > { %v3035_v16 = vpop.eup %3034 }
 0xce3   : > { %v965_v17 = vmul.f32 0.125, %v3035_v16 }
 0xce5   : > { %v968_v18 = vmul.f32 %v3591_v51, %v965_v17 }
 0xce6   : > { %v3037_v19 = vpop.eup %3036 }
 0xce7   : > { %v969_v20 = vsel %vm128_vm2, %v968_v18, 0.0  ;;  %v967_v21 = vmul.f32 0.125, %v3037_v19 }
 0xce8   : > { %v970_v22 = vrot.slane %v969_v20, 4 }
 0xce9   : > { %v977_v23 = vmul.f32 %v3595_v53, %v967_v21 }
 0xcea   : > { %v971_v24 = vadd.f32 %v970_v22, %v969_v20 }
 0xceb   : > { %v978_v25 = vsel %vm128_vm2, %v977_v23, 0.0 }
 0xcec   : > { %v972_v26 = vrot.slane %v971_v24, 2  ;;  %v979_v27 = vrot.slane %v978_v25, 4 }
 0xcee   : > { %v980_v28 = vadd.f32 %v979_v27, %v978_v25  ;;  %v973_v29 = vadd.f32 %v972_v26, %v971_v24 }
 0xcf0   : > { %v981_v30 = vrot.slane %v980_v28, 2  ;;  %v974_v31 = vrot.slane %v973_v29, 1 }
 0xcf2   : > { %v975_v32 = vadd.f32 %v974_v31, %v973_v29  ;;  %v982_v33 = vadd.f32 %v981_v30, %v980_v28 }
 0xcf4   : > { %v976_v34 = vmax.f32 %v975_v32, 1e-30  ;;  %v983_v35 = vrot.slane %v982_v33, 1 }
 0xcf6   : > { %3038 = vrcp.f32 %v976_v34  ;;  %v984_v36 = vadd.f32 %v983_v35, %v982_v33 }
 0xcf8   : > { %v985_v37 = vmax.f32 %v984_v36, 1e-30 }
 0xcfa   : > { %3040 = vrcp.f32 %v985_v37 }
 0xd00   : > { %v3039_v38 = vpop.eup %3038 }
 0xd01   : > { %v987_v39 = vmul.f32 0.125, %v3039_v38 }
 0xd03   : > { %v990_v40 = vmul.f32 %v3591_v51, %v987_v39 }
 0xd04   : > { %v3041_v42 = vpop.eup %3040 }
 0xd05   : > { %v991_v43 = vsel %vm128_vm2, %v990_v40, 0.0  ;;  %v989_v45 = vmul.f32 0.125, %v3041_v42 }
 0xd06   : > { %992 = vadd.xlane.f32.xlu0 %v991_v43 }
 0xd07   : > { %v995_v46 = vmul.f32 %v3595_v53, %v989_v45 }
 0xd09   : > { %v996_v47 = vsel %vm128_vm2, %v995_v46, 0.0 }
 0xd0a   : > { %997 = vadd.xlane.f32.xlu1 %v996_v47 }
 0xd93   : > { %v993_v48 = vpop.xlane.xlu0 %992 }
 0xd94   : > { %v994_v50 = vmax.f32 %v993_v48, 1e-30 }
 0xd96   : > { %3042 = vrcp.f32 %v994_v50 }
 0xd97   : > { %v998_v52 = vpop.xlane.xlu1 %997 }
 0xd98   : > { %v999_v54 = vmax.f32 %v998_v52, 1e-30 }
 0xd9a   : > { %3044 = vrcp.f32 %v999_v54 }
 0xda0   : > { %v3043_v55 = vpop.eup %3042 }
 0xda1   : > { %v1001_v56 = vmul.f32 0.125, %v3043_v55 }
 0xda3   : > { %v1004_v57 = vmul.f32 %v3591_v51, %v1001_v56 }
 0xda4   : > { %v3045_v58 = vpop.eup %3044 }
 0xda5   : > { %v1005_v59 = vsel %vm128_vm2, %v1004_v57, 0.0  ;;  %v1003_v61 = vmul.f32 0.125, %v3045_v58 }
 0xda6   : > { %v1006_v63 = vrot.slane %v1005_v59, 4 }
 0xda7   : > { %v1013_v0 = vmul.f32 %v3595_v53, %v1003_v61 }
 0xda8   : > { %v1007_v1 = vadd.f32 %v1006_v63, %v1005_v59 }
 0xda9   : > { %v1014_v3 = vsel %vm128_vm2, %v1013_v0, 0.0 }
 0xdaa   : > { %v1008_v4 = vrot.slane %v1007_v1, 2  ;;  %v1015_v7 = vrot.slane %v1014_v3, 4 }
 0xdac   : > { %v1016_v8 = vadd.f32 %v1015_v7, %v1014_v3  ;;  %v1009_v9 = vadd.f32 %v1008_v4, %v1007_v1 }
 0xdae   : > { %v1017_v10 = vrot.slane %v1016_v8, 2  ;;  %v1010_v11 = vrot.slane %v1009_v9, 1 }
 0xdb0   : > { %v1011_v12 = vadd.f32 %v1010_v11, %v1009_v9  ;;  %v1018_v13 = vadd.f32 %v1017_v10, %v1016_v8 }
 0xdb2   : > { %v1012_v14 = vmax.f32 %v1011_v12, 1e-30  ;;  %v1019_v15 = vrot.slane %v1018_v13, 1 }
 0xdb4   : > { %3046 = vrcp.f32 %v1012_v14  ;;  %v1020_v16 = vadd.f32 %v1019_v15, %v1018_v13 }
 0xdb6   : > { %v1021_v17 = vmax.f32 %v1020_v16, 1e-30 }
 0xdb8   : > { %3048 = vrcp.f32 %v1021_v17 }
 0xdbe   : > { %v3047_v18 = vpop.eup %3046 }
 0xdbf   : > { %v1023_v19 = vmul.f32 0.125, %v3047_v18 }
 0xdc1   : > { %v1026_v20 = vmul.f32 %v3591_v51, %v1023_v19 }
 0xdc2   : > { %v3049_v21 = vpop.eup %3048 }
 0xdc3   : > { %v1027_v22 = vsel %vm128_vm2, %v1026_v20, 0.0  ;;  %v1025_v23 = vmul.f32 0.125, %v3049_v21 }
 0xdc4   : > { %1028 = vadd.xlane.f32.xlu0 %v1027_v22 }
 0xdc5   : > { %v1031_v24 = vmul.f32 %v3595_v53, %v1025_v23 }
 0xdc7   : > { %v1032_v25 = vsel %vm128_vm2, %v1031_v24, 0.0 }
 0xdc8   : > { %1033 = vadd.xlane.f32.xlu1 %v1032_v25 }
 0xe51   : > { %v1029_v26 = vpop.xlane.xlu0 %1028 }
 0xe52   : > { %v1030_v27 = vmax.f32 %v1029_v26, 1e-30 }
 0xe54   : > { %3050 = vrcp.f32 %v1030_v27 }
 0xe55   : > { %v1034_v28 = vpop.xlane.xlu1 %1033 }
 0xe56   : > { %v1035_v29 = vmax.f32 %v1034_v28, 1e-30 }
 0xe58   : > { %3052 = vrcp.f32 %v1035_v29 }
 0xe5e   : > { %v3051_v30 = vpop.eup %3050 }
 0xe5f   : > { %v1037_v31 = vmul.f32 0.125, %v3051_v30 }
 0xe61   : > { %v1040_v32 = vmul.f32 %v3591_v51, %v1037_v31 }
 0xe62   : > { %v3053_v33 = vpop.eup %3052 }
 0xe63   : > { %v1041_v34 = vsel %vm128_vm2, %v1040_v32, 0.0  ;;  %v1039_v35 = vmul.f32 0.125, %v3053_v33 }
 0xe64   : > { %v1042_v36 = vrot.slane %v1041_v34, 4 }
 0xe65   : > { %v1049_v37 = vmul.f32 %v3595_v53, %v1039_v35 }
 0xe66   : > { %v1043_v38 = vadd.f32 %v1042_v36, %v1041_v34 }
 0xe67   : > { %v1050_v39 = vsel %vm128_vm2, %v1049_v37, 0.0 }
 0xe68   : > { %v1044_v40 = vrot.slane %v1043_v38, 2  ;;  %v1051_v42 = vrot.slane %v1050_v39, 4 }
 0xe6a   : > { %v1052_v43 = vadd.f32 %v1051_v42, %v1050_v39  ;;  %v1045_v45 = vadd.f32 %v1044_v40, %v1043_v38 }
 0xe6c   : > { %v1053_v46 = vrot.slane %v1052_v43, 2  ;;  %v1046_v47 = vrot.slane %v1045_v45, 1 }
 0xe6e   : > { %v1047_v48 = vadd.f32 %v1046_v47, %v1045_v45  ;;  %v1054_v50 = vadd.f32 %v1053_v46, %v1052_v43 }
 0xe70   : > { %v1048_v52 = vmax.f32 %v1047_v48, 1e-30  ;;  %v1055_v54 = vrot.slane %v1054_v50, 1 }
 0xe72   : > { %3054 = vrcp.f32 %v1048_v52  ;;  %v1056_v55 = vadd.f32 %v1055_v54, %v1054_v50 }
 0xe74   : > { %v1057_v56 = vmax.f32 %v1056_v55, 1e-30 }
 0xe76   : > { %3056 = vrcp.f32 %v1057_v56 }
 0xe7c   : > { %v3055_v57 = vpop.eup %3054 }
 0xe7d   : > { %v1059_v58 = vmul.f32 0.125, %v3055_v57 }
 0xe7f   : > { %v1062_v59 = vmul.f32 %v3591_v51, %v1059_v58 }
 0xe80   : > { %v3057_v61 = vpop.eup %3056 }
 0xe81   : > { %v1063_v63 = vsel %vm128_vm2, %v1062_v59, 0.0  ;;  %v1061_v0 = vmul.f32 0.125, %v3057_v61 }
 0xe82   : > { %1064 = vadd.xlane.f32.xlu0 %v1063_v63 }
 0xe83   : > { %v1067_v1 = vmul.f32 %v3595_v53, %v1061_v0 }
 0xe85   : > { %v1068_v3 = vsel %vm128_vm2, %v1067_v1, 0.0 }
 0xe86   : > { %1069 = vadd.xlane.f32.xlu1 %v1068_v3 }
 0xf0f   : > { %v1065_v4 = vpop.xlane.xlu0 %1064 }
 0xf10   : > { %v1066_v7 = vmax.f32 %v1065_v4, 1e-30 }
 0xf12   : > { %3058 = vrcp.f32 %v1066_v7 }
 0xf13   : > { %v1070_v8 = vpop.xlane.xlu1 %1069 }
 0xf14   : > { %v1071_v9 = vmax.f32 %v1070_v8, 1e-30 }
 0xf16   : > { %3060 = vrcp.f32 %v1071_v9 }
 0xf1c   : > { %v3059_v10 = vpop.eup %3058 }
 0xf1d   : > { %v1073_v11 = vmul.f32 0.125, %v3059_v10 }
 0xf1f   : > { %v1076_v12 = vmul.f32 %v3591_v51, %v1073_v11 }
 0xf20   : > { %v3061_v13 = vpop.eup %3060 }
 0xf21   : > { %v1077_v14 = vsel %vm128_vm2, %v1076_v12, 0.0  ;;  %v1075_v15 = vmul.f32 0.125, %v3061_v13 }
 0xf22   : > { %v1078_v16 = vrot.slane %v1077_v14, 4 }
 0xf23   : > { %v1085_v17 = vmul.f32 %v3595_v53, %v1075_v15 }
 0xf24   : > { %v1079_v18 = vadd.f32 %v1078_v16, %v1077_v14 }
 0xf25   : > { %v1086_v19 = vsel %vm128_vm2, %v1085_v17, 0.0 }
 0xf26   : > { %v1080_v20 = vrot.slane %v1079_v18, 2  ;;  %v1087_v21 = vrot.slane %v1086_v19, 4 }
 0xf28   : > { %v1088_v22 = vadd.f32 %v1087_v21, %v1086_v19  ;;  %v1081_v23 = vadd.f32 %v1080_v20, %v1079_v18 }
 0xf2a   : > { %v1089_v24 = vrot.slane %v1088_v22, 2  ;;  %v1082_v25 = vrot.slane %v1081_v23, 1 }
 0xf2c   : > { %v1083_v26 = vadd.f32 %v1082_v25, %v1081_v23  ;;  %v1090_v27 = vadd.f32 %v1089_v24, %v1088_v22 }
 0xf2e   : > { %v1084_v28 = vmax.f32 %v1083_v26, 1e-30  ;;  %v1091_v29 = vrot.slane %v1090_v27, 1 }
 0xf30   : > { %3062 = vrcp.f32 %v1084_v28  ;;  %v1092_v30 = vadd.f32 %v1091_v29, %v1090_v27 }
 0xf32   : > { %v1093_v31 = vmax.f32 %v1092_v30, 1e-30 }
 0xf34   : > { %3064 = vrcp.f32 %v1093_v31 }
 0xf3a   : > { %v3063_v32 = vpop.eup %3062 }
 0xf3b   : > { %v1095_v33 = vmul.f32 0.125, %v3063_v32 }
 0xf3d   : > { %v1098_v34 = vmul.f32 %v3591_v51, %v1095_v33 }
 0xf3e   : > { %v3065_v35 = vpop.eup %3064 }
 0xf3f   : > { %v1099_v36 = vsel %vm128_vm2, %v1098_v34, 0.0  ;;  %v1097_v37 = vmul.f32 0.125, %v3065_v35 }
 0xf40   : > { %1100 = vadd.xlane.f32.xlu0 %v1099_v36 }
 0xf41   : > { %v1103_v38 = vmul.f32 %v3595_v53, %v1097_v37 }
 0xf43   : > { %v1104_v39 = vsel %vm128_vm2, %v1103_v38, 0.0 }
 0xf44   : > { %1105 = vadd.xlane.f32.xlu1 %v1104_v39 }
 0xfcd   : > { %v1101_v40 = vpop.xlane.xlu0 %1100 }
 0xfce   : > { %v1102_v42 = vmax.f32 %v1101_v40, 1e-30 }
 0xfd0   : > { %3066 = vrcp.f32 %v1102_v42 }
 0xfd1   : > { %v1106_v43 = vpop.xlane.xlu1 %1105 }
 0xfd2   : > { %v1107_v45 = vmax.f32 %v1106_v43, 1e-30 }
 0xfd4   : > { %3068 = vrcp.f32 %v1107_v45 }
 0xfda   : > { %v3067_v46 = vpop.eup %3066 }
 0xfdb   : > { %v1109_v47 = vmul.f32 0.125, %v3067_v46 }
 0xfdd   : > { %v1112_v48 = vmul.f32 %v3591_v51, %v1109_v47 }
 0xfde   : > { %v3069_v50 = vpop.eup %3068 }
 0xfdf   : > { %v1113_v52 = vsel %vm128_vm2, %v1112_v48, 0.0  ;;  %v1111_v54 = vmul.f32 0.125, %v3069_v50 }
 0xfe0   : > { %v1114_v55 = vrot.slane %v1113_v52, 4 }
 0xfe1   : > { %v1121_v56 = vmul.f32 %v3595_v53, %v1111_v54 }
 0xfe2   : > { %v1115_v57 = vadd.f32 %v1114_v55, %v1113_v52 }
 0xfe3   : > { %v1122_v58 = vsel %vm128_vm2, %v1121_v56, 0.0 }
 0xfe4   : > { %v1116_v59 = vrot.slane %v1115_v57, 2  ;;  %v1123_v61 = vrot.slane %v1122_v58, 4 }
 0xfe6   : > { %v1124_v63 = vadd.f32 %v1123_v61, %v1122_v58  ;;  %v1117_v0 = vadd.f32 %v1116_v59, %v1115_v57 }
 0xfe8   : > { %v1125_v1 = vrot.slane %v1124_v63, 2  ;;  %v1118_v3 = vrot.slane %v1117_v0, 1 }
 0xfea   : > { %v1119_v4 = vadd.f32 %v1118_v3, %v1117_v0  ;;  %v1126_v7 = vadd.f32 %v1125_v1, %v1124_v63 }
 0xfec   : > { %v1120_v8 = vmax.f32 %v1119_v4, 1e-30  ;;  %v1127_v9 = vrot.slane %v1126_v7, 1 }
 0xfee   : > { %3070 = vrcp.f32 %v1120_v8  ;;  %v1128_v10 = vadd.f32 %v1127_v9, %v1126_v7 }
 0xff0   : > { %v1129_v11 = vmax.f32 %v1128_v10, 1e-30 }
 0xff2   : > { %3072 = vrcp.f32 %v1129_v11 }
 0xff8   : > { %v3071_v12 = vpop.eup %3070 }
 0xff9   : > { %v1131_v13 = vmul.f32 0.125, %v3071_v12 }
 0xffb   : > { %v1134_v14 = vmul.f32 %v3591_v51, %v1131_v13 }
 0xffc   : > { %v3073_v15 = vpop.eup %3072 }
 0xffd   : > { %v1135_v16 = vsel %vm128_vm2, %v1134_v14, 0.0  ;;  %v1133_v17 = vmul.f32 0.125, %v3073_v15 }
 0xffe   : > { %1136 = vadd.xlane.f32.xlu0 %v1135_v16 }
 0xfff   : > { %v1139_v18 = vmul.f32 %v3595_v53, %v1133_v17 }
0x1001   : > { %v1140_v19 = vsel %vm128_vm2, %v1139_v18, 0.0 }
0x1002   : > { %1141 = vadd.xlane.f32.xlu1 %v1140_v19 }
0x108b   : > { %v1137_v20 = vpop.xlane.xlu0 %1136 }
0x108c   : > { %v1138_v21 = vmax.f32 %v1137_v20, 1e-30 }
0x108e   : > { %3074 = vrcp.f32 %v1138_v21 }
0x108f   : > { %v1142_v22 = vpop.xlane.xlu1 %1141 }
0x1090   : > { %v1143_v23 = vmax.f32 %v1142_v22, 1e-30 }
0x1092   : > { %3076 = vrcp.f32 %v1143_v23 }
0x1098   : > { %v3075_v24 = vpop.eup %3074 }
0x1099   : > { %v1145_v25 = vmul.f32 0.125, %v3075_v24 }
0x109b   : > { %v1148_v26 = vmul.f32 %v3591_v51, %v1145_v25 }
0x109c   : > { %v3077_v27 = vpop.eup %3076 }
0x109d   : > { %v1149_v28 = vsel %vm128_vm2, %v1148_v26, 0.0  ;;  %v1147_v29 = vmul.f32 0.125, %v3077_v27 }
0x109e   : > { %v1150_v30 = vrot.slane %v1149_v28, 4 }
0x109f   : > { %v1157_v31 = vmul.f32 %v3595_v53, %v1147_v29 }
0x10a0   : > { %v1151_v32 = vadd.f32 %v1150_v30, %v1149_v28 }
0x10a1   : > { %v1158_v33 = vsel %vm128_vm2, %v1157_v31, 0.0 }
0x10a2   : > { %v1152_v34 = vrot.slane %v1151_v32, 2  ;;  %v1159_v35 = vrot.slane %v1158_v33, 4 }
0x10a4   : > { %v1160_v36 = vadd.f32 %v1159_v35, %v1158_v33  ;;  %v1153_v37 = vadd.f32 %v1152_v34, %v1151_v32 }
0x10a6   : > { %v1161_v38 = vrot.slane %v1160_v36, 2  ;;  %v1154_v39 = vrot.slane %v1153_v37, 1 }
0x10a8   : > { %v1155_v40 = vadd.f32 %v1154_v39, %v1153_v37  ;;  %v1162_v42 = vadd.f32 %v1161_v38, %v1160_v36 }
0x10aa   : > { %v1156_v43 = vmax.f32 %v1155_v40, 1e-30  ;;  %v1163_v45 = vrot.slane %v1162_v42, 1 }
0x10ac   : > { %3078 = vrcp.f32 %v1156_v43  ;;  %v1164_v46 = vadd.f32 %v1163_v45, %v1162_v42 }
0x10ae   : > { %v1165_v47 = vmax.f32 %v1164_v46, 1e-30 }
0x10b0   : > { %3080 = vrcp.f32 %v1165_v47 }
0x10b6   : > { %v3079_v48 = vpop.eup %3078 }
0x10b7   : > { %v1167_v50 = vmul.f32 0.125, %v3079_v48 }
0x10b9   : > { %v1170_v52 = vmul.f32 %v3591_v51, %v1167_v50 }
0x10ba   : > { %v3081_v54 = vpop.eup %3080 }
0x10bb   : > { %v1171_v55 = vsel %vm128_vm2, %v1170_v52, 0.0  ;;  %v1169_v56 = vmul.f32 0.125, %v3081_v54 }
0x10bc   : > { %1172 = vadd.xlane.f32.xlu0 %v1171_v55 }
0x10bd   : > { %v1175_v57 = vmul.f32 %v3595_v53, %v1169_v56 }
0x10bf   : > { %v1176_v58 = vsel %vm128_vm2, %v1175_v57, 0.0 }
0x10c0   : > { %1177 = vadd.xlane.f32.xlu1 %v1176_v58 }
0x1149   : > { %v1173_v59 = vpop.xlane.xlu0 %1172 }
0x114a   : > { %v1174_v61 = vmax.f32 %v1173_v59, 1e-30 }
0x114c   : > { %3082 = vrcp.f32 %v1174_v61 }
0x114d   : > { %v1178_v63 = vpop.xlane.xlu1 %1177 }
0x114e   : > { %v1179_v0 = vmax.f32 %v1178_v63, 1e-30 }
0x1150   : > { %3084 = vrcp.f32 %v1179_v0 }
0x1156   : > { %v3083_v1 = vpop.eup %3082 }
0x1157   : > { %v1181_v3 = vmul.f32 0.125, %v3083_v1 }
0x1159   : > { %v1184_v4 = vmul.f32 %v3591_v51, %v1181_v3 }
0x115a   : > { %v3085_v7 = vpop.eup %3084 }
0x115b   : > { %v1185_v8 = vsel %vm128_vm2, %v1184_v4, 0.0  ;;  %v1183_v9 = vmul.f32 0.125, %v3085_v7 }
0x115c   : > { %v1186_v10 = vrot.slane %v1185_v8, 4 }
0x115d   : > { %v1193_v11 = vmul.f32 %v3595_v53, %v1183_v9 }
0x115e   : > { %v1187_v12 = vadd.f32 %v1186_v10, %v1185_v8 }
0x115f   : > { %v1194_v13 = vsel %vm128_vm2, %v1193_v11, 0.0 }
0x1160   : > { %v1188_v14 = vrot.slane %v1187_v12, 2  ;;  %v1195_v15 = vrot.slane %v1194_v13, 4 }
0x1162   : > { %v1196_v16 = vadd.f32 %v1195_v15, %v1194_v13  ;;  %v1189_v17 = vadd.f32 %v1188_v14, %v1187_v12 }
0x1164   : > { %v1197_v18 = vrot.slane %v1196_v16, 2  ;;  %v1190_v19 = vrot.slane %v1189_v17, 1 }
0x1166   : > { %v1191_v20 = vadd.f32 %v1190_v19, %v1189_v17  ;;  %v1198_v21 = vadd.f32 %v1197_v18, %v1196_v16 }
0x1168   : > { %v1192_v22 = vmax.f32 %v1191_v20, 1e-30  ;;  %v1199_v23 = vrot.slane %v1198_v21, 1 }
0x116a   : > { %3086 = vrcp.f32 %v1192_v22  ;;  %v1200_v24 = vadd.f32 %v1199_v23, %v1198_v21 }
0x116c   : > { %v1201_v25 = vmax.f32 %v1200_v24, 1e-30 }
0x116e   : > { %3088 = vrcp.f32 %v1201_v25 }
0x1174   : > { %v3087_v26 = vpop.eup %3086 }
0x1175   : > { %v1203_v27 = vmul.f32 0.125, %v3087_v26 }
0x1177   : > { %v1206_v28 = vmul.f32 %v3591_v51, %v1203_v27 }
0x1178   : > { %v3089_v29 = vpop.eup %3088 }
0x1179   : > { %v1207_v30 = vsel %vm128_vm2, %v1206_v28, 0.0  ;;  %v1205_v31 = vmul.f32 0.125, %v3089_v29 }
0x117a   : > { %1208 = vadd.xlane.f32.xlu0 %v1207_v30 }
0x117b   : > { %v1211_v32 = vmul.f32 %v3595_v53, %v1205_v31 }
0x117d   : > { %v1212_v33 = vsel %vm128_vm2, %v1211_v32, 0.0 }
0x117e   : > { %1213 = vadd.xlane.f32.xlu1 %v1212_v33 }
0x1207   : > { %v1209_v34 = vpop.xlane.xlu0 %1208 }
0x1208   : > { %v1210_v35 = vmax.f32 %v1209_v34, 1e-30 }
0x120a   : > { %3090 = vrcp.f32 %v1210_v35 }
0x120b   : > { %v1214_v36 = vpop.xlane.xlu1 %1213 }
0x120c   : > { %v1215_v37 = vmax.f32 %v1214_v36, 1e-30 }
0x120e   : > { %3092 = vrcp.f32 %v1215_v37 }
0x1214   : > { %v3091_v38 = vpop.eup %3090 }
0x1215   : > { %v1217_v39 = vmul.f32 0.125, %v3091_v38 }
0x1217   : > { %v1220_v40 = vmul.f32 %v3591_v51, %v1217_v39 }
0x1218   : > { %v3093_v42 = vpop.eup %3092 }
0x1219   : > { %v1221_v43 = vsel %vm128_vm2, %v1220_v40, 0.0  ;;  %v1219_v45 = vmul.f32 0.125, %v3093_v42 }
0x121a   : > { %v1222_v46 = vrot.slane %v1221_v43, 4 }
0x121b   : > { %v1229_v47 = vmul.f32 %v3595_v53, %v1219_v45 }
0x121c   : > { %v1223_v48 = vadd.f32 %v1222_v46, %v1221_v43 }
0x121d   : > { %v1230_v50 = vsel %vm128_vm2, %v1229_v47, 0.0 }
0x121e   : > { %v1224_v52 = vrot.slane %v1223_v48, 2  ;;  %v1231_v54 = vrot.slane %v1230_v50, 4 }
0x1220   : > { %v1232_v55 = vadd.f32 %v1231_v54, %v1230_v50  ;;  %v1225_v56 = vadd.f32 %v1224_v52, %v1223_v48 }
0x1222   : > { %v1233_v57 = vrot.slane %v1232_v55, 2  ;;  %v1226_v58 = vrot.slane %v1225_v56, 1 }
0x1224   : > { %v1227_v59 = vadd.f32 %v1226_v58, %v1225_v56  ;;  %v1234_v61 = vadd.f32 %v1233_v57, %v1232_v55 }
0x1226   : > { %v1228_v63 = vmax.f32 %v1227_v59, 1e-30  ;;  %v1235_v0 = vrot.slane %v1234_v61, 1 }
0x1228   : > { %3094 = vrcp.f32 %v1228_v63  ;;  %v1236_v1 = vadd.f32 %v1235_v0, %v1234_v61 }
0x122a   : > { %v1237_v3 = vmax.f32 %v1236_v1, 1e-30 }
0x122c   : > { %3096 = vrcp.f32 %v1237_v3 }
0x1232   : > { %v3095_v4 = vpop.eup %3094 }
0x1233   : > { %v1239_v7 = vmul.f32 0.125, %v3095_v4 }
0x1235   : > { %v1242_v8 = vmul.f32 %v3591_v51, %v1239_v7 }
0x1236   : > { %v3097_v9 = vpop.eup %3096 }
0x1237   : > { %v1243_v10 = vsel %vm128_vm2, %v1242_v8, 0.0  ;;  %v1241_v11 = vmul.f32 0.125, %v3097_v9 }
0x1238   : > { %1244 = vadd.xlane.f32.xlu0 %v1243_v10 }
0x1239   : > { %v1247_v12 = vmul.f32 %v3595_v53, %v1241_v11 }
0x123b   : > { %v1248_v13 = vsel %vm128_vm2, %v1247_v12, 0.0 }
0x123c   : > { %1249 = vadd.xlane.f32.xlu1 %v1248_v13 }
0x12c5   : > { %v1245_v14 = vpop.xlane.xlu0 %1244 }
0x12c6   : > { %v1246_v15 = vmax.f32 %v1245_v14, 1e-30 }
0x12c8   : > { %3098 = vrcp.f32 %v1246_v15 }
0x12c9   : > { %v1250_v16 = vpop.xlane.xlu1 %1249 }
0x12ca   : > { %v1251_v17 = vmax.f32 %v1250_v16, 1e-30 }
0x12cc   : > { %3100 = vrcp.f32 %v1251_v17 }
0x12d2   : > { %v3099_v18 = vpop.eup %3098 }
0x12d3   : > { %v1253_v19 = vmul.f32 0.125, %v3099_v18 }
0x12d5   : > { %v1256_v20 = vmul.f32 %v3591_v51, %v1253_v19 }
0x12d6   : > { %v3101_v21 = vpop.eup %3100 }
0x12d7   : > { %v1257_v22 = vsel %vm128_vm2, %v1256_v20, 0.0  ;;  %v1255_v23 = vmul.f32 0.125, %v3101_v21 }
0x12d8   : > { %v1258_v24 = vrot.slane %v1257_v22, 4 }
0x12d9   : > { %v1265_v25 = vmul.f32 %v3595_v53, %v1255_v23 }
0x12da   : > { %v1259_v26 = vadd.f32 %v1258_v24, %v1257_v22 }
0x12db   : > { %v1266_v27 = vsel %vm128_vm2, %v1265_v25, 0.0 }
0x12dc   : > { %v1260_v28 = vrot.slane %v1259_v26, 2  ;;  %v1267_v29 = vrot.slane %v1266_v27, 4 }
0x12de   : > { %v1268_v30 = vadd.f32 %v1267_v29, %v1266_v27  ;;  %v1261_v31 = vadd.f32 %v1260_v28, %v1259_v26 }
0x12e0   : > { %v1269_v32 = vrot.slane %v1268_v30, 2  ;;  %v1262_v33 = vrot.slane %v1261_v31, 1 }
0x12e2   : > { %v1263_v34 = vadd.f32 %v1262_v33, %v1261_v31  ;;  %v1270_v35 = vadd.f32 %v1269_v32, %v1268_v30 }
0x12e4   : > { %v1264_v36 = vmax.f32 %v1263_v34, 1e-30  ;;  %v1271_v37 = vrot.slane %v1270_v35, 1 }
0x12e6   : > { %3102 = vrcp.f32 %v1264_v36  ;;  %v1272_v38 = vadd.f32 %v1271_v37, %v1270_v35 }
0x12e8   : > { %v1273_v39 = vmax.f32 %v1272_v38, 1e-30 }
0x12ea   : > { %3104 = vrcp.f32 %v1273_v39 }
0x12f0   : > { %v3103_v40 = vpop.eup %3102 }
0x12f1   : > { %v1275_v42 = vmul.f32 0.125, %v3103_v40 }
0x12f3   : > { %v1278_v43 = vmul.f32 %v3591_v51, %v1275_v42 }
0x12f4   : > { %v3105_v45 = vpop.eup %3104 }
0x12f5   : > { %v1279_v46 = vsel %vm128_vm2, %v1278_v43, 0.0  ;;  %v1277_v47 = vmul.f32 0.125, %v3105_v45 }
0x12f6   : > { %1280 = vadd.xlane.f32.xlu0 %v1279_v46 }
0x12f7   : > { %v1283_v48 = vmul.f32 %v3595_v53, %v1277_v47 }
0x12f9   : > { %v1284_v50 = vsel %vm128_vm2, %v1283_v48, 0.0 }
0x12fa   : > { %1285 = vadd.xlane.f32.xlu1 %v1284_v50 }
0x1383   : > { %v1281_v52 = vpop.xlane.xlu0 %1280 }
0x1384   : > { %v1282_v54 = vmax.f32 %v1281_v52, 1e-30 }
0x1386   : > { %3106 = vrcp.f32 %v1282_v54 }
0x1387   : > { %v1286_v55 = vpop.xlane.xlu1 %1285 }
0x1388   : > { %v1287_v56 = vmax.f32 %v1286_v55, 1e-30 }
0x138a   : > { %3108 = vrcp.f32 %v1287_v56 }
0x1390   : > { %v3107_v57 = vpop.eup %3106 }
0x1391   : > { %v1289_v58 = vmul.f32 0.125, %v3107_v57 }
0x1393   : > { %v1292_v59 = vmul.f32 %v3591_v51, %v1289_v58 }
0x1394   : > { %v3109_v61 = vpop.eup %3108 }
0x1395   : > { %v1293_v63 = vsel %vm128_vm2, %v1292_v59, 0.0  ;;  %v1291_v0 = vmul.f32 0.125, %v3109_v61 }
0x1396   : > { %v1294_v1 = vrot.slane %v1293_v63, 4 }
0x1397   : > { %v1301_v3 = vmul.f32 %v3595_v53, %v1291_v0 }
0x1398   : > { %v1295_v4 = vadd.f32 %v1294_v1, %v1293_v63 }
0x1399   : > { %v1302_v7 = vsel %vm128_vm2, %v1301_v3, 0.0 }
0x139a   : > { %v1296_v8 = vrot.slane %v1295_v4, 2  ;;  %v1303_v9 = vrot.slane %v1302_v7, 4 }
0x139c   : > { %v1304_v10 = vadd.f32 %v1303_v9, %v1302_v7  ;;  %v1297_v11 = vadd.f32 %v1296_v8, %v1295_v4 }
0x139e   : > { %v1305_v12 = vrot.slane %v1304_v10, 2  ;;  %v1298_v13 = vrot.slane %v1297_v11, 1 }
0x13a0   : > { %v1299_v14 = vadd.f32 %v1298_v13, %v1297_v11  ;;  %v1306_v15 = vadd.f32 %v1305_v12, %v1304_v10 }
0x13a2   : > { %v1300_v16 = vmax.f32 %v1299_v14, 1e-30  ;;  %v1307_v17 = vrot.slane %v1306_v15, 1 }
0x13a4   : > { %3110 = vrcp.f32 %v1300_v16  ;;  %v1308_v18 = vadd.f32 %v1307_v17, %v1306_v15 }
0x13a6   : > { %v1309_v19 = vmax.f32 %v1308_v18, 1e-30 }
0x13a8   : > { %3112 = vrcp.f32 %v1309_v19 }
0x13ae   : > { %v3111_v20 = vpop.eup %3110 }
0x13af   : > { %v1311_v21 = vmul.f32 0.125, %v3111_v20 }
0x13b1   : > { %v1314_v22 = vmul.f32 %v3591_v51, %v1311_v21 }
0x13b2   : > { %v3113_v23 = vpop.eup %3112 }
0x13b3   : > { %v1315_v24 = vsel %vm128_vm2, %v1314_v22, 0.0  ;;  %v1313_v25 = vmul.f32 0.125, %v3113_v23 }
0x13b4   : > { %1316 = vadd.xlane.f32.xlu0 %v1315_v24 }
0x13b5   : > { %v1319_v26 = vmul.f32 %v3595_v53, %v1313_v25 }
0x13b7   : > { %v1320_v27 = vsel %vm128_vm2, %v1319_v26, 0.0 }
0x13b8   : > { %1321 = vadd.xlane.f32.xlu1 %v1320_v27 }
0x1441   : > { %v1317_v28 = vpop.xlane.xlu0 %1316 }
0x1442   : > { %v1318_v29 = vmax.f32 %v1317_v28, 1e-30 }
0x1444   : > { %3114 = vrcp.f32 %v1318_v29 }
0x1445   : > { %v1322_v30 = vpop.xlane.xlu1 %1321 }
0x1446   : > { %v1323_v31 = vmax.f32 %v1322_v30, 1e-30 }
0x1448   : > { %3116 = vrcp.f32 %v1323_v31 }
0x144e   : > { %v3115_v32 = vpop.eup %3114 }
0x144f   : > { %v1325_v33 = vmul.f32 0.125, %v3115_v32 }
0x1451   : > { %v1328_v34 = vmul.f32 %v3591_v51, %v1325_v33 }
0x1452   : > { %v3117_v35 = vpop.eup %3116 }
0x1453   : > { %v1329_v36 = vsel %vm128_vm2, %v1328_v34, 0.0  ;;  %v1327_v37 = vmul.f32 0.125, %v3117_v35 }
0x1454   : > { %v1330_v38 = vrot.slane %v1329_v36, 4 }
0x1455   : > { %v1337_v39 = vmul.f32 %v3595_v53, %v1327_v37 }
0x1456   : > { %v1331_v40 = vadd.f32 %v1330_v38, %v1329_v36 }
0x1457   : > { %v1338_v42 = vsel %vm128_vm2, %v1337_v39, 0.0 }
0x1458   : > { %v1332_v43 = vrot.slane %v1331_v40, 2  ;;  %v1339_v45 = vrot.slane %v1338_v42, 4 }
0x145a   : > { %v1340_v46 = vadd.f32 %v1339_v45, %v1338_v42  ;;  %v1333_v47 = vadd.f32 %v1332_v43, %v1331_v40 }
0x145c   : > { %v1341_v48 = vrot.slane %v1340_v46, 2  ;;  %v1334_v50 = vrot.slane %v1333_v47, 1 }
0x145e   : > { %v1335_v52 = vadd.f32 %v1334_v50, %v1333_v47  ;;  %v1342_v54 = vadd.f32 %v1341_v48, %v1340_v46 }
0x1460   : > { %v1336_v55 = vmax.f32 %v1335_v52, 1e-30  ;;  %v1343_v56 = vrot.slane %v1342_v54, 1 }
0x1462   : > { %3118 = vrcp.f32 %v1336_v55  ;;  %v1344_v57 = vadd.f32 %v1343_v56, %v1342_v54 }
0x1464   : > { %v1345_v58 = vmax.f32 %v1344_v57, 1e-30 }
0x1466   : > { %3120 = vrcp.f32 %v1345_v58 }
0x146c   : > { %v3119_v59 = vpop.eup %3118 }
0x146d   : > { %v1347_v61 = vmul.f32 0.125, %v3119_v59 }
0x146f   : > { %v1350_v63 = vmul.f32 %v3591_v51, %v1347_v61 }
0x1470   : > { %v3121_v0 = vpop.eup %3120 }
0x1471   : > { %v1351_v1 = vsel %vm128_vm2, %v1350_v63, 0.0  ;;  %v1349_v3 = vmul.f32 0.125, %v3121_v0 }
0x1472   : > { %1352 = vadd.xlane.f32.xlu0 %v1351_v1 }
0x1473   : > { %v1355_v4 = vmul.f32 %v3595_v53, %v1349_v3 }
0x1475   : > { %v1356_v7 = vsel %vm128_vm2, %v1355_v4, 0.0 }
0x1476   : > { %1357 = vadd.xlane.f32.xlu1 %v1356_v7 }
0x14ff   : > { %v1353_v8 = vpop.xlane.xlu0 %1352 }
0x1500   : > { %v1354_v9 = vmax.f32 %v1353_v8, 1e-30 }
0x1502   : > { %3122 = vrcp.f32 %v1354_v9 }
0x1503   : > { %v1358_v10 = vpop.xlane.xlu1 %1357 }
0x1504   : > { %v1359_v11 = vmax.f32 %v1358_v10, 1e-30 }
0x1506   : > { %3124 = vrcp.f32 %v1359_v11 }
0x150c   : > { %v3123_v12 = vpop.eup %3122 }
0x150d   : > { %v1361_v13 = vmul.f32 0.125, %v3123_v12 }
0x150f   : > { %v1364_v14 = vmul.f32 %v3591_v51, %v1361_v13 }
0x1510   : > { %v3125_v15 = vpop.eup %3124 }
0x1511   : > { %v1365_v16 = vsel %vm128_vm2, %v1364_v14, 0.0  ;;  %v1363_v17 = vmul.f32 0.125, %v3125_v15 }
0x1512   : > { %v1366_v18 = vrot.slane %v1365_v16, 4 }
0x1513   : > { %v1373_v19 = vmul.f32 %v3595_v53, %v1363_v17 }
0x1514   : > { %v1367_v20 = vadd.f32 %v1366_v18, %v1365_v16 }
0x1515   : > { %v1374_v21 = vsel %vm128_vm2, %v1373_v19, 0.0 }
0x1516   : > { %v1368_v22 = vrot.slane %v1367_v20, 2  ;;  %v1375_v23 = vrot.slane %v1374_v21, 4 }
0x1518   : > { %v1376_v24 = vadd.f32 %v1375_v23, %v1374_v21  ;;  %v1369_v25 = vadd.f32 %v1368_v22, %v1367_v20 }
0x151a   : > { %v1377_v26 = vrot.slane %v1376_v24, 2  ;;  %v1370_v27 = vrot.slane %v1369_v25, 1 }
0x151c   : > { %v1371_v28 = vadd.f32 %v1370_v27, %v1369_v25  ;;  %v1378_v29 = vadd.f32 %v1377_v26, %v1376_v24 }
0x151e   : > { %v1372_v30 = vmax.f32 %v1371_v28, 1e-30  ;;  %v1379_v31 = vrot.slane %v1378_v29, 1 }
0x1520   : > { %3126 = vrcp.f32 %v1372_v30  ;;  %v1380_v32 = vadd.f32 %v1379_v31, %v1378_v29 }
0x1522   : > { %v1381_v33 = vmax.f32 %v1380_v32, 1e-30 }
0x1524   : > { %3128 = vrcp.f32 %v1381_v33 }
0x152a   : > { %v3127_v34 = vpop.eup %3126 }
0x152b   : > { %v1383_v35 = vmul.f32 0.125, %v3127_v34 }
0x152d   : > { %v1386_v36 = vmul.f32 %v3591_v51, %v1383_v35 }
0x152e   : > { %v3129_v37 = vpop.eup %3128 }
0x152f   : > { %v1387_v38 = vsel %vm128_vm2, %v1386_v36, 0.0  ;;  %v1385_v39 = vmul.f32 0.125, %v3129_v37 }
0x1530   : > { %1388 = vadd.xlane.f32.xlu0 %v1387_v38 }
0x1531   : > { %v1391_v40 = vmul.f32 %v3595_v53, %v1385_v39 }
0x1533   : > { %v1392_v42 = vsel %vm128_vm2, %v1391_v40, 0.0 }
0x1534   : > { %1393 = vadd.xlane.f32.xlu1 %v1392_v42 }
0x15bd   : > { %v1389_v43 = vpop.xlane.xlu0 %1388 }
0x15be   : > { %v1390_v45 = vmax.f32 %v1389_v43, 1e-30 }
0x15c0   : > { %3130 = vrcp.f32 %v1390_v45 }
0x15c1   : > { %v1394_v46 = vpop.xlane.xlu1 %1393 }
0x15c2   : > { %v1395_v47 = vmax.f32 %v1394_v46, 1e-30 }
0x15c4   : > { %3132 = vrcp.f32 %v1395_v47 }
0x15ca   : > { %v3131_v48 = vpop.eup %3130 }
0x15cb   : > { %v1397_v50 = vmul.f32 0.125, %v3131_v48 }
0x15cd   : > { %v1400_v52 = vmul.f32 %v3591_v51, %v1397_v50 }
0x15ce   : > { %v3133_v54 = vpop.eup %3132 }
0x15cf   : > { %v1401_v55 = vsel %vm128_vm2, %v1400_v52, 0.0  ;;  %v1399_v56 = vmul.f32 0.125, %v3133_v54 }
0x15d0   : > { %v1402_v57 = vrot.slane %v1401_v55, 4 }
0x15d1   : > { %v1409_v58 = vmul.f32 %v3595_v53, %v1399_v56 }
0x15d2   : > { %v1403_v59 = vadd.f32 %v1402_v57, %v1401_v55 }
0x15d3   : > { %v1410_v61 = vsel %vm128_vm2, %v1409_v58, 0.0 }
0x15d4   : > { %v1404_v63 = vrot.slane %v1403_v59, 2  ;;  %v1411_v0 = vrot.slane %v1410_v61, 4 }
0x15d6   : > { %v1412_v1 = vadd.f32 %v1411_v0, %v1410_v61  ;;  %v1405_v3 = vadd.f32 %v1404_v63, %v1403_v59 }
0x15d8   : > { %v1413_v4 = vrot.slane %v1412_v1, 2  ;;  %v1406_v7 = vrot.slane %v1405_v3, 1 }
0x15da   : > { %v1407_v8 = vadd.f32 %v1406_v7, %v1405_v3  ;;  %v1414_v9 = vadd.f32 %v1413_v4, %v1412_v1 }
0x15dc   : > { %v1408_v10 = vmax.f32 %v1407_v8, 1e-30  ;;  %v1415_v11 = vrot.slane %v1414_v9, 1 }
0x15de   : > { %3134 = vrcp.f32 %v1408_v10  ;;  %v1416_v12 = vadd.f32 %v1415_v11, %v1414_v9 }
0x15e0   : > { %v1417_v13 = vmax.f32 %v1416_v12, 1e-30 }
0x15e2   : > { %3136 = vrcp.f32 %v1417_v13 }
0x15e8   : > { %v3135_v14 = vpop.eup %3134 }
0x15e9   : > { %v1419_v15 = vmul.f32 0.125, %v3135_v14 }
0x15eb   : > { %v1422_v16 = vmul.f32 %v3591_v51, %v1419_v15 }
0x15ec   : > { %v3137_v17 = vpop.eup %3136 }
0x15ed   : > { %v1423_v18 = vsel %vm128_vm2, %v1422_v16, 0.0  ;;  %v1421_v19 = vmul.f32 0.125, %v3137_v17 }
0x15ee   : > { %1424 = vadd.xlane.f32.xlu0 %v1423_v18 }
0x15ef   : > { %v1427_v20 = vmul.f32 %v3595_v53, %v1421_v19 }
0x15f1   : > { %v1428_v21 = vsel %vm128_vm2, %v1427_v20, 0.0 }
0x15f2   : > { %1429 = vadd.xlane.f32.xlu1 %v1428_v21 }
0x167b   : > { %v1425_v22 = vpop.xlane.xlu0 %1424 }
0x167c   : > { %v1426_v23 = vmax.f32 %v1425_v22, 1e-30 }
0x167e   : > { %3138 = vrcp.f32 %v1426_v23 }
0x167f   : > { %v1430_v24 = vpop.xlane.xlu1 %1429 }
0x1680   : > { %v1431_v25 = vmax.f32 %v1430_v24, 1e-30 }
0x1682   : > { %3140 = vrcp.f32 %v1431_v25 }
0x1688   : > { %v3139_v26 = vpop.eup %3138 }
0x1689   : > { %v1433_v27 = vmul.f32 0.125, %v3139_v26 }
0x168b   : > { %v1436_v28 = vmul.f32 %v3591_v51, %v1433_v27 }
0x168c   : > { %v3141_v29 = vpop.eup %3140 }
0x168d   : > { %v1437_v30 = vsel %vm128_vm2, %v1436_v28, 0.0  ;;  %v1435_v31 = vmul.f32 0.125, %v3141_v29 }
0x168e   : > { %v1438_v32 = vrot.slane %v1437_v30, 4 }
0x168f   : > { %v1445_v33 = vmul.f32 %v3595_v53, %v1435_v31 }
0x1690   : > { %v1439_v34 = vadd.f32 %v1438_v32, %v1437_v30 }
0x1691   : > { %v1446_v35 = vsel %vm128_vm2, %v1445_v33, 0.0 }
0x1692   : > { %v1440_v36 = vrot.slane %v1439_v34, 2  ;;  %v1447_v37 = vrot.slane %v1446_v35, 4 }
0x1694   : > { %v1448_v38 = vadd.f32 %v1447_v37, %v1446_v35  ;;  %v1441_v39 = vadd.f32 %v1440_v36, %v1439_v34 }
0x1696   : > { %v1449_v40 = vrot.slane %v1448_v38, 2  ;;  %v1442_v42 = vrot.slane %v1441_v39, 1 }
0x1698   : > { %v1443_v43 = vadd.f32 %v1442_v42, %v1441_v39  ;;  %v1450_v45 = vadd.f32 %v1449_v40, %v1448_v38 }
0x169a   : > { %v1444_v46 = vmax.f32 %v1443_v43, 1e-30  ;;  %v1451_v47 = vrot.slane %v1450_v45, 1 }
0x169c   : > { %3142 = vrcp.f32 %v1444_v46  ;;  %v1452_v48 = vadd.f32 %v1451_v47, %v1450_v45 }
0x169e   : > { %v1453_v50 = vmax.f32 %v1452_v48, 1e-30 }
0x16a0   : > { %3144 = vrcp.f32 %v1453_v50 }
0x16a6   : > { %v3143_v52 = vpop.eup %3142 }
0x16a7   : > { %v1455_v54 = vmul.f32 0.125, %v3143_v52 }
0x16a9   : > { %v1458_v55 = vmul.f32 %v3591_v51, %v1455_v54 }
0x16aa   : > { %v3145_v56 = vpop.eup %3144 }
0x16ab   : > { %v1459_v57 = vsel %vm128_vm2, %v1458_v55, 0.0  ;;  %v1457_v58 = vmul.f32 0.125, %v3145_v56 }
0x16ac   : > { %1460 = vadd.xlane.f32.xlu0 %v1459_v57 }
0x16ad   : > { %v1463_v59 = vmul.f32 %v3595_v53, %v1457_v58 }
0x16af   : > { %v1464_v61 = vsel %vm128_vm2, %v1463_v59, 0.0 }
0x16b0   : > { %1465 = vadd.xlane.f32.xlu1 %v1464_v61 }
0x1739   : > { %v1461_v63 = vpop.xlane.xlu0 %1460 }
0x173a   : > { %v1462_v0 = vmax.f32 %v1461_v63, 1e-30 }
0x173c   : > { %3146 = vrcp.f32 %v1462_v0 }
0x173d   : > { %v1466_v1 = vpop.xlane.xlu1 %1465 }
0x173e   : > { %v1467_v3 = vmax.f32 %v1466_v1, 1e-30 }
0x1740   : > { %3148 = vrcp.f32 %v1467_v3 }
0x1746   : > { %v3147_v4 = vpop.eup %3146 }
0x1747   : > { %v1469_v7 = vmul.f32 0.125, %v3147_v4 }
0x1749   : > { %v1472_v8 = vmul.f32 %v3591_v51, %v1469_v7 }
0x174a   : > { %v3149_v9 = vpop.eup %3148 }
0x174b   : > { %v1473_v10 = vsel %vm128_vm2, %v1472_v8, 0.0  ;;  %v1471_v11 = vmul.f32 0.125, %v3149_v9 }
0x174c   : > { %v1474_v12 = vrot.slane %v1473_v10, 4 }
0x174d   : > { %v1481_v13 = vmul.f32 %v3595_v53, %v1471_v11 }
0x174e   : > { %v1475_v14 = vadd.f32 %v1474_v12, %v1473_v10 }
0x174f   : > { %v1482_v15 = vsel %vm128_vm2, %v1481_v13, 0.0 }
0x1750   : > { %v1476_v16 = vrot.slane %v1475_v14, 2  ;;  %v1483_v17 = vrot.slane %v1482_v15, 4 }
0x1752   : > { %v1484_v18 = vadd.f32 %v1483_v17, %v1482_v15  ;;  %v1477_v19 = vadd.f32 %v1476_v16, %v1475_v14 }
0x1754   : > { %v1485_v20 = vrot.slane %v1484_v18, 2  ;;  %v1478_v21 = vrot.slane %v1477_v19, 1 }
0x1756   : > { %v1479_v22 = vadd.f32 %v1478_v21, %v1477_v19  ;;  %v1486_v23 = vadd.f32 %v1485_v20, %v1484_v18 }
0x1758   : > { %v1480_v24 = vmax.f32 %v1479_v22, 1e-30  ;;  %v1487_v25 = vrot.slane %v1486_v23, 1 }
0x175a   : > { %3150 = vrcp.f32 %v1480_v24  ;;  %v1488_v26 = vadd.f32 %v1487_v25, %v1486_v23 }
0x175c   : > { %v1489_v27 = vmax.f32 %v1488_v26, 1e-30 }
0x175e   : > { %3152 = vrcp.f32 %v1489_v27 }
0x1764   : > { %v3151_v28 = vpop.eup %3150 }
0x1765   : > { %v1491_v29 = vmul.f32 0.125, %v3151_v28 }
0x1767   : > { %v1494_v30 = vmul.f32 %v3591_v51, %v1491_v29 }
0x1768   : > { %v3153_v31 = vpop.eup %3152 }
0x1769   : > { %v1495_v32 = vsel %vm128_vm2, %v1494_v30, 0.0  ;;  %v1493_v33 = vmul.f32 0.125, %v3153_v31 }
0x176a   : > { %1496 = vadd.xlane.f32.xlu0 %v1495_v32 }
0x176b   : > { %v1499_v34 = vmul.f32 %v3595_v53, %v1493_v33 }
0x176d   : > { %v1500_v35 = vsel %vm128_vm2, %v1499_v34, 0.0 }
0x176e   : > { %1501 = vadd.xlane.f32.xlu1 %v1500_v35 }
0x17f7   : > { %v1497_v36 = vpop.xlane.xlu0 %1496 }
0x17f8   : > { %v1498_v37 = vmax.f32 %v1497_v36, 1e-30 }
0x17fa   : > { %3154 = vrcp.f32 %v1498_v37 }
0x17fb   : > { %v1502_v38 = vpop.xlane.xlu1 %1501 }
0x17fc   : > { %v1503_v39 = vmax.f32 %v1502_v38, 1e-30 }
0x17fe   : > { %3156 = vrcp.f32 %v1503_v39 }
0x1804   : > { %v3155_v40 = vpop.eup %3154 }
0x1805   : > { %v1505_v42 = vmul.f32 0.125, %v3155_v40 }
0x1807   : > { %v1508_v43 = vmul.f32 %v3591_v51, %v1505_v42 }
0x1808   : > { %v3157_v45 = vpop.eup %3156 }
0x1809   : > { %v1509_v46 = vsel %vm128_vm2, %v1508_v43, 0.0  ;;  %v1507_v47 = vmul.f32 0.125, %v3157_v45 }
0x180a   : > { %v1510_v48 = vrot.slane %v1509_v46, 4 }
0x180b   : > { %v1517_v50 = vmul.f32 %v3595_v53, %v1507_v47 }
0x180c   : > { %v1511_v52 = vadd.f32 %v1510_v48, %v1509_v46 }
0x180d   : > { %v1518_v54 = vsel %vm128_vm2, %v1517_v50, 0.0 }
0x180e   : > { %v1512_v55 = vrot.slane %v1511_v52, 2  ;;  %v1519_v56 = vrot.slane %v1518_v54, 4 }
0x1810   : > { %v1520_v57 = vadd.f32 %v1519_v56, %v1518_v54  ;;  %v1513_v58 = vadd.f32 %v1512_v55, %v1511_v52 }
0x1812   : > { %v1521_v59 = vrot.slane %v1520_v57, 2  ;;  %v1514_v61 = vrot.slane %v1513_v58, 1 }
0x1814   : > { %v1515_v63 = vadd.f32 %v1514_v61, %v1513_v58  ;;  %v1522_v0 = vadd.f32 %v1521_v59, %v1520_v57 }
0x1816   : > { %v1516_v1 = vmax.f32 %v1515_v63, 1e-30  ;;  %v1523_v3 = vrot.slane %v1522_v0, 1 }
0x1818   : > { %3158 = vrcp.f32 %v1516_v1  ;;  %v1524_v4 = vadd.f32 %v1523_v3, %v1522_v0 }
0x181a   : > { %v1525_v7 = vmax.f32 %v1524_v4, 1e-30 }
0x181c   : > { %3160 = vrcp.f32 %v1525_v7 }
0x1822   : > { %v3159_v8 = vpop.eup %3158 }
0x1823   : > { %v1527_v9 = vmul.f32 0.125, %v3159_v8 }
0x1825   : > { %v1530_v10 = vmul.f32 %v3591_v51, %v1527_v9 }
0x1826   : > { %v3161_v11 = vpop.eup %3160 }
0x1827   : > { %v1531_v12 = vsel %vm128_vm2, %v1530_v10, 0.0  ;;  %v1529_v13 = vmul.f32 0.125, %v3161_v11 }
0x1828   : > { %1532 = vadd.xlane.f32.xlu0 %v1531_v12 }
0x1829   : > { %v1535_v14 = vmul.f32 %v3595_v53, %v1529_v13 }
0x182b   : > { %v1536_v15 = vsel %vm128_vm2, %v1535_v14, 0.0 }
0x182c   : > { %1537 = vadd.xlane.f32.xlu1 %v1536_v15 }
0x18b5   : > { %v1533_v16 = vpop.xlane.xlu0 %1532 }
0x18b6   : > { %v1534_v17 = vmax.f32 %v1533_v16, 1e-30 }
0x18b8   : > { %3162 = vrcp.f32 %v1534_v17 }
0x18b9   : > { %v1538_v18 = vpop.xlane.xlu1 %1537 }
0x18ba   : > { %v1539_v19 = vmax.f32 %v1538_v18, 1e-30 }
0x18bc   : > { %3164 = vrcp.f32 %v1539_v19 }
0x18c2   : > { %v3163_v20 = vpop.eup %3162 }
0x18c3   : > { %v1541_v21 = vmul.f32 0.125, %v3163_v20 }
0x18c5   : > { %v1544_v22 = vmul.f32 %v3591_v51, %v1541_v21 }
0x18c6   : > { %v3165_v23 = vpop.eup %3164 }
0x18c7   : > { %v1545_v24 = vsel %vm128_vm2, %v1544_v22, 0.0  ;;  %v1543_v25 = vmul.f32 0.125, %v3165_v23 }
0x18c8   : > { %v1546_v26 = vrot.slane %v1545_v24, 4 }
0x18c9   : > { %v1553_v27 = vmul.f32 %v3595_v53, %v1543_v25 }
0x18ca   : > { %v1547_v28 = vadd.f32 %v1546_v26, %v1545_v24 }
0x18cb   : > { %v1554_v29 = vsel %vm128_vm2, %v1553_v27, 0.0 }
0x18cc   : > { %v1548_v30 = vrot.slane %v1547_v28, 2  ;;  %v1555_v31 = vrot.slane %v1554_v29, 4 }
0x18ce   : > { %v1556_v32 = vadd.f32 %v1555_v31, %v1554_v29  ;;  %v1549_v33 = vadd.f32 %v1548_v30, %v1547_v28 }
0x18d0   : > { %v1557_v34 = vrot.slane %v1556_v32, 2  ;;  %v1550_v35 = vrot.slane %v1549_v33, 1 }
0x18d2   : > { %v1551_v36 = vadd.f32 %v1550_v35, %v1549_v33  ;;  %v1558_v37 = vadd.f32 %v1557_v34, %v1556_v32 }
0x18d4   : > { %v1552_v38 = vmax.f32 %v1551_v36, 1e-30  ;;  %v1559_v39 = vrot.slane %v1558_v37, 1 }
0x18d6   : > { %3166 = vrcp.f32 %v1552_v38  ;;  %v1560_v40 = vadd.f32 %v1559_v39, %v1558_v37 }
0x18d8   : > { %v1561_v42 = vmax.f32 %v1560_v40, 1e-30 }
0x18da   : > { %3168 = vrcp.f32 %v1561_v42 }
0x18e0   : > { %v3167_v43 = vpop.eup %3166 }
0x18e1   : > { %v1563_v45 = vmul.f32 0.125, %v3167_v43 }
0x18e3   : > { %v1566_v46 = vmul.f32 %v3591_v51, %v1563_v45 }
0x18e4   : > { %v3169_v47 = vpop.eup %3168 }
0x18e5   : > { %v1567_v48 = vsel %vm128_vm2, %v1566_v46, 0.0  ;;  %v1565_v50 = vmul.f32 0.125, %v3169_v47 }
0x18e6   : > { %1568 = vadd.xlane.f32.xlu0 %v1567_v48 }
0x18e7   : > { %v1571_v52 = vmul.f32 %v3595_v53, %v1565_v50 }
0x18e9   : > { %v1572_v54 = vsel %vm128_vm2, %v1571_v52, 0.0 }
0x18ea   : > { %1573 = vadd.xlane.f32.xlu1 %v1572_v54 }
0x1973   : > { %v1569_v55 = vpop.xlane.xlu0 %1568 }
0x1974   : > { %v1570_v56 = vmax.f32 %v1569_v55, 1e-30 }
0x1976   : > { %3170 = vrcp.f32 %v1570_v56 }
0x1977   : > { %v1574_v57 = vpop.xlane.xlu1 %1573 }
0x1978   : > { %v1575_v58 = vmax.f32 %v1574_v57, 1e-30 }
0x197a   : > { %3172 = vrcp.f32 %v1575_v58 }
0x1980   : > { %v3171_v59 = vpop.eup %3170 }
0x1981   : > { %v1577_v61 = vmul.f32 0.125, %v3171_v59 }
0x1983   : > { %v1580_v63 = vmul.f32 %v3591_v51, %v1577_v61 }
0x1984   : > { %v3173_v0 = vpop.eup %3172 }
0x1985   : > { %v1581_v1 = vsel %vm128_vm2, %v1580_v63, 0.0  ;;  %v1579_v3 = vmul.f32 0.125, %v3173_v0 }
0x1986   : > { %v1582_v4 = vrot.slane %v1581_v1, 4 }
0x1987   : > { %v1589_v7 = vmul.f32 %v3595_v53, %v1579_v3 }
0x1988   : > { %v1583_v8 = vadd.f32 %v1582_v4, %v1581_v1 }
0x1989   : > { %v1590_v9 = vsel %vm128_vm2, %v1589_v7, 0.0 }
0x198a   : > { %v1584_v10 = vrot.slane %v1583_v8, 2  ;;  %v1591_v11 = vrot.slane %v1590_v9, 4 }
0x198c   : > { %v1592_v12 = vadd.f32 %v1591_v11, %v1590_v9  ;;  %v1585_v13 = vadd.f32 %v1584_v10, %v1583_v8 }
0x198e   : > { %v1593_v14 = vrot.slane %v1592_v12, 2  ;;  %v1586_v15 = vrot.slane %v1585_v13, 1 }
0x1990   : > { %v1587_v16 = vadd.f32 %v1586_v15, %v1585_v13  ;;  %v1594_v17 = vadd.f32 %v1593_v14, %v1592_v12 }
0x1992   : > { %v1588_v18 = vmax.f32 %v1587_v16, 1e-30  ;;  %v1595_v19 = vrot.slane %v1594_v17, 1 }
0x1994   : > { %3174 = vrcp.f32 %v1588_v18  ;;  %v1596_v20 = vadd.f32 %v1595_v19, %v1594_v17 }
0x1996   : > { %v1597_v21 = vmax.f32 %v1596_v20, 1e-30 }
0x1998   : > { %3176 = vrcp.f32 %v1597_v21 }
0x199e   : > { %v3175_v22 = vpop.eup %3174 }
0x199f   : > { %v1599_v23 = vmul.f32 0.125, %v3175_v22 }
0x19a1   : > { %v1602_v24 = vmul.f32 %v3591_v51, %v1599_v23 }
0x19a2   : > { %v3177_v25 = vpop.eup %3176 }
0x19a3   : > { %v1603_v26 = vsel %vm128_vm2, %v1602_v24, 0.0  ;;  %v1601_v27 = vmul.f32 0.125, %v3177_v25 }
0x19a4   : > { %1604 = vadd.xlane.f32.xlu0 %v1603_v26 }
0x19a5   : > { %v1607_v28 = vmul.f32 %v3595_v53, %v1601_v27 }
0x19a7   : > { %v1608_v29 = vsel %vm128_vm2, %v1607_v28, 0.0 }
0x19a8   : > { %1609 = vadd.xlane.f32.xlu1 %v1608_v29 }
0x1a31   : > { %v1605_v30 = vpop.xlane.xlu0 %1604 }
0x1a32   : > { %v1606_v31 = vmax.f32 %v1605_v30, 1e-30 }
0x1a34   : > { %3178 = vrcp.f32 %v1606_v31 }
0x1a35   : > { %v1610_v32 = vpop.xlane.xlu1 %1609 }
0x1a36   : > { %v1611_v33 = vmax.f32 %v1610_v32, 1e-30 }
0x1a38   : > { %3180 = vrcp.f32 %v1611_v33 }
0x1a3e   : > { %v3179_v34 = vpop.eup %3178 }
0x1a3f   : > { %v1613_v35 = vmul.f32 0.125, %v3179_v34 }
0x1a41   : > { %v1616_v36 = vmul.f32 %v3591_v51, %v1613_v35 }
0x1a42   : > { %v3181_v37 = vpop.eup %3180 }
0x1a43   : > { %v1617_v38 = vsel %vm128_vm2, %v1616_v36, 0.0  ;;  %v1615_v39 = vmul.f32 0.125, %v3181_v37 }
0x1a44   : > { %v1618_v40 = vrot.slane %v1617_v38, 4 }
0x1a45   : > { %v1625_v42 = vmul.f32 %v3595_v53, %v1615_v39 }
0x1a46   : > { %v1619_v43 = vadd.f32 %v1618_v40, %v1617_v38 }
0x1a47   : > { %v1626_v45 = vsel %vm128_vm2, %v1625_v42, 0.0 }
0x1a48   : > { %v1620_v46 = vrot.slane %v1619_v43, 2  ;;  %v1627_v47 = vrot.slane %v1626_v45, 4 }
0x1a4a   : > { %v1628_v48 = vadd.f32 %v1627_v47, %v1626_v45  ;;  %v1621_v50 = vadd.f32 %v1620_v46, %v1619_v43 }
0x1a4c   : > { %v1629_v52 = vrot.slane %v1628_v48, 2  ;;  %v1622_v54 = vrot.slane %v1621_v50, 1 }
0x1a4e   : > { %v1623_v55 = vadd.f32 %v1622_v54, %v1621_v50  ;;  %v1630_v56 = vadd.f32 %v1629_v52, %v1628_v48 }
0x1a50   : > { %v1624_v57 = vmax.f32 %v1623_v55, 1e-30  ;;  %v1631_v58 = vrot.slane %v1630_v56, 1 }
0x1a52   : > { %3182 = vrcp.f32 %v1624_v57  ;;  %v1632_v59 = vadd.f32 %v1631_v58, %v1630_v56 }
0x1a54   : > { %v1633_v61 = vmax.f32 %v1632_v59, 1e-30 }
0x1a56   : > { %3184 = vrcp.f32 %v1633_v61 }
0x1a5c   : > { %v3183_v63 = vpop.eup %3182 }
0x1a5d   : > { %v1635_v0 = vmul.f32 0.125, %v3183_v63 }
0x1a5f   : > { %v1638_v1 = vmul.f32 %v3591_v51, %v1635_v0 }
0x1a60   : > { %v3185_v3 = vpop.eup %3184 }
0x1a61   : > { %v1639_v4 = vsel %vm128_vm2, %v1638_v1, 0.0  ;;  %v1637_v7 = vmul.f32 0.125, %v3185_v3 }
0x1a62   : > { %1640 = vadd.xlane.f32.xlu0 %v1639_v4 }
0x1a63   : > { %v1643_v8 = vmul.f32 %v3595_v53, %v1637_v7 }
0x1a65   : > { %v1644_v9 = vsel %vm128_vm2, %v1643_v8, 0.0 }
0x1a66   : > { %1645 = vadd.xlane.f32.xlu1 %v1644_v9 }
0x1aef   : > { %v1641_v10 = vpop.xlane.xlu0 %1640 }
0x1af0   : > { %v1642_v11 = vmax.f32 %v1641_v10, 1e-30 }
0x1af2   : > { %3186 = vrcp.f32 %v1642_v11 }
0x1af3   : > { %v1646_v12 = vpop.xlane.xlu1 %1645 }
0x1af4   : > { %v1647_v13 = vmax.f32 %v1646_v12, 1e-30 }
0x1af6   : > { %3188 = vrcp.f32 %v1647_v13 }
0x1afc   : > { %v3187_v14 = vpop.eup %3186 }
0x1afd   : > { %v1649_v15 = vmul.f32 0.125, %v3187_v14 }
0x1aff   : > { %v1652_v16 = vmul.f32 %v3591_v51, %v1649_v15 }
0x1b00   : > { %v3189_v17 = vpop.eup %3188 }
0x1b01   : > { %v1653_v18 = vsel %vm128_vm2, %v1652_v16, 0.0  ;;  %v1651_v19 = vmul.f32 0.125, %v3189_v17 }
0x1b02   : > { %v1654_v20 = vrot.slane %v1653_v18, 4 }
0x1b03   : > { %v1661_v21 = vmul.f32 %v3595_v53, %v1651_v19 }
0x1b04   : > { %v1655_v22 = vadd.f32 %v1654_v20, %v1653_v18 }
0x1b05   : > { %v1662_v23 = vsel %vm128_vm2, %v1661_v21, 0.0 }
0x1b06   : > { %v1656_v24 = vrot.slane %v1655_v22, 2  ;;  %v1663_v25 = vrot.slane %v1662_v23, 4 }
0x1b08   : > { %v1664_v26 = vadd.f32 %v1663_v25, %v1662_v23  ;;  %v1657_v27 = vadd.f32 %v1656_v24, %v1655_v22 }
0x1b0a   : > { %v1665_v28 = vrot.slane %v1664_v26, 2  ;;  %v1658_v29 = vrot.slane %v1657_v27, 1 }
0x1b0c   : > { %v1659_v30 = vadd.f32 %v1658_v29, %v1657_v27  ;;  %v1666_v31 = vadd.f32 %v1665_v28, %v1664_v26 }
0x1b0e   : > { %v1660_v32 = vmax.f32 %v1659_v30, 1e-30  ;;  %v1667_v33 = vrot.slane %v1666_v31, 1 }
0x1b10   : > { %3190 = vrcp.f32 %v1660_v32  ;;  %v1668_v34 = vadd.f32 %v1667_v33, %v1666_v31 }
0x1b12   : > { %v1669_v35 = vmax.f32 %v1668_v34, 1e-30 }
0x1b14   : > { %3192 = vrcp.f32 %v1669_v35 }
0x1b1a   : > { %v3191_v36 = vpop.eup %3190 }
0x1b1b   : > { %v1671_v37 = vmul.f32 0.125, %v3191_v36 }
0x1b1d   : > { %v1674_v38 = vmul.f32 %v3591_v51, %v1671_v37 }
0x1b1e   : > { %v3193_v39 = vpop.eup %3192 }
0x1b1f   : > { %v1675_v40 = vsel %vm128_vm2, %v1674_v38, 0.0  ;;  %v1673_v42 = vmul.f32 0.125, %v3193_v39 }
0x1b20   : > { %1676 = vadd.xlane.f32.xlu0 %v1675_v40 }
0x1b21   : > { %v1679_v43 = vmul.f32 %v3595_v53, %v1673_v42 }
0x1b23   : > { %v1680_v45 = vsel %vm128_vm2, %v1679_v43, 0.0 }
0x1b24   : > { %1681 = vadd.xlane.f32.xlu1 %v1680_v45 }
0x1bad   : > { %v1677_v46 = vpop.xlane.xlu0 %1676 }
0x1bae   : > { %v1678_v47 = vmax.f32 %v1677_v46, 1e-30 }
0x1bb0   : > { %3194 = vrcp.f32 %v1678_v47 }
0x1bb1   : > { %v1682_v48 = vpop.xlane.xlu1 %1681 }
0x1bb2   : > { %v1683_v50 = vmax.f32 %v1682_v48, 1e-30 }
0x1bb4   : > { %3196 = vrcp.f32 %v1683_v50 }
0x1bba   : > { %v3195_v52 = vpop.eup %3194 }
0x1bbb   : > { %v1685_v54 = vmul.f32 0.125, %v3195_v52 }
0x1bbd   : > { %v1688_v55 = vmul.f32 %v3591_v51, %v1685_v54 }
0x1bbe   : > { %v3197_v56 = vpop.eup %3196 }
0x1bbf   : > { %v1689_v57 = vsel %vm128_vm2, %v1688_v55, 0.0  ;;  %v1687_v58 = vmul.f32 0.125, %v3197_v56 }
0x1bc0   : > { %v1690_v59 = vrot.slane %v1689_v57, 4 }
0x1bc1   : > { %v1697_v61 = vmul.f32 %v3595_v53, %v1687_v58 }
0x1bc2   : > { %v1691_v63 = vadd.f32 %v1690_v59, %v1689_v57 }
0x1bc3   : > { %v1698_v0 = vsel %vm128_vm2, %v1697_v61, 0.0 }
0x1bc4   : > { %v1692_v1 = vrot.slane %v1691_v63, 2  ;;  %v1699_v3 = vrot.slane %v1698_v0, 4 }
0x1bc6   : > { %v1700_v4 = vadd.f32 %v1699_v3, %v1698_v0  ;;  %v1693_v7 = vadd.f32 %v1692_v1, %v1691_v63 }
0x1bc8   : > { %v1701_v8 = vrot.slane %v1700_v4, 2  ;;  %v1694_v9 = vrot.slane %v1693_v7, 1 }
0x1bca   : > { %v1695_v10 = vadd.f32 %v1694_v9, %v1693_v7  ;;  %v1702_v11 = vadd.f32 %v1701_v8, %v1700_v4 }
0x1bcc   : > { %v1696_v12 = vmax.f32 %v1695_v10, 1e-30  ;;  %v1703_v13 = vrot.slane %v1702_v11, 1 }
0x1bce   : > { %3198 = vrcp.f32 %v1696_v12  ;;  %v1704_v14 = vadd.f32 %v1703_v13, %v1702_v11 }
0x1bd0   : > { %v1705_v15 = vmax.f32 %v1704_v14, 1e-30 }
0x1bd2   : > { %3200 = vrcp.f32 %v1705_v15 }
0x1bd8   : > { %v3199_v16 = vpop.eup %3198 }
0x1bd9   : > { %v1707_v17 = vmul.f32 0.125, %v3199_v16 }
0x1bdb   : > { %v1710_v18 = vmul.f32 %v3591_v51, %v1707_v17 }
0x1bdc   : > { %v3201_v19 = vpop.eup %3200 }
0x1bdd   : > { %v1711_v20 = vsel %vm128_vm2, %v1710_v18, 0.0  ;;  %v1709_v21 = vmul.f32 0.125, %v3201_v19 }
0x1bde   : > { %1712 = vadd.xlane.f32.xlu0 %v1711_v20 }
0x1bdf   : > { %v1715_v22 = vmul.f32 %v3595_v53, %v1709_v21 }
0x1be1   : > { %v1716_v23 = vsel %vm128_vm2, %v1715_v22, 0.0 }
0x1be2   : > { %1717 = vadd.xlane.f32.xlu1 %v1716_v23 }
0x1c6b   : > { %v1713_v24 = vpop.xlane.xlu0 %1712 }
0x1c6c   : > { %v1714_v25 = vmax.f32 %v1713_v24, 1e-30 }
0x1c6e   : > { %3202 = vrcp.f32 %v1714_v25 }
0x1c6f   : > { %v1718_v26 = vpop.xlane.xlu1 %1717 }
0x1c70   : > { %v1719_v27 = vmax.f32 %v1718_v26, 1e-30 }
0x1c72   : > { %3204 = vrcp.f32 %v1719_v27 }
0x1c78   : > { %v3203_v28 = vpop.eup %3202 }
0x1c79   : > { %v1721_v29 = vmul.f32 0.125, %v3203_v28 }
0x1c7b   : > { %v1724_v30 = vmul.f32 %v3591_v51, %v1721_v29 }
0x1c7c   : > { %v3205_v31 = vpop.eup %3204 }
0x1c7d   : > { %v1725_v32 = vsel %vm128_vm2, %v1724_v30, 0.0  ;;  %v1723_v33 = vmul.f32 0.125, %v3205_v31 }
0x1c7e   : > { %v1726_v34 = vrot.slane %v1725_v32, 4 }
0x1c7f   : > { %v1733_v35 = vmul.f32 %v3595_v53, %v1723_v33 }
0x1c80   : > { %v1727_v36 = vadd.f32 %v1726_v34, %v1725_v32 }
0x1c81   : > { %v1734_v37 = vsel %vm128_vm2, %v1733_v35, 0.0 }
0x1c82   : > { %v1728_v38 = vrot.slane %v1727_v36, 2  ;;  %v1735_v39 = vrot.slane %v1734_v37, 4 }
0x1c84   : > { %v1736_v40 = vadd.f32 %v1735_v39, %v1734_v37  ;;  %v1729_v42 = vadd.f32 %v1728_v38, %v1727_v36 }
0x1c86   : > { %v1737_v43 = vrot.slane %v1736_v40, 2  ;;  %v1730_v45 = vrot.slane %v1729_v42, 1 }
0x1c88   : > { %v1731_v46 = vadd.f32 %v1730_v45, %v1729_v42  ;;  %v1738_v47 = vadd.f32 %v1737_v43, %v1736_v40 }
0x1c8a   : > { %v1732_v48 = vmax.f32 %v1731_v46, 1e-30  ;;  %v1739_v50 = vrot.slane %v1738_v47, 1 }
0x1c8c   : > { %3206 = vrcp.f32 %v1732_v48  ;;  %v1740_v52 = vadd.f32 %v1739_v50, %v1738_v47 }
0x1c8e   : > { %v1741_v54 = vmax.f32 %v1740_v52, 1e-30 }
0x1c90   : > { %3208 = vrcp.f32 %v1741_v54 }
0x1c96   : > { %v3207_v55 = vpop.eup %3206 }
0x1c97   : > { %v1743_v56 = vmul.f32 0.125, %v3207_v55 }
0x1c99   : > { %v1746_v57 = vmul.f32 %v3591_v51, %v1743_v56 }
0x1c9a   : > { %v3209_v58 = vpop.eup %3208 }
0x1c9b   : > { %v1747_v59 = vsel %vm128_vm2, %v1746_v57, 0.0  ;;  %v1745_v61 = vmul.f32 0.125, %v3209_v58 }
0x1c9c   : > { %1748 = vadd.xlane.f32.xlu0 %v1747_v59 }
0x1c9d   : > { %v1751_v63 = vmul.f32 %v3595_v53, %v1745_v61 }
0x1c9f   : > { %v1752_v0 = vsel %vm128_vm2, %v1751_v63, 0.0 }
0x1ca0   : > { %1753 = vadd.xlane.f32.xlu1 %v1752_v0 }
0x1d29   : > { %v1749_v1 = vpop.xlane.xlu0 %1748 }
0x1d2a   : > { %v1750_v3 = vmax.f32 %v1749_v1, 1e-30 }
0x1d2c   : > { %3210 = vrcp.f32 %v1750_v3 }
0x1d2d   : > { %v1754_v4 = vpop.xlane.xlu1 %1753 }
0x1d2e   : > { %v1755_v7 = vmax.f32 %v1754_v4, 1e-30 }
0x1d30   : > { %3212 = vrcp.f32 %v1755_v7 }
0x1d36   : > { %v3211_v8 = vpop.eup %3210 }
0x1d37   : > { %v1757_v9 = vmul.f32 0.125, %v3211_v8 }
0x1d39   : > { %v1760_v10 = vmul.f32 %v3591_v51, %v1757_v9 }
0x1d3a   : > { %v3213_v11 = vpop.eup %3212 }
0x1d3b   : > { %v1761_v12 = vsel %vm128_vm2, %v1760_v10, 0.0  ;;  %v1759_v13 = vmul.f32 0.125, %v3213_v11 }
0x1d3c   : > { %v1762_v14 = vrot.slane %v1761_v12, 4 }
0x1d3d   : > { %v1769_v15 = vmul.f32 %v3595_v53, %v1759_v13 }
0x1d3e   : > { %v1763_v16 = vadd.f32 %v1762_v14, %v1761_v12 }
0x1d3f   : > { %v1770_v17 = vsel %vm128_vm2, %v1769_v15, 0.0 }
0x1d40   : > { %v1764_v18 = vrot.slane %v1763_v16, 2  ;;  %v1771_v19 = vrot.slane %v1770_v17, 4 }
0x1d42   : > { %v1772_v20 = vadd.f32 %v1771_v19, %v1770_v17  ;;  %v1765_v21 = vadd.f32 %v1764_v18, %v1763_v16 }
0x1d44   : > { %v1773_v22 = vrot.slane %v1772_v20, 2  ;;  %v1766_v23 = vrot.slane %v1765_v21, 1 }
0x1d46   : > { %v1767_v24 = vadd.f32 %v1766_v23, %v1765_v21  ;;  %v1774_v25 = vadd.f32 %v1773_v22, %v1772_v20 }
0x1d48   : > { %v1768_v26 = vmax.f32 %v1767_v24, 1e-30  ;;  %v1775_v27 = vrot.slane %v1774_v25, 1 }
0x1d4a   : > { %3214 = vrcp.f32 %v1768_v26  ;;  %v1776_v28 = vadd.f32 %v1775_v27, %v1774_v25 }
0x1d4c   : > { %v1777_v29 = vmax.f32 %v1776_v28, 1e-30 }
0x1d4e   : > { %3216 = vrcp.f32 %v1777_v29 }
0x1d54   : > { %v3215_v30 = vpop.eup %3214 }
0x1d55   : > { %v1779_v31 = vmul.f32 0.125, %v3215_v30 }
0x1d57   : > { %v1782_v32 = vmul.f32 %v3591_v51, %v1779_v31 }
0x1d58   : > { %v3217_v33 = vpop.eup %3216 }
0x1d59   : > { %v1783_v34 = vsel %vm128_vm2, %v1782_v32, 0.0  ;;  %v1781_v35 = vmul.f32 0.125, %v3217_v33 }
0x1d5a   : > { %1784 = vadd.xlane.f32.xlu0 %v1783_v34 }
0x1d5b   : > { %v1787_v36 = vmul.f32 %v3595_v53, %v1781_v35 }
0x1d5d   : > { %v1788_v37 = vsel %vm128_vm2, %v1787_v36, 0.0 }
0x1d5e   : > { %1789 = vadd.xlane.f32.xlu1 %v1788_v37 }
0x1de7   : > { %v1785_v38 = vpop.xlane.xlu0 %1784 }
0x1de8   : > { %v1786_v39 = vmax.f32 %v1785_v38, 1e-30 }
0x1dea   : > { %3218 = vrcp.f32 %v1786_v39 }
0x1deb   : > { %v1790_v40 = vpop.xlane.xlu1 %1789 }
0x1dec   : > { %v1791_v42 = vmax.f32 %v1790_v40, 1e-30 }
0x1dee   : > { %3220 = vrcp.f32 %v1791_v42 }
0x1df4   : > { %v3219_v43 = vpop.eup %3218 }
0x1df5   : > { %v1793_v45 = vmul.f32 0.125, %v3219_v43 }
0x1df7   : > { %v1796_v46 = vmul.f32 %v3591_v51, %v1793_v45 }
0x1df8   : > { %v3221_v47 = vpop.eup %3220 }
0x1df9   : > { %v1797_v48 = vsel %vm128_vm2, %v1796_v46, 0.0  ;;  %v1795_v50 = vmul.f32 0.125, %v3221_v47 }
0x1dfa   : > { %v1798_v52 = vrot.slane %v1797_v48, 4 }
0x1dfb   : > { %v1805_v54 = vmul.f32 %v3595_v53, %v1795_v50 }
0x1dfc   : > { %v1799_v55 = vadd.f32 %v1798_v52, %v1797_v48 }
0x1dfd   : > { %v1806_v56 = vsel %vm128_vm2, %v1805_v54, 0.0 }
0x1dfe   : > { %v1800_v57 = vrot.slane %v1799_v55, 2  ;;  %v1807_v58 = vrot.slane %v1806_v56, 4 }
0x1e00   : > { %v1808_v59 = vadd.f32 %v1807_v58, %v1806_v56  ;;  %v1801_v61 = vadd.f32 %v1800_v57, %v1799_v55 }
0x1e02   : > { %v1809_v63 = vrot.slane %v1808_v59, 2  ;;  %v1802_v0 = vrot.slane %v1801_v61, 1 }
0x1e04   : > { %v1803_v1 = vadd.f32 %v1802_v0, %v1801_v61  ;;  %v1810_v3 = vadd.f32 %v1809_v63, %v1808_v59 }
0x1e06   : > { %v1804_v4 = vmax.f32 %v1803_v1, 1e-30  ;;  %v1811_v7 = vrot.slane %v1810_v3, 1 }
0x1e08   : > { %3222 = vrcp.f32 %v1804_v4  ;;  %v1812_v8 = vadd.f32 %v1811_v7, %v1810_v3 }
0x1e0a   : > { %v1813_v9 = vmax.f32 %v1812_v8, 1e-30 }
0x1e0c   : > { %3224 = vrcp.f32 %v1813_v9 }
0x1e12   : > { %v3223_v10 = vpop.eup %3222 }
0x1e13   : > { %v1815_v11 = vmul.f32 0.125, %v3223_v10 }
0x1e15   : > { %v1818_v12 = vmul.f32 %v3591_v51, %v1815_v11 }
0x1e16   : > { %v3225_v13 = vpop.eup %3224 }
0x1e17   : > { %v1819_v14 = vsel %vm128_vm2, %v1818_v12, 0.0  ;;  %v1817_v15 = vmul.f32 0.125, %v3225_v13 }
0x1e18   : > { %1820 = vadd.xlane.f32.xlu0 %v1819_v14 }
0x1e19   : > { %v1823_v16 = vmul.f32 %v3595_v53, %v1817_v15 }
0x1e1b   : > { %v1824_v17 = vsel %vm128_vm2, %v1823_v16, 0.0 }
0x1e1c   : > { %1825 = vadd.xlane.f32.xlu1 %v1824_v17 }
0x1ea5   : > { %v1821_v18 = vpop.xlane.xlu0 %1820 }
0x1ea6   : > { %v1822_v19 = vmax.f32 %v1821_v18, 1e-30 }
0x1ea8   : > { %3226 = vrcp.f32 %v1822_v19 }
0x1ea9   : > { %v1826_v20 = vpop.xlane.xlu1 %1825 }
0x1eaa   : > { %v1827_v21 = vmax.f32 %v1826_v20, 1e-30 }
0x1eac   : > { %3228 = vrcp.f32 %v1827_v21 }
0x1eb2   : > { %v3227_v22 = vpop.eup %3226 }
0x1eb3   : > { %v1829_v23 = vmul.f32 0.125, %v3227_v22 }
0x1eb5   : > { %v1832_v24 = vmul.f32 %v3591_v51, %v1829_v23 }
0x1eb6   : > { %v3229_v25 = vpop.eup %3228 }
0x1eb7   : > { %v1833_v26 = vsel %vm128_vm2, %v1832_v24, 0.0  ;;  %v1831_v27 = vmul.f32 0.125, %v3229_v25 }
0x1eb8   : > { %v1834_v28 = vrot.slane %v1833_v26, 4 }
0x1eb9   : > { %v1841_v29 = vmul.f32 %v3595_v53, %v1831_v27 }
0x1eba   : > { %v1835_v30 = vadd.f32 %v1834_v28, %v1833_v26 }
0x1ebb   : > { %v1842_v31 = vsel %vm128_vm2, %v1841_v29, 0.0 }
0x1ebc   : > { %v1836_v32 = vrot.slane %v1835_v30, 2  ;;  %v1843_v33 = vrot.slane %v1842_v31, 4 }
0x1ebe   : > { %v1844_v34 = vadd.f32 %v1843_v33, %v1842_v31  ;;  %v1837_v35 = vadd.f32 %v1836_v32, %v1835_v30 }
0x1ec0   : > { %v1845_v36 = vrot.slane %v1844_v34, 2  ;;  %v1838_v37 = vrot.slane %v1837_v35, 1 }
0x1ec2   : > { %v1839_v38 = vadd.f32 %v1838_v37, %v1837_v35  ;;  %v1846_v39 = vadd.f32 %v1845_v36, %v1844_v34 }
0x1ec4   : > { %v1840_v40 = vmax.f32 %v1839_v38, 1e-30  ;;  %v1847_v42 = vrot.slane %v1846_v39, 1 }
0x1ec6   : > { %3230 = vrcp.f32 %v1840_v40  ;;  %v1848_v43 = vadd.f32 %v1847_v42, %v1846_v39 }
0x1ec8   : > { %v1849_v45 = vmax.f32 %v1848_v43, 1e-30 }
0x1eca   : > { %3232 = vrcp.f32 %v1849_v45 }
0x1ed0   : > { %v3231_v46 = vpop.eup %3230 }
0x1ed1   : > { %v1851_v47 = vmul.f32 0.125, %v3231_v46 }
0x1ed3   : > { %v1854_v48 = vmul.f32 %v3591_v51, %v1851_v47 }
0x1ed4   : > { %v3233_v50 = vpop.eup %3232 }
0x1ed5   : > { %v1855_v52 = vsel %vm128_vm2, %v1854_v48, 0.0  ;;  %v1853_v54 = vmul.f32 0.125, %v3233_v50 }
0x1ed6   : > { %1856 = vadd.xlane.f32.xlu0 %v1855_v52 }
0x1ed7   : > { %v1859_v55 = vmul.f32 %v3595_v53, %v1853_v54 }
0x1ed9   : > { %v1860_v56 = vsel %vm128_vm2, %v1859_v55, 0.0 }
0x1eda   : > { %1861 = vadd.xlane.f32.xlu1 %v1860_v56 }
0x1f63   : > { %v1857_v57 = vpop.xlane.xlu0 %1856 }
0x1f64   : > { %v1858_v58 = vmax.f32 %v1857_v57, 1e-30 }
0x1f66   : > { %3234 = vrcp.f32 %v1858_v58 }
0x1f67   : > { %v1862_v59 = vpop.xlane.xlu1 %1861 }
0x1f68   : > { %v1863_v61 = vmax.f32 %v1862_v59, 1e-30 }
0x1f6a   : > { %3236 = vrcp.f32 %v1863_v61 }
0x1f70   : > { %v3235_v63 = vpop.eup %3234 }
0x1f71   : > { %v1865_v0 = vmul.f32 0.125, %v3235_v63 }
0x1f73   : > { %v1868_v1 = vmul.f32 %v3591_v51, %v1865_v0 }
0x1f74   : > { %v3237_v3 = vpop.eup %3236 }
0x1f75   : > { %v1869_v4 = vsel %vm128_vm2, %v1868_v1, 0.0  ;;  %v1867_v7 = vmul.f32 0.125, %v3237_v3 }
0x1f76   : > { %v1870_v8 = vrot.slane %v1869_v4, 4 }
0x1f77   : > { %v1877_v9 = vmul.f32 %v3595_v53, %v1867_v7 }
0x1f78   : > { %v1871_v10 = vadd.f32 %v1870_v8, %v1869_v4 }
0x1f79   : > { %v1878_v11 = vsel %vm128_vm2, %v1877_v9, 0.0 }
0x1f7a   : > { %v1872_v12 = vrot.slane %v1871_v10, 2  ;;  %v1879_v13 = vrot.slane %v1878_v11, 4 }
0x1f7c   : > { %v1880_v14 = vadd.f32 %v1879_v13, %v1878_v11  ;;  %v1873_v15 = vadd.f32 %v1872_v12, %v1871_v10 }
0x1f7e   : > { %v1881_v16 = vrot.slane %v1880_v14, 2  ;;  %v1874_v17 = vrot.slane %v1873_v15, 1 }
0x1f80   : > { %v1875_v18 = vadd.f32 %v1874_v17, %v1873_v15  ;;  %v1882_v19 = vadd.f32 %v1881_v16, %v1880_v14 }
0x1f82   : > { %v1876_v20 = vmax.f32 %v1875_v18, 1e-30  ;;  %v1883_v21 = vrot.slane %v1882_v19, 1 }
0x1f84   : > { %3238 = vrcp.f32 %v1876_v20  ;;  %v1884_v22 = vadd.f32 %v1883_v21, %v1882_v19 }
0x1f86   : > { %v1885_v23 = vmax.f32 %v1884_v22, 1e-30 }
0x1f88   : > { %3240 = vrcp.f32 %v1885_v23 }
0x1f8e   : > { %v3239_v24 = vpop.eup %3238 }
0x1f8f   : > { %v1887_v25 = vmul.f32 0.125, %v3239_v24 }
0x1f91   : > { %v1890_v26 = vmul.f32 %v3591_v51, %v1887_v25 }
0x1f92   : > { %v3241_v27 = vpop.eup %3240 }
0x1f93   : > { %v1891_v28 = vsel %vm128_vm2, %v1890_v26, 0.0  ;;  %v1889_v29 = vmul.f32 0.125, %v3241_v27 }
0x1f94   : > { %1892 = vadd.xlane.f32.xlu0 %v1891_v28 }
0x1f95   : > { %v1895_v30 = vmul.f32 %v3595_v53, %v1889_v29 }
0x1f97   : > { %v1896_v31 = vsel %vm128_vm2, %v1895_v30, 0.0 }
0x1f98   : > { %1897 = vadd.xlane.f32.xlu1 %v1896_v31 }
0x2021   : > { %v1893_v32 = vpop.xlane.xlu0 %1892 }
0x2022   : > { %v1894_v33 = vmax.f32 %v1893_v32, 1e-30 }
0x2024   : > { %3242 = vrcp.f32 %v1894_v33 }
0x2025   : > { %v1898_v34 = vpop.xlane.xlu1 %1897 }
0x2026   : > { %v1899_v35 = vmax.f32 %v1898_v34, 1e-30 }
0x2028   : > { %3244 = vrcp.f32 %v1899_v35 }
0x202e   : > { %v3243_v36 = vpop.eup %3242 }
0x202f   : > { %v1901_v37 = vmul.f32 0.125, %v3243_v36 }
0x2031   : > { %v1904_v38 = vmul.f32 %v3591_v51, %v1901_v37 }
0x2032   : > { %v3245_v39 = vpop.eup %3244 }
0x2033   : > { %v1905_v40 = vsel %vm128_vm2, %v1904_v38, 0.0  ;;  %v1903_v42 = vmul.f32 0.125, %v3245_v39 }
0x2034   : > { %v1906_v43 = vrot.slane %v1905_v40, 4 }
0x2035   : > { %v1913_v45 = vmul.f32 %v3595_v53, %v1903_v42 }
0x2036   : > { %v1907_v46 = vadd.f32 %v1906_v43, %v1905_v40 }
0x2037   : > { %v1914_v47 = vsel %vm128_vm2, %v1913_v45, 0.0 }
0x2038   : > { %v1908_v48 = vrot.slane %v1907_v46, 2  ;;  %v1915_v50 = vrot.slane %v1914_v47, 4 }
0x203a   : > { %v1916_v52 = vadd.f32 %v1915_v50, %v1914_v47  ;;  %v1909_v54 = vadd.f32 %v1908_v48, %v1907_v46 }
0x203c   : > { %v1917_v55 = vrot.slane %v1916_v52, 2  ;;  %v1910_v56 = vrot.slane %v1909_v54, 1 }
0x203e   : > { %v1911_v57 = vadd.f32 %v1910_v56, %v1909_v54  ;;  %v1918_v58 = vadd.f32 %v1917_v55, %v1916_v52 }
0x2040   : > { %v1912_v59 = vmax.f32 %v1911_v57, 1e-30  ;;  %v1919_v61 = vrot.slane %v1918_v58, 1 }
0x2042   : > { %3246 = vrcp.f32 %v1912_v59  ;;  %v1920_v63 = vadd.f32 %v1919_v61, %v1918_v58 }
0x2044   : > { %v1921_v0 = vmax.f32 %v1920_v63, 1e-30 }
0x2046   : > { %3248 = vrcp.f32 %v1921_v0 }
0x204c   : > { %v3247_v1 = vpop.eup %3246 }
0x204d   : > { %v1923_v3 = vmul.f32 0.125, %v3247_v1 }
0x204f   : > { %v1926_v4 = vmul.f32 %v3591_v51, %v1923_v3 }
0x2050   : > { %v3249_v7 = vpop.eup %3248 }
0x2051   : > { %v1927_v8 = vsel %vm128_vm2, %v1926_v4, 0.0  ;;  %v1925_v9 = vmul.f32 0.125, %v3249_v7 }
0x2052   : > { %1928 = vadd.xlane.f32.xlu0 %v1927_v8 }
0x2053   : > { %v1931_v10 = vmul.f32 %v3595_v53, %v1925_v9 }
0x2055   : > { %v1932_v11 = vsel %vm128_vm2, %v1931_v10, 0.0 }
0x2056   : > { %1933 = vadd.xlane.f32.xlu1 %v1932_v11 }
0x20df   : > { %v1929_v12 = vpop.xlane.xlu0 %1928 }
0x20e0   : > { %v1930_v13 = vmax.f32 %v1929_v12, 1e-30 }
0x20e2   : > { %3250 = vrcp.f32 %v1930_v13 }
0x20e3   : > { %v1934_v14 = vpop.xlane.xlu1 %1933 }
0x20e4   : > { %v1935_v15 = vmax.f32 %v1934_v14, 1e-30 }
0x20e6   : > { %3252 = vrcp.f32 %v1935_v15 }
0x20ec   : > { %v3251_v16 = vpop.eup %3250 }
0x20ed   : > { %v1937_v17 = vmul.f32 0.125, %v3251_v16 }
0x20ef   : > { %v1940_v18 = vmul.f32 %v3591_v51, %v1937_v17 }
0x20f0   : > { %v3253_v19 = vpop.eup %3252 }
0x20f1   : > { %v1941_v20 = vsel %vm128_vm2, %v1940_v18, 0.0  ;;  %v1939_v21 = vmul.f32 0.125, %v3253_v19 }
0x20f2   : > { %v1942_v22 = vrot.slane %v1941_v20, 4 }
0x20f3   : > { %v1949_v23 = vmul.f32 %v3595_v53, %v1939_v21 }
0x20f4   : > { %v1943_v24 = vadd.f32 %v1942_v22, %v1941_v20 }
0x20f5   : > { %v1950_v25 = vsel %vm128_vm2, %v1949_v23, 0.0 }
0x20f6   : > { %v1944_v26 = vrot.slane %v1943_v24, 2  ;;  %v1951_v27 = vrot.slane %v1950_v25, 4 }
0x20f8   : > { %v1952_v28 = vadd.f32 %v1951_v27, %v1950_v25  ;;  %v1945_v29 = vadd.f32 %v1944_v26, %v1943_v24 }
0x20fa   : > { %v1953_v30 = vrot.slane %v1952_v28, 2  ;;  %v1946_v31 = vrot.slane %v1945_v29, 1 }
0x20fc   : > { %v1947_v32 = vadd.f32 %v1946_v31, %v1945_v29  ;;  %v1954_v33 = vadd.f32 %v1953_v30, %v1952_v28 }
0x20fe   : > { %v1948_v34 = vmax.f32 %v1947_v32, 1e-30  ;;  %v1955_v35 = vrot.slane %v1954_v33, 1 }
0x2100   : > { %3254 = vrcp.f32 %v1948_v34  ;;  %v1956_v36 = vadd.f32 %v1955_v35, %v1954_v33 }
0x2102   : > { %v1957_v37 = vmax.f32 %v1956_v36, 1e-30 }
0x2104   : > { %3256 = vrcp.f32 %v1957_v37 }
0x210a   : > { %v3255_v38 = vpop.eup %3254 }
0x210b   : > { %v1959_v39 = vmul.f32 0.125, %v3255_v38 }
0x210d   : > { %v1962_v40 = vmul.f32 %v3591_v51, %v1959_v39 }
0x210e   : > { %v3257_v42 = vpop.eup %3256 }
0x210f   : > { %v1963_v43 = vsel %vm128_vm2, %v1962_v40, 0.0  ;;  %v1961_v45 = vmul.f32 0.125, %v3257_v42 }
0x2110   : > { %1964 = vadd.xlane.f32.xlu0 %v1963_v43 }
0x2111   : > { %v1967_v46 = vmul.f32 %v3595_v53, %v1961_v45 }
0x2113   : > { %v1968_v47 = vsel %vm128_vm2, %v1967_v46, 0.0 }
0x2114   : > { %1969 = vadd.xlane.f32.xlu1 %v1968_v47 }
0x219d   : > { %v1965_v48 = vpop.xlane.xlu0 %1964 }
0x219e   : > { %v1966_v50 = vmax.f32 %v1965_v48, 1e-30 }
0x21a0   : > { %3258 = vrcp.f32 %v1966_v50 }
0x21a1   : > { %v1970_v52 = vpop.xlane.xlu1 %1969 }
0x21a2   : > { %v1971_v54 = vmax.f32 %v1970_v52, 1e-30 }
0x21a4   : > { %3260 = vrcp.f32 %v1971_v54 }
0x21aa   : > { %v3259_v55 = vpop.eup %3258 }
0x21ab   : > { %v1973_v56 = vmul.f32 0.125, %v3259_v55 }
0x21ad   : > { %v1976_v57 = vmul.f32 %v3591_v51, %v1973_v56 }
0x21ae   : > { %v3261_v58 = vpop.eup %3260 }
0x21af   : > { %v1977_v59 = vsel %vm128_vm2, %v1976_v57, 0.0  ;;  %v1975_v61 = vmul.f32 0.125, %v3261_v58 }
0x21b0   : > { %v1978_v63 = vrot.slane %v1977_v59, 4 }
0x21b1   : > { %v1985_v0 = vmul.f32 %v3595_v53, %v1975_v61 }
0x21b2   : > { %v1979_v1 = vadd.f32 %v1978_v63, %v1977_v59 }
0x21b3   : > { %v1986_v3 = vsel %vm128_vm2, %v1985_v0, 0.0 }
0x21b4   : > { %v1980_v4 = vrot.slane %v1979_v1, 2  ;;  %v1987_v7 = vrot.slane %v1986_v3, 4 }
0x21b6   : > { %v1988_v8 = vadd.f32 %v1987_v7, %v1986_v3  ;;  %v1981_v9 = vadd.f32 %v1980_v4, %v1979_v1 }
0x21b8   : > { %v1989_v10 = vrot.slane %v1988_v8, 2  ;;  %v1982_v11 = vrot.slane %v1981_v9, 1 }
0x21ba   : > { %v1983_v12 = vadd.f32 %v1982_v11, %v1981_v9  ;;  %v1990_v13 = vadd.f32 %v1989_v10, %v1988_v8 }
0x21bc   : > { %v1984_v14 = vmax.f32 %v1983_v12, 1e-30  ;;  %v1991_v15 = vrot.slane %v1990_v13, 1 }
0x21be   : > { %3262 = vrcp.f32 %v1984_v14  ;;  %v1992_v16 = vadd.f32 %v1991_v15, %v1990_v13 }
0x21c0   : > { %v1993_v17 = vmax.f32 %v1992_v16, 1e-30 }
0x21c2   : > { %3264 = vrcp.f32 %v1993_v17 }
0x21c8   : > { %v3263_v18 = vpop.eup %3262 }
0x21c9   : > { %v1995_v19 = vmul.f32 0.125, %v3263_v18 }
0x21cb   : > { %v1998_v20 = vmul.f32 %v3591_v51, %v1995_v19 }
0x21cc   : > { %v3265_v21 = vpop.eup %3264 }
0x21cd   : > { %v1999_v22 = vsel %vm128_vm2, %v1998_v20, 0.0  ;;  %v1997_v23 = vmul.f32 0.125, %v3265_v21 }
0x21ce   : > { %2000 = vadd.xlane.f32.xlu0 %v1999_v22 }
0x21cf   : > { %v2003_v24 = vmul.f32 %v3595_v53, %v1997_v23 }
0x21d1   : > { %v2004_v25 = vsel %vm128_vm2, %v2003_v24, 0.0 }
0x21d2   : > { %2005 = vadd.xlane.f32.xlu1 %v2004_v25 }
0x225b   : > { %v2001_v26 = vpop.xlane.xlu0 %2000 }
0x225c   : > { %v2002_v27 = vmax.f32 %v2001_v26, 1e-30 }
0x225e   : > { %3266 = vrcp.f32 %v2002_v27 }
0x225f   : > { %v2006_v28 = vpop.xlane.xlu1 %2005 }
0x2260   : > { %v2007_v29 = vmax.f32 %v2006_v28, 1e-30 }
0x2262   : > { %3268 = vrcp.f32 %v2007_v29 }
0x2268   : > { %v3267_v30 = vpop.eup %3266 }
0x2269   : > { %v2009_v31 = vmul.f32 0.125, %v3267_v30 }
0x226b   : > { %v2012_v32 = vmul.f32 %v3591_v51, %v2009_v31 }
0x226c   : > { %v3269_v33 = vpop.eup %3268 }
0x226d   : > { %v2013_v34 = vsel %vm128_vm2, %v2012_v32, 0.0  ;;  %v2011_v35 = vmul.f32 0.125, %v3269_v33 }
0x226e   : > { %v2014_v36 = vrot.slane %v2013_v34, 4 }
0x226f   : > { %v2021_v37 = vmul.f32 %v3595_v53, %v2011_v35 }
0x2270   : > { %v2015_v38 = vadd.f32 %v2014_v36, %v2013_v34 }
0x2271   : > { %v2022_v39 = vsel %vm128_vm2, %v2021_v37, 0.0 }
0x2272   : > { %v2016_v40 = vrot.slane %v2015_v38, 2  ;;  %v2023_v42 = vrot.slane %v2022_v39, 4 }
0x2274   : > { %v2024_v43 = vadd.f32 %v2023_v42, %v2022_v39  ;;  %v2017_v45 = vadd.f32 %v2016_v40, %v2015_v38 }
0x2276   : > { %v2025_v46 = vrot.slane %v2024_v43, 2  ;;  %v2018_v47 = vrot.slane %v2017_v45, 1 }
0x2278   : > { %v2019_v48 = vadd.f32 %v2018_v47, %v2017_v45  ;;  %v2026_v50 = vadd.f32 %v2025_v46, %v2024_v43 }
0x227a   : > { %v2020_v52 = vmax.f32 %v2019_v48, 1e-30  ;;  %v2027_v54 = vrot.slane %v2026_v50, 1 }
0x227c   : > { %3270 = vrcp.f32 %v2020_v52  ;;  %v2028_v55 = vadd.f32 %v2027_v54, %v2026_v50 }
0x227e   : > { %v2029_v56 = vmax.f32 %v2028_v55, 1e-30 }
0x2280   : > { %3272 = vrcp.f32 %v2029_v56 }
0x2286   : > { %v3271_v57 = vpop.eup %3270 }
0x2287   : > { %v2031_v58 = vmul.f32 0.125, %v3271_v57 }
0x2289   : > { %v2034_v59 = vmul.f32 %v3591_v51, %v2031_v58 }
0x228a   : > { %v3273_v61 = vpop.eup %3272 }
0x228b   : > { %v2035_v63 = vsel %vm128_vm2, %v2034_v59, 0.0  ;;  %v2033_v0 = vmul.f32 0.125, %v3273_v61 }
0x228c   : > { %2036 = vadd.xlane.f32.xlu0 %v2035_v63 }
0x228d   : > { %v2039_v1 = vmul.f32 %v3595_v53, %v2033_v0 }
0x228f   : > { %v2040_v3 = vsel %vm128_vm2, %v2039_v1, 0.0 }
0x2290   : > { %2041 = vadd.xlane.f32.xlu1 %v2040_v3 }
0x2319   : > { %v2037_v4 = vpop.xlane.xlu0 %2036 }
0x231a   : > { %v2038_v7 = vmax.f32 %v2037_v4, 1e-30 }
0x231c   : > { %3274 = vrcp.f32 %v2038_v7 }
0x231d   : > { %v2042_v8 = vpop.xlane.xlu1 %2041 }
0x231e   : > { %v2043_v9 = vmax.f32 %v2042_v8, 1e-30 }
0x2320   : > { %3276 = vrcp.f32 %v2043_v9 }
0x2326   : > { %v3275_v10 = vpop.eup %3274 }
0x2327   : > { %v2045_v11 = vmul.f32 0.125, %v3275_v10 }
0x2329   : > { %v2048_v12 = vmul.f32 %v3591_v51, %v2045_v11 }
0x232a   : > { %v3277_v13 = vpop.eup %3276 }
0x232b   : > { %v2049_v14 = vsel %vm128_vm2, %v2048_v12, 0.0  ;;  %v2047_v15 = vmul.f32 0.125, %v3277_v13 }
0x232c   : > { %v2050_v16 = vrot.slane %v2049_v14, 4 }
0x232d   : > { %v2057_v17 = vmul.f32 %v3595_v53, %v2047_v15 }
0x232e   : > { %v2051_v18 = vadd.f32 %v2050_v16, %v2049_v14 }
0x232f   : > { %v2058_v19 = vsel %vm128_vm2, %v2057_v17, 0.0 }
0x2330   : > { %v2052_v20 = vrot.slane %v2051_v18, 2  ;;  %v2059_v21 = vrot.slane %v2058_v19, 4 }
0x2332   : > { %v2060_v22 = vadd.f32 %v2059_v21, %v2058_v19  ;;  %v2053_v23 = vadd.f32 %v2052_v20, %v2051_v18 }
0x2334   : > { %v2061_v24 = vrot.slane %v2060_v22, 2  ;;  %v2054_v25 = vrot.slane %v2053_v23, 1 }
0x2336   : > { %v2055_v26 = vadd.f32 %v2054_v25, %v2053_v23  ;;  %v2062_v27 = vadd.f32 %v2061_v24, %v2060_v22 }
0x2338   : > { %v2056_v28 = vmax.f32 %v2055_v26, 1e-30  ;;  %v2063_v29 = vrot.slane %v2062_v27, 1 }
0x233a   : > { %3278 = vrcp.f32 %v2056_v28  ;;  %v2064_v30 = vadd.f32 %v2063_v29, %v2062_v27 }
0x233c   : > { %v2065_v31 = vmax.f32 %v2064_v30, 1e-30 }
0x233e   : > { %3280 = vrcp.f32 %v2065_v31 }
0x2344   : > { %v3279_v32 = vpop.eup %3278 }
0x2345   : > { %v2067_v33 = vmul.f32 0.125, %v3279_v32 }
0x2347   : > { %v2070_v34 = vmul.f32 %v3591_v51, %v2067_v33 }
0x2348   : > { %v3281_v35 = vpop.eup %3280 }
0x2349   : > { %v2071_v36 = vsel %vm128_vm2, %v2070_v34, 0.0  ;;  %v2069_v37 = vmul.f32 0.125, %v3281_v35 }
0x234a   : > { %2072 = vadd.xlane.f32.xlu0 %v2071_v36 }
0x234b   : > { %v2075_v38 = vmul.f32 %v3595_v53, %v2069_v37 }
0x234d   : > { %v2076_v39 = vsel %vm128_vm2, %v2075_v38, 0.0 }
0x234e   : > { %2077 = vadd.xlane.f32.xlu1 %v2076_v39 }
0x23d7   : > { %v2073_v40 = vpop.xlane.xlu0 %2072 }
0x23d8   : > { %v2074_v42 = vmax.f32 %v2073_v40, 1e-30 }
0x23da   : > { %3282 = vrcp.f32 %v2074_v42 }
0x23db   : > { %v2078_v43 = vpop.xlane.xlu1 %2077 }
0x23dc   : > { %v2079_v45 = vmax.f32 %v2078_v43, 1e-30 }
0x23de   : > { %3284 = vrcp.f32 %v2079_v45 }
0x23e4   : > { %v3283_v46 = vpop.eup %3282 }
0x23e5   : > { %v2081_v47 = vmul.f32 0.125, %v3283_v46 }
0x23e7   : > { %v2084_v48 = vmul.f32 %v3591_v51, %v2081_v47 }
0x23e8   : > { %v3285_v50 = vpop.eup %3284 }
0x23e9   : > { %v2085_v52 = vsel %vm128_vm2, %v2084_v48, 0.0  ;;  %v2083_v54 = vmul.f32 0.125, %v3285_v50 }
0x23ea   : > { %v2086_v55 = vrot.slane %v2085_v52, 4 }
0x23eb   : > { %v2093_v56 = vmul.f32 %v3595_v53, %v2083_v54 }
0x23ec   : > { %v2087_v57 = vadd.f32 %v2086_v55, %v2085_v52 }
0x23ed   : > { %v2094_v58 = vsel %vm128_vm2, %v2093_v56, 0.0 }
0x23ee   : > { %v2088_v59 = vrot.slane %v2087_v57, 2  ;;  %v2095_v61 = vrot.slane %v2094_v58, 4 }
0x23f0   : > { %v2096_v63 = vadd.f32 %v2095_v61, %v2094_v58  ;;  %v2089_v0 = vadd.f32 %v2088_v59, %v2087_v57 }
0x23f2   : > { %v2097_v1 = vrot.slane %v2096_v63, 2  ;;  %v2090_v3 = vrot.slane %v2089_v0, 1 }
0x23f4   : > { %v2091_v4 = vadd.f32 %v2090_v3, %v2089_v0  ;;  %v2098_v7 = vadd.f32 %v2097_v1, %v2096_v63 }
0x23f6   : > { %v2092_v8 = vmax.f32 %v2091_v4, 1e-30  ;;  %v2099_v9 = vrot.slane %v2098_v7, 1 }
0x23f8   : > { %3286 = vrcp.f32 %v2092_v8  ;;  %v2100_v10 = vadd.f32 %v2099_v9, %v2098_v7 }
0x23fa   : > { %v2101_v11 = vmax.f32 %v2100_v10, 1e-30 }
0x23fc   : > { %3288 = vrcp.f32 %v2101_v11 }
0x2402   : > { %v3287_v12 = vpop.eup %3286 }
0x2403   : > { %v2103_v13 = vmul.f32 0.125, %v3287_v12 }
0x2405   : > { %v2106_v14 = vmul.f32 %v3591_v51, %v2103_v13 }
0x2406   : > { %v3289_v15 = vpop.eup %3288 }
0x2407   : > { %v2107_v16 = vsel %vm128_vm2, %v2106_v14, 0.0  ;;  %v2105_v17 = vmul.f32 0.125, %v3289_v15 }
0x2408   : > { %2108 = vadd.xlane.f32.xlu0 %v2107_v16 }
0x2409   : > { %v2111_v18 = vmul.f32 %v3595_v53, %v2105_v17 }
0x240b   : > { %v2112_v19 = vsel %vm128_vm2, %v2111_v18, 0.0 }
0x240c   : > { %2113 = vadd.xlane.f32.xlu1 %v2112_v19 }
0x2495   : > { %v2109_v20 = vpop.xlane.xlu0 %2108 }
0x2496   : > { %v2110_v21 = vmax.f32 %v2109_v20, 1e-30 }
0x2498   : > { %3290 = vrcp.f32 %v2110_v21 }
0x2499   : > { %v2114_v22 = vpop.xlane.xlu1 %2113 }
0x249a   : > { %v2115_v23 = vmax.f32 %v2114_v22, 1e-30 }
0x249c   : > { %3292 = vrcp.f32 %v2115_v23 }
0x24a2   : > { %v3291_v24 = vpop.eup %3290 }
0x24a3   : > { %v2117_v25 = vmul.f32 0.125, %v3291_v24 }
0x24a5   : > { %v2120_v26 = vmul.f32 %v3591_v51, %v2117_v25 }
0x24a6   : > { %v3293_v27 = vpop.eup %3292 }
0x24a7   : > { %v2121_v28 = vsel %vm128_vm2, %v2120_v26, 0.0  ;;  %v2119_v29 = vmul.f32 0.125, %v3293_v27 }
0x24a8   : > { %v2122_v30 = vrot.slane %v2121_v28, 4 }
0x24a9   : > { %v2129_v31 = vmul.f32 %v3595_v53, %v2119_v29 }
0x24aa   : > { %v2123_v32 = vadd.f32 %v2122_v30, %v2121_v28 }
0x24ab   : > { %v2130_v33 = vsel %vm128_vm2, %v2129_v31, 0.0 }
0x24ac   : > { %v2124_v34 = vrot.slane %v2123_v32, 2  ;;  %v2131_v35 = vrot.slane %v2130_v33, 4 }
0x24ae   : > { %v2132_v36 = vadd.f32 %v2131_v35, %v2130_v33  ;;  %v2125_v37 = vadd.f32 %v2124_v34, %v2123_v32 }
0x24b0   : > { %v2133_v38 = vrot.slane %v2132_v36, 2  ;;  %v2126_v39 = vrot.slane %v2125_v37, 1 }
0x24b2   : > { %v2127_v40 = vadd.f32 %v2126_v39, %v2125_v37  ;;  %v2134_v42 = vadd.f32 %v2133_v38, %v2132_v36 }
0x24b4   : > { %v2128_v43 = vmax.f32 %v2127_v40, 1e-30  ;;  %v2135_v45 = vrot.slane %v2134_v42, 1 }
0x24b6   : > { %3294 = vrcp.f32 %v2128_v43  ;;  %v2136_v46 = vadd.f32 %v2135_v45, %v2134_v42 }
0x24b8   : > { %v2137_v47 = vmax.f32 %v2136_v46, 1e-30 }
0x24ba   : > { %3296 = vrcp.f32 %v2137_v47 }
0x24c0   : > { %v3295_v48 = vpop.eup %3294 }
0x24c1   : > { %v2139_v50 = vmul.f32 0.125, %v3295_v48 }
0x24c3   : > { %v2142_v52 = vmul.f32 %v3591_v51, %v2139_v50 }
0x24c4   : > { %v3297_v54 = vpop.eup %3296 }
0x24c5   : > { %v2143_v55 = vsel %vm128_vm2, %v2142_v52, 0.0  ;;  %v2141_v56 = vmul.f32 0.125, %v3297_v54 }
0x24c6   : > { %2144 = vadd.xlane.f32.xlu0 %v2143_v55 }
0x24c7   : > { %v2147_v57 = vmul.f32 %v3595_v53, %v2141_v56 }
0x24c9   : > { %v2148_v58 = vsel %vm128_vm2, %v2147_v57, 0.0 }
0x24ca   : > { %2149 = vadd.xlane.f32.xlu1 %v2148_v58 }
0x2553   : > { %v2145_v59 = vpop.xlane.xlu0 %2144 }
0x2554   : > { %v2146_v61 = vmax.f32 %v2145_v59, 1e-30 }
0x2556   : > { %3298 = vrcp.f32 %v2146_v61 }
0x2557   : > { %v2150_v63 = vpop.xlane.xlu1 %2149 }
0x2558   : > { %v2151_v0 = vmax.f32 %v2150_v63, 1e-30 }
0x255a   : > { %3300 = vrcp.f32 %v2151_v0 }
0x2560   : > { %v3299_v1 = vpop.eup %3298 }
0x2561   : > { %v2153_v3 = vmul.f32 0.125, %v3299_v1 }
0x2563   : > { %v2156_v4 = vmul.f32 %v3591_v51, %v2153_v3 }
0x2564   : > { %v3301_v7 = vpop.eup %3300 }
0x2565   : > { %v2157_v8 = vsel %vm128_vm2, %v2156_v4, 0.0  ;;  %v2155_v9 = vmul.f32 0.125, %v3301_v7 }
0x2566   : > { %v2158_v10 = vrot.slane %v2157_v8, 4 }
0x2567   : > { %v2165_v11 = vmul.f32 %v3595_v53, %v2155_v9 }
0x2568   : > { %v2159_v12 = vadd.f32 %v2158_v10, %v2157_v8 }
0x2569   : > { %v2166_v13 = vsel %vm128_vm2, %v2165_v11, 0.0 }
0x256a   : > { %v2160_v14 = vrot.slane %v2159_v12, 2  ;;  %v2167_v15 = vrot.slane %v2166_v13, 4 }
0x256c   : > { %v2168_v16 = vadd.f32 %v2167_v15, %v2166_v13  ;;  %v2161_v17 = vadd.f32 %v2160_v14, %v2159_v12 }
0x256e   : > { %v2169_v18 = vrot.slane %v2168_v16, 2  ;;  %v2162_v19 = vrot.slane %v2161_v17, 1 }
0x2570   : > { %v2163_v20 = vadd.f32 %v2162_v19, %v2161_v17  ;;  %v2170_v21 = vadd.f32 %v2169_v18, %v2168_v16 }
0x2572   : > { %v2164_v22 = vmax.f32 %v2163_v20, 1e-30  ;;  %v2171_v23 = vrot.slane %v2170_v21, 1 }
0x2574   : > { %3302 = vrcp.f32 %v2164_v22  ;;  %v2172_v24 = vadd.f32 %v2171_v23, %v2170_v21 }
0x2576   : > { %v2173_v25 = vmax.f32 %v2172_v24, 1e-30 }
0x2578   : > { %3304 = vrcp.f32 %v2173_v25 }
0x257e   : > { %v3303_v26 = vpop.eup %3302 }
0x257f   : > { %v2175_v27 = vmul.f32 0.125, %v3303_v26 }
0x2581   : > { %v2178_v28 = vmul.f32 %v3591_v51, %v2175_v27 }
0x2582   : > { %v3305_v29 = vpop.eup %3304 }
0x2583   : > { %v2179_v30 = vsel %vm128_vm2, %v2178_v28, 0.0  ;;  %v2177_v31 = vmul.f32 0.125, %v3305_v29 }
0x2584   : > { %2180 = vadd.xlane.f32.xlu0 %v2179_v30 }
0x2585   : > { %v2183_v32 = vmul.f32 %v3595_v53, %v2177_v31 }
0x2587   : > { %v2184_v33 = vsel %vm128_vm2, %v2183_v32, 0.0 }
0x2588   : > { %2185 = vadd.xlane.f32.xlu1 %v2184_v33 }
0x2611   : > { %v2181_v34 = vpop.xlane.xlu0 %2180 }
0x2612   : > { %v2182_v35 = vmax.f32 %v2181_v34, 1e-30 }
0x2614   : > { %3306 = vrcp.f32 %v2182_v35 }
0x2615   : > { %v2186_v36 = vpop.xlane.xlu1 %2185 }
0x2616   : > { %v2187_v37 = vmax.f32 %v2186_v36, 1e-30 }
0x2618   : > { %3308 = vrcp.f32 %v2187_v37 }
0x261e   : > { %v3307_v38 = vpop.eup %3306 }
0x261f   : > { %v2189_v39 = vmul.f32 0.125, %v3307_v38 }
0x2621   : > { %v2192_v40 = vmul.f32 %v3591_v51, %v2189_v39 }
0x2622   : > { %v3309_v42 = vpop.eup %3308 }
0x2623   : > { %v2193_v43 = vsel %vm128_vm2, %v2192_v40, 0.0  ;;  %v2191_v45 = vmul.f32 0.125, %v3309_v42 }
0x2624   : > { %v2194_v46 = vrot.slane %v2193_v43, 4 }
0x2625   : > { %v2201_v47 = vmul.f32 %v3595_v53, %v2191_v45 }
0x2626   : > { %v2195_v48 = vadd.f32 %v2194_v46, %v2193_v43 }
0x2627   : > { %v2202_v50 = vsel %vm128_vm2, %v2201_v47, 0.0 }
0x2628   : > { %v2196_v52 = vrot.slane %v2195_v48, 2  ;;  %v2203_v54 = vrot.slane %v2202_v50, 4 }
0x262a   : > { %v2204_v55 = vadd.f32 %v2203_v54, %v2202_v50  ;;  %v2197_v56 = vadd.f32 %v2196_v52, %v2195_v48 }
0x262c   : > { %v2205_v57 = vrot.slane %v2204_v55, 2  ;;  %v2198_v58 = vrot.slane %v2197_v56, 1 }
0x262e   : > { %v2199_v59 = vadd.f32 %v2198_v58, %v2197_v56  ;;  %v2206_v61 = vadd.f32 %v2205_v57, %v2204_v55 }
0x2630   : > { %v2200_v63 = vmax.f32 %v2199_v59, 1e-30  ;;  %v2207_v0 = vrot.slane %v2206_v61, 1 }
0x2632   : > { %3310 = vrcp.f32 %v2200_v63  ;;  %v2208_v1 = vadd.f32 %v2207_v0, %v2206_v61 }
0x2634   : > { %v2209_v3 = vmax.f32 %v2208_v1, 1e-30 }
0x2636   : > { %3312 = vrcp.f32 %v2209_v3 }
0x263c   : > { %v3311_v4 = vpop.eup %3310 }
0x263d   : > { %v2211_v7 = vmul.f32 0.125, %v3311_v4 }
0x263f   : > { %v2214_v8 = vmul.f32 %v3591_v51, %v2211_v7 }
0x2640   : > { %v3313_v9 = vpop.eup %3312 }
0x2641   : > { %v2215_v10 = vsel %vm128_vm2, %v2214_v8, 0.0  ;;  %v2213_v11 = vmul.f32 0.125, %v3313_v9 }
0x2642   : > { %2216 = vadd.xlane.f32.xlu0 %v2215_v10 }
0x2643   : > { %v2219_v12 = vmul.f32 %v3595_v53, %v2213_v11 }
0x2645   : > { %v2220_v13 = vsel %vm128_vm2, %v2219_v12, 0.0 }
0x2646   : > { %2221 = vadd.xlane.f32.xlu1 %v2220_v13 }
0x26cf   : > { %v2217_v14 = vpop.xlane.xlu0 %2216 }
0x26d0   : > { %v2218_v15 = vmax.f32 %v2217_v14, 1e-30 }
0x26d2   : > { %3314 = vrcp.f32 %v2218_v15 }
0x26d3   : > { %v2222_v16 = vpop.xlane.xlu1 %2221 }
0x26d4   : > { %v2223_v17 = vmax.f32 %v2222_v16, 1e-30 }
0x26d6   : > { %3316 = vrcp.f32 %v2223_v17 }
0x26dc   : > { %v3315_v18 = vpop.eup %3314 }
0x26dd   : > { %v2225_v19 = vmul.f32 0.125, %v3315_v18 }
0x26df   : > { %v2228_v20 = vmul.f32 %v3591_v51, %v2225_v19 }
0x26e0   : > { %v3317_v21 = vpop.eup %3316 }
0x26e1   : > { %v2229_v22 = vsel %vm128_vm2, %v2228_v20, 0.0  ;;  %v2227_v23 = vmul.f32 0.125, %v3317_v21 }
0x26e2   : > { %v2230_v24 = vrot.slane %v2229_v22, 4 }
0x26e3   : > { %v2237_v25 = vmul.f32 %v3595_v53, %v2227_v23 }
0x26e4   : > { %v2231_v26 = vadd.f32 %v2230_v24, %v2229_v22 }
0x26e5   : > { %v2238_v27 = vsel %vm128_vm2, %v2237_v25, 0.0 }
0x26e6   : > { %v2232_v28 = vrot.slane %v2231_v26, 2  ;;  %v2239_v29 = vrot.slane %v2238_v27, 4 }
0x26e8   : > { %v2240_v30 = vadd.f32 %v2239_v29, %v2238_v27  ;;  %v2233_v31 = vadd.f32 %v2232_v28, %v2231_v26 }
0x26ea   : > { %v2241_v32 = vrot.slane %v2240_v30, 2  ;;  %v2234_v33 = vrot.slane %v2233_v31, 1 }
0x26ec   : > { %v2235_v34 = vadd.f32 %v2234_v33, %v2233_v31  ;;  %v2242_v35 = vadd.f32 %v2241_v32, %v2240_v30 }
0x26ee   : > { %v2236_v36 = vmax.f32 %v2235_v34, 1e-30  ;;  %v2243_v37 = vrot.slane %v2242_v35, 1 }
0x26f0   : > { %3318 = vrcp.f32 %v2236_v36  ;;  %v2244_v38 = vadd.f32 %v2243_v37, %v2242_v35 }
0x26f2   : > { %v2245_v39 = vmax.f32 %v2244_v38, 1e-30 }
0x26f4   : > { %3320 = vrcp.f32 %v2245_v39 }
0x26fa   : > { %v3319_v40 = vpop.eup %3318 }
0x26fb   : > { %v2247_v42 = vmul.f32 0.125, %v3319_v40 }
0x26fd   : > { %v2250_v43 = vmul.f32 %v3591_v51, %v2247_v42 }
0x26fe   : > { %v3321_v45 = vpop.eup %3320 }
0x26ff   : > { %v2251_v46 = vsel %vm128_vm2, %v2250_v43, 0.0  ;;  %v2249_v47 = vmul.f32 0.125, %v3321_v45 }
0x2700   : > { %2252 = vadd.xlane.f32.xlu0 %v2251_v46 }
0x2701   : > { %v2255_v48 = vmul.f32 %v3595_v53, %v2249_v47 }
0x2703   : > { %v2256_v50 = vsel %vm128_vm2, %v2255_v48, 0.0 }
0x2704   : > { %2257 = vadd.xlane.f32.xlu1 %v2256_v50 }
0x278d   : > { %v2253_v52 = vpop.xlane.xlu0 %2252 }
0x278e   : > { %v2254_v54 = vmax.f32 %v2253_v52, 1e-30 }
0x2790   : > { %3322 = vrcp.f32 %v2254_v54 }
0x2791   : > { %v2258_v55 = vpop.xlane.xlu1 %2257 }
0x2792   : > { %v2259_v56 = vmax.f32 %v2258_v55, 1e-30 }
0x2794   : > { %3324 = vrcp.f32 %v2259_v56 }
0x279a   : > { %v3323_v57 = vpop.eup %3322 }
0x279b   : > { %v2261_v58 = vmul.f32 0.125, %v3323_v57 }
0x279d   : > { %v2264_v59 = vmul.f32 %v3591_v51, %v2261_v58 }
0x279e   : > { %v3325_v61 = vpop.eup %3324 }
0x279f   : > { %v2265_v63 = vsel %vm128_vm2, %v2264_v59, 0.0  ;;  %v2263_v0 = vmul.f32 0.125, %v3325_v61 }
0x27a0   : > { %v2266_v1 = vrot.slane %v2265_v63, 4 }
0x27a1   : > { %v2273_v3 = vmul.f32 %v3595_v53, %v2263_v0 }
0x27a2   : > { %v2267_v4 = vadd.f32 %v2266_v1, %v2265_v63 }
0x27a3   : > { %v2274_v7 = vsel %vm128_vm2, %v2273_v3, 0.0 }
0x27a4   : > { %v2268_v8 = vrot.slane %v2267_v4, 2  ;;  %v2275_v9 = vrot.slane %v2274_v7, 4 }
0x27a6   : > { %v2276_v10 = vadd.f32 %v2275_v9, %v2274_v7  ;;  %v2269_v11 = vadd.f32 %v2268_v8, %v2267_v4 }
0x27a8   : > { %v2277_v12 = vrot.slane %v2276_v10, 2  ;;  %v2270_v13 = vrot.slane %v2269_v11, 1 }
0x27aa   : > { %v2271_v14 = vadd.f32 %v2270_v13, %v2269_v11  ;;  %v2278_v15 = vadd.f32 %v2277_v12, %v2276_v10 }
0x27ac   : > { %v2272_v16 = vmax.f32 %v2271_v14, 1e-30  ;;  %v2279_v17 = vrot.slane %v2278_v15, 1 }
0x27ae   : > { %3326 = vrcp.f32 %v2272_v16  ;;  %v2280_v18 = vadd.f32 %v2279_v17, %v2278_v15 }
0x27b0   : > { %v2281_v19 = vmax.f32 %v2280_v18, 1e-30 }
0x27b2   : > { %3328 = vrcp.f32 %v2281_v19 }
0x27b8   : > { %v3327_v20 = vpop.eup %3326 }
0x27b9   : > { %v2283_v21 = vmul.f32 0.125, %v3327_v20 }
0x27bb   : > { %v2286_v22 = vmul.f32 %v3591_v51, %v2283_v21 }
0x27bc   : > { %v3329_v23 = vpop.eup %3328 }
0x27bd   : > { %v2287_v24 = vsel %vm128_vm2, %v2286_v22, 0.0  ;;  %v2285_v25 = vmul.f32 0.125, %v3329_v23 }
0x27be   : > { %2288 = vadd.xlane.f32.xlu0 %v2287_v24 }
0x27bf   : > { %v2291_v26 = vmul.f32 %v3595_v53, %v2285_v25 }
0x27c1   : > { %v2292_v27 = vsel %vm128_vm2, %v2291_v26, 0.0 }
0x27c2   : > { %2293 = vadd.xlane.f32.xlu1 %v2292_v27 }
0x284b   : > { %v2289_v28 = vpop.xlane.xlu0 %2288 }
0x284c   : > { %v2290_v29 = vmax.f32 %v2289_v28, 1e-30 }
0x284e   : > { %3330 = vrcp.f32 %v2290_v29 }
0x284f   : > { %v2294_v30 = vpop.xlane.xlu1 %2293 }
0x2850   : > { %v2295_v31 = vmax.f32 %v2294_v30, 1e-30 }
0x2852   : > { %3332 = vrcp.f32 %v2295_v31 }
0x2858   : > { %v3331_v32 = vpop.eup %3330 }
0x2859   : > { %v2297_v33 = vmul.f32 0.125, %v3331_v32 }
0x285b   : > { %v2300_v34 = vmul.f32 %v3591_v51, %v2297_v33 }
0x285c   : > { %v3333_v35 = vpop.eup %3332 }
0x285d   : > { %v2301_v36 = vsel %vm128_vm2, %v2300_v34, 0.0  ;;  %v2299_v37 = vmul.f32 0.125, %v3333_v35 }
0x285e   : > { %v2302_v38 = vrot.slane %v2301_v36, 4 }
0x285f   : > { %v2309_v39 = vmul.f32 %v3595_v53, %v2299_v37 }
0x2860   : > { %v2303_v40 = vadd.f32 %v2302_v38, %v2301_v36 }
0x2861   : > { %v2310_v42 = vsel %vm128_vm2, %v2309_v39, 0.0 }
0x2862   : > { %v2304_v43 = vrot.slane %v2303_v40, 2  ;;  %v2311_v45 = vrot.slane %v2310_v42, 4 }
0x2864   : > { %v2305_v46 = vadd.f32 %v2304_v43, %v2303_v40  ;;  %v2312_v47 = vadd.f32 %v2311_v45, %v2310_v42 }
0x2866   : > { %v2313_v48 = vrot.slane %v2312_v47, 2  ;;  %v2306_v50 = vrot.slane %v2305_v46, 1 }
0x2868   : > { %v2314_v52 = vadd.f32 %v2313_v48, %v2312_v47  ;;  %v2307_v54 = vadd.f32 %v2306_v50, %v2305_v46 }
0x286a   : > { %v2308_v55 = vmax.f32 %v2307_v54, 1e-30  ;;  %v2315_v56 = vrot.slane %v2314_v52, 1 }
0x286c   : > { %3334 = vrcp.f32 %v2308_v55  ;;  %v2316_v57 = vadd.f32 %v2315_v56, %v2314_v52 }
0x286e   : > { %v2317_v58 = vmax.f32 %v2316_v57, 1e-30 }
0x2870   : > { %3336 = vrcp.f32 %v2317_v58 }
0x2876   : > { %v3335_v59 = vpop.eup %3334 }
0x2877   : > { %v2319_v61 = vmul.f32 0.125, %v3335_v59 }
0x2879   : > { %v2322_v63 = vmul.f32 %v3591_v51, %v2319_v61 }
0x287a   : > { %v3337_v0 = vpop.eup %3336 }
0x287b   : > { %v2323_v1 = vsel %vm128_vm2, %v2322_v63, 0.0  ;;  %v2321_v3 = vmul.f32 0.125, %v3337_v0 }
0x287c   : > { %2324 = vadd.xlane.f32.xlu0 %v2323_v1 }
0x287d   : > { %v2327_v4 = vmul.f32 %v3595_v53, %v2321_v3 }
0x287f   : > { %v2328_v7 = vsel %vm128_vm2, %v2327_v4, 0.0 }
0x2880   : > { %2329 = vadd.xlane.f32.xlu1 %v2328_v7 }
0x2909   : > { %v2325_v8 = vpop.xlane.xlu0 %2324 }
0x290a   : > { %v2326_v9 = vmax.f32 %v2325_v8, 1e-30 }
0x290c   : > { %3338 = vrcp.f32 %v2326_v9 }
0x290d   : > { %v2330_v10 = vpop.xlane.xlu1 %2329 }
0x290e   : > { %v2331_v11 = vmax.f32 %v2330_v10, 1e-30 }
0x2910   : > { %3340 = vrcp.f32 %v2331_v11 }
0x2916   : > { %v3339_v12 = vpop.eup %3338 }
0x2917   : > { %v2333_v13 = vmul.f32 0.125, %v3339_v12 }
0x2919   : > { %v2336_v14 = vmul.f32 %v3591_v51, %v2333_v13 }
0x291a   : > { %v3341_v15 = vpop.eup %3340 }
0x291b   : > { %v2337_v16 = vsel %vm128_vm2, %v2336_v14, 0.0  ;;  %v2335_v17 = vmul.f32 0.125, %v3341_v15 }
0x291c   : > { %v2338_v18 = vrot.slane %v2337_v16, 4 }
0x291d   : > { %v2345_v19 = vmul.f32 %v3595_v53, %v2335_v17 }
0x291e   : > { %v2339_v20 = vadd.f32 %v2338_v18, %v2337_v16 }
0x291f   : > { %v2346_v21 = vsel %vm128_vm2, %v2345_v19, 0.0 }
0x2920   : > { %v2340_v22 = vrot.slane %v2339_v20, 2  ;;  %v2347_v23 = vrot.slane %v2346_v21, 4 }
0x2922   : > { %v2341_v24 = vadd.f32 %v2340_v22, %v2339_v20  ;;  %v2348_v25 = vadd.f32 %v2347_v23, %v2346_v21  ;;  %v2754_v20 = vstv (%p258_p5), %s3548_s17 }
0x2923   :  { %v2774_v21 = vsel (%p258_p5), %vm2773_vm4, %v2754_v20, 0.0 }
0x2924   : > { %v2349_v26 = vrot.slane %v2348_v25, 2  ;;  %v2342_v27 = vrot.slane %v2341_v24, 1 }
0x2926   : > { %v2350_v28 = vadd.f32 %v2349_v26, %v2348_v25  ;;  %v2343_v29 = vadd.f32 %v2342_v27, %v2341_v24 }
0x2928   : > { %v2344_v30 = vmax.f32 %v2343_v29, 1e-30  ;;  %v2351_v31 = vrot.slane %v2350_v28, 1 }
0x292a   : > { %3342 = vrcp.f32 %v2344_v30  ;;  %v2352_v32 = vadd.f32 %v2351_v31, %v2350_v28 }
0x292c   : > { %v2353_v33 = vmax.f32 %v2352_v32, 1e-30 }
0x292e   : > { %3344 = vrcp.f32 %v2353_v33 }
0x2934   : > { %v3343_v34 = vpop.eup %3342 }
0x2935   : > { %v2355_v35 = vmul.f32 0.125, %v3343_v34 }
0x2937   : > { %v2358_v36 = vmul.f32 %v3591_v51, %v2355_v35 }
0x2938   : > { %v3345_v37 = vpop.eup %3344 }
0x2939   : > { %v2359_v38 = vsel %vm128_vm2, %v2358_v36, 0.0  ;;  %v2357_v39 = vmul.f32 0.125, %v3345_v37 }
0x293a   : > { %2360 = vadd.xlane.f32.xlu0 %v2359_v38 }
0x293b   : > { %v2363_v40 = vmul.f32 %v3595_v53, %v2357_v39 }
0x293d   : > { %v2364_v42 = vsel %vm128_vm2, %v2363_v40, 0.0 }
0x293e   : > { %2365 = vadd.xlane.f32.xlu1 %v2364_v42 }
0x29c7   : > { %v2361_v43 = vpop.xlane.xlu0 %2360 }
0x29c8   : > { %v2362_v45 = vmax.f32 %v2361_v43, 1e-30 }
0x29ca   : > { %3346 = vrcp.f32 %v2362_v45 }
0x29cb   : > { %v2366_v46 = vpop.xlane.xlu1 %2365 }
0x29cc   : > { %v2367_v47 = vmax.f32 %v2366_v46, 1e-30 }
0x29ce   : > { %3348 = vrcp.f32 %v2367_v47 }
0x29d4   : > { %v3347_v48 = vpop.eup %3346 }
0x29d5   : > { %v2369_v50 = vmul.f32 0.125, %v3347_v48 }
0x29d7   : > { %v2372_v52 = vmul.f32 %v3591_v51, %v2369_v50 }
0x29d8   : > { %v3349_v54 = vpop.eup %3348 }
0x29d9   : > { %v2373_v55 = vsel %vm128_vm2, %v2372_v52, 0.0  ;;  %v2371_v56 = vmul.f32 0.125, %v3349_v54 }
0x29da   : > { %v2374_v57 = vrot.slane %v2373_v55, 4 }
0x29db   : > { %v2381_v58 = vmul.f32 %v3595_v53, %v2371_v56 }
0x29dc   : > { %v2375_v59 = vadd.f32 %v2374_v57, %v2373_v55 }
0x29dd   : > { %v2382_v61 = vsel %vm128_vm2, %v2381_v58, 0.0 }
0x29de   : > { %v2376_v63 = vrot.slane %v2375_v59, 2  ;;  %v2383_v0 = vrot.slane %v2382_v61, 4 }
0x29e0   : > { %v2377_v1 = vadd.f32 %v2376_v63, %v2375_v59  ;;  %v2384_v3 = vadd.f32 %v2383_v0, %v2382_v61 }
0x29e2   : > { %v2378_v4 = vrot.slane %v2377_v1, 1  ;;  %v2385_v7 = vrot.slane %v2384_v3, 2 }
0x29e4   : > { %v2379_v8 = vadd.f32 %v2378_v4, %v2377_v1  ;;  %v2386_v9 = vadd.f32 %v2385_v7, %v2384_v3 }
0x29e6   : > { %v2380_v10 = vmax.f32 %v2379_v8, 1e-30  ;;  %v2387_v51 = vrot.slane %v2386_v9, 1 }
0x29e8   : > { %3350 = vrcp.f32 %v2380_v10  ;;  %v2388_v11 = vadd.f32 %v2387_v51, %v2386_v9 }
0x29ea   : > { %v2389_v12 = vmax.f32 %v2388_v11, 1e-30 }
0x29ec   : > { %3352 = vrcp.f32 %v2389_v12 }
0x29f2   : > { %v3351_v13 = vpop.eup %3350 }
0x29f3   : > { %v2391_v14 = vmul.f32 0.125, %v3351_v13 }
0x29f5   : > { %v2394_v53 = vmul.f32 %v2391_v14, %v2372_v52   ;;  %260 = sbr.rel (!%p258_p5) target bundleno = 583 (0x247), region = 52 }
0x29f6   : > { %v3353_v15 = vpop.eup %3352 }
0x29f7   : > { %v2393_v16 = vmul.f32 0.125, %v3353_v15  ;;  %v4046_v0 = vmov %v2394_v53  ;;  %2886 = vmatpush3.msra.mxu0 (%p258_p5), %v2394_v53  ;;  %2469 = vxpose.xlu0.b32.start.end [1/1] (short) (narrow) (%p258_p5), %v2394_v53, 8 }
0x29f8   :  { %2888 = vmatmul.mubr.msk.f32.vlgmr.msra.gmra.mrb[0].mxu0 (%p258_p5), %vm128_vm2, %v3536_v41  ;;  %2895 = vmatprep.subr.mxu0 (%p258_p5), %v3455_v2 }
0x29f9   : > { %v2395_v17 = vmul.f32 %v2393_v16, %v2381_v58   ;;  %2897 = vmatprep.mubr.msk.f32.mxu0 (%p258_p5), %vm3456_vm0, %v3455_v2 }
0x29fb   : > { %v4045_v63 = vmov %v2395_v17  ;;  %2896 = vmatpush3.msra.mxu0 (%p258_p5), %v2395_v17  ;;  %2649 = vxpose.xlu0.b32.start.end [1/1] (short) (narrow) (%p258_p5), %v2395_v17, 8 }
0x29fc   :  { %2898 = vmatmul.mubr.msk.f32.vlgmr.msra.gmra.mrb[2].mxu0 %vm128_vm2, %v3540_v44  ;;  %v2574_v44 = vstv %s3546_s2 }
0x29fd   :  { %v2775_v22 = vsel %vm2772_vm5, %v2574_v44, %v2774_v21 }
0x29fe   :  { %v2777_v23 = vadd.f32 1e-10, %v2775_v22 }
0x2a00   :  { %3354 = vlog2.f32 %v2777_v23 }
0x2a0a   :  { %v3355_v26 = vpop.eup %3354 }
0x2a0b   :  { %v2779_v30 = vmul.f32 0.6931472, %v3355_v26 }
0x2a0d   :  { %v2780_v33 = vmul.f32 %v2779_v30, %v2775_v22 }
0x2a0f   :  { %v2781_v36 = vsel %vm2776_vm6, %v2780_v33, 0.0 }
0x2a10   :  { %v2783_v38 = vsel %vm2782_vm7, %v2781_v36, 0.0 }
0x2a77   :  { %v2485_v6 = vpop.trf.xlu0 }
0x2a7b   :  { %v2665_v62 = vpop.trf.xlu0 }
0x2acb   :  { %v2465_v60 = vpop.f32.mrb[0].mxu0 }
0x2acc   :  { %v2889_v41 = vpop.f32.mrb[1].mxu0  ;;  %2891 = vmatpush3.msra.mxu1 %v2465_v60 }
0x2acd   :  { %2893 = vmatmul.mubr.msk.f32.vlgmr.msra.gmra.mrb[0].mxu1 %vm128_vm2, %v2485_v6  ;;  %2900 = vmatprep.subr.mxu1 %v3455_v2 }
0x2ace   :  { %2902 = vmatprep.mubr.msk.f32.mxu1 %vm3456_vm0, %v3455_v2 }
0x2acf   :  { %v2645_v18 = vpop.f32.mrb[2].mxu0 }
0x2ad0   :  { %v2899_v19 = vpop.f32.mrb[3].mxu0  ;;  %2901 = vmatpush3.msra.mxu1 %v2645_v18 }
0x2ad1   :  { %2903 = vmatmul.mubr.msk.f32.vlgmr.msra.gmra.mrb[2].mxu1 %vm128_vm2, %v2665_v62 }
0x2ba0   :  { %v2570_v24 = vpop.f32.mrb[0].mxu1 }
0x2ba1   :  { %v2894_v25 = vpop.f32.mrb[1].mxu1  ;;  %v2575_v2 = vmul.f32 %v2574_v44, %v2570_v24 }
0x2ba4   :  { %v2750_v27 = vpop.f32.mrb[2].mxu1 }
0x2ba5   :  { %v2755_v28 = vmul.f32 %v2754_v20, %v2750_v27  ;;  %v2904_v29 = vpop.f32.mrb[3].mxu1 }
0x2ba7   :  { %v2756_v31 = vadd.f32 %v2755_v28, %v2575_v2 }
0x2ba9   :  { %v2758_v32 = vmul.f32 64.0, %v2756_v31 }
0x2bab   :  { %v2759_v34 = vsub.f32 %v2758_v32, %v3553_v49 }
0x2bad   :  { %v2760_v35 = vmul.f32 %v2759_v34, %v2759_v34 }
0x2baf   :  { %v2761_v37 = vsel %vm128_vm2, %v2760_v35, 0.0 }
0x2bb0   :  { %2762 = vadd.xlane.f32.xlu1 %v2761_v37 }
0x2bb4   :  { %2784 = vadd.xlane.f32.xlu1 %v2783_v38 }
0x2c3d   :  { %v2763_v39 = vpop.xlane.xlu1 %2762 }
0x2c3e   :  { %v2764_v40 = vrot.slane %v2763_v39, 4 }
0x2c40   :  { %v2765_v42 = vadd.f32 %v2764_v40, %v2763_v39 }
0x2c41   :  { %v2785_v43 = vpop.xlane.xlu1 %2784 }
0x2c42   :  { %v2766_v45 = vrot.slane %v2765_v42, 2  ;;  %v2786_v46 = vrot.slane %v2785_v43, 4 }
0x2c44   :  { %v2787_v47 = vadd.f32 %v2786_v46, %v2785_v43  ;;  %v2767_v48 = vadd.f32 %v2766_v45, %v2765_v42 }
0x2c46   :  { %v2788_v50 = vrot.slane %v2787_v47, 2  ;;  %v2768_v49 = vrot.slane %v2767_v48, 1 }
0x2c48   :  { %v2789_v52 = vadd.f32 %v2788_v50, %v2787_v47  ;;  %v2769_v5 = vadd.f32 %v2768_v49, %v2767_v48 }
0x2c4a   :  { %2909 = vpush %v2769_v5  ;;  %v2790_v54 = vrot.slane %v2789_v52, 1 }
0x2c4c   :  { %v2791_v55 = vadd.f32 %v2790_v54, %v2789_v52 }
0x2c4e   :  { %2911 = vpush %v2791_v55 }
0x2c7b   :  { %s2910_s21 = spop %2909 }
0x2c7c   :  { %s2771_s22 = smul.f32 0.015625, %s2910_s21 }
0x2c7f   :  { %s2912_s23 = spop %2911 }
0x2c80   :  { %s2793_s24 = smul.f32 0.1, %s2912_s23 }
0x2c82   :  { %s2794_s25 = sadd.f32 %s2793_s24, %s2771_s22 }
0x2c84   :  { %2796 = sst [smem:[#allocation9]] %s2794_s25 }
0x2c85   :  { %3419 = shalt.err (!%p3416_p8)
}
0x2c86   :  { %s3460_s0 = smov [#allocation9]  }
0x2c87   :  { %2804 = dma.smem_to_hbm %s3460_s0, 16, %s4042_s3, [#allocation5]  }
0x2c88   :  { %3438 = dma.done.wait [#allocation5], 16  }
0x2c89   :  { %3439 = vsyncadd [#allocation5], 4294967280 }
0x2c8a   :  { %2808 = sfence }
0x2c8b   :  { %2809 = vsyncpa [#allocation3], 1 }
0x2c8c   :  { %2810 = vsyncpa [#allocation8], 1 }
0x2c8d   :  { %2811 = vsyncpa [#allocation4], 1 }
0x2c8e   :  { %2812 = vsyncpa [#allocation5], 1 }

</bundles_post_ra>
